<compile_context>
chip_gen: v7x
topology: tpu7x:2x2x1
jax: 0.10.0
libtpu: 0.0.40
codegen_flags: <defaults>
</compile_context>

<pallas_src>
import functools

import jax
import jax.numpy as jnp
from jax.experimental import pallas as pl
from jax.experimental.pallas import tpu as pltpu

LRELU_SLOPE = 0.2
BN_EPS = 1e-5


def _round_up(x, m):
    return ((x + m - 1) // m) * m


def _vmem():
    return pl.BlockSpec(memory_space=pltpu.MemorySpace.VMEM)


# ----------------------------------------------------------------------------
# Pallas kernels
# ----------------------------------------------------------------------------
def _conv_bn_lrelu_kernel(x_ref, w_ref, g_ref, beta_ref, o_ref, *, m_rows, eps):
    """Fused im2col-matmul + BatchNorm (batch stats) + LeakyReLU(0.2).

    x_ref:    (Mp, Kp) bf16 patches; rows >= m_rows and the K tail are zero pad.
    w_ref:    (Kp, C)  bf16 flattened conv weight (zero rows in the K tail).
    g_ref:    (1, C)   f32 BN gamma.
    beta_ref: (1, C)   f32 BN beta.
    o_ref:    (Mp, C)  bf16 output.
    """
    # MXU: bf16 operands, f32 accumulation.
    y = jnp.dot(x_ref[...], w_ref[...], preferred_element_type=jnp.float32)

    # Per-channel batch statistics over the m_rows real rows (zero-padded rows
    # contribute nothing to either sum).  The conv bias is omitted on purpose:
    # a per-channel constant is cancelled exactly by the mean subtraction.
    inv_m = jnp.float32(1.0 / m_rows)
    mean = jnp.sum(y, axis=0, keepdims=True) * inv_m
    var = jnp.sum(y * y, axis=0, keepdims=True) * inv_m - mean * mean

    scale = g_ref[...] * jax.lax.rsqrt(var + jnp.float32(eps))
    shift = beta_ref[...] - mean * scale
    z = y * scale + shift
    o_ref[...] = jnp.where(z > 0, z, jnp.float32(LRELU_SLOPE) * z).astype(o_ref.dtype)


def _head_kernel(x_ref, w_ref, b_ref, o_ref):
    """Conv4 (Cout == 1) + bias + LeakyReLU(0.2) + Sigmoid.

    With a single output channel the conv is a per-row dot product, so it runs on
    the VPU (multiply + lane reduce) instead of a 1-lane-wide MXU matmul.
    x_ref: (Mp, K) bf16, w_ref: (1, K) bf16, b_ref: (1, 1) f32, o_ref: (Mp, 1) f32.
    """
    x = x_ref[...].astype(jnp.float32)
    w = w_ref[...].astype(jnp.float32)
    s = jnp.sum(x * w, axis=-1, keepdims=True) + b_ref[...]
    z = jnp.where(s > 0, s, jnp.float32(LRELU_SLOPE) * s)
    o_ref[...] = 1.0 / (1.0 + jnp.exp(-z))


# ----------------------------------------------------------------------------
# Layer wrappers (XLA glue: im2col, tiny alignment pads, reshapes)
# ----------------------------------------------------------------------------
def _im2col(x_nhwc, kh, kw, stride, pad):
    """Extract conv patches -> (N*Ho*Wo, kh*kw*C) in x's dtype, plus Ho, Wo."""
    N, H, W, C = x_nhwc.shape
    xp = x_nhwc
    if pad:
        xp = jnp.pad(x_nhwc, ((0, 0), (pad, pad), (pad, pad), (0, 0)))
    Ho = (H + 2 * pad - kh) // stride + 1
    Wo = (W + 2 * pad - kw) // stride + 1
    cols = []
    for i in range(kh):
        for j in range(kw):
            cols.append(xp[:, i:i + stride * Ho:stride,
                           j:j + stride * Wo:stride, :])
    patches = jnp.concatenate(cols, axis=-1)            # (N, Ho, Wo, kh*kw*C)
    return patches.reshape(N * Ho * Wo, kh * kw * C), Ho, Wo


def conv_bn_lrelu(x_nhwc, p, idx, stride, pad):
    N = x_nhwc.shape[0]
    w_mat = p[f"w{idx}"]                                # (Kp, C) bf16
    Kp, C = w_mat.shape
    patches, Ho, Wo = _im2col(x_nhwc, 4, 4, stride, pad)
    M, K = patches.shape
    Mp = _round_up(M, 8)                                # tiny sublane alignment only
    if (Mp, Kp) != (M, K):
        patches = jnp.pad(patches, ((0, Mp - M), (0, Kp - K)))

    kernel = functools.partial(_conv_bn_lrelu_kernel, m_rows=M, eps=BN_EPS)
    y = pl.pallas_call(
        kernel,
        out_shape=jax.ShapeDtypeStruct((Mp, C), jnp.bfloat16),
        in_specs=[_vmem(), _vmem(), _vmem(), _vmem()],
        out_specs=_vmem(),
    )(patches, w_mat, p[f"g{idx}"], p[f"be{idx}"])
    return y[:M].reshape(N, Ho, Wo, C)


def head(x_nhwc, p):
    N = x_nhwc.shape[0]
    patches, Ho, Wo = _im2col(x_nhwc, 4, 4, 1, 0)       # (N, 8192); Ho = Wo = 1
    M = patches.shape[0]
    Mp = _round_up(M, 8)
    if Mp != M:
        patches = jnp.pad(patches, ((0, Mp - M), (0, 0)))

    out = pl.pallas_call(
        _head_kernel,
        out_shape=jax.ShapeDtypeStruct((Mp, 1), jnp.float32),
        in_specs=[_vmem(), _vmem(), _vmem()],
        out_specs=_vmem(),
    )(patches, p["w4"], p["b4"])
    out = out[:M].reshape(N, Ho, Wo, 1)
    return jnp.transpose(out, (0, 3, 1, 2))             # NCHW (N, 1, 1, 1)


# ----------------------------------------------------------------------------
# Full Discriminator forward
# ----------------------------------------------------------------------------
@jax.jit
def discriminator_forward(prepped, z, label):
    x = jnp.concatenate([z, label], axis=1)                       # (N, 11, H, W)
    x = jnp.transpose(x, (0, 2, 3, 1)).astype(jnp.bfloat16)       # NHWC, bf16 MXU operands
    x = conv_bn_lrelu(x, prepped, 1, stride=2, pad=1)             # (N, 14, 14, 128)
    x = conv_bn_lrelu(x, prepped, 2, stride=2, pad=1)             # (N,  7,  7, 256)
    x = conv_bn_lrelu(x, prepped, 3, stride=1, pad=0)             # (N,  4,  4, 512)
    return head(x, prepped)                                       # (N, 1, 1, 1)


# ----------------------------------------------------------------------------
# Parameters
# ----------------------------------------------------------------------------
def init_params(key):
    def conv_p(k, cout, cin, ksz):
        k1, k2 = jax.random.split(k)
        fan_in = cin * ksz * ksz
        bound = 1.0 / (fan_in ** 0.5)
        w = jax.random.uniform(k1, (cout, cin, ksz, ksz), jnp.float32, -bound, bound)
        b = jax.random.uniform(k2, (cout,), jnp.float32, -bound, bound)
        return w, b

    keys = jax.random.split(key, 4)
    p = {}
    p["w1"], p["b1"] = conv_p(keys[0], 128, 11, 4)
    p["w2"], p["b2"] = conv_p(keys[1], 256, 128, 4)
    p["w3"], p["b3"] = conv_p(keys[2], 512, 256, 4)
    p["w4"], p["b4"] = conv_p(keys[3], 1, 512, 4)
    for i, c in ((1, 128), (2, 256), (3, 512)):       # BatchNorm affine defaults
        p[f"g{i}"] = jnp.ones((c,), jnp.float32)
        p[f"be{i}"] = jnp.zeros((c,), jnp.float32)
    return p


def prepare_params(params):
    """One-time weight re-layout, done OUTSIDE the jitted forward:
    (Cout, Cin, kh, kw) -> (K, Cout) bf16 (K padded to a lane multiple),
    BN affine params -> (1, C) f32, head weight -> (1, K) bf16."""
    pp = {}
    for i in (1, 2, 3):
        w = params[f"w{i}"]
        cout = w.shape[0]
        w_mat = jnp.transpose(w, (2, 3, 1, 0)).reshape(-1, cout)
        k = w_mat.shape[0]
        kp = _round_up(k, 128)
        if kp != k:
            w_mat = jnp.pad(w_mat, ((0, kp - k), (0, 0)))
        pp[f"w{i}"] = w_mat.astype(jnp.bfloat16)
        # Conv biases b1..b3 are not needed: BN batch statistics cancel them exactly.
        pp[f"g{i}"] = params[f"g{i}"].reshape(1, -1).astype(jnp.float32)
        pp[f"be{i}"] = params[f"be{i}"].reshape(1, -1).astype(jnp.float32)
    pp["w4"] = jnp.transpose(params["w4"], (2, 3, 1, 0)).reshape(1, -1).astype(jnp.bfloat16)
    pp["b4"] = params["b4"].reshape(1, 1).astype(jnp.float32)
    return pp


# ----------------------------------------------------------------------------
# Pure-XLA f32 reference (independent path, for a loose correctness check)
# ----------------------------------------------------------------------------
@jax.jit
def _reference_forward(params, z, label):
    def conv(x, w, b, stride, pad):
        y = jax.lax.conv_general_dilated(
            x, w, window_strides=(stride, stride),
            padding=[(pad, pad), (pad, pad)],
            dimension_numbers=("NCHW", "OIHW", "NCHW"))
        return y + b.reshape(1, -1, 1, 1)

    def bn_lrelu(x, g, be):
        mean = jnp.mean(x, axis=(0, 2, 3), keepdims=True)
        var = jnp.var(x, axis=(0, 2, 3), keepdims=True)
        y = (x - mean) * jax.lax.rsqrt(var + BN_EPS)
        y = y * g.reshape(1, -1, 1, 1) + be.reshape(1, -1, 1, 1)
        return jnp.where(y > 0, y, LRELU_SLOPE * y)

    x = jnp.concatenate([z, label], axis=1).astype(jnp.float32)
    x = bn_lrelu(conv(x, params["w1"], params["b1"], 2, 1), params["g1"], params["be1"])
    x = bn_lrelu(conv(x, params["w2"], params["b2"], 2, 1), params["g2"], params["be2"])
    x = bn_lrelu(conv(x, params["w3"], params["b3"], 1, 0), params["g3"], params["be3"])
    s = conv(x, params["w4"], params["b4"], 1, 0)
    s = jnp.where(s > 0, s, LRELU_SLOPE * s)
    return 1.0 / (1.0 + jnp.exp(-s))


if __name__ == "__main__":
    key = jax.random.PRNGKey(0)
    kp, kz, kl = jax.random.split(key, 3)
    params = init_params(kp)
    prepped = prepare_params(params)

    # MNIST geometry (28x28) is the smallest spatial size consistent with the convs.
    N = 2
    z = jax.random.normal(kz, (N, 1, 28, 28), jnp.float32)
    label = jax.random.normal(kl, (N, 10, 28, 28), jnp.float32)

    out = discriminator_forward(prepped, z, label)
    out = jax.block_until_ready(out)
    assert out.shape == (N, 1, 1, 1), out.shape
    assert bool(jnp.all(jnp.isfinite(out)))

    # Loose check vs. the f32 XLA reference (bf16 MXU operands -> ~1e-2-level diffs).
    ref = jax.block_until_ready(_reference_forward(params, z, label))
    assert jnp.allclose(out, ref, atol=5e-2, rtol=5e-2), (out, ref)

    print("KERNEL_OK")
</pallas_src>

<mosaic_0001>
module attributes {stable_mosaic.version = 11 : i64} {
  func.func @_conv_bn_lrelu_kernel(%arg0: memref<392x256xbf16, #tpu.memory_space<vmem>>, %arg1: memref<256x128xbf16, #tpu.memory_space<vmem>>, %arg2: memref<1x128xf32, #tpu.memory_space<vmem>>, %arg3: memref<1x128xf32, #tpu.memory_space<vmem>>, %arg4: memref<392x128xbf16, #tpu.memory_space<vmem>>) attributes {dimension_semantics = [], scalar_prefetch = 0 : i64, scratch_operands = 0 : i64, tpu.core_type = #tpu.core_type<tc>} {
    %c0 = arith.constant 0 : index
    %c0_0 = arith.constant 0 : index
    %0 = vector.load %arg0[%c0, %c0_0] : memref<392x256xbf16, #tpu.memory_space<vmem>>, vector<392x256xbf16>
    %c0_1 = arith.constant 0 : index
    %c0_2 = arith.constant 0 : index
    %1 = vector.load %arg1[%c0_1, %c0_2] : memref<256x128xbf16, #tpu.memory_space<vmem>>, vector<256x128xbf16>
    %cst = arith.constant dense<0.000000e+00> : vector<392x128xf32>
    %2 = tpu.matmul %0, %1, %cst {dimension_numbers = #tpu.dot_dimension_numbers<[1], [0], [0], [1], [0, 0, 1, 1], [], []>} : vector<392x256xbf16>, vector<256x128xbf16>, vector<392x128xf32> -> vector<392x128xf32>
    %cst_3 = arith.constant dense<0.000000e+00> : vector<128xf32>
    %3 = vector.multi_reduction <add>, %2, %cst_3 [0] : vector<392x128xf32> to vector<128xf32>
    %4 = vector.shape_cast %3 : vector<128xf32> to vector<1x128xf32>
    %cst_4 = arith.constant 0.00255102036 : f32
    %5 = vector.broadcast %cst_4 : f32 to vector<1x128xf32>
    %6 = arith.mulf %4, %5 : vector<1x128xf32>
    %7 = arith.mulf %2, %2 : vector<392x128xf32>
    %cst_5 = arith.constant dense<0.000000e+00> : vector<128xf32>
    %8 = vector.multi_reduction <add>, %7, %cst_5 [0] : vector<392x128xf32> to vector<128xf32>
    %9 = vector.shape_cast %8 : vector<128xf32> to vector<1x128xf32>
    %cst_6 = arith.constant 0.00255102036 : f32
    %10 = vector.broadcast %cst_6 : f32 to vector<1x128xf32>
    %11 = arith.mulf %9, %10 : vector<1x128xf32>
    %12 = arith.mulf %6, %6 : vector<1x128xf32>
    %13 = arith.subf %11, %12 : vector<1x128xf32>
    %c0_7 = arith.constant 0 : index
    %c0_8 = arith.constant 0 : index
    %14 = vector.load %arg2[%c0_7, %c0_8] : memref<1x128xf32, #tpu.memory_space<vmem>>, vector<1x128xf32>
    %cst_9 = arith.constant 9.99999974E-6 : f32
    %15 = vector.broadcast %cst_9 : f32 to vector<1x128xf32>
    %16 = arith.addf %13, %15 : vector<1x128xf32>
    %17 = math.rsqrt %16 : vector<1x128xf32>
    %18 = arith.mulf %14, %17 : vector<1x128xf32>
    %c0_10 = arith.constant 0 : index
    %c0_11 = arith.constant 0 : index
    %19 = vector.load %arg3[%c0_10, %c0_11] : memref<1x128xf32, #tpu.memory_space<vmem>>, vector<1x128xf32>
    %20 = arith.mulf %6, %18 : vector<1x128xf32>
    %21 = arith.subf %19, %20 : vector<1x128xf32>
    %22 = vector.broadcast %18 : vector<1x128xf32> to vector<392x128xf32>
    %23 = arith.mulf %2, %22 : vector<392x128xf32>
    %24 = vector.broadcast %21 : vector<1x128xf32> to vector<392x128xf32>
    %25 = arith.addf %23, %24 : vector<392x128xf32>
    %cst_12 = arith.constant 0.000000e+00 : f32
    %26 = vector.broadcast %cst_12 : f32 to vector<392x128xf32>
    %27 = arith.cmpf ogt, %25, %26 : vector<392x128xf32>
    %cst_13 = arith.constant 2.000000e-01 : f32
    %28 = vector.broadcast %cst_13 : f32 to vector<392x128xf32>
    %29 = arith.mulf %28, %25 : vector<392x128xf32>
    %30 = arith.select %27, %25, %29 : vector<392x128xi1>, vector<392x128xf32>
    %31 = arith.truncf %30 : vector<392x128xf32> to vector<392x128xbf16>
    %c0_14 = arith.constant 0 : index
    %c0_15 = arith.constant 0 : index
    %32 = vector.load %arg4[%c0_14, %c0_15] : memref<392x128xbf16, #tpu.memory_space<vmem>>, vector<392x128xbf16>
    tpu.vector_store %arg4[%c0_14, %c0_15], %31 {strides = array<i32>} : memref<392x128xbf16, #tpu.memory_space<vmem>>, vector<392x128xbf16>,
    return
  }
}

module attributes {stable_mosaic.version = 11 : i64} {
  func.func @_conv_bn_lrelu_kernel(%arg0: memref<104x2048xbf16, #tpu.memory_space<vmem>>, %arg1: memref<2048x256xbf16, #tpu.memory_space<vmem>>, %arg2: memref<1x256xf32, #tpu.memory_space<vmem>>, %arg3: memref<1x256xf32, #tpu.memory_space<vmem>>, %arg4: memref<104x256xbf16, #tpu.memory_space<vmem>>) attributes {dimension_semantics = [], scalar_prefetch = 0 : i64, scratch_operands = 0 : i64, tpu.core_type = #tpu.core_type<tc>} {
    %c0 = arith.constant 0 : index
    %c0_0 = arith.constant 0 : index
    %0 = vector.load %arg0[%c0, %c0_0] : memref<104x2048xbf16, #tpu.memory_space<vmem>>, vector<104x2048xbf16>
    %c0_1 = arith.constant 0 : index
    %c0_2 = arith.constant 0 : index
    %1 = vector.load %arg1[%c0_1, %c0_2] : memref<2048x256xbf16, #tpu.memory_space<vmem>>, vector<2048x256xbf16>
    %cst = arith.constant dense<0.000000e+00> : vector<104x256xf32>
    %2 = tpu.matmul %0, %1, %cst {dimension_numbers = #tpu.dot_dimension_numbers<[1], [0], [0], [1], [0, 0, 1, 1], [], []>} : vector<104x2048xbf16>, vector<2048x256xbf16>, vector<104x256xf32> -> vector<104x256xf32>
    %cst_3 = arith.constant dense<0.000000e+00> : vector<256xf32>
    %3 = vector.multi_reduction <add>, %2, %cst_3 [0] : vector<104x256xf32> to vector<256xf32>
    %4 = vector.shape_cast %3 : vector<256xf32> to vector<1x256xf32>
    %cst_4 = arith.constant 0.0102040814 : f32
    %5 = vector.broadcast %cst_4 : f32 to vector<1x256xf32>
    %6 = arith.mulf %4, %5 : vector<1x256xf32>
    %7 = arith.mulf %2, %2 : vector<104x256xf32>
    %cst_5 = arith.constant dense<0.000000e+00> : vector<256xf32>
    %8 = vector.multi_reduction <add>, %7, %cst_5 [0] : vector<104x256xf32> to vector<256xf32>
    %9 = vector.shape_cast %8 : vector<256xf32> to vector<1x256xf32>
    %cst_6 = arith.constant 0.0102040814 : f32
    %10 = vector.broadcast %cst_6 : f32 to vector<1x256xf32>
    %11 = arith.mulf %9, %10 : vector<1x256xf32>
    %12 = arith.mulf %6, %6 : vector<1x256xf32>
    %13 = arith.subf %11, %12 : vector<1x256xf32>
    %c0_7 = arith.constant 0 : index
    %c0_8 = arith.constant 0 : index
    %14 = vector.load %arg2[%c0_7, %c0_8] : memref<1x256xf32, #tpu.memory_space<vmem>>, vector<1x256xf32>
    %cst_9 = arith.constant 9.99999974E-6 : f32
    %15 = vector.broadcast %cst_9 : f32 to vector<1x256xf32>
    %16 = arith.addf %13, %15 : vector<1x256xf32>
    %17 = math.rsqrt %16 : vector<1x256xf32>
    %18 = arith.mulf %14, %17 : vector<1x256xf32>
    %c0_10 = arith.constant 0 : index
    %c0_11 = arith.constant 0 : index
    %19 = vector.load %arg3[%c0_10, %c0_11] : memref<1x256xf32, #tpu.memory_space<vmem>>, vector<1x256xf32>
    %20 = arith.mulf %6, %18 : vector<1x256xf32>
    %21 = arith.subf %19, %20 : vector<1x256xf32>
    %22 = vector.broadcast %18 : vector<1x256xf32> to vector<104x256xf32>
    %23 = arith.mulf %2, %22 : vector<104x256xf32>
    %24 = vector.broadcast %21 : vector<1x256xf32> to vector<104x256xf32>
    %25 = arith.addf %23, %24 : vector<104x256xf32>
    %cst_12 = arith.constant 0.000000e+00 : f32
    %26 = vector.broadcast %cst_12 : f32 to vector<104x256xf32>
    %27 = arith.cmpf ogt, %25, %26 : vector<104x256xf32>
    %cst_13 = arith.constant 2.000000e-01 : f32
    %28 = vector.broadcast %cst_13 : f32 to vector<104x256xf32>
    %29 = arith.mulf %28, %25 : vector<104x256xf32>
    %30 = arith.select %27, %25, %29 : vector<104x256xi1>, vector<104x256xf32>
    %31 = arith.truncf %30 : vector<104x256xf32> to vector<104x256xbf16>
    %c0_14 = arith.constant 0 : index
    %c0_15 = arith.constant 0 : index
    %32 = vector.load %arg4[%c0_14, %c0_15] : memref<104x256xbf16, #tpu.memory_space<vmem>>, vector<104x256xbf16>
    tpu.vector_store %arg4[%c0_14, %c0_15], %31 {strides = array<i32>} : memref<104x256xbf16, #tpu.memory_space<vmem>>, vector<104x256xbf16>,
    return
  }
}

module attributes {stable_mosaic.version = 11 : i64} {
  func.func @_conv_bn_lrelu_kernel(%arg0: memref<32x4096xbf16, #tpu.memory_space<vmem>>, %arg1: memref<4096x512xbf16, #tpu.memory_space<vmem>>, %arg2: memref<1x512xf32, #tpu.memory_space<vmem>>, %arg3: memref<1x512xf32, #tpu.memory_space<vmem>>, %arg4: memref<32x512xbf16, #tpu.memory_space<vmem>>) attributes {dimension_semantics = [], scalar_prefetch = 0 : i64, scratch_operands = 0 : i64, tpu.core_type = #tpu.core_type<tc>} {
    %c0 = arith.constant 0 : index
    %c0_0 = arith.constant 0 : index
    %0 = vector.load %arg0[%c0, %c0_0] : memref<32x4096xbf16, #tpu.memory_space<vmem>>, vector<32x4096xbf16>
    %c0_1 = arith.constant 0 : index
    %c0_2 = arith.constant 0 : index
    %1 = vector.load %arg1[%c0_1, %c0_2] : memref<4096x512xbf16, #tpu.memory_space<vmem>>, vector<4096x512xbf16>
    %cst = arith.constant dense<0.000000e+00> : vector<32x512xf32>
    %2 = tpu.matmul %0, %1, %cst {dimension_numbers = #tpu.dot_dimension_numbers<[1], [0], [0], [1], [0, 0, 1, 1], [], []>} : vector<32x4096xbf16>, vector<4096x512xbf16>, vector<32x512xf32> -> vector<32x512xf32>
    %cst_3 = arith.constant dense<0.000000e+00> : vector<512xf32>
    %3 = vector.multi_reduction <add>, %2, %cst_3 [0] : vector<32x512xf32> to vector<512xf32>
    %4 = vector.shape_cast %3 : vector<512xf32> to vector<1x512xf32>
    %cst_4 = arith.constant 3.125000e-02 : f32
    %5 = vector.broadcast %cst_4 : f32 to vector<1x512xf32>
    %6 = arith.mulf %4, %5 : vector<1x512xf32>
    %7 = arith.mulf %2, %2 : vector<32x512xf32>
    %cst_5 = arith.constant dense<0.000000e+00> : vector<512xf32>
    %8 = vector.multi_reduction <add>, %7, %cst_5 [0] : vector<32x512xf32> to vector<512xf32>
    %9 = vector.shape_cast %8 : vector<512xf32> to vector<1x512xf32>
    %cst_6 = arith.constant 3.125000e-02 : f32
    %10 = vector.broadcast %cst_6 : f32 to vector<1x512xf32>
    %11 = arith.mulf %9, %10 : vector<1x512xf32>
    %12 = arith.mulf %6, %6 : vector<1x512xf32>
    %13 = arith.subf %11, %12 : vector<1x512xf32>
    %c0_7 = arith.constant 0 : index
    %c0_8 = arith.constant 0 : index
    %14 = vector.load %arg2[%c0_7, %c0_8] : memref<1x512xf32, #tpu.memory_space<vmem>>, vector<1x512xf32>
    %cst_9 = arith.constant 9.99999974E-6 : f32
    %15 = vector.broadcast %cst_9 : f32 to vector<1x512xf32>
    %16 = arith.addf %13, %15 : vector<1x512xf32>
    %17 = math.rsqrt %16 : vector<1x512xf32>
    %18 = arith.mulf %14, %17 : vector<1x512xf32>
    %c0_10 = arith.constant 0 : index
    %c0_11 = arith.constant 0 : index
    %19 = vector.load %arg3[%c0_10, %c0_11] : memref<1x512xf32, #tpu.memory_space<vmem>>, vector<1x512xf32>
    %20 = arith.mulf %6, %18 : vector<1x512xf32>
    %21 = arith.subf %19, %20 : vector<1x512xf32>
    %22 = vector.broadcast %18 : vector<1x512xf32> to vector<32x512xf32>
    %23 = arith.mulf %2, %22 : vector<32x512xf32>
    %24 = vector.broadcast %21 : vector<1x512xf32> to vector<32x512xf32>
    %25 = arith.addf %23, %24 : vector<32x512xf32>
    %cst_12 = arith.constant 0.000000e+00 : f32
    %26 = vector.broadcast %cst_12 : f32 to vector<32x512xf32>
    %27 = arith.cmpf ogt, %25, %26 : vector<32x512xf32>
    %cst_13 = arith.constant 2.000000e-01 : f32
    %28 = vector.broadcast %cst_13 : f32 to vector<32x512xf32>
    %29 = arith.mulf %28, %25 : vector<32x512xf32>
    %30 = arith.select %27, %25, %29 : vector<32x512xi1>, vector<32x512xf32>
    %31 = arith.truncf %30 : vector<32x512xf32> to vector<32x512xbf16>
    %c0_14 = arith.constant 0 : index
    %c0_15 = arith.constant 0 : index
    %32 = vector.load %arg4[%c0_14, %c0_15] : memref<32x512xbf16, #tpu.memory_space<vmem>>, vector<32x512xbf16>
    tpu.vector_store %arg4[%c0_14, %c0_15], %31 {strides = array<i32>} : memref<32x512xbf16, #tpu.memory_space<vmem>>, vector<32x512xbf16>,
    return
  }
}

module attributes {stable_mosaic.version = 11 : i64} {
  func.func @_head_kernel(%arg0: memref<8x8192xbf16, #tpu.memory_space<vmem>>, %arg1: memref<1x8192xbf16, #tpu.memory_space<vmem>>, %arg2: memref<1x1xf32, #tpu.memory_space<vmem>>, %arg3: memref<8x1xf32, #tpu.memory_space<vmem>>) attributes {dimension_semantics = [], scalar_prefetch = 0 : i64, scratch_operands = 0 : i64, tpu.core_type = #tpu.core_type<tc>} {
    %c0 = arith.constant 0 : index
    %c0_0 = arith.constant 0 : index
    %0 = vector.load %arg0[%c0, %c0_0] : memref<8x8192xbf16, #tpu.memory_space<vmem>>, vector<8x8192xbf16>
    %1 = arith.extf %0 : vector<8x8192xbf16> to vector<8x8192xf32>
    %c0_1 = arith.constant 0 : index
    %c0_2 = arith.constant 0 : index
    %2 = vector.load %arg1[%c0_1, %c0_2] : memref<1x8192xbf16, #tpu.memory_space<vmem>>, vector<1x8192xbf16>
    %3 = arith.extf %2 : vector<1x8192xbf16> to vector<1x8192xf32>
    %4 = vector.broadcast %3 : vector<1x8192xf32> to vector<8x8192xf32>
    %5 = arith.mulf %1, %4 : vector<8x8192xf32>
    %cst = arith.constant dense<0.000000e+00> : vector<8xf32>
    %6 = vector.multi_reduction <add>, %5, %cst [1] : vector<8x8192xf32> to vector<8xf32>
    %7 = vector.shape_cast %6 : vector<8xf32> to vector<8x1xf32>
    %c0_3 = arith.constant 0 : index
    %c0_4 = arith.constant 0 : index
    %8 = vector.load %arg2[%c0_3, %c0_4] : memref<1x1xf32, #tpu.memory_space<vmem>>, vector<1x1xf32>
    %9 = vector.broadcast %8 : vector<1x1xf32> to vector<8x1xf32>
    %10 = arith.addf %7, %9 : vector<8x1xf32>
    %cst_5 = arith.constant 0.000000e+00 : f32
    %11 = vector.broadcast %cst_5 : f32 to vector<8x1xf32>
    %12 = arith.cmpf ogt, %10, %11 : vector<8x1xf32>
    %cst_6 = arith.constant 2.000000e-01 : f32
    %13 = vector.broadcast %cst_6 : f32 to vector<8x1xf32>
    %14 = arith.mulf %13, %10 : vector<8x1xf32>
    %15 = arith.select %12, %10, %14 : vector<8x1xi1>, vector<8x1xf32>
    %cst_7 = arith.constant 0.000000e+00 : f32
    %16 = vector.broadcast %cst_7 : f32 to vector<8x1xf32>
    %17 = arith.subf %16, %15 : vector<8x1xf32>
    %18 = math.exp %17 : vector<8x1xf32>
    %cst_8 = arith.constant 1.000000e+00 : f32
    %19 = vector.broadcast %cst_8 : f32 to vector<8x1xf32>
    %20 = arith.addf %19, %18 : vector<8x1xf32>
    %cst_9 = arith.constant 1.000000e+00 : f32
    %21 = vector.broadcast %cst_9 : f32 to vector<8x1xf32>
    %22 = arith.divf %21, %20 : vector<8x1xf32>
    %c0_10 = arith.constant 0 : index
    %c0_11 = arith.constant 0 : index
    %23 = vector.load %arg3[%c0_10, %c0_11] : memref<8x1xf32, #tpu.memory_space<vmem>>, vector<8x1xf32>
    tpu.vector_store %arg3[%c0_10, %c0_11], %22 {strides = array<i32>} : memref<8x1xf32, #tpu.memory_space<vmem>>, vector<8x1xf32>,
    return
  }
}

</mosaic_0001>

<bundles_post_ra>
// kernel: discriminator_forward.4
= control target key start
LH: loop header
LB: loop body
LE: loop exit
PB: predicated region body
PF: predicated region fallthrough
CT: control target
= control target key end

     0   :  { %v1781_v0 = vmov 0   ;;  %s2839_s1 = inlined_call_operand.vmem [shape: bf16[256,128], index: 1, kind: input, shape index: {}]   ;;  %s2840_s0 = inlined_call_operand.vmem [shape: bf16[392,256], index: 0, kind: input, shape index: {}]   ;;  %s2841_s2 = inlined_call_operand.vmem [shape: f32[1,128], index: 2, kind: input, shape index: {}]   ;;  %s2842_s3 = inlined_call_operand.vmem [shape: f32[1,128], index: 3, kind: input, shape index: {}]   ;;  %s2843_s4 = inlined_call_operand.vmem [shape: bf16[392,128], index: 4, kind: output, shape index: {}]  }
   0x1   :  { %442 = vmatprep.subr.bf16.mxu0 %v1781_v0  ;;  %v1689_v1 = vld [vmem:[%s2839_s1] sm:$0xff]   ;;  %1656 = vmatprep.subr.bf16.mxu1 %v1781_v0  ;;  %v1690_v2 = vld [vmem:[%s2839_s1 + $0x8] sm:$0xff]   ;;  %v1691_v3 = vld [vmem:[%s2839_s1 + $0x10] sm:$0xff]  }
   0x2   :  { %443 = vmatpush1.bf16.msra.mxu0 %v1689_v1  ;;  %1672 = vmatpush1.bf16.msra.mxu1 %v1689_v1  ;;  %v1692_v4 = vld [vmem:[%s2839_s1 + $0x18] sm:$0xff]   ;;  %v1693_v5 = vld [vmem:[%s2839_s1 + $0x20] sm:$0xff]   ;;  %v1694_v7 = vld [vmem:[%s2839_s1 + $0x28] sm:$0xff]  }
   0x3   :  { %444 = vmatprep.subr.bf16.mxu0 %v1781_v0  ;;  %1657 = vmatprep.subr.bf16.mxu1 %v1781_v0  ;;  %v1707_v6 = vld [vmem:[%s2840_s0 + $0x4] ss:$8 sps:$4 sm:$0xff]   ;;  %v1695_v8 = vld [vmem:[%s2839_s1 + $0x30] sm:$0xff]   ;;  %v1696_v9 = vld [vmem:[%s2839_s1 + $0x38] sm:$0xff]  }
   0x4   :  { %474 = vmatprep.mubr.bf16.mxu0 %v1707_v6  ;;  %v1728_v10 = vld [vmem:[%s2840_s0 + $0xd4] ss:$8 sps:$4 sm:$0xff]   ;;  %v1697_v11 = vld [vmem:[%s2839_s1 + $0x40] sm:$0xff]   ;;  %v1698_v12 = vld [vmem:[%s2839_s1 + $0x48] sm:$0xff]  }
   0x5   :  { %578 = vmatprep.mubr.bf16.mxu1 %v1728_v10  ;;  %v1699_v13 = vld [vmem:[%s2839_s1 + $0x50] sm:$0xff]   ;;  %v1700_v14 = vld [vmem:[%s2839_s1 + $0x58] sm:$0xff]   ;;  %v1701_v15 = vld [vmem:[%s2839_s1 + $0x60] sm:$0xff]  }
   0x6   :  { %445 = vmatpush1.bf16.msra.mxu0 %v1690_v2  ;;  %1673 = vmatpush1.bf16.msra.mxu1 %v1690_v2  ;;  %v1702_v16 = vld [vmem:[%s2839_s1 + $0x68] sm:$0xff]   ;;  %v1703_v17 = vld [vmem:[%s2839_s1 + $0x70] sm:$0xff]   ;;  %v1704_v18 = vld [vmem:[%s2839_s1 + $0x78] sm:$0xff]  }
   0x7   :  { %446 = vmatprep.subr.bf16.mxu0 %v1781_v0  ;;  %1658 = vmatprep.subr.bf16.mxu1 %v1781_v0  ;;  %v1705_v19 = vld [vmem:[%s2840_s0] ss:$8 sps:$4 sm:$0xff]   ;;  %v1726_v20 = vld [vmem:[%s2840_s0 + $0xd0] ss:$8 sps:$4 sm:$0xff]   ;;  %v1708_v21 = vld [vmem:[%s2840_s0 + $0x14] ss:$8 sps:$4 sm:$0xff]  }
   0x8   :  { %v1732_v22 = vld [vmem:[%s2840_s0 + $0xe4] ss:$8 sps:$4 sm:$0xff]   ;;  %v1710_v23 = vld [vmem:[%s2840_s0 + $0x10] ss:$8 sps:$4 sm:$0xff]   ;;  %v1734_v24 = vld [vmem:[%s2840_s0 + $0xe0] ss:$8 sps:$4 sm:$0xff]  }
   0x9   :  { %v1711_v25 = vld [vmem:[%s2840_s0 + $0x24] ss:$8 sps:$4 sm:$0xff]   ;;  %v1738_v26 = vld [vmem:[%s2840_s0 + $0xf4] ss:$8 sps:$4 sm:$0xff]   ;;  %v1713_v27 = vld [vmem:[%s2840_s0 + $0x20] ss:$8 sps:$4 sm:$0xff]  }
   0xa   :  { %447 = vmatpush1.bf16.msra.mxu0 %v1691_v3  ;;  %1674 = vmatpush1.bf16.msra.mxu1 %v1691_v3  ;;  %v1740_v28 = vld [vmem:[%s2840_s0 + $0xf0] ss:$8 sps:$4 sm:$0xff]   ;;  %v1714_v29 = vld [vmem:[%s2840_s0 + $0x34] ss:$8 sps:$4 sm:$0xff]   ;;  %v1744_v30 = vld [vmem:[%s2840_s0 + $0x104] ss:$8 sps:$4 sm:$0xff]  }
   0xb   :  { %448 = vmatprep.subr.bf16.mxu0 %v1781_v0  ;;  %1659 = vmatprep.subr.bf16.mxu1 %v1781_v0  ;;  %v1716_v31 = vld [vmem:[%s2840_s0 + $0x30] ss:$8 sps:$4 sm:$0xff]   ;;  %v1746_v32 = vld [vmem:[%s2840_s0 + $0x100] ss:$8 sps:$4 sm:$0xff]   ;;  %v1717_v33 = vld [vmem:[%s2840_s0 + $0x44] ss:$8 sps:$4 sm:$0xff]  }
   0xc   :  { %v1750_v34 = vld [vmem:[%s2840_s0 + $0x114] ss:$8 sps:$4 sm:$0xff]   ;;  %v1719_v35 = vld [vmem:[%s2840_s0 + $0x40] ss:$8 sps:$4 sm:$0xff]   ;;  %v1752_v36 = vld [vmem:[%s2840_s0 + $0x110] ss:$8 sps:$4 sm:$0xff]  }
   0xd   :  { %v1720_v37 = vld [vmem:[%s2840_s0 + $0x54] ss:$8 sps:$4 sm:$0xff]   ;;  %v1756_v38 = vld [vmem:[%s2840_s0 + $0x124] ss:$8 sps:$4 sm:$0xff]   ;;  %v1722_v39 = vld [vmem:[%s2840_s0 + $0x50] ss:$8 sps:$4 sm:$0xff]  }
   0xe   :  { %449 = vmatpush1.bf16.msra.mxu0 %v1692_v4  ;;  %1675 = vmatpush1.bf16.msra.mxu1 %v1692_v4  ;;  %v1758_v40 = vld [vmem:[%s2840_s0 + $0x120] ss:$8 sps:$4 sm:$0xff]   ;;  %v1723_v41 = vld [vmem:[%s2840_s0 + $0x64] ss:$8 sps:$4 sm:$0xff]   ;;  %v1762_v42 = vld [vmem:[%s2840_s0 + $0x134] ss:$8 sps:$4 sm:$0xff]  }
   0xf   :  { %450 = vmatprep.subr.bf16.mxu0 %v1781_v0  ;;  %1660 = vmatprep.subr.bf16.mxu1 %v1781_v0  ;;  %v1725_v43 = vld [vmem:[%s2840_s0 + $0x60] ss:$8 sps:$4 sm:$0xff]   ;;  %v1764_v44 = vld [vmem:[%s2840_s0 + $0x130] ss:$8 sps:$4 sm:$0xff]   ;;  %v1729_v45 = vld [vmem:[%s2840_s0 + $0x74] ss:$8 sps:$4 sm:$0xff]  }
  0x10   :  { %v1765_v46 = vld [vmem:[%s2840_s0 + $0x144] ss:$8 sps:$4 sm:$0xff]   ;;  %v1731_v47 = vld [vmem:[%s2840_s0 + $0x70] ss:$8 sps:$4 sm:$0xff]   ;;  %v1767_v48 = vld [vmem:[%s2840_s0 + $0x140] ss:$8 sps:$4 sm:$0xff]  }
  0x11   :  { %v1735_v49 = vld [vmem:[%s2840_s0 + $0x84] ss:$8 sps:$4 sm:$0xff]   ;;  %v1768_v50 = vld [vmem:[%s2840_s0 + $0x154] ss:$8 sps:$4 sm:$0xff]   ;;  %v1737_v51 = vld [vmem:[%s2840_s0 + $0x80] ss:$8 sps:$4 sm:$0xff]  }
  0x12   :  { %451 = vmatpush1.bf16.msra.mxu0 %v1693_v5  ;;  %1676 = vmatpush1.bf16.msra.mxu1 %v1693_v5  ;;  %v1770_v52 = vld [vmem:[%s2840_s0 + $0x150] ss:$8 sps:$4 sm:$0xff]   ;;  %v1741_v53 = vld [vmem:[%s2840_s0 + $0x94] ss:$8 sps:$4 sm:$0xff]   ;;  %v1771_v54 = vld [vmem:[%s2840_s0 + $0x164] ss:$8 sps:$4 sm:$0xff]  }
  0x13   :  { %452 = vmatprep.subr.bf16.mxu0 %v1781_v0  ;;  %1661 = vmatprep.subr.bf16.mxu1 %v1781_v0  ;;  %v1743_v55 = vld [vmem:[%s2840_s0 + $0x90] ss:$8 sps:$4 sm:$0xff]   ;;  %v1773_v56 = vld [vmem:[%s2840_s0 + $0x160] ss:$8 sps:$4 sm:$0xff]   ;;  %v1747_v57 = vld [vmem:[%s2840_s0 + $0xa4] ss:$8 sps:$4 sm:$0xff]  }
  0x14   :  { %v1774_v58 = vld [vmem:[%s2840_s0 + $0x174] ss:$8 sps:$4 sm:$0xff]   ;;  %v66_v59 = vld [vmem:[%s2840_s0 + $0x180] sm:$0xff]  ;;  %v1776_v61 = vld [vmem:[%s2840_s0 + $0x170] ss:$8 sps:$4 sm:$0xff]  }
  0x15   :  { %v1749_v60 = vld [vmem:[%s2840_s0 + $0xa0] ss:$8 sps:$4 sm:$0xff]   ;;  %v1753_v62 = vld [vmem:[%s2840_s0 + $0xb4] ss:$8 sps:$4 sm:$0xff]   ;;  %v1398_v63 = vcombine.high %v66_v59, %v66_v59  ;;  %v1397_v1 = vcombine.low %v66_v59, %v66_v59  ;;  %v1759_v2 = vld [vmem:[%s2840_s0 + $0xc4] ss:$8 sps:$4 sm:$0xff]  }
  0x16   :  { %453 = vmatpush1.bf16.msra.mxu0 %v1694_v7  ;;  %1677 = vmatpush1.bf16.msra.mxu1 %v1694_v7  ;;  %v1761_v3 = vld [vmem:[%s2840_s0 + $0xc0] ss:$8 sps:$4 sm:$0xff]  }
  0x17   :  { %454 = vmatprep.subr.bf16.mxu0 %v1781_v0  ;;  %1662 = vmatprep.subr.bf16.mxu1 %v1781_v0 }
  0x1a   :  { %455 = vmatpush1.bf16.msra.mxu0 %v1695_v8  ;;  %1678 = vmatpush1.bf16.msra.mxu1 %v1695_v8 }
  0x1b   :  { %456 = vmatprep.subr.bf16.mxu0 %v1781_v0  ;;  %1663 = vmatprep.subr.bf16.mxu1 %v1781_v0 }
  0x1e   :  { %457 = vmatpush1.bf16.msra.mxu0 %v1696_v9  ;;  %1679 = vmatpush1.bf16.msra.mxu1 %v1696_v9 }
  0x1f   :  { %458 = vmatprep.subr.bf16.mxu0 %v1781_v0  ;;  %1664 = vmatprep.subr.bf16.mxu1 %v1781_v0 }
  0x22   :  { %459 = vmatpush1.bf16.msra.mxu0 %v1697_v11  ;;  %1680 = vmatpush1.bf16.msra.mxu1 %v1697_v11 }
  0x23   :  { %460 = vmatprep.subr.bf16.mxu0 %v1781_v0  ;;  %1665 = vmatprep.subr.bf16.mxu1 %v1781_v0 }
  0x26   :  { %461 = vmatpush1.bf16.msra.mxu0 %v1698_v12  ;;  %1681 = vmatpush1.bf16.msra.mxu1 %v1698_v12 }
  0x27   :  { %462 = vmatprep.subr.bf16.mxu0 %v1781_v0  ;;  %1666 = vmatprep.subr.bf16.mxu1 %v1781_v0 }
  0x2a   :  { %463 = vmatpush1.bf16.msra.mxu0 %v1699_v13  ;;  %1682 = vmatpush1.bf16.msra.mxu1 %v1699_v13 }
  0x2b   :  { %464 = vmatprep.subr.bf16.mxu0 %v1781_v0  ;;  %1667 = vmatprep.subr.bf16.mxu1 %v1781_v0 }
  0x2e   :  { %465 = vmatpush1.bf16.msra.mxu0 %v1700_v14  ;;  %1683 = vmatpush1.bf16.msra.mxu1 %v1700_v14 }
  0x2f   :  { %466 = vmatprep.subr.bf16.mxu0 %v1781_v0  ;;  %1668 = vmatprep.subr.bf16.mxu1 %v1781_v0 }
  0x32   :  { %467 = vmatpush1.bf16.msra.mxu0 %v1701_v15  ;;  %1684 = vmatpush1.bf16.msra.mxu1 %v1701_v15 }
  0x33   :  { %468 = vmatprep.subr.bf16.mxu0 %v1781_v0  ;;  %1669 = vmatprep.subr.bf16.mxu1 %v1781_v0 }
  0x36   :  { %469 = vmatpush1.bf16.msra.mxu0 %v1702_v16  ;;  %1685 = vmatpush1.bf16.msra.mxu1 %v1702_v16 }
  0x37   :  { %470 = vmatprep.subr.bf16.mxu0 %v1781_v0  ;;  %1670 = vmatprep.subr.bf16.mxu1 %v1781_v0 }
  0x3a   :  { %471 = vmatpush1.bf16.msra.mxu0 %v1703_v17  ;;  %1686 = vmatpush1.bf16.msra.mxu1 %v1703_v17 }
  0x3b   :  { %472 = vmatprep.subr.bf16.mxu0 %v1781_v0  ;;  %1671 = vmatprep.subr.bf16.mxu1 %v1781_v0  ;;  %v1755_v0 = vld [vmem:[%s2840_s0 + $0xb0] ss:$8 sps:$4 sm:$0xff]  }
  0x3e   :  { %473 = vmatpush1.bf16.msra.mxu0 %v1704_v18  ;;  %1687 = vmatpush1.bf16.msra.mxu1 %v1704_v18 }
  0x41   :  { %475 = vmatmul.mubr.bf16.vlgmr.msra.gmra.mrb[0].mxu0 %v1705_v19  ;;  %579 = vmatmul.mubr.bf16.vlgmr.msra.gmra.mrb[0].mxu1 %v1726_v20 }
  0x42   :  { %482 = vmatprep.mubr.bf16.mxu0 %v1708_v21  ;;  %586 = vmatprep.mubr.bf16.mxu1 %v1732_v22 }
  0x49   :  { %483 = vmatmul.mubr.bf16.gmra.mrb[4].mxu0 %v1710_v23  ;;  %587 = vmatmul.mubr.bf16.gmra.mrb[4].mxu1 %v1734_v24 }
  0x4a   :  { %490 = vmatprep.mubr.bf16.mxu0 %v1711_v25  ;;  %594 = vmatprep.mubr.bf16.mxu1 %v1738_v26 }
  0x51   :  { %491 = vmatmul.mubr.bf16.gmra.mrb[8].mxu0 %v1713_v27  ;;  %595 = vmatmul.mubr.bf16.gmra.mrb[8].mxu1 %v1740_v28 }
  0x52   :  { %498 = vmatprep.mubr.bf16.mxu0 %v1714_v29  ;;  %602 = vmatprep.mubr.bf16.mxu1 %v1744_v30 }
  0x59   :  { %499 = vmatmul.mubr.bf16.gmra.mrb[12].mxu0 %v1716_v31  ;;  %603 = vmatmul.mubr.bf16.gmra.mrb[12].mxu1 %v1746_v32 }
  0x5a   :  { %506 = vmatprep.mubr.bf16.mxu0 %v1717_v33  ;;  %610 = vmatprep.mubr.bf16.mxu1 %v1750_v34 }
  0x61   :  { %507 = vmatmul.mubr.bf16.gmra.mrb[16].mxu0 %v1719_v35  ;;  %611 = vmatmul.mubr.bf16.gmra.mrb[16].mxu1 %v1752_v36 }
  0x62   :  { %514 = vmatprep.mubr.bf16.mxu0 %v1720_v37  ;;  %618 = vmatprep.mubr.bf16.mxu1 %v1756_v38 }
  0x69   :  { %515 = vmatmul.mubr.bf16.gmra.mrb[20].mxu0 %v1722_v39  ;;  %619 = vmatmul.mubr.bf16.gmra.mrb[20].mxu1 %v1758_v40 }
  0x6a   :  { %522 = vmatprep.mubr.bf16.mxu0 %v1723_v41  ;;  %626 = vmatprep.mubr.bf16.mxu1 %v1762_v42 }
  0x71   :  { %523 = vmatmul.mubr.bf16.gmra.mrb[24].mxu0 %v1725_v43  ;;  %627 = vmatmul.mubr.bf16.gmra.mrb[24].mxu1 %v1764_v44 }
  0x72   :  { %530 = vmatprep.mubr.bf16.mxu0 %v1729_v45  ;;  %634 = vmatprep.mubr.bf16.mxu1 %v1765_v46 }
  0x79   :  { %531 = vmatmul.mubr.bf16.gmra.mrb[28].mxu0 %v1731_v47  ;;  %635 = vmatmul.mubr.bf16.gmra.mrb[28].mxu1 %v1767_v48 }
  0x7a   :  { %538 = vmatprep.mubr.bf16.mxu0 %v1735_v49  ;;  %642 = vmatprep.mubr.bf16.mxu1 %v1768_v50 }
  0x81   :  { %539 = vmatmul.mubr.bf16.gmra.mrb[32].mxu0 %v1737_v51  ;;  %643 = vmatmul.mubr.bf16.gmra.mrb[32].mxu1 %v1770_v52 }
  0x82   :  { %546 = vmatprep.mubr.bf16.mxu0 %v1741_v53  ;;  %650 = vmatprep.mubr.bf16.mxu1 %v1771_v54 }
  0x89   :  { %547 = vmatmul.mubr.bf16.gmra.mrb[36].mxu0 %v1743_v55  ;;  %651 = vmatmul.mubr.bf16.gmra.mrb[36].mxu1 %v1773_v56 }
  0x8a   :  { %554 = vmatprep.mubr.bf16.mxu0 %v1747_v57  ;;  %658 = vmatprep.mubr.bf16.mxu1 %v1774_v58 }
  0x91   :  { %555 = vmatmul.mubr.bf16.gmra.mrb[40].mxu0 %v1749_v60  ;;  %659 = vmatmul.mubr.bf16.gmra.mrb[40].mxu1 %v1776_v61 }
  0x92   :  { %562 = vmatprep.mubr.bf16.mxu0 %v1753_v62  ;;  %666 = vmatprep.mubr.bf16.mxu1 %v1398_v63 }
  0x99   :  { %563 = vmatmul.mubr.bf16.gmra.mrb[44].mxu0 %v1755_v0  ;;  %667 = vmatmul.mubr.bf16.gmra.mrb[44].mxu1 %v1397_v1 }
  0x9a   :  { %570 = vmatprep.mubr.bf16.mxu0 %v1759_v2 }
  0xa1   :  { %571 = vmatmul.mubr.bf16.gmra.mrb[48].mxu0 %v1761_v3 }
 0x114   :  { %v2034_v4 = vpop.f32.mrb[0].mxu0  ;;  %v2036_v5 = vpop.f32.mrb[0].mxu1 }
 0x115   :  { %v478_v6 = vpop.f32.mrb[1].mxu0  ;;  %v582_v7 = vpop.f32.mrb[1].mxu1  ;;  %v729_v10 = vmul.f32 %v2034_v4, %v2034_v4 }
 0x116   :  { %v2038_v8 = vpop.f32.mrb[2].mxu0  ;;  %v2040_v9 = vpop.f32.mrb[2].mxu1 }
 0x117   :  { %v674_v11 = vadd.f32 %v2038_v8, %v2034_v4  ;;  %v730_v12 = vmul.f32 %v2038_v8, %v2038_v8  ;;  %v481_v13 = vpop.f32.mrb[3].mxu0  ;;  %v585_v14 = vpop.f32.mrb[3].mxu1 }
 0x119   :  { %v778_v15 = vadd.f32 %v730_v12, %v729_v10 }
 0x11c   :  { %v2048_v16 = vpop.f32.mrb[4].mxu0  ;;  %v2050_v17 = vpop.f32.mrb[4].mxu1 }
 0x11d   :  { %v675_v18 = vadd.f32 %v674_v11, %v2048_v16  ;;  %v731_v19 = vmul.f32 %v2048_v16, %v2048_v16  ;;  %v486_v20 = vpop.f32.mrb[5].mxu0  ;;  %v590_v21 = vpop.f32.mrb[5].mxu1 }
 0x11e   :  { %v2055_v22 = vpop.f32.mrb[6].mxu0  ;;  %v2057_v23 = vpop.f32.mrb[6].mxu1 }
 0x11f   :  { %v779_v24 = vadd.f32 %v778_v15, %v731_v19  ;;  %v676_v25 = vadd.f32 %v675_v18, %v2055_v22  ;;  %v732_v26 = vmul.f32 %v2055_v22, %v2055_v22  ;;  %v489_v27 = vpop.f32.mrb[7].mxu0  ;;  %v593_v28 = vpop.f32.mrb[7].mxu1 }
 0x121   :  { %v780_v29 = vadd.f32 %v779_v24, %v732_v26 }
 0x124   :  { %v2062_v30 = vpop.f32.mrb[8].mxu0  ;;  %v2064_v31 = vpop.f32.mrb[8].mxu1 }
 0x125   :  { %v677_v32 = vadd.f32 %v676_v25, %v2062_v30  ;;  %v733_v33 = vmul.f32 %v2062_v30, %v2062_v30  ;;  %v494_v34 = vpop.f32.mrb[9].mxu0  ;;  %v598_v35 = vpop.f32.mrb[9].mxu1 }
 0x126   :  { %v2069_v36 = vpop.f32.mrb[10].mxu0  ;;  %v2071_v37 = vpop.f32.mrb[10].mxu1 }
 0x127   :  { %v781_v38 = vadd.f32 %v780_v29, %v733_v33  ;;  %v678_v39 = vadd.f32 %v677_v32, %v2069_v36  ;;  %v734_v40 = vmul.f32 %v2069_v36, %v2069_v36  ;;  %v497_v41 = vpop.f32.mrb[11].mxu0  ;;  %v601_v42 = vpop.f32.mrb[11].mxu1 }
 0x129   :  { %v782_v43 = vadd.f32 %v781_v38, %v734_v40 }
 0x12c   :  { %v2076_v44 = vpop.f32.mrb[12].mxu0  ;;  %v2078_v45 = vpop.f32.mrb[12].mxu1 }
 0x12d   :  { %v679_v46 = vadd.f32 %v678_v39, %v2076_v44  ;;  %v735_v47 = vmul.f32 %v2076_v44, %v2076_v44  ;;  %v502_v48 = vpop.f32.mrb[13].mxu0  ;;  %v606_v49 = vpop.f32.mrb[13].mxu1 }
 0x12e   :  { %v2083_v50 = vpop.f32.mrb[14].mxu0  ;;  %v2085_v51 = vpop.f32.mrb[14].mxu1 }
 0x12f   :  { %v783_v52 = vadd.f32 %v782_v43, %v735_v47  ;;  %v680_v53 = vadd.f32 %v679_v46, %v2083_v50  ;;  %v736_v54 = vmul.f32 %v2083_v50, %v2083_v50  ;;  %v505_v55 = vpop.f32.mrb[15].mxu0  ;;  %v609_v56 = vpop.f32.mrb[15].mxu1 }
 0x131   :  { %v784_v57 = vadd.f32 %v783_v52, %v736_v54 }
 0x134   :  { %v2090_v58 = vpop.f32.mrb[16].mxu0  ;;  %v2092_v59 = vpop.f32.mrb[16].mxu1 }
 0x135   :  { %v681_v60 = vadd.f32 %v680_v53, %v2090_v58  ;;  %v737_v61 = vmul.f32 %v2090_v58, %v2090_v58  ;;  %v510_v62 = vpop.f32.mrb[17].mxu0  ;;  %v614_v63 = vpop.f32.mrb[17].mxu1 }
 0x136   :  { %v2097_v0 = vpop.f32.mrb[18].mxu0  ;;  %v2099_v1 = vpop.f32.mrb[18].mxu1 }
 0x137   :  { %v785_v2 = vadd.f32 %v784_v57, %v737_v61  ;;  %v682_v3 = vadd.f32 %v681_v60, %v2097_v0  ;;  %v738_v6 = vmul.f32 %v2097_v0, %v2097_v0  ;;  %v513_v7 = vpop.f32.mrb[19].mxu0  ;;  %v617_v10 = vpop.f32.mrb[19].mxu1 }
 0x139   :  { %v786_v11 = vadd.f32 %v785_v2, %v738_v6 }
 0x13c   :  { %v2104_v12 = vpop.f32.mrb[20].mxu0  ;;  %v2106_v13 = vpop.f32.mrb[20].mxu1 }
 0x13d   :  { %v683_v14 = vadd.f32 %v682_v3, %v2104_v12  ;;  %v739_v15 = vmul.f32 %v2104_v12, %v2104_v12  ;;  %v518_v18 = vpop.f32.mrb[21].mxu0  ;;  %v622_v19 = vpop.f32.mrb[21].mxu1 }
 0x13e   :  { %v2111_v20 = vpop.f32.mrb[22].mxu0  ;;  %v2113_v21 = vpop.f32.mrb[22].mxu1 }
 0x13f   :  { %v787_v24 = vadd.f32 %v786_v11, %v739_v15  ;;  %v684_v25 = vadd.f32 %v683_v14, %v2111_v20  ;;  %v740_v26 = vmul.f32 %v2111_v20, %v2111_v20  ;;  %v521_v27 = vpop.f32.mrb[23].mxu0  ;;  %v625_v28 = vpop.f32.mrb[23].mxu1 }
 0x141   :  { %v788_v29 = vadd.f32 %v787_v24, %v740_v26 }
 0x144   :  { %v2118_v32 = vpop.f32.mrb[24].mxu0  ;;  %v2120_v33 = vpop.f32.mrb[24].mxu1 }
 0x145   :  { %v685_v34 = vadd.f32 %v684_v25, %v2118_v32  ;;  %v741_v35 = vmul.f32 %v2118_v32, %v2118_v32  ;;  %v526_v38 = vpop.f32.mrb[25].mxu0  ;;  %v630_v39 = vpop.f32.mrb[25].mxu1 }
 0x146   :  { %v2125_v40 = vpop.f32.mrb[26].mxu0  ;;  %v2127_v41 = vpop.f32.mrb[26].mxu1 }
 0x147   :  { %v789_v42 = vadd.f32 %v788_v29, %v741_v35  ;;  %v686_v43 = vadd.f32 %v685_v34, %v2125_v40  ;;  %v742_v46 = vmul.f32 %v2125_v40, %v2125_v40  ;;  %v529_v47 = vpop.f32.mrb[27].mxu0  ;;  %v633_v48 = vpop.f32.mrb[27].mxu1 }
 0x149   :  { %v790_v49 = vadd.f32 %v789_v42, %v742_v46 }
 0x14c   :  { %v2132_v52 = vpop.f32.mrb[28].mxu0  ;;  %v2134_v53 = vpop.f32.mrb[28].mxu1 }
 0x14d   :  { %2874 = vst [vmem:[#allocation2_spill] sm:$0xff] %v2134_v53  ;;  %v687_v54 = vadd.f32 %v686_v43, %v2132_v52  ;;  %v743_v55 = vmul.f32 %v2132_v52, %v2132_v52  ;;  %v534_v56 = vpop.f32.mrb[29].mxu0  ;;  %v638_v57 = vpop.f32.mrb[29].mxu1 }
 0x14e   :  { %v2139_v60 = vpop.f32.mrb[30].mxu0  ;;  %v2141_v61 = vpop.f32.mrb[30].mxu1 }
 0x14f   :  { %2875 = vst [vmem:[#allocation3_spill] sm:$0xff] %v2141_v61  ;;  %v791_v62 = vadd.f32 %v790_v49, %v743_v55  ;;  %v688_v63 = vadd.f32 %v687_v54, %v2139_v60  ;;  %v744_v2 = vmul.f32 %v2139_v60, %v2139_v60  ;;  %v537_v3 = vpop.f32.mrb[31].mxu0  ;;  %v641_v6 = vpop.f32.mrb[31].mxu1 }
 0x151   :  { %v792_v7 = vadd.f32 %v791_v62, %v744_v2 }
 0x154   :  { %v2146_v10 = vpop.f32.mrb[32].mxu0  ;;  %v2148_v11 = vpop.f32.mrb[32].mxu1 }
 0x155   :  { %2876 = vst [vmem:[#allocation4_spill] sm:$0xff] %v2148_v11  ;;  %v689_v14 = vadd.f32 %v688_v63, %v2146_v10  ;;  %v745_v15 = vmul.f32 %v2146_v10, %v2146_v10  ;;  %v542_v18 = vpop.f32.mrb[33].mxu0  ;;  %v646_v19 = vpop.f32.mrb[33].mxu1 }
 0x156   :  { %v2153_v24 = vpop.f32.mrb[34].mxu0  ;;  %v2155_v25 = vpop.f32.mrb[34].mxu1 }
 0x157   :  { %2877 = vst [vmem:[#allocation5_spill] sm:$0xff] %v2155_v25  ;;  %v793_v26 = vadd.f32 %v792_v7, %v745_v15  ;;  %v690_v27 = vadd.f32 %v689_v14, %v2153_v24  ;;  %v746_v28 = vmul.f32 %v2153_v24, %v2153_v24  ;;  %v545_v29 = vpop.f32.mrb[35].mxu0  ;;  %v649_v34 = vpop.f32.mrb[35].mxu1 }
 0x159   :  { %v794_v35 = vadd.f32 %v793_v26, %v746_v28 }
 0x15c   :  { %v2160_v38 = vpop.f32.mrb[36].mxu0  ;;  %v2162_v39 = vpop.f32.mrb[36].mxu1 }
 0x15d   :  { %2878 = vst [vmem:[#allocation6_spill] sm:$0xff] %v2162_v39  ;;  %v691_v42 = vadd.f32 %v690_v27, %v2160_v38  ;;  %v747_v43 = vmul.f32 %v2160_v38, %v2160_v38  ;;  %v550_v46 = vpop.f32.mrb[37].mxu0  ;;  %v654_v47 = vpop.f32.mrb[37].mxu1 }
 0x15e   :  { %v2167_v48 = vpop.f32.mrb[38].mxu0  ;;  %v2169_v49 = vpop.f32.mrb[38].mxu1 }
 0x15f   :  { %2879 = vst [vmem:[#allocation7_spill] sm:$0xff] %v2169_v49  ;;  %v795_v54 = vadd.f32 %v794_v35, %v747_v43  ;;  %v692_v55 = vadd.f32 %v691_v42, %v2167_v48  ;;  %v748_v56 = vmul.f32 %v2167_v48, %v2167_v48  ;;  %v553_v57 = vpop.f32.mrb[39].mxu0  ;;  %v657_v62 = vpop.f32.mrb[39].mxu1 }
 0x161   :  { %v796_v63 = vadd.f32 %v795_v54, %v748_v56 }
 0x164   :  { %v2174_v2 = vpop.f32.mrb[40].mxu0  ;;  %v2176_v3 = vpop.f32.mrb[40].mxu1 }
 0x165   :  { %2880 = vst [vmem:[#allocation8_spill] sm:$0xff] %v2176_v3  ;;  %v693_v6 = vadd.f32 %v692_v55, %v2174_v2  ;;  %v749_v7 = vmul.f32 %v2174_v2, %v2174_v2  ;;  %v558_v14 = vpop.f32.mrb[41].mxu0  ;;  %v662_v15 = vpop.f32.mrb[41].mxu1 }
 0x166   :  { %v2181_v18 = vpop.f32.mrb[42].mxu0  ;;  %v2183_v19 = vpop.f32.mrb[42].mxu1 }
 0x167   :  { %2881 = vst [vmem:[#allocation9_spill] sm:$0xff] %v2183_v19  ;;  %v797_v26 = vadd.f32 %v796_v63, %v749_v7  ;;  %v694_v27 = vadd.f32 %v693_v6, %v2181_v18  ;;  %v750_v28 = vmul.f32 %v2181_v18, %v2181_v18  ;;  %v561_v29 = vpop.f32.mrb[43].mxu0  ;;  %v665_v34 = vpop.f32.mrb[43].mxu1 }
 0x169   :  { %v798_v35 = vadd.f32 %v797_v26, %v750_v28 }
 0x16c   :  { %v2188_v42 = vpop.f32.mrb[44].mxu0  ;;  %v2190_v43 = vpop.f32.mrb[44].mxu1 }
 0x16d   :  { %v695_v46 = vadd.f32 %v694_v27, %v2188_v42  ;;  %v751_v47 = vmul.f32 %v2188_v42, %v2188_v42  ;;  %v566_v54 = vpop.f32.mrb[45].mxu0  ;;  %v670_v55 = vpop.f32.mrb[45].mxu1 }
 0x16e   :  { %v2195_v56 = vpop.f32.mrb[46].mxu0  ;;  %v671_v57 = vpop.f32.mrb[46].mxu1  ;;  %v755_v55 = vmul.f32 %v2036_v5, %v2036_v5 }
 0x16f   :  { %v799_v62 = vadd.f32 %v798_v35, %v751_v47  ;;  %v696_v63 = vadd.f32 %v695_v46, %v2195_v56  ;;  %v752_v6 = vmul.f32 %v2195_v56, %v2195_v56  ;;  %v569_v7 = vpop.f32.mrb[47].mxu0  ;;  %v672_v14 = vpop.f32.mrb[47].mxu1 }
 0x170   :  { %v757_v14 = vmul.f32 %v2050_v17, %v2050_v17 }
 0x171   :  { %v800_v15 = vadd.f32 %v799_v62, %v752_v6 }
 0x174   :  { %v2200_v26 = vpop.f32.mrb[48].mxu0 }
 0x175   :  { %v697_v27 = vadd.f32 %v696_v63, %v2200_v26  ;;  %v753_v28 = vmul.f32 %v2200_v26, %v2200_v26  ;;  %v574_v29 = vpop.f32.mrb[49].mxu0  ;;  %v756_v63 = vmul.f32 %v2040_v9, %v2040_v9 }
 0x176   :  { %v2205_v34 = vpop.f32.mrb[50].mxu0 }
 0x177   :  { %v801_v54 = vadd.f32 %v800_v15, %v753_v28  ;;  %v698_v35 = vadd.f32 %v697_v27, %v2205_v34  ;;  %v754_v46 = vmul.f32 %v2205_v34, %v2205_v34  ;;  %v577_v47 = vpop.f32.mrb[51].mxu0  ;;  %v758_v28 = vmul.f32 %v2057_v23, %v2057_v23 }
 0x179   :  { %v699_v57 = vadd.f32 %v698_v35, %v2036_v5  ;;  %v802_v62 = vadd.f32 %v801_v54, %v754_v46  ;;  %v759_v54 = vmul.f32 %v2064_v31, %v2064_v31 }
 0x17b   :  { %v700_v6 = vadd.f32 %v699_v57, %v2040_v9  ;;  %v803_v7 = vadd.f32 %v802_v62, %v755_v55  ;;  %v760_v55 = vmul.f32 %v2071_v37, %v2071_v37 }
 0x17d   :  { %v701_v15 = vadd.f32 %v700_v6, %v2050_v17  ;;  %v804_v27 = vadd.f32 %v803_v7, %v756_v63  ;;  %v761_v63 = vmul.f32 %v2078_v45, %v2078_v45 }
 0x17f   :  { %v702_v29 = vadd.f32 %v701_v15, %v2057_v23  ;;  %v805_v47 = vadd.f32 %v804_v27, %v757_v14  ;;  %v762_v14 = vmul.f32 %v2085_v51, %v2085_v51 }
 0x181   :  { %v703_v35 = vadd.f32 %v702_v29, %v2064_v31  ;;  %v806_v46 = vadd.f32 %v805_v47, %v758_v28  ;;  %v763_v28 = vmul.f32 %v2092_v59, %v2092_v59 }
 0x183   :  { %v704_v57 = vadd.f32 %v703_v35, %v2071_v37  ;;  %v807_v62 = vadd.f32 %v806_v46, %v759_v54  ;;  %v764_v54 = vmul.f32 %v2099_v1, %v2099_v1 }
 0x185   :  { %v808_v6 = vadd.f32 %v807_v62, %v760_v55  ;;  %v705_v7 = vadd.f32 %v704_v57, %v2078_v45  ;;  %v765_v55 = vmul.f32 %v2106_v13, %v2106_v13 }
 0x187   :  { %v706_v15 = vadd.f32 %v705_v7, %v2085_v51  ;;  %v809_v27 = vadd.f32 %v808_v6, %v761_v63  ;;  %v766_v63 = vmul.f32 %v2113_v21, %v2113_v21 }
 0x189   :  { %v707_v29 = vadd.f32 %v706_v15, %v2092_v59  ;;  %v810_v47 = vadd.f32 %v809_v27, %v762_v14  ;;  %v767_v15 = vmul.f32 %v2120_v33, %v2120_v33 }
 0x18b   :  { %v708_v35 = vadd.f32 %v707_v29, %v2099_v1  ;;  %v811_v46 = vadd.f32 %v810_v47, %v763_v28  ;;  %v768_v47 = vmul.f32 %v2127_v41, %v2127_v41 }
 0x18d   :  { %v709_v57 = vadd.f32 %v708_v35, %v2106_v13  ;;  %v812_v62 = vadd.f32 %v811_v46, %v764_v54  ;;  %v769_v46 = vmul.f32 %v2134_v53, %v2134_v53 }
 0x18f   :  { %v710_v6 = vadd.f32 %v709_v57, %v2113_v21  ;;  %v813_v7 = vadd.f32 %v812_v62, %v765_v55  ;;  %v770_v62 = vmul.f32 %v2141_v61, %v2141_v61 }
 0x191   :  { %v711_v14 = vadd.f32 %v710_v6, %v2120_v33  ;;  %v814_v27 = vadd.f32 %v813_v7, %v766_v63  ;;  %v771_v7 = vmul.f32 %v2148_v11, %v2148_v11 }
 0x193   :  { %v815_v29 = vadd.f32 %v814_v27, %v767_v15  ;;  %v712_v28 = vadd.f32 %v711_v14, %v2127_v41  ;;  %v772_v27 = vmul.f32 %v2155_v25, %v2155_v25 }
 0x195   :  { %v816_v35 = vadd.f32 %v815_v29, %v768_v47  ;;  %v713_v54 = vadd.f32 %v712_v28, %v2134_v53  ;;  %v773_v47 = vmul.f32 %v2162_v39, %v2162_v39 }
 0x197   :  { %v817_v57 = vadd.f32 %v816_v35, %v769_v46  ;;  %v714_v55 = vadd.f32 %v713_v54, %v2141_v61  ;;  %v774_v46 = vmul.f32 %v2169_v49, %v2169_v49 }
 0x199   :  { %v818_v6 = vadd.f32 %v817_v57, %v770_v62  ;;  %v715_v63 = vadd.f32 %v714_v55, %v2148_v11  ;;  %v775_v62 = vmul.f32 %v2176_v3, %v2176_v3 }
 0x19b   :  { %v819_v14 = vadd.f32 %v818_v6, %v771_v7  ;;  %v716_v15 = vadd.f32 %v715_v63, %v2155_v25  ;;  %v776_v7 = vmul.f32 %v2183_v19, %v2183_v19 }
 0x19d   :  { %v820_v29 = vadd.f32 %v819_v14, %v772_v27  ;;  %v717_v28 = vadd.f32 %v716_v15, %v2162_v39  ;;  %v777_v14 = vmul.f32 %v2190_v43, %v2190_v43 }
 0x19f   :  { %v821_v35 = vadd.f32 %v820_v29, %v773_v47  ;;  %v718_v54 = vadd.f32 %v717_v28, %v2169_v49 }
 0x1a1   :  { %v822_v57 = vadd.f32 %v821_v35, %v774_v46  ;;  %v719_v55 = vadd.f32 %v718_v54, %v2176_v3 }
 0x1a3   :  { %v823_v6 = vadd.f32 %v822_v57, %v775_v62  ;;  %v720_v63 = vadd.f32 %v719_v55, %v2183_v19 }
 0x1a5   :  { %v824_v15 = vadd.f32 %v823_v6, %v776_v7  ;;  %v721_v27 = vadd.f32 %v720_v63, %v2190_v43  ;;  %v843_v63 = vlaneseq }
 0x1a7   :  { %v722_v29 = vrot.slane %v721_v27, 4  ;;  %v825_v28 = vadd.f32 %v824_v15, %v777_v14  ;;  %v844_v7 = vshrl.u32 %v843_v63, 7  ;;  %v835_v14 = vld [vmem:[%s2841_s2] sm:$0x1]  ;;  %v2885_v63 = vld [vmem:[#allocation5_spill] sm:$0xff] }
 0x1a9   :  { %v723_v47 = vadd.f32 %v722_v29, %v721_v27  ;;  %v826_v35 = vrot.slane %v825_v28, 4  ;;  %v845_v15 = vsub.s32 0, %v844_v7  ;;  %v2886_v7 = vld [vmem:[#allocation6_spill] sm:$0xff] }
 0x1ab   :  { %v724_v54 = vrot.slane %v723_v47, 2  ;;  %v827_v46 = vadd.f32 %v826_v35, %v825_v28 }
 0x1ad   :  { %v725_v49 = vadd.f32 %v724_v54, %v723_v47  ;;  %v828_v3 = vrot.slane %v827_v46, 2 }
 0x1af   :  { %v726_v57 = vrot.slane %v725_v49, 1  ;;  %v829_v62 = vadd.f32 %v828_v3, %v827_v46 }
 0x1b1   :  { %v727_v55 = vadd.f32 %v726_v57, %v725_v49  ;;  %v830_v39 = vrot.slane %v829_v62, 1  ;;  %v839_v49 = vld [vmem:[%s2842_s3] sm:$0x1] }
 0x1b3   :  { %v728_v25 = vmul.f32 0.0025510204, %v727_v55  ;;  %v831_v19 = vadd.f32 %v830_v39, %v829_v62  ;;  %v2882_v62 = vld [vmem:[#allocation2_spill] sm:$0xff]  ;;  %v2883_v55 = vld [vmem:[#allocation3_spill] sm:$0xff] }
 0x1b5   :  { %v832_v11 = vmul.f32 0.0025510204, %v831_v19  ;;  %v833_v61 = vmul.f32 %v728_v25, %v728_v25 }
 0x1b7   :  { %v834_v53 = vsub.f32 %v832_v11, %v833_v61 }
 0x1b9   :  { %v836_v6 = vadd.f32 1e-05, %v834_v53 }
 0x1bb   :  { %1779 = vrsqrt.f32 %v836_v6  ;;  %v2884_v6 = vld [vmem:[#allocation4_spill] sm:$0xff] }
 0x1c5   :  { %v1780_v27 = vpop.eup %1779 }
 0x1c6   :  { %v838_v29 = vmul.f32 %v1780_v27, %v835_v14  ;;  %v2887_v14 = vld [vmem:[#allocation7_spill] sm:$0xff]  ;;  %v2888_v27 = vld [vmem:[#allocation8_spill] sm:$0xff] }
 0x1c8   :  { %v840_v3 = vmul.f32 %v838_v29, %v728_v25  ;;  %v846_v39 = vrot.slane %v838_v29, %v845_v15  ;;  %v2889_v29 = vld [vmem:[#allocation9_spill] sm:$0xff] }
 0x1ca   :  { %v841_v19 = vsub.f32 %v839_v49, %v840_v3  ;;  %v848_v61 = vmul.f32 %v846_v39, %v2034_v4  ;;  %v849_v53 = vmul.f32 %v846_v39, %v2038_v8  ;;  %v850_v11 = vmul.f32 %v846_v39, %v2048_v16 }
 0x1cb   :  { %v851_v28 = vmul.f32 %v846_v39, %v2055_v22  ;;  %v852_v47 = vmul.f32 %v846_v39, %v2062_v30  ;;  %v853_v35 = vmul.f32 %v846_v39, %v2069_v36  ;;  %v854_v54 = vmul.f32 %v846_v39, %v2076_v44 }
 0x1cc   :  { %v855_v46 = vmul.f32 %v846_v39, %v2083_v50  ;;  %v856_v25 = vmul.f32 %v846_v39, %v2090_v58  ;;  %v857_v57 = vmul.f32 %v846_v39, %v2097_v0  ;;  %v858_v4 = vmul.f32 %v846_v39, %v2104_v12 }
 0x1cd   :  { %v859_v8 = vmul.f32 %v846_v39, %v2111_v20  ;;  %v860_v16 = vmul.f32 %v846_v39, %v2118_v32  ;;  %v861_v22 = vmul.f32 %v846_v39, %v2125_v40  ;;  %v862_v30 = vmul.f32 %v846_v39, %v2132_v52 }
 0x1ce   :  { %v863_v36 = vmul.f32 %v846_v39, %v2139_v60  ;;  %v864_v44 = vmul.f32 %v846_v39, %v2146_v10  ;;  %v865_v50 = vmul.f32 %v846_v39, %v2153_v24  ;;  %v866_v58 = vmul.f32 %v846_v39, %v2160_v38 }
 0x1cf   :  { %v867_v0 = vmul.f32 %v846_v39, %v2167_v48  ;;  %v868_v12 = vmul.f32 %v846_v39, %v2174_v2  ;;  %v869_v20 = vmul.f32 %v846_v39, %v2181_v18  ;;  %v870_v32 = vmul.f32 %v846_v39, %v2188_v42 }
 0x1d0   :  { %v871_v40 = vmul.f32 %v846_v39, %v2195_v56  ;;  %v872_v52 = vmul.f32 %v846_v39, %v2200_v26  ;;  %v873_v60 = vmul.f32 %v846_v39, %v2205_v34  ;;  %v874_v10 = vmul.f32 %v846_v39, %v2036_v5 }
 0x1d1   :  { %v875_v24 = vmul.f32 %v846_v39, %v2040_v9  ;;  %v876_v38 = vmul.f32 %v846_v39, %v2050_v17  ;;  %v877_v48 = vmul.f32 %v846_v39, %v2057_v23  ;;  %v878_v2 = vmul.f32 %v846_v39, %v2064_v31 }
 0x1d2   :  { %v879_v18 = vmul.f32 %v846_v39, %v2071_v37  ;;  %v880_v42 = vmul.f32 %v846_v39, %v2078_v45  ;;  %v881_v56 = vmul.f32 %v846_v39, %v2085_v51  ;;  %v882_v26 = vmul.f32 %v846_v39, %v2092_v59 }
 0x1d3   :  { %v883_v34 = vmul.f32 %v846_v39, %v2099_v1  ;;  %v884_v5 = vmul.f32 %v846_v39, %v2106_v13  ;;  %v885_v9 = vmul.f32 %v846_v39, %v2113_v21  ;;  %v886_v17 = vmul.f32 %v846_v39, %v2120_v33 }
 0x1d4   :  { %v887_v23 = vmul.f32 %v846_v39, %v2127_v41  ;;  %v888_v31 = vmul.f32 %v846_v39, %v2882_v62  ;;  %v889_v37 = vmul.f32 %v846_v39, %v2883_v55  ;;  %v890_v45 = vmul.f32 %v846_v39, %v2884_v6 }
 0x1d5   :  { %v891_v51 = vmul.f32 %v846_v39, %v2885_v63  ;;  %v892_v59 = vmul.f32 %v846_v39, %v2886_v7  ;;  %v893_v1 = vmul.f32 %v846_v39, %v2887_v14  ;;  %v894_v13 = vmul.f32 %v846_v39, %v2888_v27 }
 0x1d6   :  { %v895_v21 = vmul.f32 %v846_v39, %v2889_v29  ;;  %v896_v33 = vmul.f32 %v846_v39, %v2190_v43  ;;  %v901_v49 = vrot.slane %v841_v19, %v845_v15 }
 0x1d8   :  { %v2334_v41 = vadd.f32 %v901_v49, %v848_v61  ;;  %v2336_v3 = vadd.f32 %v901_v49, %v849_v53  ;;  %v2338_v62 = vadd.f32 %v901_v49, %v850_v11  ;;  %v2340_v55 = vadd.f32 %v901_v49, %v851_v28 }
 0x1d9   :  { %v2342_v6 = vadd.f32 %v901_v49, %v852_v47  ;;  %v2344_v63 = vadd.f32 %v901_v49, %v853_v35  ;;  %v2346_v7 = vadd.f32 %v901_v49, %v854_v54  ;;  %v2348_v14 = vadd.f32 %v901_v49, %v855_v46 }
 0x1da   :  { %v2350_v27 = vadd.f32 %v901_v49, %v856_v25  ;;  %v2352_v43 = vadd.f32 %v901_v49, %v857_v57  ;;  %v2354_v15 = vadd.f32 %v901_v49, %v858_v4  ;;  %v2356_v39 = vadd.f32 %v901_v49, %v859_v8 }
 0x1db   :  { %v2358_v19 = vadd.f32 %v901_v49, %v860_v16  ;;  %v2360_v61 = vadd.f32 %v901_v49, %v861_v22  ;;  %v2362_v53 = vadd.f32 %v901_v49, %v862_v30  ;;  %v2364_v11 = vadd.f32 %v901_v49, %v863_v36 }
 0x1dc   :  { %v2366_v28 = vadd.f32 %v901_v49, %v864_v44  ;;  %v2368_v47 = vadd.f32 %v901_v49, %v865_v50  ;;  %v2370_v35 = vadd.f32 %v901_v49, %v866_v58  ;;  %v2372_v54 = vadd.f32 %v901_v49, %v867_v0 }
 0x1dd   :  { %v2374_v46 = vadd.f32 %v901_v49, %v868_v12  ;;  %v2376_v25 = vadd.f32 %v901_v49, %v869_v20  ;;  %v2378_v57 = vadd.f32 %v901_v49, %v870_v32  ;;  %v2380_v4 = vadd.f32 %v901_v49, %v871_v40 }
 0x1de   :  { %2890 = vst [vmem:[#allocation2_spill] sm:$0xff] %v2372_v54  ;;  %v2382_v8 = vadd.f32 %v901_v49, %v872_v52  ;;  %v2384_v16 = vadd.f32 %v901_v49, %v873_v60  ;;  %v2386_v22 = vadd.f32 %v901_v49, %v874_v10  ;;  %v2388_v30 = vadd.f32 %v901_v49, %v875_v24 }
 0x1df   :  { %2891 = vst [vmem:[#allocation3_spill] sm:$0xff] %v2378_v57  ;;  %v2390_v36 = vadd.f32 %v901_v49, %v876_v38  ;;  %v2392_v44 = vadd.f32 %v901_v49, %v877_v48  ;;  %v2394_v50 = vadd.f32 %v901_v49, %v878_v2  ;;  %v2396_v58 = vadd.f32 %v901_v49, %v879_v18 }
 0x1e0   :  { %2892 = vst [vmem:[#allocation4_spill] sm:$0xff] %v2384_v16  ;;  %v2398_v0 = vadd.f32 %v901_v49, %v880_v42  ;;  %v2400_v12 = vadd.f32 %v901_v49, %v881_v56  ;;  %v2402_v20 = vadd.f32 %v901_v49, %v882_v26  ;;  %v2404_v32 = vadd.f32 %v901_v49, %v883_v34 }
 0x1e1   :  { %2893 = vst [vmem:[#allocation5_spill] sm:$0xff] %v2390_v36  ;;  %2894 = vst [vmem:[#allocation6_spill] sm:$0xff] %v2396_v58  ;;  %v2406_v40 = vadd.f32 %v901_v49, %v884_v5  ;;  %v2408_v52 = vadd.f32 %v901_v49, %v885_v9  ;;  %v2410_v60 = vadd.f32 %v901_v49, %v886_v17  ;;  %vm952_vm0 = vcmp.gt.f32.partialorder %v2334_v41, 0.0 }
 0x1e2   :  { %v2412_v10 = vadd.f32 %v901_v49, %v887_v23  ;;  %v2414_v24 = vadd.f32 %v901_v49, %v888_v31  ;;  %v2416_v38 = vadd.f32 %v901_v49, %v889_v37  ;;  %v2418_v48 = vadd.f32 %v901_v49, %v890_v45 }
 0x1e3   :  { %2895 = vst [vmem:[#allocation7_spill] sm:$0xff] %v2406_v40  ;;  %2896 = vst [vmem:[#allocation8_spill] sm:$0xff] %v2408_v52  ;;  %v2420_v2 = vadd.f32 %v901_v49, %v891_v51  ;;  %v2422_v18 = vadd.f32 %v901_v49, %v892_v59  ;;  %v2424_v42 = vadd.f32 %v901_v49, %v893_v1  ;;  %vm953_vm1 = vcmp.gt.f32.partialorder %v2336_v3, 0.0 }
 0x1e4   :  { %2897 = vst [vmem:[#allocation9_spill] sm:$0xff] %v2410_v60  ;;  %2898 = vst [vmem:[#allocation10_spill] sm:$0xff] %v2412_v10  ;;  %v2426_v56 = vadd.f32 %v901_v49, %v894_v13  ;;  %v2428_v26 = vadd.f32 %v901_v49, %v895_v21  ;;  %v2430_v34 = vadd.f32 %v901_v49, %v896_v33  ;;  %vm954_vm2 = vcmp.gt.f32.partialorder %v2338_v62, 0.0 }
 0x1e5   :  { %2899 = vst [vmem:[#allocation11_spill] sm:$0xff] %v2414_v24  ;;  %2900 = vst [vmem:[#allocation12_spill] sm:$0xff] %v2420_v2  ;;  %vm955_vm3 = vcmp.gt.f32.partialorder %v2340_v55, 0.0  ;;  %vm956_vm4 = vcmp.gt.f32.partialorder %v2342_v6, 0.0  ;;  %vm957_vm5 = vcmp.gt.f32.partialorder %v2344_v63, 0.0  ;;  %vm958_vm6 = vcmp.gt.f32.partialorder %v2346_v7, 0.0 }
 0x1e6   :  { %vm959_vm7 = vcmp.gt.f32.partialorder %v2348_v14, 0.0  ;;  %vm960_vm8 = vcmp.gt.f32.partialorder %v2350_v27, 0.0  ;;  %vm961_vm9 = vcmp.gt.f32.partialorder %v2352_v43, 0.0  ;;  %v1001_v5 = vmul.f32 0.2, %v2334_v41 }
 0x1e7   :  { %v1002_v9 = vmul.f32 0.2, %v2336_v3  ;;  %vm962_vm10 = vcmp.gt.f32.partialorder %v2354_v15, 0.0  ;;  %v1003_v17 = vmul.f32 0.2, %v2338_v62  ;;  %vm963_vm11 = vcmp.gt.f32.partialorder %v2356_v39, 0.0 }
 0x1e8   :  { %v1004_v23 = vmul.f32 0.2, %v2340_v55  ;;  %v1005_v31 = vmul.f32 0.2, %v2342_v6  ;;  %v1006_v37 = vmul.f32 0.2, %v2344_v63  ;;  %v2455_v59 = vsel %vm952_vm0, %v2334_v41, %v1001_v5 }
 0x1e9   :  { %v1007_v45 = vmul.f32 0.2, %v2346_v7  ;;  %v1008_v51 = vmul.f32 0.2, %v2348_v14  ;;  %2901 = vst [vmem:[#allocation13_spill] sm:$0xff] %v2455_v59  ;;  %vm964_vm12 = vcmp.gt.f32.partialorder %v2358_v19, 0.0  ;;  %v2466_v21 = vsel %vm953_vm1, %v2336_v3, %v1002_v9 }
 0x1ea   :  { %v1009_v1 = vmul.f32 0.2, %v2350_v27  ;;  %v1010_v13 = vmul.f32 0.2, %v2352_v43  ;;  %v2461_v29 = vmul.f32 0.2, %v2354_v15  ;;  %v2481_v5 = vsel %vm954_vm2, %v2338_v62, %v1003_v17 }
 0x1eb   :  { %2902 = vst [vmem:[#allocation14_spill] sm:$0xff] %v2466_v21  ;;  %vm965_vm13 = vcmp.gt.f32.partialorder %v2360_v61, 0.0  ;;  %v2470_v33 = vmul.f32 0.2, %v2356_v39  ;;  %v2473_v49 = vmul.f32 0.2, %v2358_v19  ;;  %v2497_v59 = vsel %vm955_vm3, %v2340_v55, %v1004_v23 }
 0x1ec   :  { %v2476_v41 = vmul.f32 0.2, %v2360_v61  ;;  %2903 = vst [vmem:[#allocation15_spill] sm:$0xff] %v2481_v5  ;;  %vm966_vm14 = vcmp.gt.f32.partialorder %v2362_v53, 0.0  ;;  %v2486_v3 = vmul.f32 0.2, %v2362_v53  ;;  %v2515_v55 = vsel %vm956_vm4, %v2342_v6, %v1005_v31 }
 0x1ed   :  { %v2489_v9 = vmul.f32 0.2, %v2364_v11  ;;  %v2492_v21 = vmul.f32 0.2, %v2366_v28  ;;  %2904 = vst [vmem:[#allocation16_spill] sm:$0xff] %v2497_v59  ;;  %vm968_vm0 = vcmp.gt.f32.partialorder %v2366_v28, 0.0  ;;  %v2533_v6 = vsel %vm957_vm5, %v2344_v63, %v1006_v37 }
 0x1ee   :  { %v2504_v62 = vmul.f32 0.2, %v2368_v47  ;;  %v2507_v17 = vmul.f32 0.2, %v2370_v35  ;;  %v2510_v5 = vmul.f32 0.2, %v2372_v54  ;;  %v2551_v63 = vsel %vm958_vm6, %v2346_v7, %v1007_v45 }
 0x1ef   :  { %2905 = vst [vmem:[#allocation17_spill] sm:$0xff] %v2515_v55  ;;  %vm972_vm3 = vcmp.gt.f32.partialorder %v2374_v46, 0.0  ;;  %v2522_v23 = vmul.f32 0.2, %v2374_v46  ;;  %v2525_v59 = vmul.f32 0.2, %v2376_v25 }
 0x1f0   :  { %v2528_v54 = vmul.f32 0.2, %v2378_v57  ;;  %2906 = vst [vmem:[#allocation18_spill] sm:$0xff] %v2533_v6  ;;  %vm976_vm4 = vcmp.gt.f32.partialorder %v2382_v8, 0.0  ;;  %v2540_v31 = vmul.f32 0.2, %v2380_v4 }
 0x1f1   :  { %v2543_v55 = vmul.f32 0.2, %v2382_v8  ;;  %v2546_v57 = vmul.f32 0.2, %v2384_v16  ;;  %2908 = vst [vmem:[#allocation20_spill] sm:$0xff] %v2551_v63  ;;  %vm983_vm15 = vcmp.gt.f32.partialorder %v2396_v58, 0.0 }
 0x1f2   :  { %v1027_v37 = vmul.f32 0.2, %v2386_v22  ;;  %v1028_v6 = vmul.f32 0.2, %v2388_v30  ;;  %v1029_v16 = vmul.f32 0.2, %v2390_v36  ;;  %v2575_v36 = vsel %vm960_vm8, %v2350_v27, %v1009_v1 }
 0x1f3   :  { %2907 = vst [vmem:[#allocation19_spill] sm:$0xff] %v2546_v57  ;;  %v2563_v57 = vsel %vm959_vm7, %v2348_v14, %v1008_v51  ;;  %vm987_vm2 = vcmp.gt.f32.partialorder %v2404_v32, 0.0  ;;  %v1030_v7 = vmul.f32 0.2, %v2392_v44  ;;  %v1031_v45 = vmul.f32 0.2, %v2394_v50 }
 0x1f4   :  { %2909 = vst [vmem:[#allocation21_spill] sm:$0xff] %v2563_v57  ;;  %v1032_v63 = vmul.f32 0.2, %v2396_v58  ;;  %2910 = vst [vmem:[#allocation22_spill] sm:$0xff] %v2575_v36  ;;  %vm991_vm1 = vcmp.gt.f32.partialorder %v2412_v10, 0.0  ;;  %v2587_v58 = vsel %vm961_vm9, %v2352_v43, %v1010_v13  ;;  %vm992_vm8 = vcmp.gt.f32.partialorder %v2414_v24, 0.0 }
 0x1f5   :  { %v1033_v14 = vmul.f32 0.2, %v2398_v0  ;;  %v1034_v51 = vmul.f32 0.2, %v2400_v12  ;;  %v1035_v57 = vmul.f32 0.2, %v2402_v20  ;;  %v2600_v43 = vsel %vm962_vm10, %v2354_v15, %v2461_v29 }
 0x1f6   :  { %2911 = vst [vmem:[#allocation23_spill] sm:$0xff] %v2587_v58  ;;  %v1036_v27 = vmul.f32 0.2, %v2404_v32  ;;  %v1037_v1 = vmul.f32 0.2, %v2406_v40  ;;  %2912 = vst [vmem:[#allocation24_spill] sm:$0xff] %v2600_v43  ;;  %v2613_v15 = vsel %vm963_vm11, %v2356_v39, %v2470_v33  ;;  %v1063_v33 = vsel %vm965_vm13, %v2360_v61, %v2476_v41 }
 0x1f7   :  { %v1038_v36 = vmul.f32 0.2, %v2408_v52  ;;  %vm996_vm9 = vcmp.gt.f32.partialorder %v2422_v18, 0.0  ;;  %vm997_vm7 = vcmp.gt.f32.partialorder %v2424_v42, 0.0  ;;  %vm998_vm6 = vcmp.gt.f32.partialorder %v2426_v56, 0.0  ;;  %2913 = vst [vmem:[#allocation25_spill] sm:$0xff] %v2613_v15 }
 0x1f8   :  { %vm999_vm5 = vcmp.gt.f32.partialorder %v2428_v26, 0.0  ;;  %v1039_v13 = vmul.f32 0.2, %v2410_v60  ;;  %v1040_v58 = vmul.f32 0.2, %v2412_v10  ;;  %vm1000_vm10 = vcmp.gt.f32.partialorder %v2430_v34, 0.0 }
 0x1f9   :  { %v1041_v52 = vmul.f32 0.2, %v2414_v24  ;;  %v1042_v29 = vmul.f32 0.2, %v2416_v38  ;;  %v1043_v43 = vmul.f32 0.2, %v2418_v48  ;;  %v2623_v10 = vsel %vm964_vm12, %v2358_v19, %v2473_v49 }
 0x1fa   :  { %v1044_v40 = vmul.f32 0.2, %v2420_v2  ;;  %2914 = vst [vmem:[#allocation26_spill] sm:$0xff] %v2623_v10  ;;  %v1045_v24 = vmul.f32 0.2, %v2422_v18  ;;  %v1064_v19 = vsel %vm966_vm14, %v2362_v53, %v2486_v3  ;;  %vm2915_vm11 = vcmp.gt.f32.partialorder %v2364_v11, 0.0 }
 0x1fb   :  { %v1046_v60 = vmul.f32 0.2, %v2424_v42  ;;  %v1047_v39 = vmul.f32 0.2, %v2426_v56  ;;  %v1048_v15 = vmul.f32 0.2, %v2428_v26  ;;  %v1065_v49 = vsel %vm2915_vm11, %v2364_v11, %v2489_v9 }
 0x1fc   :  { %v1049_v2 = vmul.f32 0.2, %v2430_v34  ;;  %v1066_v10 = vsel %vm968_vm0, %v2366_v28, %v2492_v21  ;;  %vm2916_vm12 = vcmp.gt.f32.partialorder %v2368_v47, 0.0  ;;  %vm2917_vm13 = vcmp.gt.f32.partialorder %v2370_v35, 0.0  ;;  %v2918_v41 = vld [vmem:[#allocation2_spill] sm:$0xff]  ;;  %v2921_v21 = vld [vmem:[#allocation3_spill] sm:$0xff] }
 0x1fd   :  { %v1067_v61 = vsel %vm2916_vm12, %v2368_v47, %v2504_v62  ;;  %v1068_v53 = vsel %vm2917_vm13, %v2370_v35, %v2507_v17  ;;  %vm2919_vm14 = vcmp.gt.f32.partialorder %v2918_v41, 0.0  ;;  %v1070_v28 = vsel %vm972_vm3, %v2374_v46, %v2522_v23  ;;  %v2924_v3 = vld [vmem:[#allocation19_spill] sm:$0xff]  ;;  %v2925_v9 = vld [vmem:[#allocation4_spill] sm:$0xff]  ;;  %v2929_v62 = vld [vmem:[#allocation5_spill] sm:$0xff] }
 0x1fe   :  { %v1069_v11 = vsel %vm2919_vm14, %v2918_v41, %v2510_v5  ;;  %vm2920_vm0 = vcmp.gt.f32.partialorder %v2376_v25, 0.0  ;;  %vm2922_vm11 = vcmp.gt.f32.partialorder %v2921_v21, 0.0  ;;  %vm2923_vm12 = vcmp.gt.f32.partialorder %v2380_v4, 0.0  ;;  %v2937_v23 = vld [vmem:[#allocation7_spill] sm:$0xff]  ;;  %v2955_v41 = vld [vmem:[#allocation20_spill] sm:$0xff] }
 0x1ff   :  { %v1071_v47 = vsel %vm2920_vm0, %v2376_v25, %v2525_v59  ;;  %v1072_v35 = vsel %vm2922_vm11, %v2921_v21, %v2528_v54  ;;  %v1073_v5 = vsel %vm2923_vm12, %v2380_v4, %v2540_v31  ;;  %v1074_v46 = vsel %vm976_vm4, %v2382_v8, %v2543_v55  ;;  %v2933_v55 = vld [vmem:[#allocation6_spill] sm:$0xff]  ;;  %v2939_v31 = vld [vmem:[#allocation8_spill] sm:$0xff] }
 0x200   :  { %vm2926_vm3 = vcmp.gt.f32.partialorder %v2925_v9, 0.0  ;;  %vm2927_vm13 = vcmp.gt.f32.partialorder %v2386_v22, 0.0  ;;  %vm2928_vm14 = vcmp.gt.f32.partialorder %v2388_v30, 0.0  ;;  %vm2930_vm0 = vcmp.gt.f32.partialorder %v2929_v62, 0.0  ;;  %v2957_v21 = vld [vmem:[#allocation22_spill] sm:$0xff] }
 0x201   :  { %v1075_v25 = vsel %vm2926_vm3, %v2925_v9, %v2924_v3  ;;  %v1076_v59 = vsel %vm2927_vm13, %v2386_v22, %v1027_v37  ;;  %v1077_v54 = vsel %vm2928_vm14, %v2388_v30, %v1028_v6  ;;  %v1078_v4 = vsel %vm2930_vm0, %v2929_v62, %v1029_v16  ;;  %v2943_v37 = vld [vmem:[#allocation10_spill] sm:$0xff]  ;;  %v2958_v3 = vld [vmem:[#allocation23_spill] sm:$0xff]  ;;  %v2960_v9 = vld [vmem:[#allocation25_spill] sm:$0xff] }
 0x202   :  { %vm2931_vm4 = vcmp.gt.f32.partialorder %v2392_v44, 0.0  ;;  %vm2932_vm11 = vcmp.gt.f32.partialorder %v2394_v50, 0.0  ;;  %v1081_v22 = vsel %vm983_vm15, %v2933_v55, %v1032_v63  ;;  %vm2934_vm12 = vcmp.gt.f32.partialorder %v2398_v0, 0.0  ;;  %v2941_v63 = vld [vmem:[#allocation9_spill] sm:$0xff] }
 0x203   :  { %v1079_v8 = vsel %vm2931_vm4, %v2392_v44, %v1030_v7  ;;  %v1080_v17 = vsel %vm2932_vm11, %v2394_v50, %v1031_v45  ;;  %v1082_v30 = vsel %vm2934_vm12, %v2398_v0, %v1033_v14  ;;  %vm2935_vm3 = vcmp.gt.f32.partialorder %v2400_v12, 0.0  ;;  %v2947_v45 = vld [vmem:[#allocation12_spill] sm:$0xff] }
 0x204   :  { %v1083_v16 = vsel %vm2935_vm3, %v2400_v12, %v1034_v51  ;;  %vm2936_vm13 = vcmp.gt.f32.partialorder %v2402_v20, 0.0  ;;  %v1085_v50 = vsel %vm987_vm2, %v2404_v32, %v1036_v27  ;;  %vm2938_vm14 = vcmp.gt.f32.partialorder %v2937_v23, 0.0  ;;  %v2949_v51 = vld [vmem:[#allocation13_spill] sm:$0xff]  ;;  %v2950_v27 = vld [vmem:[#allocation14_spill] sm:$0xff] }
 0x205   :  { %v1084_v44 = vsel %vm2936_vm13, %v2402_v20, %v1035_v57  ;;  %v1086_v6 = vsel %vm2938_vm14, %v2937_v23, %v1037_v1  ;;  %vm2940_vm15 = vcmp.gt.f32.partialorder %v2939_v31, 0.0  ;;  %vm2942_vm0 = vcmp.gt.f32.partialorder %v2941_v63, 0.0  ;;  %v2944_v20 = vld [vmem:[#allocation11_spill] sm:$0xff] }
 0x206   :  { %v1087_v0 = vsel %vm2940_vm15, %v2939_v31, %v1038_v36  ;;  %v1088_v12 = vsel %vm2942_vm0, %v2941_v63, %v1039_v13  ;;  %v1089_v57 = vsel %vm991_vm1, %v2943_v37, %v1040_v58  ;;  %v1090_v32 = vsel %vm992_vm8, %v2944_v20, %v1041_v52  ;;  %v2953_v13 = vld [vmem:[#allocation17_spill] sm:$0xff] }
 0x207   :  { %vm2945_vm2 = vcmp.gt.f32.partialorder %v2416_v38, 0.0  ;;  %vm2946_vm4 = vcmp.gt.f32.partialorder %v2418_v48, 0.0  ;;  %vm2948_vm11 = vcmp.gt.f32.partialorder %v2947_v45, 0.0  ;;  %v1094_v58 = vsel %vm996_vm9, %v2422_v18, %v1045_v24  ;;  %v2951_v24 = vld [vmem:[#allocation15_spill] sm:$0xff]  ;;  %v2952_v18 = vld [vmem:[#allocation16_spill] sm:$0xff] }
 0x208   :  { %v1091_v7 = vsel %vm2945_vm2, %v2416_v38, %v1042_v29  ;;  %v1092_v36 = vsel %vm2946_vm4, %v2418_v48, %v1043_v43  ;;  %v1093_v14 = vsel %vm2948_vm11, %v2947_v45, %v1044_v40  ;;  %v1095_v52 = vsel %vm997_vm7, %v2424_v42, %v1046_v60  ;;  %v2954_v60 = vld [vmem:[#allocation18_spill] sm:$0xff] }
 0x209   :  { %v1096_v38 = vsel %vm998_vm6, %v2426_v56, %v1047_v39  ;;  %v1097_v48 = vsel %vm999_vm5, %v2428_v26, %v1048_v15  ;;  %v1098_v40 = vsel %vm1000_vm10, %v2430_v34, %v1049_v2  ;;  %v1516_v1 = vpack.c.bf16 %v2950_v27, %v2949_v51  ;;  %v2956_v56 = vld [vmem:[#allocation21_spill] sm:$0xff]  ;;  %v2959_v15 = vld [vmem:[#allocation24_spill] sm:$0xff]  ;;  %v2961_v2 = vld [vmem:[#allocation26_spill] sm:$0xff] }
 0x20a   :  { %v1521_v43 = vpack.c.bf16 %v2952_v18, %v2951_v24  ;;  %v1526_v42 = vpack.c.bf16 %v2954_v60, %v2953_v13  ;;  %v1512_v29 = vpack.c.bf16 %v1098_v40, %v1098_v40  ;;  %v1531_v39 = vpack.c.bf16 %v2956_v56, %v2955_v41 }
 0x20b   :  { %v1536_v26 = vpack.c.bf16 %v2958_v3, %v2957_v21  ;;  %v1541_v62 = vpack.c.bf16 %v2960_v9, %v2959_v15  ;;  %1517 = vst [vmem:[%s2843_s4] sm:$0xff] %v1516_v1   ;;  %v1546_v34 = vpack.c.bf16 %v1063_v33, %v2961_v2  ;;  %v1551_v55 = vpack.c.bf16 %v1065_v49, %v1064_v19 }
 0x20c   :  { %1633 = vst [vmem:[%s2843_s4 + $0x8] sm:$0xff] %v1521_v43   ;;  %1634 = vst [vmem:[%s2843_s4 + $0x10] sm:$0xff] %v1526_v42   ;;  %v1556_v23 = vpack.c.bf16 %v1067_v61, %v1066_v10  ;;  %v1561_v31 = vpack.c.bf16 %v1069_v11, %v1068_v53  ;;  %v1566_v63 = vpack.c.bf16 %v1071_v47, %v1070_v28 }
 0x20d   :  { %1635 = vst [vmem:[%s2843_s4 + $0x18] sm:$0xff] %v1531_v39   ;;  %1636 = vst [vmem:[%s2843_s4 + $0x20] sm:$0xff] %v1536_v26   ;;  %v1571_v37 = vpack.c.bf16 %v1073_v5, %v1072_v35  ;;  %v1576_v20 = vpack.c.bf16 %v1075_v25, %v1074_v46  ;;  %v1581_v45 = vpack.c.bf16 %v1077_v54, %v1076_v59 }
 0x20e   :  { %1637 = vst [vmem:[%s2843_s4 + $0x28] sm:$0xff] %v1541_v62   ;;  %1344 = vst [vmem:[%s2843_s4 + $0xc0] sm:$0xf] %v1512_v29  ;;  %v1586_v10 = vpack.c.bf16 %v1079_v8, %v1078_v4  ;;  %v1591_v33 = vpack.c.bf16 %v1081_v22, %v1080_v17  ;;  %v1596_v19 = vpack.c.bf16 %v1083_v16, %v1082_v30 }
 0x20f   :  { %1638 = vst [vmem:[%s2843_s4 + $0x30] sm:$0xff] %v1546_v34   ;;  %1639 = vst [vmem:[%s2843_s4 + $0x38] sm:$0xff] %v1551_v55   ;;  %v1601_v49 = vpack.c.bf16 %v1085_v50, %v1084_v44  ;;  %v1606_v61 = vpack.c.bf16 %v1087_v0, %v1086_v6  ;;  %v1611_v53 = vpack.c.bf16 %v1089_v57, %v1088_v12 }
 0x210   :  { %1640 = vst [vmem:[%s2843_s4 + $0x40] sm:$0xff] %v1556_v23   ;;  %1641 = vst [vmem:[%s2843_s4 + $0x48] sm:$0xff] %v1561_v31   ;;  %v1616_v11 = vpack.c.bf16 %v1091_v7, %v1090_v32  ;;  %v1621_v28 = vpack.c.bf16 %v1093_v14, %v1092_v36  ;;  %v1626_v47 = vpack.c.bf16 %v1095_v52, %v1094_v58 }
 0x211   :  { %1642 = vst [vmem:[%s2843_s4 + $0x50] sm:$0xff] %v1566_v63   ;;  %1643 = vst [vmem:[%s2843_s4 + $0x58] sm:$0xff] %v1571_v37   ;;  %v1631_v35 = vpack.c.bf16 %v1097_v48, %v1096_v38 }
 0x212   :  { %1644 = vst [vmem:[%s2843_s4 + $0x60] sm:$0xff] %v1576_v20   ;;  %1645 = vst [vmem:[%s2843_s4 + $0x68] sm:$0xff] %v1581_v45  }
 0x213   :  { %1646 = vst [vmem:[%s2843_s4 + $0x70] sm:$0xff] %v1586_v10   ;;  %1647 = vst [vmem:[%s2843_s4 + $0x78] sm:$0xff] %v1591_v33  }
 0x214   :  { %1648 = vst [vmem:[%s2843_s4 + $0x80] sm:$0xff] %v1596_v19   ;;  %1649 = vst [vmem:[%s2843_s4 + $0x88] sm:$0xff] %v1601_v49  }
 0x215   :  { %1650 = vst [vmem:[%s2843_s4 + $0x90] sm:$0xff] %v1606_v61   ;;  %1651 = vst [vmem:[%s2843_s4 + $0x98] sm:$0xff] %v1611_v53  }
 0x216   :  { %1652 = vst [vmem:[%s2843_s4 + $0xa0] sm:$0xff] %v1616_v11   ;;  %1653 = vst [vmem:[%s2843_s4 + $0xa8] sm:$0xff] %v1621_v28  }
 0x217   :  { %1654 = vst [vmem:[%s2843_s4 + $0xb0] sm:$0xff] %v1626_v47   ;;  %1655 = vst [vmem:[%s2843_s4 + $0xb8] sm:$0xff] %v1631_v35  }

// kernel: discriminator_forward.5
= control target key start
LH: loop header
LB: loop body
LE: loop exit
PB: predicated region body
PF: predicated region fallthrough
CT: control target
= control target key end

     0   :  { %s5878_s1 = inlined_call_operand.vmem [shape: bf16[2048,256], index: 1, kind: input, shape index: {}]   ;;  %s5879_s0 = inlined_call_operand.vmem [shape: bf16[104,2048], index: 0, kind: input, shape index: {}]   ;;  %s5880_s2 = inlined_call_operand.vmem [shape: f32[1,256], index: 2, kind: input, shape index: {}]   ;;  %s5881_s3 = inlined_call_operand.vmem [shape: f32[1,256], index: 3, kind: input, shape index: {}]   ;;  %s5882_s4 = inlined_call_operand.vmem [shape: bf16[104,256], index: 4, kind: output, shape index: {}]  }
   0x1   :  { %v3991_v0 = vld [vmem:[%s5878_s1 + $0x4] ss:$8 sps:$4 sm:$0xff]   ;;  %v3995_v2 = vld [vmem:[%s5878_s1] ss:$8 sps:$4 sm:$0xff]   ;;  %v3997_v4 = vld [vmem:[%s5878_s1 + $0x14] ss:$8 sps:$4 sm:$0xff]  }
   0x2   :  { %v3993_v1 = vld [vmem:[%s5878_s1 + $0x404] ss:$8 sps:$4 sm:$0xff]   ;;  %2193 = vmatprep.subr.bf16.mxu1 %v3991_v0  ;;  %v3996_v3 = vld [vmem:[%s5878_s1 + $0x400] ss:$8 sps:$4 sm:$0xff]   ;;  %v3999_v5 = vld [vmem:[%s5878_s1 + $0x414] ss:$8 sps:$4 sm:$0xff]  }
   0x3   :  { %2597 = vmatprep.subr.bf16.mxu0 %v3993_v1  ;;  %2194 = vmatpush1.bf16.msra.mxu1 %v3995_v2  ;;  %v4001_v6 = vld [vmem:[%s5878_s1 + $0x10] ss:$8 sps:$4 sm:$0xff]   ;;  %v4003_v8 = vld [vmem:[%s5878_s1 + $0x24] ss:$8 sps:$4 sm:$0xff]   ;;  %v4007_v10 = vld [vmem:[%s5878_s1 + $0x20] ss:$8 sps:$4 sm:$0xff]  }
   0x4   :  { %2598 = vmatpush1.bf16.msra.mxu0 %v3996_v3  ;;  %2195 = vmatprep.subr.bf16.mxu1 %v3997_v4  ;;  %v4002_v7 = vld [vmem:[%s5878_s1 + $0x410] ss:$8 sps:$4 sm:$0xff]   ;;  %v4005_v9 = vld [vmem:[%s5878_s1 + $0x424] ss:$8 sps:$4 sm:$0xff]   ;;  %v4008_v11 = vld [vmem:[%s5878_s1 + $0x420] ss:$8 sps:$4 sm:$0xff]  }
   0x5   :  { %2599 = vmatprep.subr.bf16.mxu0 %v3999_v5  ;;  %v4009_v12 = vld [vmem:[%s5878_s1 + $0x34] ss:$8 sps:$4 sm:$0xff]   ;;  %v4013_v14 = vld [vmem:[%s5878_s1 + $0x30] ss:$8 sps:$4 sm:$0xff]   ;;  %v4015_v16 = vld [vmem:[%s5878_s1 + $0x44] ss:$8 sps:$4 sm:$0xff]  }
   0x6   :  { %v4011_v13 = vld [vmem:[%s5878_s1 + $0x434] ss:$8 sps:$4 sm:$0xff]   ;;  %v4014_v15 = vld [vmem:[%s5878_s1 + $0x430] ss:$8 sps:$4 sm:$0xff]   ;;  %v4017_v17 = vld [vmem:[%s5878_s1 + $0x444] ss:$8 sps:$4 sm:$0xff]  }
   0x7   :  { %2196 = vmatpush1.bf16.msra.mxu1 %v4001_v6  ;;  %v4019_v18 = vld [vmem:[%s5878_s1 + $0x40] ss:$8 sps:$4 sm:$0xff]   ;;  %v4021_v20 = vld [vmem:[%s5878_s1 + $0x54] ss:$8 sps:$4 sm:$0xff]   ;;  %v4025_v22 = vld [vmem:[%s5878_s1 + $0x50] ss:$8 sps:$4 sm:$0xff]  }
   0x8   :  { %2600 = vmatpush1.bf16.msra.mxu0 %v4002_v7  ;;  %2197 = vmatprep.subr.bf16.mxu1 %v4003_v8  ;;  %v4020_v19 = vld [vmem:[%s5878_s1 + $0x440] ss:$8 sps:$4 sm:$0xff]   ;;  %v4023_v21 = vld [vmem:[%s5878_s1 + $0x454] ss:$8 sps:$4 sm:$0xff]   ;;  %v4026_v23 = vld [vmem:[%s5878_s1 + $0x450] ss:$8 sps:$4 sm:$0xff]  }
   0x9   :  { %2601 = vmatprep.subr.bf16.mxu0 %v4005_v9  ;;  %v4027_v24 = vld [vmem:[%s5878_s1 + $0x64] ss:$8 sps:$4 sm:$0xff]   ;;  %v4031_v26 = vld [vmem:[%s5878_s1 + $0x60] ss:$8 sps:$4 sm:$0xff]   ;;  %v4033_v28 = vld [vmem:[%s5878_s1 + $0x74] ss:$8 sps:$4 sm:$0xff]  }
   0xa   :  { %v4029_v25 = vld [vmem:[%s5878_s1 + $0x464] ss:$8 sps:$4 sm:$0xff]   ;;  %v4032_v27 = vld [vmem:[%s5878_s1 + $0x460] ss:$8 sps:$4 sm:$0xff]   ;;  %v4035_v29 = vld [vmem:[%s5878_s1 + $0x474] ss:$8 sps:$4 sm:$0xff]  }
   0xb   :  { %2198 = vmatpush1.bf16.msra.mxu1 %v4007_v10  ;;  %v4037_v30 = vld [vmem:[%s5878_s1 + $0x70] ss:$8 sps:$4 sm:$0xff]   ;;  %v4039_v32 = vld [vmem:[%s5878_s1 + $0x84] ss:$8 sps:$4 sm:$0xff]   ;;  %v4043_v34 = vld [vmem:[%s5878_s1 + $0x80] ss:$8 sps:$4 sm:$0xff]  }
   0xc   :  { %2602 = vmatpush1.bf16.msra.mxu0 %v4008_v11  ;;  %2199 = vmatprep.subr.bf16.mxu1 %v4009_v12  ;;  %v4038_v31 = vld [vmem:[%s5878_s1 + $0x470] ss:$8 sps:$4 sm:$0xff]   ;;  %v4041_v33 = vld [vmem:[%s5878_s1 + $0x484] ss:$8 sps:$4 sm:$0xff]   ;;  %v4044_v35 = vld [vmem:[%s5878_s1 + $0x480] ss:$8 sps:$4 sm:$0xff]  }
   0xd   :  { %2603 = vmatprep.subr.bf16.mxu0 %v4011_v13  ;;  %v4045_v36 = vld [vmem:[%s5878_s1 + $0x94] ss:$8 sps:$4 sm:$0xff]   ;;  %v4049_v38 = vld [vmem:[%s5878_s1 + $0x90] ss:$8 sps:$4 sm:$0xff]   ;;  %v4051_v40 = vld [vmem:[%s5878_s1 + $0xa4] ss:$8 sps:$4 sm:$0xff]  }
   0xe   :  { %v4047_v37 = vld [vmem:[%s5878_s1 + $0x494] ss:$8 sps:$4 sm:$0xff]   ;;  %v4050_v39 = vld [vmem:[%s5878_s1 + $0x490] ss:$8 sps:$4 sm:$0xff]   ;;  %v4053_v41 = vld [vmem:[%s5878_s1 + $0x4a4] ss:$8 sps:$4 sm:$0xff]  }
   0xf   :  { %2200 = vmatpush1.bf16.msra.mxu1 %v4013_v14  ;;  %v4055_v42 = vld [vmem:[%s5878_s1 + $0xa0] ss:$8 sps:$4 sm:$0xff]   ;;  %v4057_v44 = vld [vmem:[%s5878_s1 + $0xb4] ss:$8 sps:$4 sm:$0xff]   ;;  %v4061_v46 = vld [vmem:[%s5878_s1 + $0xb0] ss:$8 sps:$4 sm:$0xff]  }
  0x10   :  { %2604 = vmatpush1.bf16.msra.mxu0 %v4014_v15  ;;  %2201 = vmatprep.subr.bf16.mxu1 %v4015_v16  ;;  %v4056_v43 = vld [vmem:[%s5878_s1 + $0x4a0] ss:$8 sps:$4 sm:$0xff]   ;;  %v4059_v45 = vld [vmem:[%s5878_s1 + $0x4b4] ss:$8 sps:$4 sm:$0xff]   ;;  %v4062_v47 = vld [vmem:[%s5878_s1 + $0x4b0] ss:$8 sps:$4 sm:$0xff]  }
  0x11   :  { %2605 = vmatprep.subr.bf16.mxu0 %v4017_v17  ;;  %v17_v48 = vld [vmem:[%s5879_s0] sm:$0xff]  ;;  %v4069_v58 = vld [vmem:[%s5878_s1 + $0xd4] ss:$8 sps:$4 sm:$0xff]   ;;  %v4073_v60 = vld [vmem:[%s5878_s1 + $0xd0] ss:$8 sps:$4 sm:$0xff]  }
  0x12   :  { %v25_v49 = vld [vmem:[%s5879_s0 + $0x40] sm:$0xff]  ;;  %v4071_v59 = vld [vmem:[%s5878_s1 + $0x4d4] ss:$8 sps:$4 sm:$0xff]   ;;  %v4074_v61 = vld [vmem:[%s5878_s1 + $0x4d0] ss:$8 sps:$4 sm:$0xff]  }
  0x13   :  { %2202 = vmatpush1.bf16.msra.mxu1 %v4019_v18  ;;  %v4063_v50 = vld [vmem:[%s5878_s1 + $0xc4] ss:$8 sps:$4 sm:$0xff]   ;;  %v3403_v52 = vcombine.high %v17_v48, %v25_v49  ;;  %v4067_v56 = vld [vmem:[%s5878_s1 + $0xc0] ss:$8 sps:$4 sm:$0xff]   ;;  %v4081_v2 = vld [vmem:[%s5878_s1 + $0xf4] ss:$8 sps:$4 sm:$0xff]   ;;  %v3402_v11 = vcombine.low %v17_v48, %v25_v49 }
  0x14   :  { %2606 = vmatpush1.bf16.msra.mxu0 %v4020_v19  ;;  %2203 = vmatprep.subr.bf16.mxu1 %v4021_v20  ;;  %v4065_v51 = vld [vmem:[%s5878_s1 + $0x4c4] ss:$8 sps:$4 sm:$0xff]   ;;  %v4068_v57 = vld [vmem:[%s5878_s1 + $0x4c0] ss:$8 sps:$4 sm:$0xff]   ;;  %v4083_v3 = vld [vmem:[%s5878_s1 + $0x4f4] ss:$8 sps:$4 sm:$0xff]  }
  0x15   :  { %2607 = vmatprep.subr.bf16.mxu0 %v4023_v21  ;;  %v21_v53 = vld [vmem:[%s5879_s0 + $0x20] sm:$0xff]  ;;  %2225 = vmatprep.mubr.bf16.mxu1 %v3403_v52  ;;  %v4085_v4 = vld [vmem:[%s5878_s1 + $0xf0] ss:$8 sps:$4 sm:$0xff]   ;;  %v4095_v16 = vld [vmem:[%s5878_s1 + $0x114] ss:$8 sps:$4 sm:$0xff]  }
  0x16   :  { %v29_v54 = vld [vmem:[%s5879_s0 + $0x60] sm:$0xff]  ;;  %v4086_v5 = vld [vmem:[%s5878_s1 + $0x4f0] ss:$8 sps:$4 sm:$0xff]   ;;  %v4098_v17 = vld [vmem:[%s5878_s1 + $0x514] ss:$8 sps:$4 sm:$0xff]  }
  0x17   :  { %2204 = vmatpush1.bf16.msra.mxu1 %v4025_v22  ;;  %v3411_v55 = vcombine.high %v21_v53, %v29_v54  ;;  %v4075_v62 = vld [vmem:[%s5878_s1 + $0xe4] ss:$8 sps:$4 sm:$0xff]   ;;  %v4079_v0 = vld [vmem:[%s5878_s1 + $0xe0] ss:$8 sps:$4 sm:$0xff]   ;;  %v3410_v12 = vcombine.low %v21_v53, %v29_v54  ;;  %v4093_v20 = vld [vmem:[%s5878_s1 + $0x110] ss:$8 sps:$4 sm:$0xff]  }
  0x18   :  { %2608 = vmatpush1.bf16.msra.mxu0 %v4026_v23  ;;  %2205 = vmatprep.subr.bf16.mxu1 %v4027_v24  ;;  %v4077_v63 = vld [vmem:[%s5878_s1 + $0x4e4] ss:$8 sps:$4 sm:$0xff]   ;;  %v4080_v1 = vld [vmem:[%s5878_s1 + $0x4e0] ss:$8 sps:$4 sm:$0xff]   ;;  %v4096_v21 = vld [vmem:[%s5878_s1 + $0x510] ss:$8 sps:$4 sm:$0xff]  }
  0x19   :  { %2609 = vmatprep.subr.bf16.mxu0 %v4029_v25  ;;  %2629 = vmatprep.mubr.bf16.mxu0 %v3411_v55  ;;  %v4089_v6 = vld [vmem:[%s5878_s1 + $0x104] ss:$8 sps:$4 sm:$0xff]   ;;  %v4087_v8 = vld [vmem:[%s5878_s1 + $0x100] ss:$8 sps:$4 sm:$0xff]   ;;  %v4119_v48 = vld [vmem:[%s5878_s1 + $0x154] ss:$8 sps:$4 sm:$0xff]  }
  0x1a   :  { %v4092_v7 = vld [vmem:[%s5878_s1 + $0x504] ss:$8 sps:$4 sm:$0xff]   ;;  %v4090_v9 = vld [vmem:[%s5878_s1 + $0x500] ss:$8 sps:$4 sm:$0xff]   ;;  %v4122_v49 = vld [vmem:[%s5878_s1 + $0x554] ss:$8 sps:$4 sm:$0xff]  }
  0x1b   :  { %2206 = vmatpush1.bf16.msra.mxu1 %v4031_v26  ;;  %v33_v10 = vld [vmem:[%s5879_s0 + $0x80] sm:$0xff]  ;;  %v4117_v52 = vld [vmem:[%s5878_s1 + $0x150] ss:$8 sps:$4 sm:$0xff]  }
  0x1c   :  { %2610 = vmatpush1.bf16.msra.mxu0 %v4032_v27  ;;  %2207 = vmatprep.subr.bf16.mxu1 %v4033_v28  ;;  %v41_v13 = vld [vmem:[%s5879_s0 + $0xc0] sm:$0xff]  ;;  %v4120_v53 = vld [vmem:[%s5878_s1 + $0x550] ss:$8 sps:$4 sm:$0xff]  }
  0x1d   :  { %2611 = vmatprep.subr.bf16.mxu0 %v4035_v29  ;;  %v37_v14 = vld [vmem:[%s5879_s0 + $0xa0] sm:$0xff]  ;;  %v3419_v18 = vcombine.high %v33_v10, %v41_v13  ;;  %v3418_v28 = vcombine.low %v33_v10, %v41_v13 }
  0x1e   :  { %v45_v15 = vld [vmem:[%s5879_s0 + $0xe0] sm:$0xff] }
  0x1f   :  { %2208 = vmatpush1.bf16.msra.mxu1 %v4037_v30  ;;  %v3427_v19 = vcombine.high %v37_v14, %v45_v15  ;;  %v4101_v22 = vld [vmem:[%s5878_s1 + $0x124] ss:$8 sps:$4 sm:$0xff]   ;;  %v4099_v24 = vld [vmem:[%s5878_s1 + $0x120] ss:$8 sps:$4 sm:$0xff]   ;;  %v3426_v29 = vcombine.low %v37_v14, %v45_v15 }
  0x20   :  { %2612 = vmatpush1.bf16.msra.mxu0 %v4038_v31  ;;  %2209 = vmatprep.subr.bf16.mxu1 %v4039_v32  ;;  %v4104_v23 = vld [vmem:[%s5878_s1 + $0x524] ss:$8 sps:$4 sm:$0xff]   ;;  %v4102_v25 = vld [vmem:[%s5878_s1 + $0x520] ss:$8 sps:$4 sm:$0xff]   ;;  %v4107_v32 = vld [vmem:[%s5878_s1 + $0x134] ss:$8 sps:$4 sm:$0xff]  }
  0x21   :  { %2613 = vmatprep.subr.bf16.mxu0 %v4041_v33  ;;  %v49_v26 = vld [vmem:[%s5879_s0 + $0x100] sm:$0xff]  ;;  %v4110_v33 = vld [vmem:[%s5878_s1 + $0x534] ss:$8 sps:$4 sm:$0xff]  }
  0x22   :  { %v57_v27 = vld [vmem:[%s5879_s0 + $0x140] sm:$0xff] }
  0x23   :  { %2210 = vmatpush1.bf16.msra.mxu1 %v4043_v34  ;;  %v53_v30 = vld [vmem:[%s5879_s0 + $0x120] sm:$0xff]  ;;  %v3435_v34 = vcombine.high %v49_v26, %v57_v27 }
  0x24   :  { %2614 = vmatpush1.bf16.msra.mxu0 %v4044_v35  ;;  %2211 = vmatprep.subr.bf16.mxu1 %v4045_v36  ;;  %v61_v31 = vld [vmem:[%s5879_s0 + $0x160] sm:$0xff]  ;;  %v4105_v36 = vld [vmem:[%s5878_s1 + $0x130] ss:$8 sps:$4 sm:$0xff]  }
  0x25   :  { %2615 = vmatprep.subr.bf16.mxu0 %v4047_v37  ;;  %v3443_v35 = vcombine.high %v53_v30, %v61_v31  ;;  %v4108_v37 = vld [vmem:[%s5878_s1 + $0x530] ss:$8 sps:$4 sm:$0xff]   ;;  %v4125_v54 = vld [vmem:[%s5878_s1 + $0x164] ss:$8 sps:$4 sm:$0xff]   ;;  %v4135_v14 = vld [vmem:[%s5878_s1 + $0x180] ss:$8 sps:$4 sm:$0xff]  }
  0x26   :  { %v4128_v55 = vld [vmem:[%s5878_s1 + $0x564] ss:$8 sps:$4 sm:$0xff]   ;;  %v4138_v15 = vld [vmem:[%s5878_s1 + $0x580] ss:$8 sps:$4 sm:$0xff]  }
  0x27   :  { %2212 = vmatpush1.bf16.msra.mxu1 %v4049_v38  ;;  %v4113_v38 = vld [vmem:[%s5878_s1 + $0x144] ss:$8 sps:$4 sm:$0xff]  }
  0x28   :  { %2616 = vmatpush1.bf16.msra.mxu0 %v4050_v39  ;;  %2213 = vmatprep.subr.bf16.mxu1 %v4051_v40  ;;  %v4116_v39 = vld [vmem:[%s5878_s1 + $0x544] ss:$8 sps:$4 sm:$0xff]   ;;  %v4111_v40 = vld [vmem:[%s5878_s1 + $0x140] ss:$8 sps:$4 sm:$0xff]  }
  0x29   :  { %2617 = vmatprep.subr.bf16.mxu0 %v4053_v41  ;;  %v65_v41 = vld [vmem:[%s5879_s0 + $0x180] sm:$0xff] }
  0x2a   :  { %v109_v13 = vld [vmem:[%s5879_s0 + $0x2e0] sm:$0xff] }
  0x2b   :  { %2214 = vmatpush1.bf16.msra.mxu1 %v4055_v42  ;;  %v73_v42 = vld [vmem:[%s5879_s0 + $0x1c0] sm:$0xff] }
  0x2c   :  { %2618 = vmatpush1.bf16.msra.mxu0 %v4056_v43  ;;  %2215 = vmatprep.subr.bf16.mxu1 %v4057_v44  ;;  %v3434_v43 = vcombine.low %v49_v26, %v57_v27  ;;  %v3442_v44 = vcombine.low %v53_v30, %v61_v31  ;;  %v117_v27 = vld [vmem:[%s5879_s0 + $0x320] sm:$0xff]  ;;  %v4155_v30 = vld [vmem:[%s5878_s1 + $0x1b4] ss:$8 sps:$4 sm:$0xff]  }
  0x2d   :  { %2619 = vmatprep.subr.bf16.mxu0 %v4059_v45  ;;  %v69_v45 = vld [vmem:[%s5879_s0 + $0x1a0] sm:$0xff]  ;;  %v4158_v31 = vld [vmem:[%s5878_s1 + $0x5b4] ss:$8 sps:$4 sm:$0xff]  }
  0x2f   :  { %2216 = vmatpush1.bf16.msra.mxu1 %v4061_v46  ;;  %v77_v46 = vld [vmem:[%s5879_s0 + $0x1e0] sm:$0xff] }
  0x30   :  { %2620 = vmatpush1.bf16.msra.mxu0 %v4062_v47  ;;  %2217 = vmatprep.subr.bf16.mxu1 %v4063_v50  ;;  %v4114_v47 = vld [vmem:[%s5878_s1 + $0x540] ss:$8 sps:$4 sm:$0xff]   ;;  %v3451_v50 = vcombine.high %v65_v41, %v73_v42 }
  0x31   :  { %2621 = vmatprep.subr.bf16.mxu0 %v4065_v51  ;;  %v3459_v51 = vcombine.high %v69_v45, %v77_v46 }
  0x33   :  { %2218 = vmatpush1.bf16.msra.mxu1 %v4067_v56  ;;  %v4123_v56 = vld [vmem:[%s5878_s1 + $0x160] ss:$8 sps:$4 sm:$0xff]  }
  0x34   :  { %2622 = vmatpush1.bf16.msra.mxu0 %v4068_v57  ;;  %2219 = vmatprep.subr.bf16.mxu1 %v4069_v58  ;;  %v81_v57 = vld [vmem:[%s5879_s0 + $0x200] sm:$0xff] }
  0x35   :  { %2623 = vmatprep.subr.bf16.mxu0 %v4071_v59  ;;  %v89_v58 = vld [vmem:[%s5879_s0 + $0x240] sm:$0xff]  ;;  %v3450_v59 = vcombine.low %v65_v41, %v73_v42  ;;  %v3506_v42 = vcombine.low %v117_v27, %v117_v27 }
  0x36   :  { %v3466_v10 = vcombine.low %v81_v57, %v89_v58 }
  0x37   :  { %2220 = vmatpush1.bf16.msra.mxu1 %v4073_v60  ;;  %v3458_v60 = vcombine.low %v69_v45, %v77_v46  ;;  %v4162_v45 = vld [vmem:[%s5878_s1 + $0x5c0] ss:$8 sps:$4 sm:$0xff]   ;;  %v4167_v46 = vld [vmem:[%s5878_s1 + $0x1d4] ss:$8 sps:$4 sm:$0xff]  }
  0x38   :  { %2624 = vmatpush1.bf16.msra.mxu0 %v4074_v61  ;;  %2221 = vmatprep.subr.bf16.mxu1 %v4075_v62  ;;  %v85_v61 = vld [vmem:[%s5879_s0 + $0x220] sm:$0xff] }
  0x39   :  { %2625 = vmatprep.subr.bf16.mxu0 %v4077_v63  ;;  %v93_v62 = vld [vmem:[%s5879_s0 + $0x260] sm:$0xff] }
  0x3a   :  { %v4126_v63 = vld [vmem:[%s5878_s1 + $0x560] ss:$8 sps:$4 sm:$0xff]  }
  0x3b   :  { %2222 = vmatpush1.bf16.msra.mxu1 %v4079_v0  ;;  %v4131_v0 = vld [vmem:[%s5878_s1 + $0x174] ss:$8 sps:$4 sm:$0xff]  }
  0x3c   :  { %2626 = vmatpush1.bf16.msra.mxu0 %v4080_v1  ;;  %2223 = vmatprep.subr.bf16.mxu1 %v4081_v2  ;;  %v4134_v1 = vld [vmem:[%s5878_s1 + $0x574] ss:$8 sps:$4 sm:$0xff]   ;;  %v3467_v2 = vcombine.high %v81_v57, %v89_v58  ;;  %v4181_v58 = vld [vmem:[%s5878_s1 + $0x1f0] ss:$8 sps:$4 sm:$0xff]  }
  0x3d   :  { %2627 = vmatprep.subr.bf16.mxu0 %v4083_v3  ;;  %v3475_v3 = vcombine.high %v85_v61, %v93_v62  ;;  %v4186_v57 = vld [vmem:[%s5878_s1 + $0x5f4] ss:$8 sps:$4 sm:$0xff]  }
  0x3f   :  { %2224 = vmatpush1.bf16.msra.mxu1 %v4085_v4  ;;  %v4129_v4 = vld [vmem:[%s5878_s1 + $0x170] ss:$8 sps:$4 sm:$0xff]  }
  0x40   :  { %2628 = vmatpush1.bf16.msra.mxu0 %v4086_v5  ;;  %2294 = vmatprep.subr.bf16.mxu1 %v4089_v6  ;;  %v4132_v5 = vld [vmem:[%s5878_s1 + $0x570] ss:$8 sps:$4 sm:$0xff]   ;;  %v4137_v6 = vld [vmem:[%s5878_s1 + $0x184] ss:$8 sps:$4 sm:$0xff]  }
  0x41   :  { %2698 = vmatprep.subr.bf16.mxu0 %v4092_v7  ;;  %v4140_v7 = vld [vmem:[%s5878_s1 + $0x584] ss:$8 sps:$4 sm:$0xff]  }
  0x42   :  { %2226 = vmatmul.mubr.bf16.vlgmr.msra.gmra.mrb[0].mxu1 %v3402_v11  ;;  %v3474_v11 = vcombine.low %v85_v61, %v93_v62  ;;  %v4192_v61 = vld [vmem:[%s5878_s1 + $0x604] ss:$8 sps:$4 sm:$0xff]  }
  0x43   :  { %2630 = vmatmul.mubr.bf16.vlgmr.msra.gmra.mrb[0].mxu0 %v3410_v12  ;;  %2295 = vmatpush1.bf16.msra.mxu1 %v4087_v8  ;;  %v97_v8 = vld [vmem:[%s5879_s0 + $0x280] sm:$0xff]  ;;  %v34_v62 = vld [vmem:[%s5879_s0 + $0x88] sm:$0xff] }
  0x44   :  { %2699 = vmatpush1.bf16.msra.mxu0 %v4090_v9  ;;  %2296 = vmatprep.subr.bf16.mxu1 %v4095_v16  ;;  %v105_v9 = vld [vmem:[%s5879_s0 + $0x2c0] sm:$0xff]  ;;  %v4143_v16 = vld [vmem:[%s5878_s1 + $0x194] ss:$8 sps:$4 sm:$0xff]  }
  0x45   :  { %2700 = vmatprep.subr.bf16.mxu0 %v4098_v17  ;;  %2235 = vmatprep.mubr.bf16.mxu1 %v3419_v18  ;;  %v101_v12 = vld [vmem:[%s5879_s0 + $0x2a0] sm:$0xff]  ;;  %v4146_v17 = vld [vmem:[%s5878_s1 + $0x594] ss:$8 sps:$4 sm:$0xff]   ;;  %v3483_v18 = vcombine.high %v97_v8, %v105_v9 }
  0x46   :  { %2639 = vmatprep.mubr.bf16.mxu0 %v3427_v19  ;;  %v3491_v19 = vcombine.high %v101_v12, %v109_v13  ;;  %v3490_v26 = vcombine.low %v101_v12, %v109_v13  ;;  %v4201_v12 = vld [vmem:[%s5878_s1 + $0x224] ss:$8 sps:$4 sm:$0xff]  }
  0x47   :  { %2297 = vmatpush1.bf16.msra.mxu1 %v4093_v20  ;;  %v4141_v20 = vld [vmem:[%s5878_s1 + $0x190] ss:$8 sps:$4 sm:$0xff]   ;;  %v4204_v13 = vld [vmem:[%s5878_s1 + $0x624] ss:$8 sps:$4 sm:$0xff]  }
  0x48   :  { %2701 = vmatpush1.bf16.msra.mxu0 %v4096_v21  ;;  %2298 = vmatprep.subr.bf16.mxu1 %v4101_v22  ;;  %v4144_v21 = vld [vmem:[%s5878_s1 + $0x590] ss:$8 sps:$4 sm:$0xff]   ;;  %v4149_v22 = vld [vmem:[%s5878_s1 + $0x1a4] ss:$8 sps:$4 sm:$0xff]  }
  0x49   :  { %2702 = vmatprep.subr.bf16.mxu0 %v4104_v23  ;;  %v4152_v23 = vld [vmem:[%s5878_s1 + $0x5a4] ss:$8 sps:$4 sm:$0xff]  }
  0x4a   :  { %2236 = vmatmul.mubr.bf16.gmra.mrb[4].mxu1 %v3418_v28  ;;  %v4147_v28 = vld [vmem:[%s5878_s1 + $0x1a0] ss:$8 sps:$4 sm:$0xff]  }
  0x4b   :  { %2640 = vmatmul.mubr.bf16.gmra.mrb[4].mxu0 %v3426_v29  ;;  %2299 = vmatpush1.bf16.msra.mxu1 %v4099_v24  ;;  %v113_v24 = vld [vmem:[%s5879_s0 + $0x300] sm:$0xff] }
  0x4c   :  { %2703 = vmatpush1.bf16.msra.mxu0 %v4102_v25  ;;  %2300 = vmatprep.subr.bf16.mxu1 %v4107_v32  ;;  %v3482_v25 = vcombine.low %v97_v8, %v105_v9  ;;  %v4150_v29 = vld [vmem:[%s5878_s1 + $0x5a0] ss:$8 sps:$4 sm:$0xff]   ;;  %v3499_v32 = vcombine.high %v113_v24, %v113_v24  ;;  %v3498_v41 = vcombine.low %v113_v24, %v113_v24 }
  0x4d   :  { %2704 = vmatprep.subr.bf16.mxu0 %v4110_v33  ;;  %2245 = vmatprep.mubr.bf16.mxu1 %v3435_v34  ;;  %v3507_v33 = vcombine.high %v117_v27, %v117_v27  ;;  %v4153_v34 = vld [vmem:[%s5878_s1 + $0x1b0] ss:$8 sps:$4 sm:$0xff]  }
  0x4e   :  { %2649 = vmatprep.mubr.bf16.mxu0 %v3443_v35  ;;  %v4156_v35 = vld [vmem:[%s5878_s1 + $0x5b0] ss:$8 sps:$4 sm:$0xff]  }
  0x4f   :  { %2301 = vmatpush1.bf16.msra.mxu1 %v4105_v36  ;;  %v4161_v36 = vld [vmem:[%s5878_s1 + $0x1c4] ss:$8 sps:$4 sm:$0xff]   ;;  %v4208_v27 = vld [vmem:[%s5878_s1 + $0x630] ss:$8 sps:$4 sm:$0xff]  }
  0x50   :  { %2705 = vmatpush1.bf16.msra.mxu0 %v4108_v37  ;;  %2302 = vmatprep.subr.bf16.mxu1 %v4113_v38  ;;  %v4164_v37 = vld [vmem:[%s5878_s1 + $0x5c4] ss:$8 sps:$4 sm:$0xff]  }
  0x51   :  { %2706 = vmatprep.subr.bf16.mxu0 %v4116_v39  ;;  %v18_v38 = vld [vmem:[%s5879_s0 + $0x8] sm:$0xff] }
  0x52   :  { %2246 = vmatmul.mubr.bf16.gmra.mrb[8].mxu1 %v3434_v43  ;;  %v26_v39 = vld [vmem:[%s5879_s0 + $0x48] sm:$0xff] }
  0x53   :  { %2650 = vmatmul.mubr.bf16.gmra.mrb[8].mxu0 %v3442_v44  ;;  %2303 = vmatpush1.bf16.msra.mxu1 %v4111_v40  ;;  %v22_v40 = vld [vmem:[%s5879_s0 + $0x28] sm:$0xff] }
  0x54   :  { %2707 = vmatpush1.bf16.msra.mxu0 %v4114_v47  ;;  %2304 = vmatprep.subr.bf16.mxu1 %v4119_v48  ;;  %v30_v43 = vld [vmem:[%s5879_s0 + $0x68] sm:$0xff]  ;;  %v4170_v47 = vld [vmem:[%s5878_s1 + $0x5d4] ss:$8 sps:$4 sm:$0xff]   ;;  %v3405_v48 = vcombine.high %v18_v38, %v26_v39 }
  0x55   :  { %2708 = vmatprep.subr.bf16.mxu0 %v4122_v49  ;;  %2255 = vmatprep.mubr.bf16.mxu1 %v3451_v50  ;;  %v4159_v44 = vld [vmem:[%s5878_s1 + $0x1c0] ss:$8 sps:$4 sm:$0xff]   ;;  %v3413_v49 = vcombine.high %v22_v40, %v30_v43  ;;  %v4165_v50 = vld [vmem:[%s5878_s1 + $0x1d0] ss:$8 sps:$4 sm:$0xff]  }
  0x56   :  { %2659 = vmatprep.mubr.bf16.mxu0 %v3459_v51  ;;  %v4168_v51 = vld [vmem:[%s5878_s1 + $0x5d0] ss:$8 sps:$4 sm:$0xff]  }
  0x57   :  { %2305 = vmatpush1.bf16.msra.mxu1 %v4117_v52  ;;  %v4174_v52 = vld [vmem:[%s5878_s1 + $0x1e4] ss:$8 sps:$4 sm:$0xff]  }
  0x58   :  { %2709 = vmatpush1.bf16.msra.mxu0 %v4120_v53  ;;  %2306 = vmatprep.subr.bf16.mxu1 %v4125_v54  ;;  %v4178_v53 = vld [vmem:[%s5878_s1 + $0x5e4] ss:$8 sps:$4 sm:$0xff]   ;;  %v4172_v54 = vld [vmem:[%s5878_s1 + $0x1e0] ss:$8 sps:$4 sm:$0xff]  }
  0x59   :  { %2710 = vmatprep.subr.bf16.mxu0 %v4128_v55  ;;  %v4176_v55 = vld [vmem:[%s5878_s1 + $0x5e0] ss:$8 sps:$4 sm:$0xff]  }
  0x5a   :  { %2256 = vmatmul.mubr.bf16.gmra.mrb[12].mxu1 %v3450_v59  ;;  %v4184_v59 = vld [vmem:[%s5878_s1 + $0x5f0] ss:$8 sps:$4 sm:$0xff]  }
  0x5b   :  { %2660 = vmatmul.mubr.bf16.gmra.mrb[12].mxu0 %v3458_v60  ;;  %2307 = vmatpush1.bf16.msra.mxu1 %v4123_v56  ;;  %v4183_v56 = vld [vmem:[%s5878_s1 + $0x1f4] ss:$8 sps:$4 sm:$0xff]   ;;  %v4189_v60 = vld [vmem:[%s5878_s1 + $0x204] ss:$8 sps:$4 sm:$0xff]  }
  0x5c   :  { %2711 = vmatpush1.bf16.msra.mxu0 %v4126_v63  ;;  %2308 = vmatprep.subr.bf16.mxu1 %v4131_v0  ;;  %v42_v63 = vld [vmem:[%s5879_s0 + $0xc8] sm:$0xff]  ;;  %v3404_v0 = vcombine.low %v18_v38, %v26_v39  ;;  %v4219_v38 = vld [vmem:[%s5878_s1 + $0x254] ss:$8 sps:$4 sm:$0xff]  }
  0x5d   :  { %2712 = vmatprep.subr.bf16.mxu0 %v4134_v1  ;;  %2265 = vmatprep.mubr.bf16.mxu1 %v3467_v2  ;;  %v3412_v1 = vcombine.low %v22_v40, %v30_v43  ;;  %v38_v2 = vld [vmem:[%s5879_s0 + $0xa8] sm:$0xff]  ;;  %v3421_v8 = vcombine.high %v34_v62, %v42_v63  ;;  %v4222_v39 = vld [vmem:[%s5878_s1 + $0x654] ss:$8 sps:$4 sm:$0xff]   ;;  %v4220_v43 = vld [vmem:[%s5878_s1 + $0x650] ss:$8 sps:$4 sm:$0xff]  }
  0x5e   :  { %2669 = vmatprep.mubr.bf16.mxu0 %v3475_v3  ;;  %v46_v3 = vld [vmem:[%s5879_s0 + $0xe8] sm:$0xff] }
  0x5f   :  { %2309 = vmatpush1.bf16.msra.mxu1 %v4129_v4  ;;  %v4187_v4 = vld [vmem:[%s5878_s1 + $0x200] ss:$8 sps:$4 sm:$0xff]   ;;  %v3429_v9 = vcombine.high %v38_v2, %v46_v3 }
  0x60   :  { %2713 = vmatpush1.bf16.msra.mxu0 %v4132_v5  ;;  %2310 = vmatprep.subr.bf16.mxu1 %v4137_v6  ;;  %v4190_v5 = vld [vmem:[%s5878_s1 + $0x600] ss:$8 sps:$4 sm:$0xff]   ;;  %v4195_v6 = vld [vmem:[%s5878_s1 + $0x214] ss:$8 sps:$4 sm:$0xff]  }
  0x61   :  { %2714 = vmatprep.subr.bf16.mxu0 %v4140_v7  ;;  %v4198_v7 = vld [vmem:[%s5878_s1 + $0x614] ss:$8 sps:$4 sm:$0xff]  }
  0x62   :  { %2266 = vmatmul.mubr.bf16.gmra.mrb[16].mxu1 %v3466_v10  ;;  %v4193_v10 = vld [vmem:[%s5878_s1 + $0x210] ss:$8 sps:$4 sm:$0xff]  }
  0x63   :  { %2670 = vmatmul.mubr.bf16.gmra.mrb[16].mxu0 %v3474_v11  ;;  %2311 = vmatpush1.bf16.msra.mxu1 %v4135_v14  ;;  %v4196_v11 = vld [vmem:[%s5878_s1 + $0x610] ss:$8 sps:$4 sm:$0xff]   ;;  %v50_v14 = vld [vmem:[%s5879_s0 + $0x108] sm:$0xff] }
  0x64   :  { %2715 = vmatpush1.bf16.msra.mxu0 %v4138_v15  ;;  %2312 = vmatprep.subr.bf16.mxu1 %v4143_v16  ;;  %v58_v15 = vld [vmem:[%s5879_s0 + $0x148] sm:$0xff] }
  0x65   :  { %2716 = vmatprep.subr.bf16.mxu0 %v4146_v17  ;;  %2275 = vmatprep.mubr.bf16.mxu1 %v3483_v18  ;;  %v54_v16 = vld [vmem:[%s5879_s0 + $0x128] sm:$0xff]  ;;  %v3420_v17 = vcombine.low %v34_v62, %v42_v63  ;;  %v3428_v18 = vcombine.low %v38_v2, %v46_v3  ;;  %v3437_v24 = vcombine.high %v50_v14, %v58_v15 }
  0x66   :  { %2679 = vmatprep.mubr.bf16.mxu0 %v3491_v19  ;;  %v62_v19 = vld [vmem:[%s5879_s0 + $0x168] sm:$0xff] }
  0x67   :  { %2313 = vmatpush1.bf16.msra.mxu1 %v4141_v20  ;;  %v4199_v20 = vld [vmem:[%s5878_s1 + $0x220] ss:$8 sps:$4 sm:$0xff]  }
  0x68   :  { %2717 = vmatpush1.bf16.msra.mxu0 %v4144_v21  ;;  %2314 = vmatprep.subr.bf16.mxu1 %v4149_v22  ;;  %v4202_v21 = vld [vmem:[%s5878_s1 + $0x620] ss:$8 sps:$4 sm:$0xff]   ;;  %v4207_v22 = vld [vmem:[%s5878_s1 + $0x234] ss:$8 sps:$4 sm:$0xff]  }
  0x69   :  { %2718 = vmatprep.subr.bf16.mxu0 %v4152_v23  ;;  %v4210_v23 = vld [vmem:[%s5878_s1 + $0x634] ss:$8 sps:$4 sm:$0xff]   ;;  %v4235_v62 = vld [vmem:[%s5878_s1 + $0x280] ss:$8 sps:$4 sm:$0xff]  }
  0x6a   :  { %2276 = vmatmul.mubr.bf16.gmra.mrb[20].mxu1 %v3482_v25  ;;  %v3445_v25 = vcombine.high %v54_v16, %v62_v19  ;;  %v4238_v63 = vld [vmem:[%s5878_s1 + $0x680] ss:$8 sps:$4 sm:$0xff]  }
  0x6b   :  { %2680 = vmatmul.mubr.bf16.gmra.mrb[20].mxu0 %v3490_v26  ;;  %2315 = vmatpush1.bf16.msra.mxu1 %v4147_v28  ;;  %v4205_v26 = vld [vmem:[%s5878_s1 + $0x230] ss:$8 sps:$4 sm:$0xff]   ;;  %v4213_v28 = vld [vmem:[%s5878_s1 + $0x244] ss:$8 sps:$4 sm:$0xff]  }
  0x6c   :  { %2719 = vmatpush1.bf16.msra.mxu0 %v4150_v29  ;;  %2316 = vmatprep.subr.bf16.mxu1 %v4155_v30  ;;  %v4216_v29 = vld [vmem:[%s5878_s1 + $0x644] ss:$8 sps:$4 sm:$0xff]   ;;  %v4211_v30 = vld [vmem:[%s5878_s1 + $0x240] ss:$8 sps:$4 sm:$0xff]  }
  0x6d   :  { %2720 = vmatprep.subr.bf16.mxu0 %v4158_v31  ;;  %2285 = vmatprep.mubr.bf16.mxu1 %v3499_v32  ;;  %v66_v31 = vld [vmem:[%s5879_s0 + $0x188] sm:$0xff] }
  0x6e   :  { %2689 = vmatprep.mubr.bf16.mxu0 %v3507_v33  ;;  %v74_v32 = vld [vmem:[%s5879_s0 + $0x1c8] sm:$0xff]  ;;  %v3436_v33 = vcombine.low %v50_v14, %v58_v15 }
  0x6f   :  { %2317 = vmatpush1.bf16.msra.mxu1 %v4153_v34  ;;  %v3444_v34 = vcombine.low %v54_v16, %v62_v19  ;;  %v3453_v40 = vcombine.high %v66_v31, %v74_v32  ;;  %v4247_v14 = vld [vmem:[%s5878_s1 + $0x2a0] ss:$8 sps:$4 sm:$0xff]  }
  0x70   :  { %2721 = vmatpush1.bf16.msra.mxu0 %v4156_v35  ;;  %2318 = vmatprep.subr.bf16.mxu1 %v4161_v36  ;;  %v70_v35 = vld [vmem:[%s5879_s0 + $0x1a8] sm:$0xff] }
  0x71   :  { %2722 = vmatprep.subr.bf16.mxu0 %v4164_v37  ;;  %v78_v36 = vld [vmem:[%s5879_s0 + $0x1e8] sm:$0xff] }
  0x72   :  { %2286 = vmatmul.mubr.bf16.gmra.mrb[24].mxu1 %v3498_v41  ;;  %v4214_v37 = vld [vmem:[%s5878_s1 + $0x640] ss:$8 sps:$4 sm:$0xff]   ;;  %v3461_v41 = vcombine.high %v70_v35, %v78_v36 }
  0x73   :  { %2690 = vmatmul.mubr.bf16.gmra.mrb[24].mxu0 %v3506_v42  ;;  %2319 = vmatpush1.bf16.msra.mxu1 %v4159_v44  ;;  %v4217_v42 = vld [vmem:[%s5878_s1 + $0x250] ss:$8 sps:$4 sm:$0xff]   ;;  %v4225_v44 = vld [vmem:[%s5878_s1 + $0x264] ss:$8 sps:$4 sm:$0xff]   ;;  %v4250_v15 = vld [vmem:[%s5878_s1 + $0x6a0] ss:$8 sps:$4 sm:$0xff]  }
  0x74   :  { %2723 = vmatpush1.bf16.msra.mxu0 %v4162_v45  ;;  %2320 = vmatprep.subr.bf16.mxu1 %v4167_v46  ;;  %v4228_v45 = vld [vmem:[%s5878_s1 + $0x664] ss:$8 sps:$4 sm:$0xff]   ;;  %v4223_v46 = vld [vmem:[%s5878_s1 + $0x260] ss:$8 sps:$4 sm:$0xff]  }
  0x75   :  { %2724 = vmatprep.subr.bf16.mxu0 %v4170_v47  ;;  %2326 = vmatprep.mubr.bf16.mxu1 %v3405_v48  ;;  %v4226_v47 = vld [vmem:[%s5878_s1 + $0x660] ss:$8 sps:$4 sm:$0xff]  }
  0x76   :  { %2730 = vmatprep.mubr.bf16.mxu0 %v3413_v49  ;;  %v82_v48 = vld [vmem:[%s5879_s0 + $0x208] sm:$0xff] }
  0x77   :  { %2321 = vmatpush1.bf16.msra.mxu1 %v4165_v50  ;;  %v90_v49 = vld [vmem:[%s5879_s0 + $0x248] sm:$0xff]  ;;  %v3452_v50 = vcombine.low %v66_v31, %v74_v32 }
  0x78   :  { %2725 = vmatpush1.bf16.msra.mxu0 %v4168_v51  ;;  %2322 = vmatprep.subr.bf16.mxu1 %v4174_v52  ;;  %v3460_v51 = vcombine.low %v70_v35, %v78_v36  ;;  %v86_v52 = vld [vmem:[%s5879_s0 + $0x228] sm:$0xff]  ;;  %v3468_v2 = vcombine.low %v82_v48, %v90_v49  ;;  %v4267_v36 = vld [vmem:[%s5878_s1 + $0x2d4] ss:$8 sps:$4 sm:$0xff]  }
  0x79   :  { %2726 = vmatprep.subr.bf16.mxu0 %v4178_v53  ;;  %v94_v53 = vld [vmem:[%s5879_s0 + $0x268] sm:$0xff] }
  0x7a   :  { %v3476_v3 = vcombine.low %v86_v52, %v94_v53  ;;  %v118_v19 = vld [vmem:[%s5879_s0 + $0x328] sm:$0xff] }
  0x7b   :  { %2323 = vmatpush1.bf16.msra.mxu1 %v4172_v54  ;;  %v4231_v54 = vld [vmem:[%s5878_s1 + $0x274] ss:$8 sps:$4 sm:$0xff]   ;;  %v3508_v32 = vcombine.low %v118_v19, %v118_v19  ;;  %v4262_v35 = vld [vmem:[%s5878_s1 + $0x6c0] ss:$8 sps:$4 sm:$0xff]  }
  0x7c   :  { %2727 = vmatpush1.bf16.msra.mxu0 %v4176_v55  ;;  %2324 = vmatprep.subr.bf16.mxu1 %v4183_v56  ;;  %v4234_v55 = vld [vmem:[%s5878_s1 + $0x674] ss:$8 sps:$4 sm:$0xff]   ;;  %v3469_v56 = vcombine.high %v82_v48, %v90_v49  ;;  %v4281_v48 = vld [vmem:[%s5878_s1 + $0x2f0] ss:$8 sps:$4 sm:$0xff]  }
  0x7d   :  { %2728 = vmatprep.subr.bf16.mxu0 %v4186_v57  ;;  %v3477_v57 = vcombine.high %v86_v52, %v94_v53  ;;  %v4284_v49 = vld [vmem:[%s5878_s1 + $0x6f0] ss:$8 sps:$4 sm:$0xff]  }
  0x7e   :  { %v35_v52 = vld [vmem:[%s5879_s0 + $0x90] sm:$0xff] }
  0x7f   :  { %2325 = vmatpush1.bf16.msra.mxu1 %v4181_v58  ;;  %v4229_v58 = vld [vmem:[%s5878_s1 + $0x270] ss:$8 sps:$4 sm:$0xff]  }
  0x80   :  { %2729 = vmatpush1.bf16.msra.mxu0 %v4184_v59  ;;  %2395 = vmatprep.subr.bf16.mxu1 %v4189_v60  ;;  %v4232_v59 = vld [vmem:[%s5878_s1 + $0x670] ss:$8 sps:$4 sm:$0xff]   ;;  %v4237_v60 = vld [vmem:[%s5878_s1 + $0x284] ss:$8 sps:$4 sm:$0xff]  }
  0x81   :  { %2799 = vmatprep.subr.bf16.mxu0 %v4192_v61  ;;  %v4240_v61 = vld [vmem:[%s5878_s1 + $0x684] ss:$8 sps:$4 sm:$0xff]   ;;  %v43_v53 = vld [vmem:[%s5879_s0 + $0xd0] sm:$0xff] }
  0x82   :  { %2327 = vmatmul.mubr.bf16.vlgmr.msra.gmra.mrb[0].mxu1 %v3404_v0  ;;  %v98_v0 = vld [vmem:[%s5879_s0 + $0x288] sm:$0xff] }
  0x83   :  { %2731 = vmatmul.mubr.bf16.vlgmr.msra.gmra.mrb[0].mxu0 %v3412_v1  ;;  %2396 = vmatpush1.bf16.msra.mxu1 %v4187_v4  ;;  %v106_v1 = vld [vmem:[%s5879_s0 + $0x2c8] sm:$0xff] }
  0x84   :  { %2800 = vmatpush1.bf16.msra.mxu0 %v4190_v5  ;;  %2397 = vmatprep.subr.bf16.mxu1 %v4195_v6  ;;  %v102_v4 = vld [vmem:[%s5879_s0 + $0x2a8] sm:$0xff]  ;;  %v4243_v6 = vld [vmem:[%s5878_s1 + $0x294] ss:$8 sps:$4 sm:$0xff]   ;;  %v3484_v16 = vcombine.low %v98_v0, %v106_v1 }
  0x85   :  { %2801 = vmatprep.subr.bf16.mxu0 %v4198_v7  ;;  %2336 = vmatprep.mubr.bf16.mxu1 %v3421_v8  ;;  %v110_v5 = vld [vmem:[%s5879_s0 + $0x2e8] sm:$0xff]  ;;  %v4246_v7 = vld [vmem:[%s5878_s1 + $0x694] ss:$8 sps:$4 sm:$0xff]   ;;  %v3485_v8 = vcombine.high %v98_v0, %v106_v1  ;;  %v4293_v0 = vld [vmem:[%s5878_s1 + $0x310] ss:$8 sps:$4 sm:$0xff]  }
  0x86   :  { %2740 = vmatprep.mubr.bf16.mxu0 %v3429_v9  ;;  %v3493_v9 = vcombine.high %v102_v4, %v110_v5  ;;  %v4296_v1 = vld [vmem:[%s5878_s1 + $0x710] ss:$8 sps:$4 sm:$0xff]  }
  0x87   :  { %2398 = vmatpush1.bf16.msra.mxu1 %v4193_v10  ;;  %v4241_v10 = vld [vmem:[%s5878_s1 + $0x290] ss:$8 sps:$4 sm:$0xff]  }
  0x88   :  { %2802 = vmatpush1.bf16.msra.mxu0 %v4196_v11  ;;  %2399 = vmatprep.subr.bf16.mxu1 %v4201_v12  ;;  %v4244_v11 = vld [vmem:[%s5878_s1 + $0x690] ss:$8 sps:$4 sm:$0xff]   ;;  %v4249_v12 = vld [vmem:[%s5878_s1 + $0x2a4] ss:$8 sps:$4 sm:$0xff]  }
  0x89   :  { %2803 = vmatprep.subr.bf16.mxu0 %v4204_v13  ;;  %v4252_v13 = vld [vmem:[%s5878_s1 + $0x6a4] ss:$8 sps:$4 sm:$0xff]  }
  0x8a   :  { %2337 = vmatmul.mubr.bf16.gmra.mrb[4].mxu1 %v3420_v17  ;;  %v3492_v17 = vcombine.low %v102_v4, %v110_v5  ;;  %v51_v4 = vld [vmem:[%s5879_s0 + $0x110] sm:$0xff]  ;;  %v3422_v5 = vcombine.low %v35_v52, %v43_v53 }
  0x8b   :  { %2741 = vmatmul.mubr.bf16.gmra.mrb[4].mxu0 %v3428_v18  ;;  %2400 = vmatpush1.bf16.msra.mxu1 %v4199_v20  ;;  %v114_v18 = vld [vmem:[%s5879_s0 + $0x308] sm:$0xff]  ;;  %v4255_v20 = vld [vmem:[%s5878_s1 + $0x2b4] ss:$8 sps:$4 sm:$0xff]  }
  0x8c   :  { %2804 = vmatpush1.bf16.msra.mxu0 %v4202_v21  ;;  %2401 = vmatprep.subr.bf16.mxu1 %v4207_v22  ;;  %v4258_v21 = vld [vmem:[%s5878_s1 + $0x6b4] ss:$8 sps:$4 sm:$0xff]   ;;  %v3501_v22 = vcombine.high %v114_v18, %v114_v18  ;;  %v3500_v31 = vcombine.low %v114_v18, %v114_v18  ;;  %v4313_v18 = vld [vmem:[%s5878_s1 + $0x344] ss:$8 sps:$4 sm:$0xff]  }
  0x8d   :  { %2805 = vmatprep.subr.bf16.mxu0 %v4210_v23  ;;  %2346 = vmatprep.mubr.bf16.mxu1 %v3437_v24  ;;  %v3509_v23 = vcombine.high %v118_v19, %v118_v19  ;;  %v4253_v24 = vld [vmem:[%s5878_s1 + $0x2b0] ss:$8 sps:$4 sm:$0xff]   ;;  %v4316_v19 = vld [vmem:[%s5878_s1 + $0x744] ss:$8 sps:$4 sm:$0xff]  }
  0x8e   :  { %2750 = vmatprep.mubr.bf16.mxu0 %v3445_v25  ;;  %v4256_v25 = vld [vmem:[%s5878_s1 + $0x6b0] ss:$8 sps:$4 sm:$0xff]  }
  0x8f   :  { %2402 = vmatpush1.bf16.msra.mxu1 %v4205_v26  ;;  %v4261_v26 = vld [vmem:[%s5878_s1 + $0x2c4] ss:$8 sps:$4 sm:$0xff]  }
  0x90   :  { %2806 = vmatpush1.bf16.msra.mxu0 %v4208_v27  ;;  %2403 = vmatprep.subr.bf16.mxu1 %v4213_v28  ;;  %v4264_v27 = vld [vmem:[%s5878_s1 + $0x6c4] ss:$8 sps:$4 sm:$0xff]   ;;  %v4259_v28 = vld [vmem:[%s5878_s1 + $0x2c0] ss:$8 sps:$4 sm:$0xff]  }
  0x91   :  { %2807 = vmatprep.subr.bf16.mxu0 %v4216_v29  ;;  %v19_v29 = vld [vmem:[%s5879_s0 + $0x10] sm:$0xff] }
  0x92   :  { %2347 = vmatmul.mubr.bf16.gmra.mrb[8].mxu1 %v3436_v33  ;;  %v23_v33 = vld [vmem:[%s5879_s0 + $0x30] sm:$0xff] }
  0x93   :  { %2751 = vmatmul.mubr.bf16.gmra.mrb[8].mxu0 %v3444_v34  ;;  %2404 = vmatpush1.bf16.msra.mxu1 %v4211_v30  ;;  %v27_v30 = vld [vmem:[%s5879_s0 + $0x50] sm:$0xff] }
  0x94   :  { %2808 = vmatpush1.bf16.msra.mxu0 %v4214_v37  ;;  %2405 = vmatprep.subr.bf16.mxu1 %v4219_v38  ;;  %v31_v34 = vld [vmem:[%s5879_s0 + $0x70] sm:$0xff]  ;;  %v3407_v38 = vcombine.high %v19_v29, %v27_v30 }
  0x95   :  { %2809 = vmatprep.subr.bf16.mxu0 %v4222_v39  ;;  %2356 = vmatprep.mubr.bf16.mxu1 %v3453_v40  ;;  %v4270_v37 = vld [vmem:[%s5878_s1 + $0x6d4] ss:$8 sps:$4 sm:$0xff]   ;;  %v3415_v39 = vcombine.high %v23_v33, %v31_v34  ;;  %v4265_v40 = vld [vmem:[%s5878_s1 + $0x2d0] ss:$8 sps:$4 sm:$0xff]  }
  0x96   :  { %2760 = vmatprep.mubr.bf16.mxu0 %v3461_v41  ;;  %v4268_v41 = vld [vmem:[%s5878_s1 + $0x6d0] ss:$8 sps:$4 sm:$0xff]  }
  0x97   :  { %2406 = vmatpush1.bf16.msra.mxu1 %v4217_v42  ;;  %v4274_v42 = vld [vmem:[%s5878_s1 + $0x2e4] ss:$8 sps:$4 sm:$0xff]  }
  0x98   :  { %2810 = vmatpush1.bf16.msra.mxu0 %v4220_v43  ;;  %2407 = vmatprep.subr.bf16.mxu1 %v4225_v44  ;;  %v4278_v43 = vld [vmem:[%s5878_s1 + $0x6e4] ss:$8 sps:$4 sm:$0xff]   ;;  %v4272_v44 = vld [vmem:[%s5878_s1 + $0x2e0] ss:$8 sps:$4 sm:$0xff]  }
  0x99   :  { %2811 = vmatprep.subr.bf16.mxu0 %v4228_v45  ;;  %v4276_v45 = vld [vmem:[%s5878_s1 + $0x6e0] ss:$8 sps:$4 sm:$0xff]  }
  0x9a   :  { %2357 = vmatmul.mubr.bf16.gmra.mrb[12].mxu1 %v3452_v50  ;;  %v4289_v50 = vld [vmem:[%s5878_s1 + $0x304] ss:$8 sps:$4 sm:$0xff]  }
  0x9b   :  { %2761 = vmatmul.mubr.bf16.gmra.mrb[12].mxu0 %v3460_v51  ;;  %2408 = vmatpush1.bf16.msra.mxu1 %v4223_v46  ;;  %v4283_v46 = vld [vmem:[%s5878_s1 + $0x2f4] ss:$8 sps:$4 sm:$0xff]   ;;  %v4292_v51 = vld [vmem:[%s5878_s1 + $0x704] ss:$8 sps:$4 sm:$0xff]  }
  0x9c   :  { %2812 = vmatpush1.bf16.msra.mxu0 %v4226_v47  ;;  %2409 = vmatprep.subr.bf16.mxu1 %v4231_v54  ;;  %v4286_v47 = vld [vmem:[%s5878_s1 + $0x6f4] ss:$8 sps:$4 sm:$0xff]  }
  0x9d   :  { %2813 = vmatprep.subr.bf16.mxu0 %v4234_v55  ;;  %2366 = vmatprep.mubr.bf16.mxu1 %v3469_v56  ;;  %v39_v54 = vld [vmem:[%s5879_s0 + $0xb0] sm:$0xff]  ;;  %v3406_v55 = vcombine.low %v19_v29, %v27_v30  ;;  %v3414_v56 = vcombine.low %v23_v33, %v31_v34  ;;  %v4325_v34 = vld [vmem:[%s5878_s1 + $0x364] ss:$8 sps:$4 sm:$0xff]  }
  0x9e   :  { %2770 = vmatprep.mubr.bf16.mxu0 %v3477_v57  ;;  %v47_v57 = vld [vmem:[%s5879_s0 + $0xf0] sm:$0xff] }
  0x9f   :  { %2410 = vmatpush1.bf16.msra.mxu1 %v4229_v58  ;;  %v4287_v58 = vld [vmem:[%s5878_s1 + $0x300] ss:$8 sps:$4 sm:$0xff]   ;;  %v4322_v29 = vld [vmem:[%s5878_s1 + $0x754] ss:$8 sps:$4 sm:$0xff]   ;;  %v4320_v33 = vld [vmem:[%s5878_s1 + $0x750] ss:$8 sps:$4 sm:$0xff]  }
  0xa0   :  { %2814 = vmatpush1.bf16.msra.mxu0 %v4232_v59  ;;  %2411 = vmatprep.subr.bf16.mxu1 %v4237_v60  ;;  %v4290_v59 = vld [vmem:[%s5878_s1 + $0x700] ss:$8 sps:$4 sm:$0xff]   ;;  %v4295_v60 = vld [vmem:[%s5878_s1 + $0x314] ss:$8 sps:$4 sm:$0xff]  }
  0xa1   :  { %2815 = vmatprep.subr.bf16.mxu0 %v4240_v61  ;;  %v4298_v61 = vld [vmem:[%s5878_s1 + $0x714] ss:$8 sps:$4 sm:$0xff]  }
  0xa2   :  { %2367 = vmatmul.mubr.bf16.gmra.mrb[16].mxu1 %v3468_v2  ;;  %v4301_v2 = vld [vmem:[%s5878_s1 + $0x324] ss:$8 sps:$4 sm:$0xff]  }
  0xa3   :  { %2771 = vmatmul.mubr.bf16.gmra.mrb[16].mxu0 %v3476_v3  ;;  %2412 = vmatpush1.bf16.msra.mxu1 %v4235_v62  ;;  %v3423_v62 = vcombine.high %v35_v52, %v43_v53  ;;  %v4304_v3 = vld [vmem:[%s5878_s1 + $0x724] ss:$8 sps:$4 sm:$0xff]   ;;  %v99_v52 = vld [vmem:[%s5879_s0 + $0x290] sm:$0xff] }
  0xa4   :  { %2816 = vmatpush1.bf16.msra.mxu0 %v4238_v63  ;;  %2413 = vmatprep.subr.bf16.mxu1 %v4243_v6  ;;  %v3431_v63 = vcombine.high %v39_v54, %v47_v57  ;;  %v3430_v6 = vcombine.low %v39_v54, %v47_v57  ;;  %v111_v57 = vld [vmem:[%s5879_s0 + $0x2f0] sm:$0xff] }
  0xa5   :  { %2817 = vmatprep.subr.bf16.mxu0 %v4246_v7  ;;  %2376 = vmatprep.mubr.bf16.mxu1 %v3485_v8  ;;  %v59_v7 = vld [vmem:[%s5879_s0 + $0x150] sm:$0xff] }
  0xa6   :  { %2780 = vmatprep.mubr.bf16.mxu0 %v3493_v9  ;;  %v55_v8 = vld [vmem:[%s5879_s0 + $0x130] sm:$0xff] }
  0xa7   :  { %2414 = vmatpush1.bf16.msra.mxu1 %v4241_v10  ;;  %v63_v9 = vld [vmem:[%s5879_s0 + $0x170] sm:$0xff]  ;;  %v4299_v10 = vld [vmem:[%s5878_s1 + $0x320] ss:$8 sps:$4 sm:$0xff]  }
  0xa8   :  { %2818 = vmatpush1.bf16.msra.mxu0 %v4244_v11  ;;  %2415 = vmatprep.subr.bf16.mxu1 %v4249_v12  ;;  %v4302_v11 = vld [vmem:[%s5878_s1 + $0x720] ss:$8 sps:$4 sm:$0xff]   ;;  %v4307_v12 = vld [vmem:[%s5878_s1 + $0x334] ss:$8 sps:$4 sm:$0xff]  }
  0xa9   :  { %2819 = vmatprep.subr.bf16.mxu0 %v4252_v13  ;;  %v4310_v13 = vld [vmem:[%s5878_s1 + $0x734] ss:$8 sps:$4 sm:$0xff]  }
  0xaa   :  { %2377 = vmatmul.mubr.bf16.gmra.mrb[20].mxu1 %v3484_v16  ;;  %v4305_v16 = vld [vmem:[%s5878_s1 + $0x330] ss:$8 sps:$4 sm:$0xff]  }
  0xab   :  { %2781 = vmatmul.mubr.bf16.gmra.mrb[20].mxu0 %v3492_v17  ;;  %2416 = vmatpush1.bf16.msra.mxu1 %v4247_v14  ;;  %v3439_v14 = vcombine.high %v51_v4, %v59_v7  ;;  %v4308_v17 = vld [vmem:[%s5878_s1 + $0x730] ss:$8 sps:$4 sm:$0xff]  }
  0xac   :  { %2820 = vmatpush1.bf16.msra.mxu0 %v4250_v15  ;;  %2417 = vmatprep.subr.bf16.mxu1 %v4255_v20  ;;  %v3447_v15 = vcombine.high %v55_v8, %v63_v9  ;;  %v67_v20 = vld [vmem:[%s5879_s0 + $0x190] sm:$0xff] }
  0xad   :  { %2821 = vmatprep.subr.bf16.mxu0 %v4258_v21  ;;  %2386 = vmatprep.mubr.bf16.mxu1 %v3501_v22  ;;  %v3438_v21 = vcombine.low %v51_v4, %v59_v7  ;;  %v3446_v22 = vcombine.low %v55_v8, %v63_v9  ;;  %v119_v7 = vld [vmem:[%s5879_s0 + $0x330] sm:$0xff]  ;;  %v4347_v8 = vld [vmem:[%s5878_s1 + $0x3a0] ss:$8 sps:$4 sm:$0xff]  }
  0xae   :  { %2790 = vmatprep.mubr.bf16.mxu0 %v3509_v23  ;;  %v75_v23 = vld [vmem:[%s5879_s0 + $0x1d0] sm:$0xff]  ;;  %v4350_v9 = vld [vmem:[%s5878_s1 + $0x7a0] ss:$8 sps:$4 sm:$0xff]  }
  0xaf   :  { %2418 = vmatpush1.bf16.msra.mxu1 %v4253_v24  ;;  %v71_v24 = vld [vmem:[%s5879_s0 + $0x1b0] sm:$0xff]  ;;  %v3455_v30 = vcombine.high %v67_v20, %v75_v23 }
  0xb0   :  { %2822 = vmatpush1.bf16.msra.mxu0 %v4256_v25  ;;  %2419 = vmatprep.subr.bf16.mxu1 %v4261_v26  ;;  %v79_v25 = vld [vmem:[%s5879_s0 + $0x1f0] sm:$0xff]  ;;  %v4311_v26 = vld [vmem:[%s5878_s1 + $0x340] ss:$8 sps:$4 sm:$0xff]  }
  0xb1   :  { %2823 = vmatprep.subr.bf16.mxu0 %v4264_v27  ;;  %v4314_v27 = vld [vmem:[%s5878_s1 + $0x740] ss:$8 sps:$4 sm:$0xff]  }
  0xb2   :  { %2387 = vmatmul.mubr.bf16.gmra.mrb[24].mxu1 %v3500_v31  ;;  %v3463_v31 = vcombine.high %v71_v24, %v79_v25 }
  0xb3   :  { %2791 = vmatmul.mubr.bf16.gmra.mrb[24].mxu0 %v3508_v32  ;;  %2420 = vmatpush1.bf16.msra.mxu1 %v4259_v28  ;;  %v4319_v28 = vld [vmem:[%s5878_s1 + $0x354] ss:$8 sps:$4 sm:$0xff]   ;;  %v4317_v32 = vld [vmem:[%s5878_s1 + $0x350] ss:$8 sps:$4 sm:$0xff]  }
  0xb4   :  { %2824 = vmatpush1.bf16.msra.mxu0 %v4262_v35  ;;  %2421 = vmatprep.subr.bf16.mxu1 %v4267_v36  ;;  %v4328_v35 = vld [vmem:[%s5878_s1 + $0x764] ss:$8 sps:$4 sm:$0xff]   ;;  %v83_v36 = vld [vmem:[%s5879_s0 + $0x210] sm:$0xff] }
  0xb5   :  { %2825 = vmatprep.subr.bf16.mxu0 %v4270_v37  ;;  %2427 = vmatprep.mubr.bf16.mxu1 %v3407_v38  ;;  %v3454_v37 = vcombine.low %v67_v20, %v75_v23  ;;  %v3462_v38 = vcombine.low %v71_v24, %v79_v25  ;;  %v3510_v20 = vcombine.low %v119_v7, %v119_v7  ;;  %v32_v23 = vld [vmem:[%s5879_s0 + $0x78] sm:$0xff]  ;;  %v4359_v24 = vld [vmem:[%s5878_s1 + $0x3c0] ss:$8 sps:$4 sm:$0xff]  }
  0xb6   :  { %2831 = vmatprep.mubr.bf16.mxu0 %v3415_v39  ;;  %v91_v39 = vld [vmem:[%s5879_s0 + $0x250] sm:$0xff]  ;;  %v4362_v25 = vld [vmem:[%s5878_s1 + $0x7c0] ss:$8 sps:$4 sm:$0xff]  }
  0xb7   :  { %2422 = vmatpush1.bf16.msra.mxu1 %v4265_v40  ;;  %v87_v40 = vld [vmem:[%s5879_s0 + $0x230] sm:$0xff]  ;;  %v3470_v53 = vcombine.low %v83_v36, %v91_v39 }
  0xb8   :  { %2826 = vmatpush1.bf16.msra.mxu0 %v4268_v41  ;;  %2423 = vmatprep.subr.bf16.mxu1 %v4274_v42  ;;  %v95_v41 = vld [vmem:[%s5879_s0 + $0x270] sm:$0xff]  ;;  %v4323_v42 = vld [vmem:[%s5878_s1 + $0x360] ss:$8 sps:$4 sm:$0xff]  }
  0xb9   :  { %2827 = vmatprep.subr.bf16.mxu0 %v4278_v43  ;;  %v4326_v43 = vld [vmem:[%s5878_s1 + $0x760] ss:$8 sps:$4 sm:$0xff]   ;;  %v3478_v54 = vcombine.low %v87_v40, %v95_v41 }
  0xbb   :  { %2424 = vmatpush1.bf16.msra.mxu1 %v4272_v44  ;;  %v4331_v44 = vld [vmem:[%s5878_s1 + $0x374] ss:$8 sps:$4 sm:$0xff]  }
  0xbc   :  { %2828 = vmatpush1.bf16.msra.mxu0 %v4276_v45  ;;  %2425 = vmatprep.subr.bf16.mxu1 %v4283_v46  ;;  %v4334_v45 = vld [vmem:[%s5878_s1 + $0x774] ss:$8 sps:$4 sm:$0xff]   ;;  %v3471_v46 = vcombine.high %v83_v36, %v91_v39  ;;  %v4384_v39 = vld [vmem:[%s5878_s1 + $0x7f0] ss:$8 sps:$4 sm:$0xff]  }
  0xbd   :  { %2829 = vmatprep.subr.bf16.mxu0 %v4286_v47  ;;  %v3479_v47 = vcombine.high %v87_v40, %v95_v41  ;;  %v4383_v36 = vld [vmem:[%s5878_s1 + $0x3f4] ss:$8 sps:$4 sm:$0xff]  }
  0xbe   :  { %v36_v40 = vld [vmem:[%s5879_s0 + $0x98] sm:$0xff] }
  0xbf   :  { %2426 = vmatpush1.bf16.msra.mxu1 %v4281_v48  ;;  %v4329_v48 = vld [vmem:[%s5878_s1 + $0x370] ss:$8 sps:$4 sm:$0xff]  }
  0xc0   :  { %2830 = vmatpush1.bf16.msra.mxu0 %v4284_v49  ;;  %2496 = vmatprep.subr.bf16.mxu1 %v4289_v50  ;;  %v4332_v49 = vld [vmem:[%s5878_s1 + $0x770] ss:$8 sps:$4 sm:$0xff]   ;;  %v4337_v50 = vld [vmem:[%s5878_s1 + $0x384] ss:$8 sps:$4 sm:$0xff]  }
  0xc1   :  { %2900 = vmatprep.subr.bf16.mxu0 %v4292_v51  ;;  %v4340_v51 = vld [vmem:[%s5878_s1 + $0x784] ss:$8 sps:$4 sm:$0xff]   ;;  %v44_v41 = vld [vmem:[%s5879_s0 + $0xd8] sm:$0xff] }
  0xc2   :  { %2428 = vmatmul.mubr.bf16.vlgmr.msra.gmra.mrb[0].mxu1 %v3406_v55  ;;  %v107_v55 = vld [vmem:[%s5879_s0 + $0x2d0] sm:$0xff] }
  0xc3   :  { %2832 = vmatmul.mubr.bf16.vlgmr.msra.gmra.mrb[0].mxu0 %v3414_v56  ;;  %2497 = vmatpush1.bf16.msra.mxu1 %v4287_v58  ;;  %v103_v56 = vld [vmem:[%s5879_s0 + $0x2b0] sm:$0xff]  ;;  %v4335_v58 = vld [vmem:[%s5878_s1 + $0x380] ss:$8 sps:$4 sm:$0xff]   ;;  %v3486_v4 = vcombine.low %v99_v52, %v107_v55 }
  0xc4   :  { %2901 = vmatpush1.bf16.msra.mxu0 %v4290_v59  ;;  %2498 = vmatprep.subr.bf16.mxu1 %v4295_v60  ;;  %v4338_v59 = vld [vmem:[%s5878_s1 + $0x780] ss:$8 sps:$4 sm:$0xff]   ;;  %v4343_v60 = vld [vmem:[%s5878_s1 + $0x394] ss:$8 sps:$4 sm:$0xff]  }
  0xc5   :  { %2902 = vmatprep.subr.bf16.mxu0 %v4298_v61  ;;  %2437 = vmatprep.mubr.bf16.mxu1 %v3423_v62  ;;  %v4346_v61 = vld [vmem:[%s5878_s1 + $0x794] ss:$8 sps:$4 sm:$0xff]   ;;  %v3487_v62 = vcombine.high %v99_v52, %v107_v55  ;;  %v3424_v52 = vcombine.low %v36_v40, %v44_v41 }
  0xc6   :  { %2841 = vmatprep.mubr.bf16.mxu0 %v3431_v63  ;;  %v3495_v63 = vcombine.high %v103_v56, %v111_v57 }
  0xc7   :  { %2499 = vmatpush1.bf16.msra.mxu1 %v4293_v0  ;;  %v4341_v0 = vld [vmem:[%s5878_s1 + $0x390] ss:$8 sps:$4 sm:$0xff]  }
  0xc8   :  { %2903 = vmatpush1.bf16.msra.mxu0 %v4296_v1  ;;  %2500 = vmatprep.subr.bf16.mxu1 %v4301_v2  ;;  %v4344_v1 = vld [vmem:[%s5878_s1 + $0x790] ss:$8 sps:$4 sm:$0xff]   ;;  %v4349_v2 = vld [vmem:[%s5878_s1 + $0x3a4] ss:$8 sps:$4 sm:$0xff]  }
  0xc9   :  { %2904 = vmatprep.subr.bf16.mxu0 %v4304_v3  ;;  %v4352_v3 = vld [vmem:[%s5878_s1 + $0x7a4] ss:$8 sps:$4 sm:$0xff]  }
  0xca   :  { %2438 = vmatmul.mubr.bf16.gmra.mrb[4].mxu1 %v3422_v5  ;;  %v3494_v5 = vcombine.low %v103_v56, %v111_v57  ;;  %v68_v56 = vld [vmem:[%s5879_s0 + $0x198] sm:$0xff] }
  0xcb   :  { %2842 = vmatmul.mubr.bf16.gmra.mrb[4].mxu0 %v3430_v6  ;;  %2501 = vmatpush1.bf16.msra.mxu1 %v4299_v10  ;;  %v115_v6 = vld [vmem:[%s5879_s0 + $0x310] sm:$0xff]  ;;  %v76_v57 = vld [vmem:[%s5879_s0 + $0x1d8] sm:$0xff] }
  0xcc   :  { %2905 = vmatpush1.bf16.msra.mxu0 %v4302_v11  ;;  %2502 = vmatprep.subr.bf16.mxu1 %v4307_v12  ;;  %v4355_v10 = vld [vmem:[%s5878_s1 + $0x3b4] ss:$8 sps:$4 sm:$0xff]   ;;  %v3503_v12 = vcombine.high %v115_v6, %v115_v6 }
  0xcd   :  { %2906 = vmatprep.subr.bf16.mxu0 %v4310_v13  ;;  %2447 = vmatprep.mubr.bf16.mxu1 %v3439_v14  ;;  %v4358_v11 = vld [vmem:[%s5878_s1 + $0x7b4] ss:$8 sps:$4 sm:$0xff]   ;;  %v3511_v13 = vcombine.high %v119_v7, %v119_v7  ;;  %v4353_v14 = vld [vmem:[%s5878_s1 + $0x3b0] ss:$8 sps:$4 sm:$0xff]  }
  0xce   :  { %2851 = vmatprep.mubr.bf16.mxu0 %v3447_v15  ;;  %v4356_v15 = vld [vmem:[%s5878_s1 + $0x7b0] ss:$8 sps:$4 sm:$0xff]  }
  0xcf   :  { %2503 = vmatpush1.bf16.msra.mxu1 %v4305_v16  ;;  %v4361_v16 = vld [vmem:[%s5878_s1 + $0x3c4] ss:$8 sps:$4 sm:$0xff]  }
  0xd0   :  { %2907 = vmatpush1.bf16.msra.mxu0 %v4308_v17  ;;  %2504 = vmatprep.subr.bf16.mxu1 %v4313_v18  ;;  %v4364_v17 = vld [vmem:[%s5878_s1 + $0x7c4] ss:$8 sps:$4 sm:$0xff]   ;;  %v20_v18 = vld [vmem:[%s5879_s0 + $0x18] sm:$0xff] }
  0xd1   :  { %2908 = vmatprep.subr.bf16.mxu0 %v4316_v19  ;;  %v3502_v19 = vcombine.low %v115_v6, %v115_v6 }
  0xd2   :  { %2448 = vmatmul.mubr.bf16.gmra.mrb[8].mxu1 %v3438_v21  ;;  %v28_v21 = vld [vmem:[%s5879_s0 + $0x58] sm:$0xff] }
  0xd3   :  { %2852 = vmatmul.mubr.bf16.gmra.mrb[8].mxu0 %v3446_v22  ;;  %2505 = vmatpush1.bf16.msra.mxu1 %v4311_v26  ;;  %v24_v22 = vld [vmem:[%s5879_s0 + $0x38] sm:$0xff] }
  0xd4   :  { %2909 = vmatpush1.bf16.msra.mxu0 %v4314_v27  ;;  %2506 = vmatprep.subr.bf16.mxu1 %v4319_v28  ;;  %v4367_v26 = vld [vmem:[%s5878_s1 + $0x3d4] ss:$8 sps:$4 sm:$0xff]   ;;  %v3409_v28 = vcombine.high %v20_v18, %v28_v21 }
  0xd5   :  { %2910 = vmatprep.subr.bf16.mxu0 %v4322_v29  ;;  %2457 = vmatprep.mubr.bf16.mxu1 %v3455_v30  ;;  %v4370_v27 = vld [vmem:[%s5878_s1 + $0x7d4] ss:$8 sps:$4 sm:$0xff]   ;;  %v3417_v29 = vcombine.high %v24_v22, %v32_v23  ;;  %v4365_v30 = vld [vmem:[%s5878_s1 + $0x3d0] ss:$8 sps:$4 sm:$0xff]  }
  0xd6   :  { %2861 = vmatprep.mubr.bf16.mxu0 %v3463_v31  ;;  %v4368_v31 = vld [vmem:[%s5878_s1 + $0x7d0] ss:$8 sps:$4 sm:$0xff]  }
  0xd7   :  { %2507 = vmatpush1.bf16.msra.mxu1 %v4317_v32  ;;  %v4376_v32 = vld [vmem:[%s5878_s1 + $0x3e4] ss:$8 sps:$4 sm:$0xff]  }
  0xd8   :  { %2911 = vmatpush1.bf16.msra.mxu0 %v4320_v33  ;;  %2508 = vmatprep.subr.bf16.mxu1 %v4325_v34  ;;  %v4380_v33 = vld [vmem:[%s5878_s1 + $0x7e4] ss:$8 sps:$4 sm:$0xff]   ;;  %v4374_v34 = vld [vmem:[%s5878_s1 + $0x3e0] ss:$8 sps:$4 sm:$0xff]  }
  0xd9   :  { %2912 = vmatprep.subr.bf16.mxu0 %v4328_v35  ;;  %v4378_v35 = vld [vmem:[%s5878_s1 + $0x7e0] ss:$8 sps:$4 sm:$0xff]  }
  0xda   :  { %2458 = vmatmul.mubr.bf16.gmra.mrb[12].mxu1 %v3454_v37  ;;  %v4386_v37 = vld [vmem:[%s5878_s1 + $0x7f4] ss:$8 sps:$4 sm:$0xff]  }
  0xdb   :  { %2862 = vmatmul.mubr.bf16.gmra.mrb[12].mxu0 %v3462_v38  ;;  %2509 = vmatpush1.bf16.msra.mxu1 %v4323_v42  ;;  %v4381_v38 = vld [vmem:[%s5878_s1 + $0x3f0] ss:$8 sps:$4 sm:$0xff]  }
  0xdc   :  { %2913 = vmatpush1.bf16.msra.mxu0 %v4326_v43  ;;  %2510 = vmatprep.subr.bf16.mxu1 %v4331_v44  ;;  %v40_v42 = vld [vmem:[%s5879_s0 + $0xb8] sm:$0xff]  ;;  %v3408_v44 = vcombine.low %v20_v18, %v28_v21 }
  0xdd   :  { %2914 = vmatprep.subr.bf16.mxu0 %v4334_v45  ;;  %2467 = vmatprep.mubr.bf16.mxu1 %v3471_v46  ;;  %v48_v43 = vld [vmem:[%s5879_s0 + $0xf8] sm:$0xff]  ;;  %v3416_v45 = vcombine.low %v24_v22, %v32_v23  ;;  %v3425_v46 = vcombine.high %v36_v40, %v44_v41 }
  0xde   :  { %2871 = vmatprep.mubr.bf16.mxu0 %v3479_v47  ;;  %v3433_v47 = vcombine.high %v40_v42, %v48_v43 }
  0xdf   :  { %2511 = vmatpush1.bf16.msra.mxu1 %v4329_v48  ;;  %v52_v48 = vld [vmem:[%s5879_s0 + $0x118] sm:$0xff] }
  0xe0   :  { %2915 = vmatpush1.bf16.msra.mxu0 %v4332_v49  ;;  %2512 = vmatprep.subr.bf16.mxu1 %v4337_v50  ;;  %v60_v49 = vld [vmem:[%s5879_s0 + $0x158] sm:$0xff] }
  0xe1   :  { %2916 = vmatprep.subr.bf16.mxu0 %v4340_v51  ;;  %v56_v50 = vld [vmem:[%s5879_s0 + $0x138] sm:$0xff] }
  0xe2   :  { %2468 = vmatmul.mubr.bf16.gmra.mrb[16].mxu1 %v3470_v53  ;;  %v64_v51 = vld [vmem:[%s5879_s0 + $0x178] sm:$0xff]  ;;  %v3432_v53 = vcombine.low %v40_v42, %v48_v43 }
  0xe3   :  { %2872 = vmatmul.mubr.bf16.gmra.mrb[16].mxu0 %v3478_v54  ;;  %2513 = vmatpush1.bf16.msra.mxu1 %v4335_v58  ;;  %v3441_v54 = vcombine.high %v52_v48, %v60_v49  ;;  %v3449_v55 = vcombine.high %v56_v50, %v64_v51  ;;  %v72_v58 = vld [vmem:[%s5879_s0 + $0x1b8] sm:$0xff] }
  0xe4   :  { %2917 = vmatpush1.bf16.msra.mxu0 %v4338_v59  ;;  %2514 = vmatprep.subr.bf16.mxu1 %v4343_v60  ;;  %v80_v59 = vld [vmem:[%s5879_s0 + $0x1f8] sm:$0xff]  ;;  %v3440_v60 = vcombine.low %v52_v48, %v60_v49 }
  0xe5   :  { %2918 = vmatprep.subr.bf16.mxu0 %v4346_v61  ;;  %2477 = vmatprep.mubr.bf16.mxu1 %v3487_v62  ;;  %v3448_v61 = vcombine.low %v56_v50, %v64_v51  ;;  %v3457_v62 = vcombine.high %v68_v56, %v76_v57 }
  0xe6   :  { %2881 = vmatprep.mubr.bf16.mxu0 %v3495_v63  ;;  %v3465_v63 = vcombine.high %v72_v58, %v80_v59 }
  0xe7   :  { %2515 = vmatpush1.bf16.msra.mxu1 %v4341_v0  ;;  %v84_v0 = vld [vmem:[%s5879_s0 + $0x218] sm:$0xff] }
  0xe8   :  { %2919 = vmatpush1.bf16.msra.mxu0 %v4344_v1  ;;  %2516 = vmatprep.subr.bf16.mxu1 %v4349_v2  ;;  %v92_v1 = vld [vmem:[%s5879_s0 + $0x258] sm:$0xff] }
  0xe9   :  { %2920 = vmatprep.subr.bf16.mxu0 %v4352_v3  ;;  %v88_v2 = vld [vmem:[%s5879_s0 + $0x238] sm:$0xff]  ;;  %v3473_v6 = vcombine.high %v84_v0, %v92_v1 }
  0xea   :  { %2478 = vmatmul.mubr.bf16.gmra.mrb[20].mxu1 %v3486_v4  ;;  %v96_v3 = vld [vmem:[%s5879_s0 + $0x278] sm:$0xff]  ;;  %v3456_v4 = vcombine.low %v68_v56, %v76_v57 }
  0xeb   :  { %2882 = vmatmul.mubr.bf16.gmra.mrb[20].mxu0 %v3494_v5  ;;  %2517 = vmatpush1.bf16.msra.mxu1 %v4347_v8  ;;  %v3464_v5 = vcombine.low %v72_v58, %v80_v59  ;;  %v3481_v7 = vcombine.high %v88_v2, %v96_v3  ;;  %v100_v8 = vld [vmem:[%s5879_s0 + $0x298] sm:$0xff] }
  0xec   :  { %2921 = vmatpush1.bf16.msra.mxu0 %v4350_v9  ;;  %2518 = vmatprep.subr.bf16.mxu1 %v4355_v10  ;;  %v108_v9 = vld [vmem:[%s5879_s0 + $0x2d8] sm:$0xff] }
  0xed   :  { %2922 = vmatprep.subr.bf16.mxu0 %v4358_v11  ;;  %2487 = vmatprep.mubr.bf16.mxu1 %v3503_v12  ;;  %v104_v10 = vld [vmem:[%s5879_s0 + $0x2b8] sm:$0xff]  ;;  %v3472_v12 = vcombine.low %v84_v0, %v92_v1  ;;  %v3488_v18 = vcombine.low %v100_v8, %v108_v9 }
  0xee   :  { %2891 = vmatprep.mubr.bf16.mxu0 %v3511_v13  ;;  %v112_v11 = vld [vmem:[%s5879_s0 + $0x2f8] sm:$0xff]  ;;  %v3480_v13 = vcombine.low %v88_v2, %v96_v3 }
  0xef   :  { %2519 = vmatpush1.bf16.msra.mxu1 %v4353_v14  ;;  %v3489_v14 = vcombine.high %v100_v8, %v108_v9 }
  0xf0   :  { %2923 = vmatpush1.bf16.msra.mxu0 %v4356_v15  ;;  %2520 = vmatprep.subr.bf16.mxu1 %v4361_v16  ;;  %v3497_v15 = vcombine.high %v104_v10, %v112_v11  ;;  %v116_v16 = vld [vmem:[%s5879_s0 + $0x318] sm:$0xff] }
  0xf1   :  { %2924 = vmatprep.subr.bf16.mxu0 %v4364_v17  ;;  %v120_v17 = vld [vmem:[%s5879_s0 + $0x338] sm:$0xff]  ;;  %v3504_v22 = vcombine.low %v116_v16, %v116_v16 }
  0xf2   :  { %2488 = vmatmul.mubr.bf16.gmra.mrb[24].mxu1 %v3502_v19  ;;  %v3496_v19 = vcombine.low %v104_v10, %v112_v11  ;;  %v3513_v21 = vcombine.high %v120_v17, %v120_v17  ;;  %v3512_v23 = vcombine.low %v120_v17, %v120_v17 }
  0xf3   :  { %2892 = vmatmul.mubr.bf16.gmra.mrb[24].mxu0 %v3510_v20  ;;  %2521 = vmatpush1.bf16.msra.mxu1 %v4359_v24  ;;  %v3505_v20 = vcombine.high %v116_v16, %v116_v16 }
  0xf4   :  { %2925 = vmatpush1.bf16.msra.mxu0 %v4362_v25  ;;  %2522 = vmatprep.subr.bf16.mxu1 %v4367_v26 }
  0xf5   :  { %2926 = vmatprep.subr.bf16.mxu0 %v4370_v27  ;;  %2528 = vmatprep.mubr.bf16.mxu1 %v3409_v28 }
  0xf6   :  { %2932 = vmatprep.mubr.bf16.mxu0 %v3417_v29 }
  0xf7   :  { %2523 = vmatpush1.bf16.msra.mxu1 %v4365_v30 }
  0xf8   :  { %2927 = vmatpush1.bf16.msra.mxu0 %v4368_v31  ;;  %2524 = vmatprep.subr.bf16.mxu1 %v4376_v32 }
  0xf9   :  { %2928 = vmatprep.subr.bf16.mxu0 %v4380_v33 }
  0xfb   :  { %2525 = vmatpush1.bf16.msra.mxu1 %v4374_v34 }
  0xfc   :  { %2929 = vmatpush1.bf16.msra.mxu0 %v4378_v35  ;;  %2526 = vmatprep.subr.bf16.mxu1 %v4383_v36 }
  0xfd   :  { %2930 = vmatprep.subr.bf16.mxu0 %v4386_v37 }
  0xff   :  { %2527 = vmatpush1.bf16.msra.mxu1 %v4381_v38 }
 0x100   :  { %2931 = vmatpush1.bf16.msra.mxu0 %v4384_v39 }
 0x102   :  { %2529 = vmatmul.mubr.bf16.vlgmr.msra.gmra.mrb[0].mxu1 %v3408_v44 }
 0x103   :  { %2933 = vmatmul.mubr.bf16.vlgmr.msra.gmra.mrb[0].mxu0 %v3416_v45  ;;  %2538 = vmatprep.mubr.bf16.mxu1 %v3425_v46 }
 0x104   :  { %2942 = vmatprep.mubr.bf16.mxu0 %v3433_v47 }
 0x10a   :  { %2539 = vmatmul.mubr.bf16.gmra.mrb[4].mxu1 %v3424_v52 }
 0x10b   :  { %2943 = vmatmul.mubr.bf16.gmra.mrb[4].mxu0 %v3432_v53  ;;  %2548 = vmatprep.mubr.bf16.mxu1 %v3441_v54 }
 0x10c   :  { %2952 = vmatprep.mubr.bf16.mxu0 %v3449_v55 }
 0x112   :  { %2549 = vmatmul.mubr.bf16.gmra.mrb[8].mxu1 %v3440_v60 }
 0x113   :  { %2953 = vmatmul.mubr.bf16.gmra.mrb[8].mxu0 %v3448_v61  ;;  %2558 = vmatprep.mubr.bf16.mxu1 %v3457_v62 }
 0x114   :  { %2962 = vmatprep.mubr.bf16.mxu0 %v3465_v63 }
 0x11a   :  { %2559 = vmatmul.mubr.bf16.gmra.mrb[12].mxu1 %v3456_v4 }
 0x11b   :  { %2963 = vmatmul.mubr.bf16.gmra.mrb[12].mxu0 %v3464_v5  ;;  %2568 = vmatprep.mubr.bf16.mxu1 %v3473_v6 }
 0x11c   :  { %2972 = vmatprep.mubr.bf16.mxu0 %v3481_v7 }
 0x122   :  { %2569 = vmatmul.mubr.bf16.gmra.mrb[16].mxu1 %v3472_v12 }
 0x123   :  { %2973 = vmatmul.mubr.bf16.gmra.mrb[16].mxu0 %v3480_v13  ;;  %2578 = vmatprep.mubr.bf16.mxu1 %v3489_v14 }
 0x124   :  { %2982 = vmatprep.mubr.bf16.mxu0 %v3497_v15 }
 0x12a   :  { %2579 = vmatmul.mubr.bf16.gmra.mrb[20].mxu1 %v3488_v18 }
 0x12b   :  { %2983 = vmatmul.mubr.bf16.gmra.mrb[20].mxu0 %v3496_v19  ;;  %2588 = vmatprep.mubr.bf16.mxu1 %v3505_v20 }
 0x12c   :  { %2992 = vmatprep.mubr.bf16.mxu0 %v3513_v21 }
 0x132   :  { %2589 = vmatmul.mubr.bf16.gmra.mrb[24].mxu1 %v3504_v22 }
 0x133   :  { %2993 = vmatmul.mubr.bf16.gmra.mrb[24].mxu0 %v3512_v23 }
 0x1d5   :  { %v2530_v24 = vpop.f32.mrb[0].mxu1 }
 0x1d6   :  { %v2934_v25 = vpop.f32.mrb[0].mxu0  ;;  %v2532_v27 = vpop.f32.mrb[1].mxu1 }
 0x1d7   :  { %v5501_v26 = vadd.f32 %v2934_v25, %v2530_v24  ;;  %v2936_v28 = vpop.f32.mrb[1].mxu0  ;;  %v2534_v30 = vpop.f32.mrb[2].mxu1 }
 0x1d8   :  { %v5503_v29 = vadd.f32 %v2936_v28, %v2532_v27  ;;  %v2938_v31 = vpop.f32.mrb[2].mxu0  ;;  %v2536_v33 = vpop.f32.mrb[3].mxu1 }
 0x1d9   :  { %v5505_v32 = vadd.f32 %v2938_v31, %v2534_v30  ;;  %v2940_v34 = vpop.f32.mrb[3].mxu0  ;;  %v3039_v50 = vmul.f32 %v5501_v26, %v5501_v26 }
 0x1da   :  { %v5507_v35 = vadd.f32 %v2940_v34, %v2536_v33  ;;  %v3040_v53 = vmul.f32 %v5503_v29, %v5503_v29 }
 0x1db   :  { %v3041_v48 = vmul.f32 %v5505_v32, %v5505_v32  ;;  %v3001_v51 = vadd.f32 %v5505_v32, %v5501_v26 }
 0x1dc   :  { %v3042_v49 = vmul.f32 %v5507_v35, %v5507_v35  ;;  %v3019_v54 = vadd.f32 %v5507_v35, %v5503_v29 }
 0x1dd   :  { %v2540_v36 = vpop.f32.mrb[4].mxu1  ;;  %v3065_v58 = vadd.f32 %v3041_v48, %v3039_v50 }
 0x1de   :  { %v2944_v37 = vpop.f32.mrb[4].mxu0  ;;  %v2542_v39 = vpop.f32.mrb[5].mxu1  ;;  %v3083_v63 = vadd.f32 %v3042_v49, %v3040_v53 }
 0x1df   :  { %v5509_v38 = vadd.f32 %v2944_v37, %v2540_v36  ;;  %v2946_v40 = vpop.f32.mrb[5].mxu0  ;;  %v2544_v42 = vpop.f32.mrb[6].mxu1 }
 0x1e0   :  { %v5511_v41 = vadd.f32 %v2946_v40, %v2542_v39  ;;  %v2948_v43 = vpop.f32.mrb[6].mxu0  ;;  %v2546_v45 = vpop.f32.mrb[7].mxu1 }
 0x1e1   :  { %v5513_v44 = vadd.f32 %v2948_v43, %v2544_v42  ;;  %v2950_v46 = vpop.f32.mrb[7].mxu0  ;;  %v3043_v52 = vmul.f32 %v5509_v38, %v5509_v38  ;;  %v3002_v59 = vadd.f32 %v5509_v38, %v3001_v51 }
 0x1e2   :  { %v5515_v47 = vadd.f32 %v2950_v46, %v2546_v45  ;;  %v3044_v55 = vmul.f32 %v5511_v41, %v5511_v41  ;;  %v3020_v0 = vadd.f32 %v5511_v41, %v3019_v54 }
 0x1e3   :  { %v3066_v4 = vadd.f32 %v3065_v58, %v3043_v52  ;;  %v3045_v5 = vmul.f32 %v5513_v44, %v5513_v44  ;;  %v3003_v12 = vadd.f32 %v5513_v44, %v3002_v59 }
 0x1e4   :  { %v3084_v9 = vadd.f32 %v3083_v63, %v3044_v55  ;;  %v3046_v10 = vmul.f32 %v5515_v47, %v5515_v47  ;;  %v3021_v14 = vadd.f32 %v5515_v47, %v3020_v0 }
 0x1e5   :  { %v2550_v56 = vpop.f32.mrb[8].mxu1  ;;  %v3067_v16 = vadd.f32 %v3066_v4, %v3045_v5 }
 0x1e6   :  { %v2954_v57 = vpop.f32.mrb[8].mxu0  ;;  %v2552_v61 = vpop.f32.mrb[9].mxu1  ;;  %v3085_v18 = vadd.f32 %v3084_v9, %v3046_v10 }
 0x1e7   :  { %v5534_v60 = vadd.f32 %v2954_v57, %v2550_v56  ;;  %v2956_v62 = vpop.f32.mrb[9].mxu0  ;;  %v2554_v2 = vpop.f32.mrb[10].mxu1 }
 0x1e8   :  { %v5537_v1 = vadd.f32 %v2956_v62, %v2552_v61  ;;  %v2958_v3 = vpop.f32.mrb[10].mxu0  ;;  %v2556_v7 = vpop.f32.mrb[11].mxu1 }
 0x1e9   :  { %v5541_v6 = vadd.f32 %v2958_v3, %v2554_v2  ;;  %v2960_v8 = vpop.f32.mrb[11].mxu0  ;;  %v3047_v13 = vmul.f32 %v5534_v60, %v5534_v60  ;;  %v3004_v17 = vadd.f32 %v5534_v60, %v3003_v12 }
 0x1ea   :  { %v5545_v11 = vadd.f32 %v2960_v8, %v2556_v7  ;;  %v3048_v15 = vmul.f32 %v5537_v1, %v5537_v1  ;;  %v3022_v19 = vadd.f32 %v5537_v1, %v3021_v14 }
 0x1eb   :  { %v3068_v22 = vadd.f32 %v3067_v16, %v3047_v13  ;;  %v3049_v23 = vmul.f32 %v5541_v6, %v5541_v6  ;;  %v3005_v36 = vadd.f32 %v5541_v6, %v3004_v17 }
 0x1ec   :  { %v3086_v28 = vadd.f32 %v3085_v18, %v3048_v15  ;;  %v3050_v30 = vmul.f32 %v5545_v11, %v5545_v11  ;;  %v3023_v43 = vadd.f32 %v5545_v11, %v3022_v19 }
 0x1ed   :  { %v2560_v20 = vpop.f32.mrb[12].mxu1  ;;  %v3069_v48 = vadd.f32 %v3068_v22, %v3049_v23 }
 0x1ee   :  { %v2964_v21 = vpop.f32.mrb[12].mxu0  ;;  %v2562_v25 = vpop.f32.mrb[13].mxu1  ;;  %v3087_v50 = vadd.f32 %v3086_v28, %v3050_v30 }
 0x1ef   :  { %v5557_v24 = vadd.f32 %v2964_v21, %v2560_v20  ;;  %v2966_v27 = vpop.f32.mrb[13].mxu0  ;;  %v2564_v33 = vpop.f32.mrb[14].mxu1 }
 0x1f0   :  { %v5561_v31 = vadd.f32 %v2966_v27, %v2562_v25  ;;  %v2968_v34 = vpop.f32.mrb[14].mxu0  ;;  %v2566_v40 = vpop.f32.mrb[15].mxu1 }
 0x1f1   :  { %v3051_v37 = vmul.f32 %v5557_v24, %v5557_v24  ;;  %v5566_v39 = vadd.f32 %v2968_v34, %v2564_v33  ;;  %v2970_v42 = vpop.f32.mrb[15].mxu0  ;;  %v3006_v49 = vadd.f32 %v5557_v24, %v3005_v36 }
 0x1f2   :  { %v3052_v45 = vmul.f32 %v5561_v31, %v5561_v31  ;;  %v5571_v46 = vadd.f32 %v2970_v42, %v2566_v40  ;;  %v3024_v51 = vadd.f32 %v5561_v31, %v3023_v43 }
 0x1f3   :  { %v3070_v52 = vadd.f32 %v3069_v48, %v3051_v37  ;;  %v3053_v53 = vmul.f32 %v5566_v39, %v5566_v39  ;;  %v3007_v58 = vadd.f32 %v5566_v39, %v3006_v49 }
 0x1f4   :  { %v3088_v54 = vadd.f32 %v3087_v50, %v3052_v45  ;;  %v3054_v55 = vmul.f32 %v5571_v46, %v5571_v46  ;;  %v3025_v63 = vadd.f32 %v5571_v46, %v3024_v51 }
 0x1f5   :  { %v2570_v56 = vpop.f32.mrb[16].mxu1  ;;  %v3071_v4 = vadd.f32 %v3070_v52, %v3053_v53 }
 0x1f6   :  { %v2974_v57 = vpop.f32.mrb[16].mxu0  ;;  %v2572_v61 = vpop.f32.mrb[17].mxu1  ;;  %v3089_v12 = vadd.f32 %v3088_v54, %v3054_v55 }
 0x1f7   :  { %v5580_v59 = vadd.f32 %v2974_v57, %v2570_v56  ;;  %v2976_v62 = vpop.f32.mrb[17].mxu0  ;;  %v2574_v2 = vpop.f32.mrb[18].mxu1 }
 0x1f8   :  { %v5583_v0 = vadd.f32 %v2976_v62, %v2572_v61  ;;  %v2978_v3 = vpop.f32.mrb[18].mxu0  ;;  %v2576_v9 = vpop.f32.mrb[19].mxu1 }
 0x1f9   :  { %v3008_v5 = vadd.f32 %v5580_v59, %v3007_v58  ;;  %v3055_v7 = vmul.f32 %v5580_v59, %v5580_v59  ;;  %v5588_v8 = vadd.f32 %v2978_v3, %v2574_v2  ;;  %v2980_v10 = vpop.f32.mrb[19].mxu0 }
 0x1fa   :  { %v3026_v13 = vadd.f32 %v5583_v0, %v3025_v63  ;;  %v3056_v14 = vmul.f32 %v5583_v0, %v5583_v0  ;;  %v5593_v15 = vadd.f32 %v2980_v10, %v2576_v9 }
 0x1fb   :  { %v3072_v16 = vadd.f32 %v3071_v4, %v3055_v7  ;;  %v3009_v17 = vadd.f32 %v5588_v8, %v3008_v5  ;;  %v3057_v18 = vmul.f32 %v5588_v8, %v5588_v8 }
 0x1fc   :  { %v3090_v19 = vadd.f32 %v3089_v12, %v3056_v14  ;;  %v3027_v20 = vadd.f32 %v5593_v15, %v3026_v13  ;;  %v3058_v21 = vmul.f32 %v5593_v15, %v5593_v15 }
 0x1fd   :  { %v3073_v22 = vadd.f32 %v3072_v16, %v3057_v18  ;;  %v2580_v25 = vpop.f32.mrb[20].mxu1 }
 0x1fe   :  { %v3091_v23 = vadd.f32 %v3090_v19, %v3058_v21  ;;  %v2984_v27 = vpop.f32.mrb[20].mxu0  ;;  %v2582_v30 = vpop.f32.mrb[21].mxu1 }
 0x1ff   :  { %v5601_v28 = vadd.f32 %v2984_v27, %v2580_v25  ;;  %v2986_v33 = vpop.f32.mrb[21].mxu0  ;;  %v2584_v36 = vpop.f32.mrb[22].mxu1 }
 0x200   :  { %v5603_v34 = vadd.f32 %v2986_v33, %v2582_v30  ;;  %v2988_v37 = vpop.f32.mrb[22].mxu0  ;;  %v2586_v45 = vpop.f32.mrb[23].mxu1 }
 0x201   :  { %v3010_v40 = vadd.f32 %v5601_v28, %v3009_v17  ;;  %v3059_v42 = vmul.f32 %v5601_v28, %v5601_v28  ;;  %v5608_v43 = vadd.f32 %v2988_v37, %v2584_v36  ;;  %v2990_v48 = vpop.f32.mrb[23].mxu0 }
 0x202   :  { %v3028_v49 = vadd.f32 %v5603_v34, %v3027_v20  ;;  %v3060_v50 = vmul.f32 %v5603_v34, %v5603_v34  ;;  %v5613_v51 = vadd.f32 %v2990_v48, %v2586_v45 }
 0x203   :  { %v3074_v52 = vadd.f32 %v3073_v22, %v3059_v42  ;;  %v3011_v53 = vadd.f32 %v5608_v43, %v3010_v40  ;;  %v3061_v54 = vmul.f32 %v5608_v43, %v5608_v43 }
 0x204   :  { %v3092_v55 = vadd.f32 %v3091_v23, %v3060_v50  ;;  %v3029_v56 = vadd.f32 %v5613_v51, %v3028_v49  ;;  %v3062_v57 = vmul.f32 %v5613_v51, %v5613_v51 }
 0x205   :  { %v3075_v58 = vadd.f32 %v3074_v52, %v3061_v54  ;;  %v2590_v62 = vpop.f32.mrb[24].mxu1 }
 0x206   :  { %v3093_v61 = vadd.f32 %v3092_v55, %v3062_v57  ;;  %v2994_v63 = vpop.f32.mrb[24].mxu0  ;;  %v2592_v3 = vpop.f32.mrb[25].mxu1 }
 0x207   :  { %v5621_v2 = vadd.f32 %v2994_v63, %v2590_v62  ;;  %v2996_v4 = vpop.f32.mrb[25].mxu0  ;;  %v2594_v7 = vpop.f32.mrb[26].mxu1 }
 0x208   :  { %v5623_v5 = vadd.f32 %v2996_v4, %v2592_v3  ;;  %v2998_v9 = vpop.f32.mrb[26].mxu0  ;;  %v2595_v13 = vpop.f32.mrb[27].mxu1 }
 0x209   :  { %v3012_v10 = vadd.f32 %v5621_v2, %v3011_v53  ;;  %v3063_v12 = vmul.f32 %v5621_v2, %v5621_v2  ;;  %v2999_v14 = vpop.f32.mrb[27].mxu0 }
 0x20a   :  { %v3030_v16 = vadd.f32 %v5623_v5, %v3029_v56  ;;  %v3064_v17 = vmul.f32 %v5623_v5, %v5623_v5 }
 0x20b   :  { %v3013_v18 = vrot.slane %v3012_v10, 4  ;;  %v3076_v19 = vadd.f32 %v3075_v58, %v3063_v12 }
 0x20c   :  { %v3031_v20 = vrot.slane %v3030_v16, 4  ;;  %v3094_v21 = vadd.f32 %v3093_v61, %v3064_v17 }
 0x20d   :  { %v3014_v22 = vadd.f32 %v3013_v18, %v3012_v10  ;;  %v3077_v23 = vrot.slane %v3076_v19, 4  ;;  %v3118_v18 = vlaneseq }
 0x20e   :  { %v3032_v25 = vadd.f32 %v3031_v20, %v3030_v16  ;;  %v3095_v27 = vrot.slane %v3094_v21, 4  ;;  %v4395_v16 = vmov 1966171168  }
 0x20f   :  { %v3015_v30 = vrot.slane %v3014_v22, 2  ;;  %v3078_v33 = vadd.f32 %v3077_v23, %v3076_v19  ;;  %v3116_v17 = vunpack.c.l.s4 %v4395_v16  ;;  %v3119_v20 = vshrl.u32 %v3118_v18, 7 }
 0x210   :  { %v3033_v36 = vrot.slane %v3032_v25, 2  ;;  %v3096_v37 = vadd.f32 %v3095_v27, %v3094_v21 }
 0x211   :  { %v3016_v40 = vadd.f32 %v3015_v30, %v3014_v22  ;;  %v3079_v42 = vrot.slane %v3078_v33, 2  ;;  %v3117_v19 = vunpack.c.0.s8 %v3116_v17  ;;  %v3107_v30 = vld [vmem:[%s5880_s2] sm:$0x3] }
 0x212   :  { %v3034_v45 = vadd.f32 %v3033_v36, %v3032_v25  ;;  %v3097_v48 = vrot.slane %v3096_v37, 2  ;;  %v3135_v36 = vsub.s32 0, %v3119_v20 }
 0x213   :  { %v3017_v49 = vrot.slane %v3016_v40, 1  ;;  %v3080_v50 = vadd.f32 %v3079_v42, %v3078_v33  ;;  %v3120_v22 = vsub.s32 %v3117_v19, %v3119_v20 }
 0x214   :  { %v3035_v52 = vrot.slane %v3034_v45, 1  ;;  %v3098_v53 = vadd.f32 %v3097_v48, %v3096_v37  ;;  %v3139_v37 = vsub.s32 1, %v3119_v20 }
 0x215   :  { %v3018_v54 = vadd.f32 %v3017_v49, %v3016_v40  ;;  %v3081_v55 = vrot.slane %v3080_v50, 1 }
 0x216   :  { %v3036_v56 = vadd.f32 %v3035_v52, %v3034_v45  ;;  %v3099_v57 = vrot.slane %v3098_v53, 1 }
 0x217   :  { %v3037_v58 = vmul.f32 0.010204081, %v3018_v54  ;;  %v3082_v61 = vadd.f32 %v3081_v55, %v3080_v50  ;;  %v3131_v55 = vld [vmem:[%s5881_s3] sm:$0x3] }
 0x218   :  { %v3038_v62 = vmul.f32 0.010204081, %v3036_v56  ;;  %v3100_v63 = vadd.f32 %v3099_v57, %v3098_v53 }
 0x219   :  { %v3101_v3 = vmul.f32 0.010204081, %v3082_v61  ;;  %v3103_v4 = vmul.f32 %v3037_v58, %v3037_v58 }
 0x21a   :  { %v3102_v7 = vmul.f32 0.010204081, %v3100_v63  ;;  %v3104_v9 = vmul.f32 %v3038_v62, %v3038_v62 }
 0x21b   :  { %v3105_v10 = vsub.f32 %v3101_v3, %v3103_v4 }
 0x21c   :  { %v3106_v12 = vsub.f32 %v3102_v7, %v3104_v9 }
 0x21d   :  { %v3108_v13 = vadd.f32 1e-05, %v3105_v10 }
 0x21e   :  { %v3109_v14 = vadd.f32 1e-05, %v3106_v12 }
 0x21f   :  { %4391 = vrsqrt.f32 %v3108_v13 }
 0x220   :  { %4393 = vrsqrt.f32 %v3109_v14 }
 0x229   :  { %v4392_v21 = vpop.eup %4391 }
 0x22a   :  { %v4394_v23 = vpop.eup %4393 }
 0x22b   :  { %v3114_v25 = vcombine.low %v4392_v21, %v4394_v23 }
 0x22d   :  { %v3121_v27 = vrot.slane %v3114_v25, %v3120_v22 }
 0x22f   :  { %v3128_v33 = vrot.slane %v3121_v27, %v3120_v22 }
 0x231   :  { %v3130_v40 = vmul.f32 %v3128_v33, %v3107_v30 }
 0x233   :  { %v3136_v42 = vrot.slane %v3130_v40, %v3135_v36  ;;  %v3140_v45 = vrot.slane %v3130_v40, %v3139_v37 }
 0x235   :  { %v3143_v48 = vmul.f32 %v3136_v42, %v3037_v58  ;;  %v3144_v49 = vmul.f32 %v3140_v45, %v3038_v62  ;;  %v3164_v53 = vmul.f32 %v5501_v26, %v3136_v42  ;;  %v3165_v54 = vmul.f32 %v5503_v29, %v3140_v45 }
 0x236   :  { %v3180_v56 = vmul.f32 %v5580_v59, %v3136_v42  ;;  %v3181_v57 = vmul.f32 %v5583_v0, %v3140_v45  ;;  %v3182_v61 = vmul.f32 %v5588_v8, %v3136_v42  ;;  %v3183_v63 = vmul.f32 %v5593_v15, %v3140_v45 }
 0x237   :  { %v3147_v50 = vcombine.low %v3143_v48, %v3144_v49  ;;  %v3184_v62 = vmul.f32 %v5601_v28, %v3136_v42  ;;  %v3185_v3 = vmul.f32 %v5603_v34, %v3140_v45  ;;  %v3186_v26 = vmul.f32 %v5608_v43, %v3136_v42 }
 0x238   :  { %v3166_v29 = vmul.f32 %v5505_v32, %v3136_v42  ;;  %v3187_v4 = vmul.f32 %v5613_v51, %v3140_v45  ;;  %v3188_v7 = vmul.f32 %v5621_v2, %v3136_v42  ;;  %v3189_v59 = vmul.f32 %v5623_v5, %v3140_v45 }
 0x239   :  { %v3154_v52 = vrot.slane %v3147_v50, %v3120_v22  ;;  %v3167_v8 = vmul.f32 %v5507_v35, %v3140_v45  ;;  %v3168_v15 = vmul.f32 %v5509_v38, %v3136_v42  ;;  %v3169_v9 = vmul.f32 %v5511_v41, %v3140_v45 }
 0x23a   :  { %v3170_v28 = vmul.f32 %v5513_v44, %v3136_v42  ;;  %v3171_v34 = vmul.f32 %v5515_v47, %v3140_v45  ;;  %v3172_v43 = vmul.f32 %v5534_v60, %v3136_v42  ;;  %v3173_v32 = vmul.f32 %v5537_v1, %v3140_v45 }
 0x23b   :  { %v3161_v58 = vrot.slane %v3154_v52, %v3120_v22  ;;  %v3174_v51 = vmul.f32 %v5541_v6, %v3136_v42  ;;  %v3175_v2 = vmul.f32 %v5545_v11, %v3140_v45  ;;  %v3176_v35 = vmul.f32 %v5557_v24, %v3136_v42 }
 0x23c   :  { %v3177_v38 = vmul.f32 %v5561_v31, %v3140_v45  ;;  %v3178_v41 = vmul.f32 %v5566_v39, %v3136_v42  ;;  %v3179_v44 = vmul.f32 %v5571_v46, %v3140_v45 }
 0x23d   :  { %v3163_v0 = vsub.f32 %v3131_v55, %v3161_v58 }
 0x23f   :  { %v3194_v5 = vrot.slane %v3163_v0, %v3135_v36  ;;  %v3198_v10 = vrot.slane %v3163_v0, %v3139_v37 }
 0x241   :  { %v3201_v12 = vadd.f32 %v3194_v5, %v3164_v53  ;;  %v5663_v47 = vadd.f32 %v3198_v10, %v3165_v54  ;;  %v5665_v60 = vadd.f32 %v3194_v5, %v3166_v29  ;;  %v5667_v1 = vadd.f32 %v3198_v10, %v3167_v8 }
 0x242   :  { %v5669_v6 = vadd.f32 %v3194_v5, %v3168_v15  ;;  %v5671_v11 = vadd.f32 %v3198_v10, %v3169_v9  ;;  %v5673_v13 = vadd.f32 %v3194_v5, %v3170_v28  ;;  %v5675_v24 = vadd.f32 %v3198_v10, %v3171_v34 }
 0x243   :  { %v5677_v31 = vadd.f32 %v3194_v5, %v3172_v43  ;;  %v5679_v39 = vadd.f32 %v3198_v10, %v3173_v32  ;;  %v5681_v46 = vadd.f32 %v3194_v5, %v3174_v51  ;;  %v5683_v14 = vadd.f32 %v3198_v10, %v3175_v2 }
 0x244   :  { %v5685_v16 = vadd.f32 %v3194_v5, %v3176_v35  ;;  %v5687_v17 = vadd.f32 %v3198_v10, %v3177_v38  ;;  %v5689_v18 = vadd.f32 %v3194_v5, %v3178_v41  ;;  %v5691_v19 = vadd.f32 %v3198_v10, %v3179_v44 }
 0x245   :  { %v5693_v20 = vadd.f32 %v3194_v5, %v3180_v56  ;;  %v5695_v21 = vadd.f32 %v3198_v10, %v3181_v57  ;;  %v5697_v22 = vadd.f32 %v3194_v5, %v3182_v61  ;;  %v5699_v23 = vadd.f32 %v3198_v10, %v3183_v63 }
 0x246   :  { %v5701_v25 = vadd.f32 %v3194_v5, %v3184_v62  ;;  %v5703_v27 = vadd.f32 %v3198_v10, %v3185_v3  ;;  %v5705_v30 = vadd.f32 %v3194_v5, %v3186_v26  ;;  %v5707_v33 = vadd.f32 %v3198_v10, %v3187_v4 }
 0x247   :  { %v5709_v36 = vadd.f32 %v3194_v5, %v3188_v7  ;;  %v5711_v37 = vadd.f32 %v3198_v10, %v3189_v59  ;;  %vm3227_vm0 = vcmp.gt.f32.partialorder %v3201_v12, 0.0  ;;  %vm3228_vm1 = vcmp.gt.f32.partialorder %v5663_v47, 0.0 }
 0x248   :  { %vm3229_vm2 = vcmp.gt.f32.partialorder %v5665_v60, 0.0  ;;  %vm3230_vm3 = vcmp.gt.f32.partialorder %v5667_v1, 0.0  ;;  %vm3231_vm4 = vcmp.gt.f32.partialorder %v5669_v6, 0.0  ;;  %vm3232_vm5 = vcmp.gt.f32.partialorder %v5671_v11, 0.0 }
 0x249   :  { %vm3237_vm10 = vcmp.gt.f32.partialorder %v5681_v46, 0.0  ;;  %vm3238_vm11 = vcmp.gt.f32.partialorder %v5683_v14, 0.0  ;;  %vm3243_vm6 = vcmp.gt.f32.partialorder %v5693_v20, 0.0  ;;  %vm3244_vm7 = vcmp.gt.f32.partialorder %v5695_v21, 0.0 }
 0x24a   :  { %v3253_v40 = vmul.f32 0.2, %v3201_v12  ;;  %v3254_v42 = vmul.f32 0.2, %v5663_v47  ;;  %v3255_v45 = vmul.f32 0.2, %v5665_v60 }
 0x24b   :  { %vm3247_vm12 = vcmp.gt.f32.partialorder %v5701_v25, 0.0  ;;  %vm3248_vm13 = vcmp.gt.f32.partialorder %v5703_v27, 0.0  ;;  %vm3249_vm14 = vcmp.gt.f32.partialorder %v5705_v30, 0.0  ;;  %vm3250_vm15 = vcmp.gt.f32.partialorder %v5707_v33, 0.0 }
 0x24c   :  { %v3256_v48 = vmul.f32 0.2, %v5667_v1  ;;  %v3257_v49 = vmul.f32 0.2, %v5669_v6  ;;  %v3258_v50 = vmul.f32 0.2, %v5671_v11  ;;  %v3279_v55 = vsel %vm3227_vm0, %v3201_v12, %v3253_v40 }
 0x24d   :  { %vm3251_vm9 = vcmp.gt.f32.partialorder %v5709_v36, 0.0  ;;  %vm3252_vm8 = vcmp.gt.f32.partialorder %v5711_v37, 0.0  ;;  %v3259_v52 = vmul.f32 0.2, %v5673_v13  ;;  %v3260_v53 = vmul.f32 0.2, %v5675_v24 }
 0x24e   :  { %v3261_v54 = vmul.f32 0.2, %v5677_v31  ;;  %v3262_v56 = vmul.f32 0.2, %v5679_v39  ;;  %v3263_v57 = vmul.f32 0.2, %v5681_v46  ;;  %v3280_v63 = vsel %vm3228_vm1, %v5663_v47, %v3254_v42 }
 0x24f   :  { %v3264_v61 = vmul.f32 0.2, %v5683_v14  ;;  %v3265_v58 = vmul.f32 0.2, %v5685_v16  ;;  %v3266_v62 = vmul.f32 0.2, %v5687_v17  ;;  %v3281_v26 = vsel %vm3229_vm2, %v5665_v60, %v3255_v45 }
 0x250   :  { %v3267_v3 = vmul.f32 0.2, %v5689_v18  ;;  %v3268_v29 = vmul.f32 0.2, %v5691_v19  ;;  %v3269_v4 = vmul.f32 0.2, %v5693_v20  ;;  %v3282_v59 = vsel %vm3230_vm3, %v5667_v1, %v3256_v48 }
 0x251   :  { %v3270_v7 = vmul.f32 0.2, %v5695_v21  ;;  %v3271_v0 = vmul.f32 0.2, %v5697_v22  ;;  %v3272_v8 = vmul.f32 0.2, %v5699_v23  ;;  %v3283_v9 = vsel %vm3231_vm4, %v5669_v6, %v3257_v49 }
 0x252   :  { %v3273_v15 = vmul.f32 0.2, %v5701_v25  ;;  %v3274_v28 = vmul.f32 0.2, %v5703_v27  ;;  %v3275_v34 = vmul.f32 0.2, %v5705_v30  ;;  %v3284_v32 = vsel %vm3232_vm5, %v5671_v11, %v3258_v50 }
 0x253   :  { %v3276_v43 = vmul.f32 0.2, %v5707_v33  ;;  %v3277_v51 = vmul.f32 0.2, %v5709_v36  ;;  %v3278_v2 = vmul.f32 0.2, %v5711_v37  ;;  %v3289_v41 = vsel %vm3237_vm10, %v5681_v46, %v3263_v57 }
 0x254   :  { %vm5883_vm0 = vcmp.gt.f32.partialorder %v5673_v13, 0.0  ;;  %vm5884_vm1 = vcmp.gt.f32.partialorder %v5675_v24, 0.0  ;;  %vm5885_vm2 = vcmp.gt.f32.partialorder %v5677_v31, 0.0  ;;  %vm5886_vm3 = vcmp.gt.f32.partialorder %v5679_v39, 0.0 }
 0x255   :  { %v3285_v5 = vsel %vm5883_vm0, %v5673_v13, %v3259_v52  ;;  %v3286_v10 = vsel %vm5884_vm1, %v5675_v24, %v3260_v53  ;;  %v3287_v35 = vsel %vm5885_vm2, %v5677_v31, %v3261_v54  ;;  %v3288_v38 = vsel %vm5886_vm3, %v5679_v39, %v3262_v56 }
 0x256   :  { %v3290_v44 = vsel %vm3238_vm11, %v5683_v14, %v3264_v61  ;;  %vm5887_vm4 = vcmp.gt.f32.partialorder %v5685_v16, 0.0  ;;  %vm5888_vm5 = vcmp.gt.f32.partialorder %v5687_v17, 0.0  ;;  %vm5889_vm0 = vcmp.gt.f32.partialorder %v5689_v18, 0.0 }
 0x257   :  { %v3291_v12 = vsel %vm5887_vm4, %v5685_v16, %v3265_v58  ;;  %v3292_v47 = vsel %vm5888_vm5, %v5687_v17, %v3266_v62  ;;  %v3293_v60 = vsel %vm5889_vm0, %v5689_v18, %v3267_v3  ;;  %vm5890_vm1 = vcmp.gt.f32.partialorder %v5691_v19, 0.0 }
 0x258   :  { %v3294_v1 = vsel %vm5890_vm1, %v5691_v19, %v3268_v29  ;;  %v3295_v6 = vsel %vm3243_vm6, %v5693_v20, %v3269_v4  ;;  %v3296_v11 = vsel %vm3244_vm7, %v5695_v21, %v3270_v7  ;;  %vm5891_vm10 = vcmp.gt.f32.partialorder %v5697_v22, 0.0 }
 0x259   :  { %v3297_v13 = vsel %vm5891_vm10, %v5697_v22, %v3271_v0  ;;  %vm5892_vm11 = vcmp.gt.f32.partialorder %v5699_v23, 0.0  ;;  %v3299_v31 = vsel %vm3247_vm12, %v5701_v25, %v3273_v15  ;;  %v3300_v39 = vsel %vm3248_vm13, %v5703_v27, %v3274_v28 }
 0x25a   :  { %v3298_v24 = vsel %vm5892_vm11, %v5699_v23, %v3272_v8  ;;  %v3301_v46 = vsel %vm3249_vm14, %v5705_v30, %v3275_v34  ;;  %v3302_v14 = vsel %vm3250_vm15, %v5707_v33, %v3276_v43  ;;  %v3303_v16 = vsel %vm3251_vm9, %v5709_v36, %v3277_v51 }
 0x25b   :  { %v3304_v17 = vsel %vm3252_vm8, %v5711_v37, %v3278_v2  ;;  %v3783_v18 = vpack.c.bf16 %v3280_v63, %v3279_v55  ;;  %v3784_v19 = vpack.c.bf16 %v3282_v59, %v3281_v26  ;;  %v3785_v20 = vpack.c.bf16 %v3284_v32, %v3283_v9 }
 0x25c   :  { %v3786_v21 = vpack.c.bf16 %v3286_v10, %v3285_v5  ;;  %v3787_v22 = vpack.c.bf16 %v3288_v38, %v3287_v35  ;;  %v3788_v23 = vpack.c.bf16 %v3290_v44, %v3289_v41  ;;  %v3789_v25 = vpack.c.bf16 %v3292_v47, %v3291_v12 }
 0x25d   :  { %v3790_v27 = vpack.c.bf16 %v3294_v1, %v3293_v60  ;;  %v3791_v30 = vpack.c.bf16 %v3296_v11, %v3295_v6  ;;  %v3792_v40 = vpack.c.bf16 %v3298_v24, %v3297_v13  ;;  %3385 = vst [vmem:[%s5882_s4] sm:$0xff] %v3783_v18  ;;  %3386 = vst [vmem:[%s5882_s4 + $0x8] sm:$0xff] %v3784_v19 }
 0x25e   :  { %v3793_v33 = vpack.c.bf16 %v3300_v39, %v3299_v31  ;;  %v3794_v36 = vpack.c.bf16 %v3302_v14, %v3301_v46  ;;  %v3795_v37 = vpack.c.bf16 %v3304_v17, %v3303_v16  ;;  %3387 = vst [vmem:[%s5882_s4 + $0x10] sm:$0xff] %v3785_v20  ;;  %3388 = vst [vmem:[%s5882_s4 + $0x18] sm:$0xff] %v3786_v21 }
 0x25f   :  { %3389 = vst [vmem:[%s5882_s4 + $0x20] sm:$0xff] %v3787_v22  ;;  %3390 = vst [vmem:[%s5882_s4 + $0x28] sm:$0xff] %v3788_v23 }
 0x260   :  { %3391 = vst [vmem:[%s5882_s4 + $0x30] sm:$0xff] %v3789_v25  ;;  %3392 = vst [vmem:[%s5882_s4 + $0x38] sm:$0xff] %v3790_v27 }
 0x261   :  { %3393 = vst [vmem:[%s5882_s4 + $0x40] sm:$0xff] %v3791_v30  ;;  %3394 = vst [vmem:[%s5882_s4 + $0x48] sm:$0xff] %v3792_v40 }
 0x262   :  { %3395 = vst [vmem:[%s5882_s4 + $0x50] sm:$0xff] %v3793_v33  ;;  %3396 = vst [vmem:[%s5882_s4 + $0x58] sm:$0xff] %v3794_v36 }
 0x263   :  { %3397 = vst [vmem:[%s5882_s4 + $0x60] sm:$0xff] %v3795_v37 }

// kernel: discriminator_forward.7
= control target key start
LH: loop header
LB: loop body
LE: loop exit
PB: predicated region body
PF: predicated region fallthrough
CT: control target
= control target key end

     0   :  { %v152_v1 = vlaneseq  ;;  %vm874_vm1 = vcmask 7168   ;;  %s1587_s2 = inlined_call_operand.<no memory space> [shape: f32[1,1], index: 2, kind: input, shape index: {}]   ;;  %s1588_s1 = inlined_call_operand.vmem [shape: bf16[1,8192], index: 1, kind: input, shape index: {}]   ;;  %s1589_s0 = inlined_call_operand.vmem [shape: bf16[8,8192], index: 0, kind: input, shape index: {}]   ;;  %s1590_s3 = inlined_call_operand.vmem [shape: f32[8,1], index: 3, kind: output, shape index: {}]  }
   0x1   :  { %v8_v0 = vstv %s1587_s2  ;;  %v117_v2 = vld [vmem:[%s1588_s1 + $0x28] sm:$0xff]  ;;  %v118_v3 = vld [vmem:[%s1588_s1 + $0x30] sm:$0xff]  ;;  %v119_v5 = vld [vmem:[%s1588_s1 + $0x38] sm:$0xff] }
   0x2   :  { %9 = vst [vmem:[#allocation2] sm:$0x1] %v8_v0  ;;  %v153_v4 = vshrl.u32 %v152_v1, 7  ;;  %v917_v6 = vunpack.c.l.bf16 %v117_v2  ;;  %v919_v7 = vunpack.c.h.bf16 %v117_v2  ;;  %v921_v8 = vunpack.c.l.bf16 %v118_v3  ;;  %v972_v32 = vld [vmem:[%s1589_s0] sm:$0xff]  ;;  %v977_v33 = vld [vmem:[%s1589_s0 + $0x8] sm:$0xff]  ;;  %v990_v38 = vld [vmem:[%s1589_s0 + $0x10] sm:$0xff] }
   0x3   :  { %v931_v13 = vunpack.c.h.bf16 %v118_v3  ;;  %v933_v14 = vunpack.c.l.bf16 %v119_v5  ;;  %v935_v15 = vunpack.c.h.bf16 %v119_v5  ;;  %1608 = vst [vmem:[#allocation7_spill] sm:$0xff] %v990_v38  ;;  %v995_v39 = vld [vmem:[%s1589_s0 + $0x88] sm:$0xff]  ;;  %v116_v40 = vld [vmem:[%s1588_s1 + $0x20] sm:$0xff]  ;;  %v1011_v45 = vld [vmem:[%s1589_s0 + $0x90] sm:$0xff] }
   0x4   :  { %v923_v9 = vsub.s32 0, %v153_v4  ;;  %v925_v10 = vsub.s32 2, %v153_v4  ;;  %v927_v11 = vsub.s32 4, %v153_v4  ;;  %v929_v12 = vsub.s32 6, %v153_v4  ;;  %v1016_v46 = vld [vmem:[%s1589_s0 + $0x98] sm:$0xff]  ;;  %v112_v54 = vld [vmem:[%s1588_s1] sm:$0xff] }
   0x5   :  { %v1028_v55 = vunpack.c.l.bf16 %v116_v40  ;;  %v1033_v56 = vld [vmem:[%s1589_s0 + $0xa0] sm:$0xff]  ;;  %v1038_v57 = vld [vmem:[%s1589_s0 + $0xa8] sm:$0xff]  ;;  %v1043_v61 = vunpack.c.h.bf16 %v116_v40  ;;  %v1048_v62 = vld [vmem:[%s1589_s0 + $0xb0] sm:$0xff]  ;;  %v1062_v4 = vunpack.c.l.bf16 %v112_v54  ;;  %v1078_v48 = vunpack.c.h.bf16 %v112_v54 }
   0x6   :  { %1604 = vst [vmem:[#allocation3_spill] sm:$0xff] %v923_v9  ;;  %1605 = vst [vmem:[#allocation4_spill] sm:$0xff] %v925_v10  ;;  %v315_v16 = vrot.slane %v917_v6, %v923_v9  ;;  %v319_v17 = vrot.slane %v917_v6, %v925_v10  ;;  %v323_v18 = vrot.slane %v917_v6, %v927_v11  ;;  %v1053_v63 = vld [vmem:[%s1589_s0 + $0xb8] sm:$0xff]  ;;  %v46_v50 = vld [vmem:[%s1589_s0 + $0xf0] sm:$0xff] }
   0x7   :  { %1606 = vst [vmem:[#allocation5_spill] sm:$0xff] %v927_v11  ;;  %1607 = vst [vmem:[#allocation6_spill] sm:$0xff] %v929_v12  ;;  %v327_v19 = vrot.slane %v917_v6, %v929_v12  ;;  %v331_v20 = vrot.slane %v919_v7, %v923_v9  ;;  %v335_v21 = vrot.slane %v919_v7, %v925_v10 }
   0x8   :  { %v339_v22 = vrot.slane %v919_v7, %v927_v11  ;;  %v343_v23 = vrot.slane %v919_v7, %v929_v12  ;;  %v347_v24 = vrot.slane %v921_v8, %v923_v9  ;;  %v351_v25 = vrot.slane %v921_v8, %v925_v10  ;;  %1609 = vst [vmem:[#allocation8_spill] sm:$0xff] %v1028_v55 }
   0x9   :  { %v355_v26 = vrot.slane %v921_v8, %v927_v11  ;;  %v359_v27 = vrot.slane %v921_v8, %v929_v12  ;;  %v363_v28 = vrot.slane %v931_v13, %v923_v9  ;;  %v367_v29 = vrot.slane %v931_v13, %v925_v10 }
   0xa   :  { %v371_v30 = vrot.slane %v931_v13, %v927_v11  ;;  %v375_v31 = vrot.slane %v931_v13, %v929_v12  ;;  %v379_v34 = vrot.slane %v933_v14, %v923_v9  ;;  %v383_v35 = vrot.slane %v933_v14, %v925_v10 }
   0xb   :  { %v387_v36 = vrot.slane %v933_v14, %v927_v11  ;;  %v391_v37 = vrot.slane %v933_v14, %v929_v12  ;;  %v395_v41 = vrot.slane %v935_v15, %v923_v9  ;;  %v399_v42 = vrot.slane %v935_v15, %v925_v10 }
   0xc   :  { %v403_v43 = vrot.slane %v935_v15, %v927_v11  ;;  %v407_v44 = vrot.slane %v935_v15, %v929_v12  ;;  %v287_v1 = vrot.slane %v1028_v55, %v925_v10  ;;  %v291_v2 = vrot.slane %v1028_v55, %v927_v11  ;;  %v45_v15 = vld [vmem:[%s1589_s0 + $0xe8] sm:$0xff] }
   0xd   :  { %v295_v3 = vrot.slane %v1028_v55, %v929_v12  ;;  %v303_v5 = vrot.slane %v1043_v61, %v925_v10  ;;  %v307_v40 = vrot.slane %v1043_v61, %v927_v11  ;;  %v311_v52 = vrot.slane %v1043_v61, %v929_v12 }
   0xe   :  { %v1081_v47 = vrot.slane %v287_v1, %v923_v9  ;;  %v1084_v51 = vrot.slane %v291_v2, %v923_v9  ;;  %v155_v59 = vrot.slane %v1062_v4, %v923_v9  ;;  %v1104_v1 = vrot.slane %v315_v16, %v923_v9 }
   0xf   :  { %v1087_v0 = vrot.slane %v295_v3, %v923_v9  ;;  %v1092_v58 = vrot.slane %v303_v5, %v923_v9  ;;  %v1095_v53 = vrot.slane %v307_v40, %v923_v9  ;;  %v1098_v54 = vrot.slane %v311_v52, %v923_v9 }
  0x10   :  { %1610 = vst [vmem:[#allocation9_spill] sm:$0xff] %v1081_v47  ;;  %v1110_v2 = vrot.slane %v319_v17, %v923_v9  ;;  %v1116_v3 = vrot.slane %v323_v18, %v923_v9  ;;  %v1122_v52 = vrot.slane %v327_v19, %v923_v9  ;;  %v1128_v16 = vrot.slane %v331_v20, %v923_v9 }
  0x11   :  { %v1134_v17 = vrot.slane %v335_v21, %v923_v9  ;;  %v1140_v18 = vrot.slane %v339_v22, %v923_v9  ;;  %v1146_v6 = vrot.slane %v343_v23, %v923_v9  ;;  %v1152_v19 = vrot.slane %v347_v24, %v923_v9  ;;  %v1175_v22 = vld [vmem:[%s1589_s0 + $0xc0] sm:$0xff] }
  0x12   :  { %v1158_v20 = vrot.slane %v351_v25, %v923_v9  ;;  %v1164_v21 = vrot.slane %v355_v26, %v923_v9  ;;  %v1170_v7 = vrot.slane %v359_v27, %v923_v9  ;;  %v1181_v23 = vrot.slane %v363_v28, %v923_v9  ;;  %v1204_v26 = vld [vmem:[%s1589_s0 + $0xc8] sm:$0xff] }
  0x13   :  { %v1187_v24 = vrot.slane %v367_v29, %v923_v9  ;;  %v1193_v8 = vrot.slane %v371_v30, %v923_v9  ;;  %v1199_v25 = vrot.slane %v375_v31, %v923_v9  ;;  %v1210_v27 = vrot.slane %v379_v34, %v923_v9  ;;  %v1233_v30 = vld [vmem:[%s1589_s0 + $0xd0] sm:$0xff]  ;;  %v1238_v31 = vld [vmem:[%s1589_s0 + $0xd8] sm:$0xff] }
  0x14   :  { %1611 = vst [vmem:[#allocation10_spill] sm:$0xff] %v1181_v23  ;;  %v1216_v28 = vrot.slane %v383_v35, %v923_v9  ;;  %v1222_v13 = vrot.slane %v387_v36, %v923_v9  ;;  %v1228_v29 = vrot.slane %v391_v37, %v923_v9  ;;  %v1244_v34 = vrot.slane %v395_v41, %v923_v9  ;;  %v1267_v37 = vld [vmem:[%s1589_s0 + $0xe0] sm:$0xff] }
  0x15   :  { %1612 = vst [vmem:[#allocation11_spill] sm:$0xff] %v1187_v24  ;;  %1613 = vst [vmem:[#allocation12_spill] sm:$0xff] %v1193_v8  ;;  %v1250_v14 = vrot.slane %v399_v42, %v923_v9  ;;  %v1256_v35 = vrot.slane %v403_v43, %v923_v9  ;;  %v1262_v36 = vrot.slane %v407_v44, %v923_v9  ;;  %v95_v41 = vunpack.c.h.bf16 %v1053_v63 }
  0x16   :  { %1614 = vst [vmem:[#allocation13_spill] sm:$0xff] %v1199_v25  ;;  %1615 = vst [vmem:[#allocation14_spill] sm:$0xff] %v1210_v27  ;;  %v96_v42 = vunpack.c.l.bf16 %v1175_v22  ;;  %v159_v5 = vrot.slane %v1062_v4, %v925_v10  ;;  %v163_v43 = vrot.slane %v1062_v4, %v927_v11  ;;  %v97_v44 = vunpack.c.h.bf16 %v1175_v22  ;;  %v47_v22 = vld [vmem:[%s1589_s0 + $0xf8] sm:$0xff] }
  0x17   :  { %1616 = vst [vmem:[#allocation15_spill] sm:$0xff] %v1216_v28  ;;  %1617 = vst [vmem:[#allocation16_spill] sm:$0xff] %v1222_v13  ;;  %v98_v40 = vunpack.c.l.bf16 %v1204_v26  ;;  %v99_v49 = vunpack.c.h.bf16 %v1204_v26  ;;  %v299_v60 = vrot.slane %v1043_v61, %v923_v9  ;;  %v100_v47 = vunpack.c.l.bf16 %v1233_v30  ;;  %v1297_v61 = vld [vmem:[%s1588_s1 + $0x8] sm:$0xff] }
  0x18   :  { %1618 = vst [vmem:[#allocation17_spill] sm:$0xff] %v1228_v29  ;;  %1619 = vst [vmem:[#allocation18_spill] sm:$0xff] %v1244_v34  ;;  %v101_v55 = vunpack.c.h.bf16 %v1233_v30  ;;  %v102_v38 = vunpack.c.l.bf16 %v1238_v31  ;;  %v104_v26 = vunpack.c.l.bf16 %v1267_v37  ;;  %v171_v30 = vrot.slane %v1078_v48, %v923_v9 }
  0x19   :  { %1620 = vst [vmem:[#allocation19_spill] sm:$0xff] %v1250_v14  ;;  %1621 = vst [vmem:[#allocation20_spill] sm:$0xff] %v1256_v35  ;;  %v167_v35 = vrot.slane %v1062_v4, %v929_v12  ;;  %v475_v14 = vrot.slane %v155_v59, %v923_v9  ;;  %v106_v34 = vunpack.c.l.bf16 %v45_v15  ;;  %v479_v29 = vrot.slane %v159_v5, %v923_v9 }
  0x1a   :  { %1622 = vst [vmem:[#allocation21_spill] sm:$0xff] %v1262_v36  ;;  %v103_v36 = vunpack.c.h.bf16 %v1238_v31  ;;  %1623 = vst [vmem:[#allocation22_spill] sm:$0xff] %v1297_v61  ;;  %v105_v31 = vunpack.c.h.bf16 %v1267_v37  ;;  %v483_v13 = vrot.slane %v163_v43, %v923_v9  ;;  %v107_v28 = vunpack.c.h.bf16 %v45_v15 }
  0x1b   :  { %v108_v27 = vunpack.c.l.bf16 %v46_v50  ;;  %v109_v25 = vunpack.c.h.bf16 %v46_v50  ;;  %v619_v8 = vrot.slane %v299_v60, %v923_v9  ;;  %v110_v24 = vunpack.c.l.bf16 %v47_v22 }
  0x1c   :  { %v111_v23 = vunpack.c.h.bf16 %v47_v22  ;;  %v1309_v4 = vunpack.c.l.bf16 %v1297_v61  ;;  %v175_v59 = vrot.slane %v1078_v48, %v925_v10  ;;  %v179_v37 = vrot.slane %v1078_v48, %v927_v11 }
  0x1d   :  { %v487_v5 = vrot.slane %v167_v35, %v923_v9  ;;  %v491_v43 = vrot.slane %v171_v30, %v923_v9  ;;  %v1625_v15 = vunpack.c.l.bf16 %v972_v32  ;;  %v1626_v60 = vunpack.c.h.bf16 %v972_v32 }
  0x1e   :  { %1624 = vst [vmem:[#allocation23_spill] sm:$0xff] %v1309_v4  ;;  %v1627_v22 = vunpack.c.l.bf16 %v977_v33  ;;  %v1628_v4 = vunpack.c.l.bf16 %v995_v39  ;;  %v1629_v11 = vunpack.c.h.bf16 %v995_v39  ;;  %v1630_v30 = vunpack.c.l.bf16 %v1011_v45 }
  0x1f   :  { %v728_v50 = vmul.f32 %v475_v14, %v1625_v15  ;;  %v729_v12 = vmul.f32 %v479_v29, %v1626_v60  ;;  %v1631_v32 = vunpack.c.h.bf16 %v1011_v45  ;;  %v1635_v45 = vunpack.c.h.bf16 %v1033_v56 }
  0x20   :  { %v730_v61 = vmul.f32 %v483_v13, %v1627_v22  ;;  %v1326_v10 = vmul.f32 %v1084_v51, %v1628_v4  ;;  %v1331_v35 = vmul.f32 %v1087_v0, %v1629_v11  ;;  %v1335_v9 = vmul.f32 %v619_v8, %v1630_v30 }
  0x21   :  { %v1340_v29 = vmul.f32 %v1092_v58, %v1631_v32  ;;  %v1632_v13 = vunpack.c.l.bf16 %v1016_v46  ;;  %v1633_v51 = vunpack.c.h.bf16 %v1016_v46  ;;  %v1634_v11 = vunpack.c.l.bf16 %v1033_v56 }
  0x22   :  { %v1360_v58 = vmul.f32 %v1110_v2, %v1635_v45  ;;  %v1636_v8 = vunpack.c.l.bf16 %v1038_v57  ;;  %v1637_v46 = vunpack.c.h.bf16 %v1038_v57  ;;  %v1638_v4 = vunpack.c.l.bf16 %v1048_v62 }
  0x23   :  { %v1345_v14 = vmul.f32 %v1095_v53, %v1632_v13  ;;  %v1350_v39 = vmul.f32 %v1098_v54, %v1633_v51  ;;  %v1355_v0 = vmul.f32 %v1104_v1, %v1634_v11  ;;  %v1639_v56 = vunpack.c.h.bf16 %v1048_v62  ;;  %v1651_v51 = vld [vmem:[#allocation20_spill] sm:$0xff] }
  0x24   :  { %v1365_v53 = vmul.f32 %v1116_v3, %v1636_v8  ;;  %v1370_v54 = vmul.f32 %v1122_v52, %v1637_v46  ;;  %v1375_v1 = vmul.f32 %v1128_v16, %v1638_v4  ;;  %v1640_v15 = vunpack.c.l.bf16 %v1053_v63 }
  0x25   :  { %v1380_v2 = vmul.f32 %v1134_v17, %v1639_v56  ;;  %v1388_v57 = vmul.f32 %v1146_v6, %v95_v41  ;;  %v1391_v52 = vmul.f32 %v1152_v19, %v96_v42  ;;  %v1394_v60 = vmul.f32 %v1158_v20, %v97_v44  ;;  %v1641_v17 = vld [vmem:[#allocation10_spill] sm:$0xff]  ;;  %v1643_v6 = vld [vmem:[#allocation12_spill] sm:$0xff]  ;;  %v1644_v19 = vld [vmem:[#allocation13_spill] sm:$0xff] }
  0x26   :  { %v1385_v3 = vmul.f32 %v1140_v18, %v1640_v15  ;;  %v1397_v16 = vmul.f32 %v1164_v21, %v98_v40  ;;  %v1400_v62 = vmul.f32 %v1170_v7, %v99_v49  ;;  %v1403_v63 = vmul.f32 %v1641_v17, %v100_v47  ;;  %v1642_v18 = vld [vmem:[#allocation11_spill] sm:$0xff]  ;;  %v19_v20 = vld [vmem:[%s1589_s0 + $0x18] sm:$0xff]  ;;  %v1647_v47 = vld [vmem:[#allocation16_spill] sm:$0xff] }
  0x27   :  { %v1406_v22 = vmul.f32 %v1642_v18, %v101_v55  ;;  %v1409_v41 = vmul.f32 %v1643_v6, %v102_v38  ;;  %v1412_v42 = vmul.f32 %v1644_v19, %v103_v36  ;;  %v1645_v21 = vld [vmem:[#allocation14_spill] sm:$0xff]  ;;  %v1646_v49 = vld [vmem:[#allocation15_spill] sm:$0xff]  ;;  %v1424_v40 = vmul.f32 %v1647_v47, %v106_v34  ;;  %v1648_v55 = vld [vmem:[#allocation17_spill] sm:$0xff] }
  0x28   :  { %v1418_v44 = vmul.f32 %v1645_v21, %v104_v26  ;;  %v1421_v7 = vmul.f32 %v1646_v49, %v105_v31  ;;  %v1427_v30 = vmul.f32 %v1648_v55, %v107_v28  ;;  %v1649_v38 = vld [vmem:[#allocation18_spill] sm:$0xff]  ;;  %v1650_v36 = vld [vmem:[#allocation19_spill] sm:$0xff]  ;;  %v1436_v11 = vmul.f32 %v1651_v51, %v110_v24  ;;  %v1652_v26 = vld [vmem:[#allocation21_spill] sm:$0xff] }
  0x29   :  { %v1430_v32 = vmul.f32 %v1649_v38, %v108_v27  ;;  %v1433_v13 = vmul.f32 %v1650_v36, %v109_v25  ;;  %v1439_v45 = vmul.f32 %v1652_v26, %v111_v23  ;;  %v1653_v31 = vld [vmem:[#allocation6_spill] sm:$0xff]  ;;  %v1654_v34 = vld [vmem:[#allocation3_spill] sm:$0xff]  ;;  %v1655_v28 = vunpack.c.h.bf16 %v977_v33  ;;  %v1662_v38 = vld [vmem:[#allocation5_spill] sm:$0xff] }
  0x2a   :  { %v183_v8 = vrot.slane %v1078_v48, %v1653_v31  ;;  %v495_v46 = vrot.slane %v175_v59, %v1654_v34  ;;  %v792_v56 = vadd.f32 %v729_v12, %v728_v50  ;;  %v54_v27 = vunpack.c.l.bf16 %v19_v20  ;;  %v20_v25 = vld [vmem:[%s1589_s0 + $0x20] sm:$0xff]  ;;  %v1659_v59 = vld [vmem:[#allocation4_spill] sm:$0xff] }
  0x2b   :  { %v731_v4 = vmul.f32 %v487_v5, %v1655_v28  ;;  %v1656_v24 = vld [vmem:[#allocation23_spill] sm:$0xff]  ;;  %v499_v23 = vrot.slane %v179_v37, %v1654_v34  ;;  %v55_v19 = vunpack.c.h.bf16 %v19_v20  ;;  %v56_v49 = vunpack.c.l.bf16 %v20_v25  ;;  %v1661_v47 = vld [vmem:[#allocation22_spill] sm:$0xff] }
  0x2c   :  { %v187_v15 = vrot.slane %v1656_v24, %v1654_v34  ;;  %v1657_v17 = vld [vmem:[#allocation7_spill] sm:$0xff]  ;;  %v793_v48 = vadd.f32 %v792_v56, %v730_v61  ;;  %v191_v33 = vrot.slane %v1656_v24, %v1659_v59  ;;  %v503_v12 = vrot.slane %v183_v8, %v1654_v34  ;;  %v22_v56 = vld [vmem:[%s1589_s0 + $0x30] sm:$0xff] }
  0x2d   :  { %v1658_v18 = vunpack.c.l.bf16 %v1657_v17  ;;  %v1660_v5 = vunpack.c.h.bf16 %v1657_v17  ;;  %v123_v55 = vunpack.c.h.bf16 %v1661_v47  ;;  %v21_v37 = vld [vmem:[%s1589_s0 + $0x28] sm:$0xff]  ;;  %v195_v61 = vrot.slane %v1656_v24, %v1662_v38  ;;  %v114_v17 = vld [vmem:[%s1588_s1 + $0x10] sm:$0xff] }
  0x2e   :  { %v794_v21 = vadd.f32 %v793_v48, %v731_v4  ;;  %v734_v20 = vmul.f32 %v499_v23, %v54_v27  ;;  %v57_v51 = vunpack.c.h.bf16 %v20_v25  ;;  %v199_v26 = vrot.slane %v1656_v24, %v1653_v31 }
  0x2f   :  { %v732_v6 = vmul.f32 %v491_v43, %v1658_v18  ;;  %v733_v50 = vmul.f32 %v495_v46, %v1660_v5  ;;  %v507_v43 = vrot.slane %v187_v15, %v1654_v34  ;;  %v511_v8 = vrot.slane %v191_v33, %v1654_v34  ;;  %v23_v5 = vld [vmem:[%s1589_s0 + $0x38] sm:$0xff] }
  0x30   :  { %v735_v46 = vmul.f32 %v503_v12, %v55_v19  ;;  %v58_v4 = vunpack.c.l.bf16 %v21_v37  ;;  %v203_v27 = vrot.slane %v123_v55, %v1654_v34  ;;  %v515_v25 = vrot.slane %v195_v61, %v1654_v34 }
  0x31   :  { %v795_v36 = vadd.f32 %v794_v21, %v732_v6  ;;  %v736_v15 = vmul.f32 %v507_v43, %v56_v49  ;;  %v59_v24 = vunpack.c.h.bf16 %v21_v37  ;;  %v207_v18 = vrot.slane %v123_v55, %v1659_v59 }
  0x32   :  { %v519_v6 = vrot.slane %v199_v26, %v1654_v34  ;;  %v737_v48 = vmul.f32 %v511_v8, %v57_v51  ;;  %v60_v33 = vunpack.c.l.bf16 %v22_v56  ;;  %v124_v12 = vunpack.c.l.bf16 %v114_v17  ;;  %v24_v26 = vld [vmem:[%s1589_s0 + $0x40] sm:$0xff] }
  0x33   :  { %v796_v28 = vadd.f32 %v795_v36, %v733_v50  ;;  %v211_v50 = vrot.slane %v123_v55, %v1662_v38  ;;  %v523_v21 = vrot.slane %v203_v27, %v1654_v34  ;;  %v738_v47 = vmul.f32 %v515_v25, %v58_v4 }
  0x34   :  { %v61_v61 = vunpack.c.h.bf16 %v22_v56  ;;  %v215_v37 = vrot.slane %v123_v55, %v1653_v31  ;;  %v527_v43 = vrot.slane %v207_v18, %v1654_v34  ;;  %v62_v51 = vunpack.c.l.bf16 %v23_v5  ;;  %v25_v18 = vld [vmem:[%s1589_s0 + $0x48] sm:$0xff] }
  0x35   :  { %v797_v23 = vadd.f32 %v796_v28, %v734_v20  ;;  %v739_v20 = vmul.f32 %v519_v6, %v59_v24  ;;  %v219_v8 = vrot.slane %v124_v12, %v1654_v34  ;;  %v740_v28 = vmul.f32 %v523_v21, %v60_v33 }
  0x36   :  { %v63_v4 = vunpack.c.h.bf16 %v23_v5  ;;  %v223_v56 = vrot.slane %v124_v12, %v1659_v59  ;;  %v535_v55 = vrot.slane %v215_v37, %v1654_v34  ;;  %v741_v25 = vmul.f32 %v527_v43, %v61_v61  ;;  %v115_v37 = vld [vmem:[%s1588_s1 + $0x18] sm:$0xff] }
  0x37   :  { %v798_v19 = vadd.f32 %v797_v23, %v735_v46  ;;  %v531_v46 = vrot.slane %v211_v50, %v1654_v34  ;;  %v64_v23 = vunpack.c.l.bf16 %v24_v26  ;;  %v125_v24 = vunpack.c.h.bf16 %v114_v17  ;;  %v26_v17 = vld [vmem:[%s1589_s0 + $0x50] sm:$0xff] }
  0x38   :  { %v227_v6 = vrot.slane %v124_v12, %v1662_v38  ;;  %v65_v50 = vunpack.c.h.bf16 %v24_v26  ;;  %v231_v5 = vrot.slane %v124_v12, %v1653_v31  ;;  %v543_v21 = vrot.slane %v223_v56, %v1654_v34  ;;  %v27_v56 = vld [vmem:[%s1589_s0 + $0x58] sm:$0xff] }
  0x39   :  { %v799_v49 = vadd.f32 %v798_v19, %v736_v15  ;;  %v742_v19 = vmul.f32 %v531_v46, %v62_v51  ;;  %v66_v61 = vunpack.c.l.bf16 %v25_v18  ;;  %v235_v43 = vrot.slane %v125_v24, %v1654_v34 }
  0x3a   :  { %v67_v12 = vunpack.c.h.bf16 %v25_v18  ;;  %v239_v26 = vrot.slane %v125_v24, %v1659_v59  ;;  %v745_v46 = vmul.f32 %v543_v21, %v65_v50  ;;  %v247_v18 = vrot.slane %v125_v24, %v1653_v31 }
  0x3b   :  { %v800_v36 = vadd.f32 %v799_v49, %v737_v48  ;;  %v539_v48 = vrot.slane %v219_v8, %v1654_v34  ;;  %v551_v8 = vrot.slane %v231_v5, %v1654_v34  ;;  %v70_v50 = vunpack.c.l.bf16 %v27_v56  ;;  %v28_v5 = vld [vmem:[%s1589_s0 + $0x60] sm:$0xff] }
  0x3d   :  { %v801_v27 = vadd.f32 %v800_v36, %v738_v47  ;;  %v743_v47 = vmul.f32 %v535_v55, %v63_v4  ;;  %v744_v36 = vmul.f32 %v539_v48, %v64_v23  ;;  %v126_v4 = vunpack.c.l.bf16 %v115_v37 }
  0x3e   :  { %v243_v55 = vrot.slane %v125_v24, %v1662_v38  ;;  %v559_v48 = vrot.slane %v239_v26, %v1654_v34  ;;  %v567_v24 = vrot.slane %v247_v18, %v1654_v34  ;;  %v29_v26 = vld [vmem:[%s1589_s0 + $0x68] sm:$0xff] }
  0x3f   :  { %v802_v15 = vadd.f32 %v801_v27, %v739_v20  ;;  %v547_v20 = vrot.slane %v227_v6, %v1654_v34  ;;  %v68_v27 = vunpack.c.l.bf16 %v26_v17  ;;  %v69_v6 = vunpack.c.h.bf16 %v26_v17 }
  0x40   :  { %v251_v21 = vrot.slane %v126_v4, %v1654_v34  ;;  %v255_v17 = vrot.slane %v126_v4, %v1659_v59 }
  0x41   :  { %v803_v33 = vadd.f32 %v802_v15, %v740_v28  ;;  %v746_v15 = vmul.f32 %v547_v20, %v66_v61  ;;  %v71_v61 = vunpack.c.h.bf16 %v27_v56  ;;  %v749_v20 = vmul.f32 %v559_v48, %v69_v6 }
  0x42   :  { %v263_v56 = vrot.slane %v126_v4, %v1653_v31  ;;  %v74_v6 = vunpack.c.l.bf16 %v29_v26 }
  0x43   :  { %v804_v49 = vadd.f32 %v803_v33, %v741_v25  ;;  %v555_v25 = vrot.slane %v235_v43, %v1654_v34 }
  0x45   :  { %v805_v51 = vadd.f32 %v804_v49, %v742_v19  ;;  %v747_v19 = vmul.f32 %v551_v8, %v67_v12  ;;  %v748_v49 = vmul.f32 %v555_v25, %v68_v27  ;;  %v127_v12 = vunpack.c.h.bf16 %v115_v37  ;;  %v30_v37 = vld [vmem:[%s1589_s0 + $0x70] sm:$0xff] }
  0x46   :  { %v259_v8 = vrot.slane %v126_v4, %v1662_v38  ;;  %v575_v25 = vrot.slane %v255_v17, %v1654_v34  ;;  %v583_v4 = vrot.slane %v263_v56, %v1654_v34 }
  0x47   :  { %v806_v28 = vadd.f32 %v805_v51, %v743_v47  ;;  %v563_v47 = vrot.slane %v243_v55, %v1654_v34  ;;  %v72_v51 = vunpack.c.l.bf16 %v28_v5  ;;  %v73_v55 = vunpack.c.h.bf16 %v28_v5 }
  0x48   :  { %v267_v18 = vrot.slane %v127_v12, %v1654_v34  ;;  %v579_v48 = vrot.slane %v259_v8, %v1654_v34  ;;  %v271_v5 = vrot.slane %v127_v12, %v1659_v59 }
  0x49   :  { %v807_v23 = vadd.f32 %v806_v28, %v744_v36  ;;  %v750_v28 = vmul.f32 %v563_v47, %v70_v50  ;;  %v75_v50 = vunpack.c.h.bf16 %v29_v26 }
  0x4a   :  { %v587_v17 = vrot.slane %v267_v18, %v1654_v34  ;;  %v591_v59 = vrot.slane %v271_v5, %v1654_v34 }
  0x4b   :  { %v808_v33 = vadd.f32 %v807_v23, %v745_v46  ;;  %v571_v46 = vrot.slane %v251_v21, %v1654_v34  ;;  %v753_v21 = vmul.f32 %v575_v25, %v73_v55  ;;  %v755_v26 = vmul.f32 %v583_v4, %v75_v50 }
  0x4d   :  { %v809_v43 = vadd.f32 %v808_v33, %v746_v15  ;;  %v751_v15 = vmul.f32 %v567_v24, %v71_v61  ;;  %v275_v61 = vrot.slane %v127_v12, %v1662_v38  ;;  %v754_v24 = vmul.f32 %v579_v48, %v74_v6  ;;  %v32_v38 = vld [vmem:[%s1589_s0 + $0x80] sm:$0xff] }
  0x4e   :  { %v80_v6 = vunpack.c.l.bf16 %v32_v38 }
  0x4f   :  { %v810_v36 = vadd.f32 %v809_v43, %v747_v19  ;;  %v752_v19 = vmul.f32 %v571_v46, %v72_v51  ;;  %v31_v43 = vld [vmem:[%s1589_s0 + $0x78] sm:$0xff]  ;;  %v279_v51 = vrot.slane %v127_v12, %v1653_v31  ;;  %v595_v55 = vrot.slane %v275_v61, %v1654_v34 }
  0x50   :  { %v78_v46 = vunpack.c.l.bf16 %v31_v43 }
  0x51   :  { %v811_v27 = vadd.f32 %v810_v36, %v748_v49  ;;  %v76_v49 = vunpack.c.l.bf16 %v30_v37  ;;  %v77_v36 = vunpack.c.h.bf16 %v30_v37 }
  0x52   :  { %v758_v18 = vmul.f32 %v595_v55, %v78_v46 }
  0x53   :  { %v812_v23 = vadd.f32 %v811_v27, %v749_v20  ;;  %v756_v56 = vmul.f32 %v587_v17, %v76_v49  ;;  %v757_v31 = vmul.f32 %v591_v59, %v77_v36 }
  0x55   :  { %v813_v33 = vadd.f32 %v812_v23, %v750_v28  ;;  %v1663_v28 = vld [vmem:[#allocation8_spill] sm:$0xff]  ;;  %v599_v23 = vrot.slane %v279_v51, %v1654_v34 }
  0x56   :  { %v283_v27 = vrot.slane %v1663_v28, %v1654_v34 }
  0x57   :  { %v814_v47 = vadd.f32 %v813_v33, %v751_v15  ;;  %v79_v15 = vunpack.c.h.bf16 %v31_v43 }
  0x58   :  { %v603_v37 = vrot.slane %v283_v27, %v1654_v34 }
  0x59   :  { %v815_v20 = vadd.f32 %v814_v47, %v752_v19  ;;  %v81_v19 = vunpack.c.h.bf16 %v32_v38  ;;  %v759_v33 = vmul.f32 %v599_v23, %v79_v15 }
  0x5a   :  { %v760_v5 = vmul.f32 %v603_v37, %v80_v6 }
  0x5b   :  { %v816_v8 = vadd.f32 %v815_v20, %v753_v21  ;;  %v1664_v21 = vld [vmem:[#allocation9_spill] sm:$0xff] }
  0x5c   :  { %v761_v47 = vmul.f32 %v1664_v21, %v81_v19 }
  0x5d   :  { %v817_v25 = vadd.f32 %v816_v8, %v754_v24 }
  0x5f   :  { %v818_v12 = vadd.f32 %v817_v25, %v755_v26 }
  0x61   :  { %v819_v48 = vadd.f32 %v818_v12, %v756_v56 }
  0x63   :  { %v820_v50 = vadd.f32 %v819_v48, %v757_v31 }
  0x65   :  { %v821_v4 = vadd.f32 %v820_v50, %v758_v18 }
  0x67   :  { %v822_v49 = vadd.f32 %v821_v4, %v759_v33 }
  0x69   :  { %v823_v61 = vadd.f32 %v822_v49, %v760_v5 }
  0x6b   :  { %v824_v17 = vadd.f32 %v823_v61, %v761_v47 }
  0x6d   :  { %v825_v43 = vadd.f32 %v824_v17, %v1326_v10 }
  0x6f   :  { %v826_v24 = vadd.f32 %v825_v43, %v1331_v35 }
  0x71   :  { %v827_v20 = vadd.f32 %v826_v24, %v1335_v9 }
  0x73   :  { %v828_v34 = vadd.f32 %v827_v20, %v1340_v29 }
  0x75   :  { %v829_v36 = vadd.f32 %v828_v34, %v1345_v14 }
  0x77   :  { %v830_v51 = vadd.f32 %v829_v36, %v1350_v39 }
  0x79   :  { %v831_v59 = vadd.f32 %v830_v51, %v1355_v0 }
  0x7b   :  { %v832_v26 = vadd.f32 %v831_v59, %v1360_v58 }
  0x7d   :  { %v833_v8 = vadd.f32 %v832_v26, %v1365_v53 }
  0x7f   :  { %v834_v46 = vadd.f32 %v833_v8, %v1370_v54 }
  0x81   :  { %v835_v10 = vadd.f32 %v834_v46, %v1375_v1 }
  0x83   :  { %v836_v35 = vadd.f32 %v835_v10, %v1380_v2 }
  0x85   :  { %v837_v9 = vadd.f32 %v836_v35, %v1385_v3 }
  0x87   :  { %v838_v29 = vadd.f32 %v837_v9, %v1388_v57 }
  0x89   :  { %v839_v14 = vadd.f32 %v838_v29, %v1391_v52 }
  0x8b   :  { %v840_v39 = vadd.f32 %v839_v14, %v1394_v60 }
  0x8d   :  { %v841_v0 = vadd.f32 %v840_v39, %v1397_v16 }
  0x8f   :  { %v842_v58 = vadd.f32 %v841_v0, %v1400_v62 }
  0x91   :  { %v843_v53 = vadd.f32 %v842_v58, %v1403_v63 }
  0x93   :  { %v844_v54 = vadd.f32 %v843_v53, %v1406_v22 }
  0x95   :  { %v845_v1 = vadd.f32 %v844_v54, %v1409_v41  ;;  %v880_v41 = vld [vmem:[#allocation2] ss:$0 sm:$0xff] }
  0x97   :  { %v846_v2 = vadd.f32 %v845_v1, %v1412_v42 }
  0x99   :  { %v847_v3 = vadd.f32 %v846_v2, %v1418_v44 }
  0x9b   :  { %v848_v57 = vadd.f32 %v847_v3, %v1421_v7 }
  0x9d   :  { %v849_v52 = vadd.f32 %v848_v57, %v1424_v40 }
  0x9f   :  { %v850_v60 = vadd.f32 %v849_v52, %v1427_v30 }
  0xa1   :  { %v851_v16 = vadd.f32 %v850_v60, %v1430_v32 }
  0xa3   :  { %v852_v62 = vadd.f32 %v851_v16, %v1433_v13 }
  0xa5   :  { %v853_v63 = vadd.f32 %v852_v62, %v1436_v11 }
  0xa7   :  { %v854_v22 = vadd.f32 %v853_v63, %v1439_v45 }
  0xa9   :  { %855 = vadd.xlane.f32.xlu0 %v854_v22 }
 0x136   :  { %v856_v28 = vpop.xlane.xlu0 %855 }
 0x137   :  { %v864_v42 = vadd.f32 %v880_v41, %v856_v28 }
 0x139   :  { %vm865_vm0 = vcmp.gt.f32.partialorder %v864_v42, 0.0  ;;  %v866_v44 = vmul.f32 0.2, %v864_v42 }
 0x13b   :  { %v867_v27 = vsel %vm865_vm0, %v864_v42, %v866_v44 }
 0x13c   :  { %v868_v7 = vsub.f32 0.0, %v867_v27 }
 0x13e   :  { %v869_v55 = vmul.f32 1.442695, %v868_v7 }
 0x140   :  { %881 = vpow2.f32 %v869_v55 }
 0x14a   :  { %v882_v40 = vpop.eup %881 }
 0x14b   :  { %v871_v30 = vadd.f32 1.0, %v882_v40 }
 0x14d   :  { %883 = vrcp.f32 %v871_v30 }
 0x157   :  { %v884_v32 = vpop.eup %883 }
 0x158   :  { %875 = vst.msk [vmem:[%s1590_s3] sm:$0xff] %vm874_vm1, %v884_v32 }

// kernel: discriminator_forward.6
= control target key start
LH: loop header
LB: loop body
LE: loop exit
PB: predicated region body
PF: predicated region fallthrough
CT: control target
= control target key end

     0   :  { %s15042_s1 = inlined_call_operand.vmem [shape: bf16[4096,512], index: 1, kind: input, shape index: {}]   ;;  %s15043_s0 = inlined_call_operand.vmem [shape: bf16[32,4096], index: 0, kind: input, shape index: {}]   ;;  %s15044_s2 = inlined_call_operand.vmem [shape: f32[1,512], index: 2, kind: input, shape index: {}]   ;;  %s15045_s3 = inlined_call_operand.vmem [shape: f32[1,512], index: 3, kind: input, shape index: {}]   ;;  %s15046_s4 = inlined_call_operand.vmem [shape: bf16[32,512], index: 4, kind: output, shape index: {}]  }
   0x1   :  { %v9946_v0 = vld [vmem:[%s15042_s1 + $0x4] ss:$16 sps:$4 sm:$0xff]   ;;  %v9948_v1 = vld [vmem:[%s15042_s1 + $0xc] ss:$16 sps:$4 sm:$0xff]   ;;  %v9950_v2 = vld [vmem:[%s15042_s1] ss:$16 sps:$4 sm:$0xff]  }
   0x2   :  { %6545 = vmatprep.subr.bf16.mxu0 %v9946_v0  ;;  %v9951_v3 = vld [vmem:[%s15042_s1 + $0x8] ss:$16 sps:$4 sm:$0xff]   ;;  %7393 = vmatprep.subr.bf16.mxu1 %v9948_v1  ;;  %v9952_v4 = vld [vmem:[%s15042_s1 + $0x24] ss:$16 sps:$4 sm:$0xff]   ;;  %v9954_v5 = vld [vmem:[%s15042_s1 + $0x2c] ss:$16 sps:$4 sm:$0xff]  }
   0x3   :  { %6546 = vmatpush1.bf16.msra.mxu0 %v9950_v2  ;;  %7394 = vmatpush1.bf16.msra.mxu1 %v9951_v3  ;;  %v9956_v6 = vld [vmem:[%s15042_s1 + $0x20] ss:$16 sps:$4 sm:$0xff]   ;;  %v9957_v7 = vld [vmem:[%s15042_s1 + $0x28] ss:$16 sps:$4 sm:$0xff]   ;;  %v9958_v8 = vld [vmem:[%s15042_s1 + $0x44] ss:$16 sps:$4 sm:$0xff]  }
   0x4   :  { %6547 = vmatprep.subr.bf16.mxu0 %v9952_v4  ;;  %7395 = vmatprep.subr.bf16.mxu1 %v9954_v5  ;;  %v9960_v9 = vld [vmem:[%s15042_s1 + $0x4c] ss:$16 sps:$4 sm:$0xff]   ;;  %v9962_v10 = vld [vmem:[%s15042_s1 + $0x40] ss:$16 sps:$4 sm:$0xff]   ;;  %v9963_v11 = vld [vmem:[%s15042_s1 + $0x48] ss:$16 sps:$4 sm:$0xff]  }
   0x5   :  { %v9964_v12 = vld [vmem:[%s15042_s1 + $0x64] ss:$16 sps:$4 sm:$0xff]   ;;  %v9966_v13 = vld [vmem:[%s15042_s1 + $0x6c] ss:$16 sps:$4 sm:$0xff]   ;;  %v9968_v14 = vld [vmem:[%s15042_s1 + $0x60] ss:$16 sps:$4 sm:$0xff]  }
   0x6   :  { %v9969_v15 = vld [vmem:[%s15042_s1 + $0x68] ss:$16 sps:$4 sm:$0xff]   ;;  %v9970_v16 = vld [vmem:[%s15042_s1 + $0x84] ss:$16 sps:$4 sm:$0xff]   ;;  %v9972_v17 = vld [vmem:[%s15042_s1 + $0x8c] ss:$16 sps:$4 sm:$0xff]  }
   0x7   :  { %6548 = vmatpush1.bf16.msra.mxu0 %v9956_v6  ;;  %7396 = vmatpush1.bf16.msra.mxu1 %v9957_v7  ;;  %v9974_v18 = vld [vmem:[%s15042_s1 + $0x80] ss:$16 sps:$4 sm:$0xff]   ;;  %v9975_v19 = vld [vmem:[%s15042_s1 + $0x88] ss:$16 sps:$4 sm:$0xff]   ;;  %v9976_v20 = vld [vmem:[%s15042_s1 + $0xa4] ss:$16 sps:$4 sm:$0xff]  }
   0x8   :  { %6549 = vmatprep.subr.bf16.mxu0 %v9958_v8  ;;  %7397 = vmatprep.subr.bf16.mxu1 %v9960_v9  ;;  %v9978_v21 = vld [vmem:[%s15042_s1 + $0xac] ss:$16 sps:$4 sm:$0xff]   ;;  %v9980_v22 = vld [vmem:[%s15042_s1 + $0xa0] ss:$16 sps:$4 sm:$0xff]   ;;  %v9981_v23 = vld [vmem:[%s15042_s1 + $0xa8] ss:$16 sps:$4 sm:$0xff]  }
   0x9   :  { %v9982_v24 = vld [vmem:[%s15042_s1 + $0xc4] ss:$16 sps:$4 sm:$0xff]   ;;  %v9984_v25 = vld [vmem:[%s15042_s1 + $0xcc] ss:$16 sps:$4 sm:$0xff]   ;;  %v9986_v26 = vld [vmem:[%s15042_s1 + $0xc0] ss:$16 sps:$4 sm:$0xff]  }
   0xa   :  { %v9987_v27 = vld [vmem:[%s15042_s1 + $0xc8] ss:$16 sps:$4 sm:$0xff]   ;;  %v9988_v28 = vld [vmem:[%s15042_s1 + $0xe4] ss:$16 sps:$4 sm:$0xff]   ;;  %v9990_v29 = vld [vmem:[%s15042_s1 + $0xec] ss:$16 sps:$4 sm:$0xff]  }
   0xb   :  { %6550 = vmatpush1.bf16.msra.mxu0 %v9962_v10  ;;  %7398 = vmatpush1.bf16.msra.mxu1 %v9963_v11  ;;  %v9992_v30 = vld [vmem:[%s15042_s1 + $0xe0] ss:$16 sps:$4 sm:$0xff]   ;;  %v9993_v31 = vld [vmem:[%s15042_s1 + $0xe8] ss:$16 sps:$4 sm:$0xff]   ;;  %v9994_v32 = vld [vmem:[%s15042_s1 + $0x104] ss:$16 sps:$4 sm:$0xff]  }
   0xc   :  { %6551 = vmatprep.subr.bf16.mxu0 %v9964_v12  ;;  %7399 = vmatprep.subr.bf16.mxu1 %v9966_v13  ;;  %v9996_v33 = vld [vmem:[%s15042_s1 + $0x10c] ss:$16 sps:$4 sm:$0xff]   ;;  %v9998_v34 = vld [vmem:[%s15042_s1 + $0x100] ss:$16 sps:$4 sm:$0xff]   ;;  %v9999_v35 = vld [vmem:[%s15042_s1 + $0x108] ss:$16 sps:$4 sm:$0xff]  }
   0xd   :  { %v10000_v36 = vld [vmem:[%s15042_s1 + $0x124] ss:$16 sps:$4 sm:$0xff]   ;;  %v10002_v37 = vld [vmem:[%s15042_s1 + $0x12c] ss:$16 sps:$4 sm:$0xff]   ;;  %v10004_v38 = vld [vmem:[%s15042_s1 + $0x120] ss:$16 sps:$4 sm:$0xff]  }
   0xe   :  { %v10005_v39 = vld [vmem:[%s15042_s1 + $0x128] ss:$16 sps:$4 sm:$0xff]   ;;  %v10006_v40 = vld [vmem:[%s15042_s1 + $0x144] ss:$16 sps:$4 sm:$0xff]   ;;  %v10008_v41 = vld [vmem:[%s15042_s1 + $0x14c] ss:$16 sps:$4 sm:$0xff]  }
   0xf   :  { %6552 = vmatpush1.bf16.msra.mxu0 %v9968_v14  ;;  %7400 = vmatpush1.bf16.msra.mxu1 %v9969_v15  ;;  %v10010_v42 = vld [vmem:[%s15042_s1 + $0x140] ss:$16 sps:$4 sm:$0xff]   ;;  %v10011_v43 = vld [vmem:[%s15042_s1 + $0x148] ss:$16 sps:$4 sm:$0xff]   ;;  %v10012_v44 = vld [vmem:[%s15042_s1 + $0x164] ss:$16 sps:$4 sm:$0xff]  }
  0x10   :  { %6553 = vmatprep.subr.bf16.mxu0 %v9970_v16  ;;  %7401 = vmatprep.subr.bf16.mxu1 %v9972_v17  ;;  %v10014_v45 = vld [vmem:[%s15042_s1 + $0x16c] ss:$16 sps:$4 sm:$0xff]   ;;  %v17_v46 = vld [vmem:[%s15043_s0] sm:$0xff]  ;;  %v10017_v49 = vld [vmem:[%s15042_s1 + $0x168] ss:$16 sps:$4 sm:$0xff]  }
  0x11   :  { %v33_v47 = vld [vmem:[%s15043_s0 + $0x80] sm:$0xff]  ;;  %v10020_v52 = vld [vmem:[%s15042_s1 + $0x18c] ss:$16 sps:$4 sm:$0xff]   ;;  %v10023_v54 = vld [vmem:[%s15042_s1 + $0x188] ss:$16 sps:$4 sm:$0xff]  }
  0x12   :  { %v10016_v48 = vld [vmem:[%s15042_s1 + $0x160] ss:$16 sps:$4 sm:$0xff]   ;;  %v8602_v50 = vcombine.high %v17_v46, %v33_v47  ;;  %v10018_v51 = vld [vmem:[%s15042_s1 + $0x184] ss:$16 sps:$4 sm:$0xff]   ;;  %v10026_v56 = vld [vmem:[%s15042_s1 + $0x1ac] ss:$16 sps:$4 sm:$0xff]   ;;  %v8601_v5 = vcombine.low %v17_v46, %v33_v47 }
  0x13   :  { %6554 = vmatpush1.bf16.msra.mxu0 %v9974_v18  ;;  %7402 = vmatpush1.bf16.msra.mxu1 %v9975_v19  ;;  %v10022_v53 = vld [vmem:[%s15042_s1 + $0x180] ss:$16 sps:$4 sm:$0xff]   ;;  %v10024_v55 = vld [vmem:[%s15042_s1 + $0x1a4] ss:$16 sps:$4 sm:$0xff]   ;;  %v10029_v58 = vld [vmem:[%s15042_s1 + $0x1a8] ss:$16 sps:$4 sm:$0xff]  }
  0x14   :  { %6555 = vmatprep.subr.bf16.mxu0 %v9976_v20  ;;  %7403 = vmatprep.subr.bf16.mxu1 %v9978_v21  ;;  %v10028_v57 = vld [vmem:[%s15042_s1 + $0x1a0] ss:$16 sps:$4 sm:$0xff]   ;;  %v10030_v59 = vld [vmem:[%s15042_s1 + $0x1c4] ss:$16 sps:$4 sm:$0xff]   ;;  %v10032_v60 = vld [vmem:[%s15042_s1 + $0x1cc] ss:$16 sps:$4 sm:$0xff]  }
  0x15   :  { %6577 = vmatprep.mubr.bf16.mxu0 %v8602_v50  ;;  %7425 = vmatprep.mubr.bf16.mxu1 %v8602_v50  ;;  %v10034_v61 = vld [vmem:[%s15042_s1 + $0x1c0] ss:$16 sps:$4 sm:$0xff]   ;;  %v10035_v62 = vld [vmem:[%s15042_s1 + $0x1c8] ss:$16 sps:$4 sm:$0xff]   ;;  %v10036_v63 = vld [vmem:[%s15042_s1 + $0x1e4] ss:$16 sps:$4 sm:$0xff]  }
  0x16   :  { %v10038_v0 = vld [vmem:[%s15042_s1 + $0x1ec] ss:$16 sps:$4 sm:$0xff]   ;;  %v10040_v1 = vld [vmem:[%s15042_s1 + $0x1e0] ss:$16 sps:$4 sm:$0xff]   ;;  %v10041_v2 = vld [vmem:[%s15042_s1 + $0x1e8] ss:$16 sps:$4 sm:$0xff]  }
  0x17   :  { %6556 = vmatpush1.bf16.msra.mxu0 %v9980_v22  ;;  %7404 = vmatpush1.bf16.msra.mxu1 %v9981_v23  ;;  %v10044_v3 = vld [vmem:[%s15042_s1 + $0x204] ss:$16 sps:$4 sm:$0xff]   ;;  %v10047_v4 = vld [vmem:[%s15042_s1 + $0x20c] ss:$16 sps:$4 sm:$0xff]   ;;  %v10042_v6 = vld [vmem:[%s15042_s1 + $0x200] ss:$16 sps:$4 sm:$0xff]  }
  0x18   :  { %6557 = vmatprep.subr.bf16.mxu0 %v9982_v24  ;;  %7405 = vmatprep.subr.bf16.mxu1 %v9984_v25  ;;  %v10045_v7 = vld [vmem:[%s15042_s1 + $0x208] ss:$16 sps:$4 sm:$0xff]   ;;  %v10050_v8 = vld [vmem:[%s15042_s1 + $0x224] ss:$16 sps:$4 sm:$0xff]   ;;  %v10053_v9 = vld [vmem:[%s15042_s1 + $0x22c] ss:$16 sps:$4 sm:$0xff]  }
  0x19   :  { %v10048_v10 = vld [vmem:[%s15042_s1 + $0x220] ss:$16 sps:$4 sm:$0xff]   ;;  %v10051_v11 = vld [vmem:[%s15042_s1 + $0x228] ss:$16 sps:$4 sm:$0xff]   ;;  %v10056_v12 = vld [vmem:[%s15042_s1 + $0x244] ss:$16 sps:$4 sm:$0xff]  }
  0x1a   :  { %v10059_v13 = vld [vmem:[%s15042_s1 + $0x24c] ss:$16 sps:$4 sm:$0xff]   ;;  %v10054_v14 = vld [vmem:[%s15042_s1 + $0x240] ss:$16 sps:$4 sm:$0xff]   ;;  %v10057_v15 = vld [vmem:[%s15042_s1 + $0x248] ss:$16 sps:$4 sm:$0xff]  }
  0x1b   :  { %6558 = vmatpush1.bf16.msra.mxu0 %v9986_v26  ;;  %7406 = vmatpush1.bf16.msra.mxu1 %v9987_v27  ;;  %v10062_v16 = vld [vmem:[%s15042_s1 + $0x264] ss:$16 sps:$4 sm:$0xff]   ;;  %v10065_v17 = vld [vmem:[%s15042_s1 + $0x26c] ss:$16 sps:$4 sm:$0xff]   ;;  %v10060_v18 = vld [vmem:[%s15042_s1 + $0x260] ss:$16 sps:$4 sm:$0xff]  }
  0x1c   :  { %6559 = vmatprep.subr.bf16.mxu0 %v9988_v28  ;;  %7407 = vmatprep.subr.bf16.mxu1 %v9990_v29  ;;  %v10063_v19 = vld [vmem:[%s15042_s1 + $0x268] ss:$16 sps:$4 sm:$0xff]   ;;  %v10068_v20 = vld [vmem:[%s15042_s1 + $0x284] ss:$16 sps:$4 sm:$0xff]   ;;  %v10071_v21 = vld [vmem:[%s15042_s1 + $0x28c] ss:$16 sps:$4 sm:$0xff]  }
  0x1d   :  { %v10066_v22 = vld [vmem:[%s15042_s1 + $0x280] ss:$16 sps:$4 sm:$0xff]   ;;  %v10069_v23 = vld [vmem:[%s15042_s1 + $0x288] ss:$16 sps:$4 sm:$0xff]   ;;  %v10074_v24 = vld [vmem:[%s15042_s1 + $0x2a4] ss:$16 sps:$4 sm:$0xff]  }
  0x1e   :  { %v10077_v25 = vld [vmem:[%s15042_s1 + $0x2ac] ss:$16 sps:$4 sm:$0xff]   ;;  %v49_v26 = vld [vmem:[%s15043_s0 + $0x100] sm:$0xff]  ;;  %v10093_v46 = vld [vmem:[%s15042_s1 + $0x308] ss:$16 sps:$4 sm:$0xff]  }
  0x1f   :  { %6560 = vmatpush1.bf16.msra.mxu0 %v9992_v30  ;;  %7408 = vmatpush1.bf16.msra.mxu1 %v9993_v31  ;;  %v65_v27 = vld [vmem:[%s15043_s0 + $0x180] sm:$0xff]  ;;  %v10075_v30 = vld [vmem:[%s15042_s1 + $0x2a8] ss:$16 sps:$4 sm:$0xff]  }
  0x20   :  { %6561 = vmatprep.subr.bf16.mxu0 %v9994_v32  ;;  %7409 = vmatprep.subr.bf16.mxu1 %v9996_v33  ;;  %v8634_v28 = vcombine.high %v49_v26, %v65_v27  ;;  %v10072_v29 = vld [vmem:[%s15042_s1 + $0x2a0] ss:$16 sps:$4 sm:$0xff]   ;;  %v8633_v31 = vcombine.low %v49_v26, %v65_v27  ;;  %v10080_v32 = vld [vmem:[%s15042_s1 + $0x2c4] ss:$16 sps:$4 sm:$0xff]   ;;  %v10083_v33 = vld [vmem:[%s15042_s1 + $0x2cc] ss:$16 sps:$4 sm:$0xff]  }
  0x21   :  { %v10098_v47 = vld [vmem:[%s15042_s1 + $0x324] ss:$16 sps:$4 sm:$0xff]   ;;  %v10099_v50 = vld [vmem:[%s15042_s1 + $0x328] ss:$16 sps:$4 sm:$0xff]  }
  0x22   :  { %v11970_v27 = vld [vmem:[%s15043_s0 + $0x90] sm:$0xff] }
  0x23   :  { %6562 = vmatpush1.bf16.msra.mxu0 %v9998_v34  ;;  %7410 = vmatpush1.bf16.msra.mxu1 %v9999_v35  ;;  %v11801_v34 = vld [vmem:[%s15043_s0 + $0x8] sm:$0xff] }
  0x24   :  { %6563 = vmatprep.subr.bf16.mxu0 %v10000_v36  ;;  %7411 = vmatprep.subr.bf16.mxu1 %v10002_v37  ;;  %v11806_v35 = vld [vmem:[%s15043_s0 + $0x88] sm:$0xff]  ;;  %v10078_v36 = vld [vmem:[%s15042_s1 + $0x2c0] ss:$16 sps:$4 sm:$0xff]  }
  0x25   :  { %v10081_v37 = vld [vmem:[%s15042_s1 + $0x2c8] ss:$16 sps:$4 sm:$0xff]  }
  0x27   :  { %6564 = vmatpush1.bf16.msra.mxu0 %v10004_v38  ;;  %7412 = vmatpush1.bf16.msra.mxu1 %v10005_v39  ;;  %v8604_v38 = vcombine.high %v11801_v34, %v11806_v35  ;;  %v10086_v39 = vld [vmem:[%s15042_s1 + $0x2e4] ss:$16 sps:$4 sm:$0xff]  }
  0x28   :  { %6565 = vmatprep.subr.bf16.mxu0 %v10006_v40  ;;  %7413 = vmatprep.subr.bf16.mxu1 %v10008_v41  ;;  %v10089_v40 = vld [vmem:[%s15042_s1 + $0x2ec] ss:$16 sps:$4 sm:$0xff]   ;;  %v10084_v41 = vld [vmem:[%s15042_s1 + $0x2e0] ss:$16 sps:$4 sm:$0xff]  }
  0x2b   :  { %6566 = vmatpush1.bf16.msra.mxu0 %v10010_v42  ;;  %7414 = vmatpush1.bf16.msra.mxu1 %v10011_v43  ;;  %v10087_v42 = vld [vmem:[%s15042_s1 + $0x2e8] ss:$16 sps:$4 sm:$0xff]   ;;  %v10092_v43 = vld [vmem:[%s15042_s1 + $0x304] ss:$16 sps:$4 sm:$0xff]  }
  0x2c   :  { %6567 = vmatprep.subr.bf16.mxu0 %v10012_v44  ;;  %7415 = vmatprep.subr.bf16.mxu1 %v10014_v45  ;;  %v10095_v44 = vld [vmem:[%s15042_s1 + $0x30c] ss:$16 sps:$4 sm:$0xff]   ;;  %v10090_v45 = vld [vmem:[%s15042_s1 + $0x300] ss:$16 sps:$4 sm:$0xff]  }
  0x2f   :  { %6568 = vmatpush1.bf16.msra.mxu0 %v10016_v48  ;;  %7416 = vmatpush1.bf16.msra.mxu1 %v10017_v49  ;;  %v10101_v48 = vld [vmem:[%s15042_s1 + $0x32c] ss:$16 sps:$4 sm:$0xff]   ;;  %v10096_v49 = vld [vmem:[%s15042_s1 + $0x320] ss:$16 sps:$4 sm:$0xff]  }
  0x30   :  { %6569 = vmatprep.subr.bf16.mxu0 %v10018_v51  ;;  %7417 = vmatprep.subr.bf16.mxu1 %v10020_v52  ;;  %v10104_v51 = vld [vmem:[%s15042_s1 + $0x344] ss:$16 sps:$4 sm:$0xff]   ;;  %v10107_v52 = vld [vmem:[%s15042_s1 + $0x34c] ss:$16 sps:$4 sm:$0xff]  }
  0x33   :  { %6570 = vmatpush1.bf16.msra.mxu0 %v10022_v53  ;;  %7418 = vmatpush1.bf16.msra.mxu1 %v10023_v54  ;;  %v10102_v53 = vld [vmem:[%s15042_s1 + $0x340] ss:$16 sps:$4 sm:$0xff]   ;;  %v10105_v54 = vld [vmem:[%s15042_s1 + $0x348] ss:$16 sps:$4 sm:$0xff]  }
  0x34   :  { %6571 = vmatprep.subr.bf16.mxu0 %v10024_v55  ;;  %7419 = vmatprep.subr.bf16.mxu1 %v10026_v56  ;;  %v10110_v55 = vld [vmem:[%s15042_s1 + $0x364] ss:$16 sps:$4 sm:$0xff]   ;;  %v10113_v56 = vld [vmem:[%s15042_s1 + $0x36c] ss:$16 sps:$4 sm:$0xff]  }
  0x37   :  { %6572 = vmatpush1.bf16.msra.mxu0 %v10028_v57  ;;  %7420 = vmatpush1.bf16.msra.mxu1 %v10029_v58  ;;  %v10108_v57 = vld [vmem:[%s15042_s1 + $0x360] ss:$16 sps:$4 sm:$0xff]   ;;  %v10111_v58 = vld [vmem:[%s15042_s1 + $0x368] ss:$16 sps:$4 sm:$0xff]  }
  0x38   :  { %6573 = vmatprep.subr.bf16.mxu0 %v10030_v59  ;;  %7421 = vmatprep.subr.bf16.mxu1 %v10032_v60  ;;  %v10116_v59 = vld [vmem:[%s15042_s1 + $0x384] ss:$16 sps:$4 sm:$0xff]   ;;  %v10119_v60 = vld [vmem:[%s15042_s1 + $0x38c] ss:$16 sps:$4 sm:$0xff]  }
  0x3b   :  { %6574 = vmatpush1.bf16.msra.mxu0 %v10034_v61  ;;  %7422 = vmatpush1.bf16.msra.mxu1 %v10035_v62  ;;  %v10114_v61 = vld [vmem:[%s15042_s1 + $0x380] ss:$16 sps:$4 sm:$0xff]   ;;  %v10117_v62 = vld [vmem:[%s15042_s1 + $0x388] ss:$16 sps:$4 sm:$0xff]  }
  0x3c   :  { %6575 = vmatprep.subr.bf16.mxu0 %v10036_v63  ;;  %7423 = vmatprep.subr.bf16.mxu1 %v10038_v0  ;;  %v10122_v63 = vld [vmem:[%s15042_s1 + $0x3a4] ss:$16 sps:$4 sm:$0xff]   ;;  %v10125_v0 = vld [vmem:[%s15042_s1 + $0x3ac] ss:$16 sps:$4 sm:$0xff]  }
  0x3f   :  { %6576 = vmatpush1.bf16.msra.mxu0 %v10040_v1  ;;  %7424 = vmatpush1.bf16.msra.mxu1 %v10041_v2  ;;  %v10120_v1 = vld [vmem:[%s15042_s1 + $0x3a0] ss:$16 sps:$4 sm:$0xff]   ;;  %v10123_v2 = vld [vmem:[%s15042_s1 + $0x3a8] ss:$16 sps:$4 sm:$0xff]  }
  0x40   :  { %6598 = vmatprep.subr.bf16.mxu0 %v10044_v3  ;;  %7446 = vmatprep.subr.bf16.mxu1 %v10047_v4  ;;  %v10128_v3 = vld [vmem:[%s15042_s1 + $0x3c4] ss:$16 sps:$4 sm:$0xff]   ;;  %v10131_v4 = vld [vmem:[%s15042_s1 + $0x3cc] ss:$16 sps:$4 sm:$0xff]  }
  0x42   :  { %6578 = vmatmul.mubr.bf16.vlgmr.msra.gmra.mrb[0].mxu0 %v8601_v5  ;;  %7426 = vmatmul.mubr.bf16.vlgmr.msra.gmra.mrb[0].mxu1 %v8601_v5  ;;  %v10126_v5 = vld [vmem:[%s15042_s1 + $0x3c0] ss:$16 sps:$4 sm:$0xff]  }
  0x43   :  { %6599 = vmatpush1.bf16.msra.mxu0 %v10042_v6  ;;  %7447 = vmatpush1.bf16.msra.mxu1 %v10045_v7  ;;  %v10129_v6 = vld [vmem:[%s15042_s1 + $0x3c8] ss:$16 sps:$4 sm:$0xff]   ;;  %v10134_v7 = vld [vmem:[%s15042_s1 + $0x3e4] ss:$16 sps:$4 sm:$0xff]  }
  0x44   :  { %6600 = vmatprep.subr.bf16.mxu0 %v10050_v8  ;;  %7448 = vmatprep.subr.bf16.mxu1 %v10053_v9  ;;  %v10137_v8 = vld [vmem:[%s15042_s1 + $0x3ec] ss:$16 sps:$4 sm:$0xff]   ;;  %v10132_v9 = vld [vmem:[%s15042_s1 + $0x3e0] ss:$16 sps:$4 sm:$0xff]  }
  0x45   :  { %6587 = vmatprep.mubr.bf16.mxu0 %v8634_v28  ;;  %7435 = vmatprep.mubr.bf16.mxu1 %v8634_v28  ;;  %v10150_v28 = vld [vmem:[%s15042_s1 + $0x440] ss:$16 sps:$4 sm:$0xff]  }
  0x47   :  { %6601 = vmatpush1.bf16.msra.mxu0 %v10048_v10  ;;  %7449 = vmatpush1.bf16.msra.mxu1 %v10051_v11  ;;  %v10135_v10 = vld [vmem:[%s15042_s1 + $0x3e8] ss:$16 sps:$4 sm:$0xff]   ;;  %v10140_v11 = vld [vmem:[%s15042_s1 + $0x404] ss:$16 sps:$4 sm:$0xff]  }
  0x48   :  { %6602 = vmatprep.subr.bf16.mxu0 %v10056_v12  ;;  %7450 = vmatprep.subr.bf16.mxu1 %v10059_v13  ;;  %v10143_v12 = vld [vmem:[%s15042_s1 + $0x40c] ss:$16 sps:$4 sm:$0xff]   ;;  %v10138_v13 = vld [vmem:[%s15042_s1 + $0x400] ss:$16 sps:$4 sm:$0xff]  }
  0x4a   :  { %6588 = vmatmul.mubr.bf16.gmra.mrb[4].mxu0 %v8633_v31  ;;  %7436 = vmatmul.mubr.bf16.gmra.mrb[4].mxu1 %v8633_v31  ;;  %v10161_v31 = vld [vmem:[%s15042_s1 + $0x46c] ss:$16 sps:$4 sm:$0xff]  }
  0x4b   :  { %6603 = vmatpush1.bf16.msra.mxu0 %v10054_v14  ;;  %7451 = vmatpush1.bf16.msra.mxu1 %v10057_v15  ;;  %v10141_v14 = vld [vmem:[%s15042_s1 + $0x408] ss:$16 sps:$4 sm:$0xff]   ;;  %v8603_v15 = vcombine.low %v11801_v34, %v11806_v35  ;;  %v10164_v35 = vld [vmem:[%s15042_s1 + $0x484] ss:$16 sps:$4 sm:$0xff]  }
  0x4c   :  { %6604 = vmatprep.subr.bf16.mxu0 %v10062_v16  ;;  %7452 = vmatprep.subr.bf16.mxu1 %v10065_v17  ;;  %v50_v16 = vld [vmem:[%s15043_s0 + $0x108] sm:$0xff] }
  0x4d   :  { %6630 = vmatprep.mubr.bf16.mxu0 %v8604_v38  ;;  %7478 = vmatprep.mubr.bf16.mxu1 %v8604_v38  ;;  %v66_v17 = vld [vmem:[%s15043_s0 + $0x188] sm:$0xff] }
  0x4e   :  { %v8635_v26 = vcombine.low %v50_v16, %v66_v17  ;;  %v10159_v34 = vld [vmem:[%s15042_s1 + $0x468] ss:$16 sps:$4 sm:$0xff]  }
  0x4f   :  { %6605 = vmatpush1.bf16.msra.mxu0 %v10060_v18  ;;  %7453 = vmatpush1.bf16.msra.mxu1 %v10063_v19  ;;  %v10146_v18 = vld [vmem:[%s15042_s1 + $0x424] ss:$16 sps:$4 sm:$0xff]   ;;  %v10149_v19 = vld [vmem:[%s15042_s1 + $0x42c] ss:$16 sps:$4 sm:$0xff]   ;;  %v10165_v38 = vld [vmem:[%s15042_s1 + $0x488] ss:$16 sps:$4 sm:$0xff]  }
  0x50   :  { %6606 = vmatprep.subr.bf16.mxu0 %v10068_v20  ;;  %7454 = vmatprep.subr.bf16.mxu1 %v10071_v21  ;;  %v8636_v20 = vcombine.high %v50_v16, %v66_v17  ;;  %v10144_v21 = vld [vmem:[%s15042_s1 + $0x420] ss:$16 sps:$4 sm:$0xff]   ;;  %v10233_v16 = vld [vmem:[%s15042_s1 + $0x5ec] ss:$16 sps:$4 sm:$0xff]  }
  0x51   :  { %v10228_v17 = vld [vmem:[%s15042_s1 + $0x5e0] ss:$16 sps:$4 sm:$0xff]  }
  0x53   :  { %6607 = vmatpush1.bf16.msra.mxu0 %v10066_v22  ;;  %7455 = vmatpush1.bf16.msra.mxu1 %v10069_v23  ;;  %v10147_v22 = vld [vmem:[%s15042_s1 + $0x428] ss:$16 sps:$4 sm:$0xff]   ;;  %v10152_v23 = vld [vmem:[%s15042_s1 + $0x444] ss:$16 sps:$4 sm:$0xff]  }
  0x54   :  { %6608 = vmatprep.subr.bf16.mxu0 %v10074_v24  ;;  %7456 = vmatprep.subr.bf16.mxu1 %v10077_v25  ;;  %v10155_v24 = vld [vmem:[%s15042_s1 + $0x44c] ss:$16 sps:$4 sm:$0xff]   ;;  %v11965_v25 = vld [vmem:[%s15043_s0 + $0x10] sm:$0xff] }
  0x57   :  { %6609 = vmatpush1.bf16.msra.mxu0 %v10072_v29  ;;  %7457 = vmatpush1.bf16.msra.mxu1 %v10075_v30  ;;  %v10153_v29 = vld [vmem:[%s15042_s1 + $0x448] ss:$16 sps:$4 sm:$0xff]   ;;  %v10158_v30 = vld [vmem:[%s15042_s1 + $0x464] ss:$16 sps:$4 sm:$0xff]  }
  0x58   :  { %6610 = vmatprep.subr.bf16.mxu0 %v10080_v32  ;;  %7458 = vmatprep.subr.bf16.mxu1 %v10083_v33  ;;  %v8606_v32 = vcombine.high %v11965_v25, %v11970_v27  ;;  %v10156_v33 = vld [vmem:[%s15042_s1 + $0x460] ss:$16 sps:$4 sm:$0xff]  }
  0x5b   :  { %6611 = vmatpush1.bf16.msra.mxu0 %v10078_v36  ;;  %7459 = vmatpush1.bf16.msra.mxu1 %v10081_v37  ;;  %v10167_v36 = vld [vmem:[%s15042_s1 + $0x48c] ss:$16 sps:$4 sm:$0xff]   ;;  %v10162_v37 = vld [vmem:[%s15042_s1 + $0x480] ss:$16 sps:$4 sm:$0xff]  }
  0x5c   :  { %6612 = vmatprep.subr.bf16.mxu0 %v10086_v39  ;;  %7460 = vmatprep.subr.bf16.mxu1 %v10089_v40  ;;  %v10170_v39 = vld [vmem:[%s15042_s1 + $0x4a4] ss:$16 sps:$4 sm:$0xff]   ;;  %v10173_v40 = vld [vmem:[%s15042_s1 + $0x4ac] ss:$16 sps:$4 sm:$0xff]  }
  0x5f   :  { %6613 = vmatpush1.bf16.msra.mxu0 %v10084_v41  ;;  %7461 = vmatpush1.bf16.msra.mxu1 %v10087_v42  ;;  %v10168_v41 = vld [vmem:[%s15042_s1 + $0x4a0] ss:$16 sps:$4 sm:$0xff]   ;;  %v10171_v42 = vld [vmem:[%s15042_s1 + $0x4a8] ss:$16 sps:$4 sm:$0xff]  }
  0x60   :  { %6614 = vmatprep.subr.bf16.mxu0 %v10092_v43  ;;  %7462 = vmatprep.subr.bf16.mxu1 %v10095_v44  ;;  %v10176_v43 = vld [vmem:[%s15042_s1 + $0x4c4] ss:$16 sps:$4 sm:$0xff]   ;;  %v10179_v44 = vld [vmem:[%s15042_s1 + $0x4cc] ss:$16 sps:$4 sm:$0xff]  }
  0x63   :  { %6615 = vmatpush1.bf16.msra.mxu0 %v10090_v45  ;;  %7463 = vmatpush1.bf16.msra.mxu1 %v10093_v46  ;;  %v10174_v45 = vld [vmem:[%s15042_s1 + $0x4c0] ss:$16 sps:$4 sm:$0xff]   ;;  %v10177_v46 = vld [vmem:[%s15042_s1 + $0x4c8] ss:$16 sps:$4 sm:$0xff]  }
  0x64   :  { %6616 = vmatprep.subr.bf16.mxu0 %v10098_v47  ;;  %7464 = vmatprep.subr.bf16.mxu1 %v10101_v48  ;;  %v10182_v47 = vld [vmem:[%s15042_s1 + $0x4e4] ss:$16 sps:$4 sm:$0xff]   ;;  %v10185_v48 = vld [vmem:[%s15042_s1 + $0x4ec] ss:$16 sps:$4 sm:$0xff]  }
  0x67   :  { %6617 = vmatpush1.bf16.msra.mxu0 %v10096_v49  ;;  %7465 = vmatpush1.bf16.msra.mxu1 %v10099_v50  ;;  %v10180_v49 = vld [vmem:[%s15042_s1 + $0x4e0] ss:$16 sps:$4 sm:$0xff]   ;;  %v10183_v50 = vld [vmem:[%s15042_s1 + $0x4e8] ss:$16 sps:$4 sm:$0xff]  }
  0x68   :  { %6618 = vmatprep.subr.bf16.mxu0 %v10104_v51  ;;  %7466 = vmatprep.subr.bf16.mxu1 %v10107_v52  ;;  %v10188_v51 = vld [vmem:[%s15042_s1 + $0x504] ss:$16 sps:$4 sm:$0xff]   ;;  %v10191_v52 = vld [vmem:[%s15042_s1 + $0x50c] ss:$16 sps:$4 sm:$0xff]  }
  0x6b   :  { %6619 = vmatpush1.bf16.msra.mxu0 %v10102_v53  ;;  %7467 = vmatpush1.bf16.msra.mxu1 %v10105_v54  ;;  %v10186_v53 = vld [vmem:[%s15042_s1 + $0x500] ss:$16 sps:$4 sm:$0xff]   ;;  %v10189_v54 = vld [vmem:[%s15042_s1 + $0x508] ss:$16 sps:$4 sm:$0xff]  }
  0x6c   :  { %6620 = vmatprep.subr.bf16.mxu0 %v10110_v55  ;;  %7468 = vmatprep.subr.bf16.mxu1 %v10113_v56  ;;  %v10194_v55 = vld [vmem:[%s15042_s1 + $0x524] ss:$16 sps:$4 sm:$0xff]   ;;  %v10197_v56 = vld [vmem:[%s15042_s1 + $0x52c] ss:$16 sps:$4 sm:$0xff]  }
  0x6f   :  { %6621 = vmatpush1.bf16.msra.mxu0 %v10108_v57  ;;  %7469 = vmatpush1.bf16.msra.mxu1 %v10111_v58  ;;  %v10192_v57 = vld [vmem:[%s15042_s1 + $0x520] ss:$16 sps:$4 sm:$0xff]   ;;  %v10195_v58 = vld [vmem:[%s15042_s1 + $0x528] ss:$16 sps:$4 sm:$0xff]  }
  0x70   :  { %6622 = vmatprep.subr.bf16.mxu0 %v10116_v59  ;;  %7470 = vmatprep.subr.bf16.mxu1 %v10119_v60  ;;  %v10200_v59 = vld [vmem:[%s15042_s1 + $0x544] ss:$16 sps:$4 sm:$0xff]   ;;  %v10203_v60 = vld [vmem:[%s15042_s1 + $0x54c] ss:$16 sps:$4 sm:$0xff]  }
  0x73   :  { %6623 = vmatpush1.bf16.msra.mxu0 %v10114_v61  ;;  %7471 = vmatpush1.bf16.msra.mxu1 %v10117_v62  ;;  %v10198_v61 = vld [vmem:[%s15042_s1 + $0x540] ss:$16 sps:$4 sm:$0xff]   ;;  %v10201_v62 = vld [vmem:[%s15042_s1 + $0x548] ss:$16 sps:$4 sm:$0xff]  }
  0x74   :  { %6624 = vmatprep.subr.bf16.mxu0 %v10122_v63  ;;  %7472 = vmatprep.subr.bf16.mxu1 %v10125_v0  ;;  %v10206_v63 = vld [vmem:[%s15042_s1 + $0x564] ss:$16 sps:$4 sm:$0xff]   ;;  %v10209_v0 = vld [vmem:[%s15042_s1 + $0x56c] ss:$16 sps:$4 sm:$0xff]  }
  0x77   :  { %6625 = vmatpush1.bf16.msra.mxu0 %v10120_v1  ;;  %7473 = vmatpush1.bf16.msra.mxu1 %v10123_v2  ;;  %v10204_v1 = vld [vmem:[%s15042_s1 + $0x560] ss:$16 sps:$4 sm:$0xff]   ;;  %v10207_v2 = vld [vmem:[%s15042_s1 + $0x568] ss:$16 sps:$4 sm:$0xff]  }
  0x78   :  { %6626 = vmatprep.subr.bf16.mxu0 %v10128_v3  ;;  %7474 = vmatprep.subr.bf16.mxu1 %v10131_v4  ;;  %v10212_v3 = vld [vmem:[%s15042_s1 + $0x584] ss:$16 sps:$4 sm:$0xff]   ;;  %v10215_v4 = vld [vmem:[%s15042_s1 + $0x58c] ss:$16 sps:$4 sm:$0xff]  }
  0x7b   :  { %6627 = vmatpush1.bf16.msra.mxu0 %v10126_v5  ;;  %7475 = vmatpush1.bf16.msra.mxu1 %v10129_v6  ;;  %v10210_v5 = vld [vmem:[%s15042_s1 + $0x580] ss:$16 sps:$4 sm:$0xff]   ;;  %v10213_v6 = vld [vmem:[%s15042_s1 + $0x588] ss:$16 sps:$4 sm:$0xff]  }
  0x7c   :  { %6628 = vmatprep.subr.bf16.mxu0 %v10134_v7  ;;  %7476 = vmatprep.subr.bf16.mxu1 %v10137_v8  ;;  %v10218_v7 = vld [vmem:[%s15042_s1 + $0x5a4] ss:$16 sps:$4 sm:$0xff]   ;;  %v10221_v8 = vld [vmem:[%s15042_s1 + $0x5ac] ss:$16 sps:$4 sm:$0xff]  }
  0x7f   :  { %6629 = vmatpush1.bf16.msra.mxu0 %v10132_v9  ;;  %7477 = vmatpush1.bf16.msra.mxu1 %v10135_v10  ;;  %v10216_v9 = vld [vmem:[%s15042_s1 + $0x5a0] ss:$16 sps:$4 sm:$0xff]   ;;  %v10219_v10 = vld [vmem:[%s15042_s1 + $0x5a8] ss:$16 sps:$4 sm:$0xff]  }
  0x80   :  { %6651 = vmatprep.subr.bf16.mxu0 %v10140_v11  ;;  %7499 = vmatprep.subr.bf16.mxu1 %v10143_v12  ;;  %v10224_v11 = vld [vmem:[%s15042_s1 + $0x5c4] ss:$16 sps:$4 sm:$0xff]   ;;  %v10227_v12 = vld [vmem:[%s15042_s1 + $0x5cc] ss:$16 sps:$4 sm:$0xff]  }
  0x82   :  { %6631 = vmatmul.mubr.bf16.vlgmr.msra.gmra.mrb[0].mxu0 %v8603_v15  ;;  %7479 = vmatmul.mubr.bf16.vlgmr.msra.gmra.mrb[0].mxu1 %v8603_v15  ;;  %v10230_v15 = vld [vmem:[%s15042_s1 + $0x5e4] ss:$16 sps:$4 sm:$0xff]  }
  0x83   :  { %6652 = vmatpush1.bf16.msra.mxu0 %v10138_v13  ;;  %7500 = vmatpush1.bf16.msra.mxu1 %v10141_v14  ;;  %v10222_v13 = vld [vmem:[%s15042_s1 + $0x5c0] ss:$16 sps:$4 sm:$0xff]   ;;  %v10225_v14 = vld [vmem:[%s15042_s1 + $0x5c8] ss:$16 sps:$4 sm:$0xff]  }
  0x84   :  { %6653 = vmatprep.subr.bf16.mxu0 %v10146_v18  ;;  %7501 = vmatprep.subr.bf16.mxu1 %v10149_v19  ;;  %v10231_v18 = vld [vmem:[%s15042_s1 + $0x5e8] ss:$16 sps:$4 sm:$0xff]   ;;  %v10236_v19 = vld [vmem:[%s15042_s1 + $0x604] ss:$16 sps:$4 sm:$0xff]  }
  0x85   :  { %6640 = vmatprep.mubr.bf16.mxu0 %v8636_v20  ;;  %7488 = vmatprep.mubr.bf16.mxu1 %v8636_v20  ;;  %v10239_v20 = vld [vmem:[%s15042_s1 + $0x60c] ss:$16 sps:$4 sm:$0xff]  }
  0x87   :  { %6654 = vmatpush1.bf16.msra.mxu0 %v10144_v21  ;;  %7502 = vmatpush1.bf16.msra.mxu1 %v10147_v22  ;;  %v51_v21 = vld [vmem:[%s15043_s0 + $0x110] sm:$0xff]  ;;  %v8605_v22 = vcombine.low %v11965_v25, %v11970_v27  ;;  %v10245_v27 = vld [vmem:[%s15042_s1 + $0x62c] ss:$16 sps:$4 sm:$0xff]  }
  0x88   :  { %6655 = vmatprep.subr.bf16.mxu0 %v10152_v23  ;;  %7503 = vmatprep.subr.bf16.mxu1 %v10155_v24  ;;  %v67_v23 = vld [vmem:[%s15043_s0 + $0x190] sm:$0xff] }
  0x89   :  { %v10234_v24 = vld [vmem:[%s15042_s1 + $0x600] ss:$16 sps:$4 sm:$0xff]   ;;  %v10242_v25 = vld [vmem:[%s15042_s1 + $0x624] ss:$16 sps:$4 sm:$0xff]  }
  0x8a   :  { %6641 = vmatmul.mubr.bf16.gmra.mrb[4].mxu0 %v8635_v26  ;;  %7489 = vmatmul.mubr.bf16.gmra.mrb[4].mxu1 %v8635_v26  ;;  %v10237_v26 = vld [vmem:[%s15042_s1 + $0x608] ss:$16 sps:$4 sm:$0xff]  }
  0x8b   :  { %6656 = vmatpush1.bf16.msra.mxu0 %v10150_v28  ;;  %7504 = vmatpush1.bf16.msra.mxu1 %v10153_v29  ;;  %v8638_v28 = vcombine.high %v51_v21, %v67_v23  ;;  %v10240_v29 = vld [vmem:[%s15042_s1 + $0x620] ss:$16 sps:$4 sm:$0xff]  }
  0x8c   :  { %6657 = vmatprep.subr.bf16.mxu0 %v10158_v30  ;;  %7505 = vmatprep.subr.bf16.mxu1 %v10161_v31  ;;  %v10243_v30 = vld [vmem:[%s15042_s1 + $0x628] ss:$16 sps:$4 sm:$0xff]   ;;  %v10248_v31 = vld [vmem:[%s15042_s1 + $0x644] ss:$16 sps:$4 sm:$0xff]  }
  0x8d   :  { %6683 = vmatprep.mubr.bf16.mxu0 %v8606_v32  ;;  %7531 = vmatprep.mubr.bf16.mxu1 %v8606_v32  ;;  %v10251_v32 = vld [vmem:[%s15042_s1 + $0x64c] ss:$16 sps:$4 sm:$0xff]  }
  0x8f   :  { %6658 = vmatpush1.bf16.msra.mxu0 %v10156_v33  ;;  %7506 = vmatpush1.bf16.msra.mxu1 %v10159_v34  ;;  %v12177_v33 = vld [vmem:[%s15043_s0 + $0x18] sm:$0xff]  ;;  %v8637_v34 = vcombine.low %v51_v21, %v67_v23  ;;  %v10318_v21 = vld [vmem:[%s15042_s1 + $0x7c0] ss:$16 sps:$4 sm:$0xff]   ;;  %v10326_v23 = vld [vmem:[%s15042_s1 + $0x7e4] ss:$16 sps:$4 sm:$0xff]  }
  0x90   :  { %6659 = vmatprep.subr.bf16.mxu0 %v10164_v35  ;;  %7507 = vmatprep.subr.bf16.mxu1 %v10167_v36  ;;  %v12182_v35 = vld [vmem:[%s15043_s0 + $0x98] sm:$0xff]  ;;  %v10246_v36 = vld [vmem:[%s15042_s1 + $0x640] ss:$16 sps:$4 sm:$0xff]  }
  0x93   :  { %6660 = vmatpush1.bf16.msra.mxu0 %v10162_v37  ;;  %7508 = vmatpush1.bf16.msra.mxu1 %v10165_v38  ;;  %v10249_v37 = vld [vmem:[%s15042_s1 + $0x648] ss:$16 sps:$4 sm:$0xff]   ;;  %v10254_v38 = vld [vmem:[%s15042_s1 + $0x664] ss:$16 sps:$4 sm:$0xff]  }
  0x94   :  { %6661 = vmatprep.subr.bf16.mxu0 %v10170_v39  ;;  %7509 = vmatprep.subr.bf16.mxu1 %v10173_v40  ;;  %v10257_v39 = vld [vmem:[%s15042_s1 + $0x66c] ss:$16 sps:$4 sm:$0xff]   ;;  %v8608_v40 = vcombine.high %v12177_v33, %v12182_v35 }
  0x97   :  { %6662 = vmatpush1.bf16.msra.mxu0 %v10168_v41  ;;  %7510 = vmatpush1.bf16.msra.mxu1 %v10171_v42  ;;  %v10252_v41 = vld [vmem:[%s15042_s1 + $0x660] ss:$16 sps:$4 sm:$0xff]   ;;  %v10255_v42 = vld [vmem:[%s15042_s1 + $0x668] ss:$16 sps:$4 sm:$0xff]  }
  0x98   :  { %6663 = vmatprep.subr.bf16.mxu0 %v10176_v43  ;;  %7511 = vmatprep.subr.bf16.mxu1 %v10179_v44  ;;  %v10260_v43 = vld [vmem:[%s15042_s1 + $0x684] ss:$16 sps:$4 sm:$0xff]   ;;  %v10263_v44 = vld [vmem:[%s15042_s1 + $0x68c] ss:$16 sps:$4 sm:$0xff]  }
  0x9b   :  { %6664 = vmatpush1.bf16.msra.mxu0 %v10174_v45  ;;  %7512 = vmatpush1.bf16.msra.mxu1 %v10177_v46  ;;  %v10258_v45 = vld [vmem:[%s15042_s1 + $0x680] ss:$16 sps:$4 sm:$0xff]   ;;  %v10261_v46 = vld [vmem:[%s15042_s1 + $0x688] ss:$16 sps:$4 sm:$0xff]  }
  0x9c   :  { %6665 = vmatprep.subr.bf16.mxu0 %v10182_v47  ;;  %7513 = vmatprep.subr.bf16.mxu1 %v10185_v48  ;;  %v10266_v47 = vld [vmem:[%s15042_s1 + $0x6a4] ss:$16 sps:$4 sm:$0xff]   ;;  %v10269_v48 = vld [vmem:[%s15042_s1 + $0x6ac] ss:$16 sps:$4 sm:$0xff]  }
  0x9f   :  { %6666 = vmatpush1.bf16.msra.mxu0 %v10180_v49  ;;  %7514 = vmatpush1.bf16.msra.mxu1 %v10183_v50  ;;  %v10264_v49 = vld [vmem:[%s15042_s1 + $0x6a0] ss:$16 sps:$4 sm:$0xff]   ;;  %v10267_v50 = vld [vmem:[%s15042_s1 + $0x6a8] ss:$16 sps:$4 sm:$0xff]  }
  0xa0   :  { %6667 = vmatprep.subr.bf16.mxu0 %v10188_v51  ;;  %7515 = vmatprep.subr.bf16.mxu1 %v10191_v52  ;;  %v10272_v51 = vld [vmem:[%s15042_s1 + $0x6c4] ss:$16 sps:$4 sm:$0xff]   ;;  %v10275_v52 = vld [vmem:[%s15042_s1 + $0x6cc] ss:$16 sps:$4 sm:$0xff]  }
  0xa3   :  { %6668 = vmatpush1.bf16.msra.mxu0 %v10186_v53  ;;  %7516 = vmatpush1.bf16.msra.mxu1 %v10189_v54  ;;  %v10270_v53 = vld [vmem:[%s15042_s1 + $0x6c0] ss:$16 sps:$4 sm:$0xff]   ;;  %v10273_v54 = vld [vmem:[%s15042_s1 + $0x6c8] ss:$16 sps:$4 sm:$0xff]  }
  0xa4   :  { %6669 = vmatprep.subr.bf16.mxu0 %v10194_v55  ;;  %7517 = vmatprep.subr.bf16.mxu1 %v10197_v56  ;;  %v10278_v55 = vld [vmem:[%s15042_s1 + $0x6e4] ss:$16 sps:$4 sm:$0xff]   ;;  %v10281_v56 = vld [vmem:[%s15042_s1 + $0x6ec] ss:$16 sps:$4 sm:$0xff]  }
  0xa7   :  { %6670 = vmatpush1.bf16.msra.mxu0 %v10192_v57  ;;  %7518 = vmatpush1.bf16.msra.mxu1 %v10195_v58  ;;  %v10276_v57 = vld [vmem:[%s15042_s1 + $0x6e0] ss:$16 sps:$4 sm:$0xff]   ;;  %v10279_v58 = vld [vmem:[%s15042_s1 + $0x6e8] ss:$16 sps:$4 sm:$0xff]  }
  0xa8   :  { %6671 = vmatprep.subr.bf16.mxu0 %v10200_v59  ;;  %7519 = vmatprep.subr.bf16.mxu1 %v10203_v60  ;;  %v10284_v59 = vld [vmem:[%s15042_s1 + $0x704] ss:$16 sps:$4 sm:$0xff]   ;;  %v10287_v60 = vld [vmem:[%s15042_s1 + $0x70c] ss:$16 sps:$4 sm:$0xff]  }
  0xab   :  { %6672 = vmatpush1.bf16.msra.mxu0 %v10198_v61  ;;  %7520 = vmatpush1.bf16.msra.mxu1 %v10201_v62  ;;  %v10282_v61 = vld [vmem:[%s15042_s1 + $0x700] ss:$16 sps:$4 sm:$0xff]   ;;  %v10285_v62 = vld [vmem:[%s15042_s1 + $0x708] ss:$16 sps:$4 sm:$0xff]  }
  0xac   :  { %6673 = vmatprep.subr.bf16.mxu0 %v10206_v63  ;;  %7521 = vmatprep.subr.bf16.mxu1 %v10209_v0  ;;  %v10290_v63 = vld [vmem:[%s15042_s1 + $0x724] ss:$16 sps:$4 sm:$0xff]   ;;  %v10293_v0 = vld [vmem:[%s15042_s1 + $0x72c] ss:$16 sps:$4 sm:$0xff]  }
  0xaf   :  { %6674 = vmatpush1.bf16.msra.mxu0 %v10204_v1  ;;  %7522 = vmatpush1.bf16.msra.mxu1 %v10207_v2  ;;  %v10288_v1 = vld [vmem:[%s15042_s1 + $0x720] ss:$16 sps:$4 sm:$0xff]   ;;  %v10291_v2 = vld [vmem:[%s15042_s1 + $0x728] ss:$16 sps:$4 sm:$0xff]  }
  0xb0   :  { %6675 = vmatprep.subr.bf16.mxu0 %v10212_v3  ;;  %7523 = vmatprep.subr.bf16.mxu1 %v10215_v4  ;;  %v10296_v3 = vld [vmem:[%s15042_s1 + $0x744] ss:$16 sps:$4 sm:$0xff]   ;;  %v10299_v4 = vld [vmem:[%s15042_s1 + $0x74c] ss:$16 sps:$4 sm:$0xff]  }
  0xb3   :  { %6676 = vmatpush1.bf16.msra.mxu0 %v10210_v5  ;;  %7524 = vmatpush1.bf16.msra.mxu1 %v10213_v6  ;;  %v10294_v5 = vld [vmem:[%s15042_s1 + $0x740] ss:$16 sps:$4 sm:$0xff]   ;;  %v10297_v6 = vld [vmem:[%s15042_s1 + $0x748] ss:$16 sps:$4 sm:$0xff]  }
  0xb4   :  { %6677 = vmatprep.subr.bf16.mxu0 %v10218_v7  ;;  %7525 = vmatprep.subr.bf16.mxu1 %v10221_v8  ;;  %v10302_v7 = vld [vmem:[%s15042_s1 + $0x764] ss:$16 sps:$4 sm:$0xff]   ;;  %v10305_v8 = vld [vmem:[%s15042_s1 + $0x76c] ss:$16 sps:$4 sm:$0xff]  }
  0xb7   :  { %6678 = vmatpush1.bf16.msra.mxu0 %v10216_v9  ;;  %7526 = vmatpush1.bf16.msra.mxu1 %v10219_v10  ;;  %v10300_v9 = vld [vmem:[%s15042_s1 + $0x760] ss:$16 sps:$4 sm:$0xff]   ;;  %v10303_v10 = vld [vmem:[%s15042_s1 + $0x768] ss:$16 sps:$4 sm:$0xff]  }
  0xb8   :  { %6679 = vmatprep.subr.bf16.mxu0 %v10224_v11  ;;  %7527 = vmatprep.subr.bf16.mxu1 %v10227_v12  ;;  %v10308_v11 = vld [vmem:[%s15042_s1 + $0x784] ss:$16 sps:$4 sm:$0xff]   ;;  %v10311_v12 = vld [vmem:[%s15042_s1 + $0x78c] ss:$16 sps:$4 sm:$0xff]  }
  0xbb   :  { %6680 = vmatpush1.bf16.msra.mxu0 %v10222_v13  ;;  %7528 = vmatpush1.bf16.msra.mxu1 %v10225_v14  ;;  %v10306_v13 = vld [vmem:[%s15042_s1 + $0x780] ss:$16 sps:$4 sm:$0xff]   ;;  %v10309_v14 = vld [vmem:[%s15042_s1 + $0x788] ss:$16 sps:$4 sm:$0xff]  }
  0xbc   :  { %6681 = vmatprep.subr.bf16.mxu0 %v10230_v15  ;;  %7529 = vmatprep.subr.bf16.mxu1 %v10233_v16  ;;  %v10314_v15 = vld [vmem:[%s15042_s1 + $0x7a4] ss:$16 sps:$4 sm:$0xff]   ;;  %v10317_v16 = vld [vmem:[%s15042_s1 + $0x7ac] ss:$16 sps:$4 sm:$0xff]  }
  0xbf   :  { %6682 = vmatpush1.bf16.msra.mxu0 %v10228_v17  ;;  %7530 = vmatpush1.bf16.msra.mxu1 %v10231_v18  ;;  %v10312_v17 = vld [vmem:[%s15042_s1 + $0x7a0] ss:$16 sps:$4 sm:$0xff]   ;;  %v10315_v18 = vld [vmem:[%s15042_s1 + $0x7a8] ss:$16 sps:$4 sm:$0xff]  }
  0xc0   :  { %6704 = vmatprep.subr.bf16.mxu0 %v10236_v19  ;;  %7552 = vmatprep.subr.bf16.mxu1 %v10239_v20  ;;  %v10320_v19 = vld [vmem:[%s15042_s1 + $0x7c4] ss:$16 sps:$4 sm:$0xff]   ;;  %v10323_v20 = vld [vmem:[%s15042_s1 + $0x7cc] ss:$16 sps:$4 sm:$0xff]  }
  0xc2   :  { %6684 = vmatmul.mubr.bf16.vlgmr.msra.gmra.mrb[0].mxu0 %v8605_v22  ;;  %7532 = vmatmul.mubr.bf16.vlgmr.msra.gmra.mrb[0].mxu1 %v8605_v22  ;;  %v10321_v22 = vld [vmem:[%s15042_s1 + $0x7c8] ss:$16 sps:$4 sm:$0xff]  }
  0xc3   :  { %6705 = vmatpush1.bf16.msra.mxu0 %v10234_v24  ;;  %7553 = vmatpush1.bf16.msra.mxu1 %v10237_v26  ;;  %v10329_v24 = vld [vmem:[%s15042_s1 + $0x7ec] ss:$16 sps:$4 sm:$0xff]   ;;  %v10324_v26 = vld [vmem:[%s15042_s1 + $0x7e0] ss:$16 sps:$4 sm:$0xff]  }
  0xc4   :  { %6706 = vmatprep.subr.bf16.mxu0 %v10242_v25  ;;  %7554 = vmatprep.subr.bf16.mxu1 %v10245_v27  ;;  %v10327_v25 = vld [vmem:[%s15042_s1 + $0x7e8] ss:$16 sps:$4 sm:$0xff]   ;;  %v10332_v27 = vld [vmem:[%s15042_s1 + $0x804] ss:$16 sps:$4 sm:$0xff]  }
  0xc5   :  { %6693 = vmatprep.mubr.bf16.mxu0 %v8638_v28  ;;  %7541 = vmatprep.mubr.bf16.mxu1 %v8638_v28  ;;  %v10335_v28 = vld [vmem:[%s15042_s1 + $0x80c] ss:$16 sps:$4 sm:$0xff]  }
  0xc7   :  { %6707 = vmatpush1.bf16.msra.mxu0 %v10240_v29  ;;  %7555 = vmatpush1.bf16.msra.mxu1 %v10243_v30  ;;  %v52_v29 = vld [vmem:[%s15043_s0 + $0x118] sm:$0xff]  ;;  %v8607_v30 = vcombine.low %v12177_v33, %v12182_v35 }
  0xc8   :  { %6708 = vmatprep.subr.bf16.mxu0 %v10248_v31  ;;  %7556 = vmatprep.subr.bf16.mxu1 %v10251_v32  ;;  %v68_v31 = vld [vmem:[%s15043_s0 + $0x198] sm:$0xff]  ;;  %v10330_v32 = vld [vmem:[%s15042_s1 + $0x800] ss:$16 sps:$4 sm:$0xff]  }
  0xc9   :  { %v10341_v33 = vld [vmem:[%s15042_s1 + $0x82c] ss:$16 sps:$4 sm:$0xff]   ;;  %v8640_v35 = vcombine.high %v52_v29, %v68_v31 }
  0xca   :  { %6694 = vmatmul.mubr.bf16.gmra.mrb[4].mxu0 %v8637_v34  ;;  %7542 = vmatmul.mubr.bf16.gmra.mrb[4].mxu1 %v8637_v34  ;;  %v10333_v34 = vld [vmem:[%s15042_s1 + $0x808] ss:$16 sps:$4 sm:$0xff]  }
  0xcb   :  { %6709 = vmatpush1.bf16.msra.mxu0 %v10246_v36  ;;  %7557 = vmatpush1.bf16.msra.mxu1 %v10249_v37  ;;  %v10338_v36 = vld [vmem:[%s15042_s1 + $0x824] ss:$16 sps:$4 sm:$0xff]   ;;  %v10336_v37 = vld [vmem:[%s15042_s1 + $0x820] ss:$16 sps:$4 sm:$0xff]  }
  0xcc   :  { %6710 = vmatprep.subr.bf16.mxu0 %v10254_v38  ;;  %7558 = vmatprep.subr.bf16.mxu1 %v10257_v39  ;;  %v10339_v38 = vld [vmem:[%s15042_s1 + $0x828] ss:$16 sps:$4 sm:$0xff]   ;;  %v10344_v39 = vld [vmem:[%s15042_s1 + $0x844] ss:$16 sps:$4 sm:$0xff]  }
  0xcd   :  { %6736 = vmatprep.mubr.bf16.mxu0 %v8608_v40  ;;  %7584 = vmatprep.mubr.bf16.mxu1 %v8608_v40  ;;  %v10347_v40 = vld [vmem:[%s15042_s1 + $0x84c] ss:$16 sps:$4 sm:$0xff]  }
  0xcf   :  { %6711 = vmatpush1.bf16.msra.mxu0 %v10252_v41  ;;  %7559 = vmatpush1.bf16.msra.mxu1 %v10255_v42  ;;  %v12389_v41 = vld [vmem:[%s15043_s0 + $0x20] sm:$0xff]  ;;  %v8639_v42 = vcombine.low %v52_v29, %v68_v31 }
  0xd0   :  { %6712 = vmatprep.subr.bf16.mxu0 %v10260_v43  ;;  %7560 = vmatprep.subr.bf16.mxu1 %v10263_v44  ;;  %v12394_v43 = vld [vmem:[%s15043_s0 + $0xa0] sm:$0xff] }
  0xd1   :  { %v10342_v44 = vld [vmem:[%s15042_s1 + $0x840] ss:$16 sps:$4 sm:$0xff]   ;;  %v10422_v31 = vld [vmem:[%s15042_s1 + $0x9e4] ss:$16 sps:$4 sm:$0xff]  }
  0xd2   :  { %v10414_v29 = vld [vmem:[%s15042_s1 + $0x9c0] ss:$16 sps:$4 sm:$0xff]  }
  0xd3   :  { %6713 = vmatpush1.bf16.msra.mxu0 %v10258_v45  ;;  %7561 = vmatpush1.bf16.msra.mxu1 %v10261_v46  ;;  %v10345_v45 = vld [vmem:[%s15042_s1 + $0x848] ss:$16 sps:$4 sm:$0xff]   ;;  %v10350_v46 = vld [vmem:[%s15042_s1 + $0x864] ss:$16 sps:$4 sm:$0xff]  }
  0xd4   :  { %6714 = vmatprep.subr.bf16.mxu0 %v10266_v47  ;;  %7562 = vmatprep.subr.bf16.mxu1 %v10269_v48  ;;  %v10353_v47 = vld [vmem:[%s15042_s1 + $0x86c] ss:$16 sps:$4 sm:$0xff]   ;;  %v8610_v48 = vcombine.high %v12389_v41, %v12394_v43 }
  0xd7   :  { %6715 = vmatpush1.bf16.msra.mxu0 %v10264_v49  ;;  %7563 = vmatpush1.bf16.msra.mxu1 %v10267_v50  ;;  %v10348_v49 = vld [vmem:[%s15042_s1 + $0x860] ss:$16 sps:$4 sm:$0xff]   ;;  %v10351_v50 = vld [vmem:[%s15042_s1 + $0x868] ss:$16 sps:$4 sm:$0xff]  }
  0xd8   :  { %6716 = vmatprep.subr.bf16.mxu0 %v10272_v51  ;;  %7564 = vmatprep.subr.bf16.mxu1 %v10275_v52  ;;  %v10356_v51 = vld [vmem:[%s15042_s1 + $0x884] ss:$16 sps:$4 sm:$0xff]   ;;  %v10359_v52 = vld [vmem:[%s15042_s1 + $0x88c] ss:$16 sps:$4 sm:$0xff]  }
  0xdb   :  { %6717 = vmatpush1.bf16.msra.mxu0 %v10270_v53  ;;  %7565 = vmatpush1.bf16.msra.mxu1 %v10273_v54  ;;  %v10354_v53 = vld [vmem:[%s15042_s1 + $0x880] ss:$16 sps:$4 sm:$0xff]   ;;  %v10357_v54 = vld [vmem:[%s15042_s1 + $0x888] ss:$16 sps:$4 sm:$0xff]  }
  0xdc   :  { %6718 = vmatprep.subr.bf16.mxu0 %v10278_v55  ;;  %7566 = vmatprep.subr.bf16.mxu1 %v10281_v56  ;;  %v10362_v55 = vld [vmem:[%s15042_s1 + $0x8a4] ss:$16 sps:$4 sm:$0xff]   ;;  %v10365_v56 = vld [vmem:[%s15042_s1 + $0x8ac] ss:$16 sps:$4 sm:$0xff]  }
  0xdf   :  { %6719 = vmatpush1.bf16.msra.mxu0 %v10276_v57  ;;  %7567 = vmatpush1.bf16.msra.mxu1 %v10279_v58  ;;  %v10360_v57 = vld [vmem:[%s15042_s1 + $0x8a0] ss:$16 sps:$4 sm:$0xff]   ;;  %v10363_v58 = vld [vmem:[%s15042_s1 + $0x8a8] ss:$16 sps:$4 sm:$0xff]  }
  0xe0   :  { %6720 = vmatprep.subr.bf16.mxu0 %v10284_v59  ;;  %7568 = vmatprep.subr.bf16.mxu1 %v10287_v60  ;;  %v10368_v59 = vld [vmem:[%s15042_s1 + $0x8c4] ss:$16 sps:$4 sm:$0xff]   ;;  %v10371_v60 = vld [vmem:[%s15042_s1 + $0x8cc] ss:$16 sps:$4 sm:$0xff]  }
  0xe3   :  { %6721 = vmatpush1.bf16.msra.mxu0 %v10282_v61  ;;  %7569 = vmatpush1.bf16.msra.mxu1 %v10285_v62  ;;  %v10366_v61 = vld [vmem:[%s15042_s1 + $0x8c0] ss:$16 sps:$4 sm:$0xff]   ;;  %v10369_v62 = vld [vmem:[%s15042_s1 + $0x8c8] ss:$16 sps:$4 sm:$0xff]  }
  0xe4   :  { %6722 = vmatprep.subr.bf16.mxu0 %v10290_v63  ;;  %7570 = vmatprep.subr.bf16.mxu1 %v10293_v0  ;;  %v10374_v63 = vld [vmem:[%s15042_s1 + $0x8e4] ss:$16 sps:$4 sm:$0xff]   ;;  %v10377_v0 = vld [vmem:[%s15042_s1 + $0x8ec] ss:$16 sps:$4 sm:$0xff]  }
  0xe7   :  { %6723 = vmatpush1.bf16.msra.mxu0 %v10288_v1  ;;  %7571 = vmatpush1.bf16.msra.mxu1 %v10291_v2  ;;  %v10372_v1 = vld [vmem:[%s15042_s1 + $0x8e0] ss:$16 sps:$4 sm:$0xff]   ;;  %v10375_v2 = vld [vmem:[%s15042_s1 + $0x8e8] ss:$16 sps:$4 sm:$0xff]  }
  0xe8   :  { %6724 = vmatprep.subr.bf16.mxu0 %v10296_v3  ;;  %7572 = vmatprep.subr.bf16.mxu1 %v10299_v4  ;;  %v10380_v3 = vld [vmem:[%s15042_s1 + $0x904] ss:$16 sps:$4 sm:$0xff]   ;;  %v10383_v4 = vld [vmem:[%s15042_s1 + $0x90c] ss:$16 sps:$4 sm:$0xff]  }
  0xeb   :  { %6725 = vmatpush1.bf16.msra.mxu0 %v10294_v5  ;;  %7573 = vmatpush1.bf16.msra.mxu1 %v10297_v6  ;;  %v10378_v5 = vld [vmem:[%s15042_s1 + $0x900] ss:$16 sps:$4 sm:$0xff]   ;;  %v10381_v6 = vld [vmem:[%s15042_s1 + $0x908] ss:$16 sps:$4 sm:$0xff]  }
  0xec   :  { %6726 = vmatprep.subr.bf16.mxu0 %v10302_v7  ;;  %7574 = vmatprep.subr.bf16.mxu1 %v10305_v8  ;;  %v10386_v7 = vld [vmem:[%s15042_s1 + $0x924] ss:$16 sps:$4 sm:$0xff]   ;;  %v10389_v8 = vld [vmem:[%s15042_s1 + $0x92c] ss:$16 sps:$4 sm:$0xff]  }
  0xef   :  { %6727 = vmatpush1.bf16.msra.mxu0 %v10300_v9  ;;  %7575 = vmatpush1.bf16.msra.mxu1 %v10303_v10  ;;  %v10384_v9 = vld [vmem:[%s15042_s1 + $0x920] ss:$16 sps:$4 sm:$0xff]   ;;  %v10387_v10 = vld [vmem:[%s15042_s1 + $0x928] ss:$16 sps:$4 sm:$0xff]  }
  0xf0   :  { %6728 = vmatprep.subr.bf16.mxu0 %v10308_v11  ;;  %7576 = vmatprep.subr.bf16.mxu1 %v10311_v12  ;;  %v10392_v11 = vld [vmem:[%s15042_s1 + $0x944] ss:$16 sps:$4 sm:$0xff]   ;;  %v10395_v12 = vld [vmem:[%s15042_s1 + $0x94c] ss:$16 sps:$4 sm:$0xff]  }
  0xf3   :  { %6729 = vmatpush1.bf16.msra.mxu0 %v10306_v13  ;;  %7577 = vmatpush1.bf16.msra.mxu1 %v10309_v14  ;;  %v10390_v13 = vld [vmem:[%s15042_s1 + $0x940] ss:$16 sps:$4 sm:$0xff]   ;;  %v10393_v14 = vld [vmem:[%s15042_s1 + $0x948] ss:$16 sps:$4 sm:$0xff]  }
  0xf4   :  { %6730 = vmatprep.subr.bf16.mxu0 %v10314_v15  ;;  %7578 = vmatprep.subr.bf16.mxu1 %v10317_v16  ;;  %v10398_v15 = vld [vmem:[%s15042_s1 + $0x964] ss:$16 sps:$4 sm:$0xff]   ;;  %v10401_v16 = vld [vmem:[%s15042_s1 + $0x96c] ss:$16 sps:$4 sm:$0xff]  }
  0xf7   :  { %6731 = vmatpush1.bf16.msra.mxu0 %v10312_v17  ;;  %7579 = vmatpush1.bf16.msra.mxu1 %v10315_v18  ;;  %v10396_v17 = vld [vmem:[%s15042_s1 + $0x960] ss:$16 sps:$4 sm:$0xff]   ;;  %v10399_v18 = vld [vmem:[%s15042_s1 + $0x968] ss:$16 sps:$4 sm:$0xff]  }
  0xf8   :  { %6732 = vmatprep.subr.bf16.mxu0 %v10320_v19  ;;  %7580 = vmatprep.subr.bf16.mxu1 %v10323_v20  ;;  %v10404_v19 = vld [vmem:[%s15042_s1 + $0x984] ss:$16 sps:$4 sm:$0xff]   ;;  %v10407_v20 = vld [vmem:[%s15042_s1 + $0x98c] ss:$16 sps:$4 sm:$0xff]  }
  0xfb   :  { %6733 = vmatpush1.bf16.msra.mxu0 %v10318_v21  ;;  %7581 = vmatpush1.bf16.msra.mxu1 %v10321_v22  ;;  %v10402_v21 = vld [vmem:[%s15042_s1 + $0x980] ss:$16 sps:$4 sm:$0xff]   ;;  %v10405_v22 = vld [vmem:[%s15042_s1 + $0x988] ss:$16 sps:$4 sm:$0xff]  }
  0xfc   :  { %6734 = vmatprep.subr.bf16.mxu0 %v10326_v23  ;;  %7582 = vmatprep.subr.bf16.mxu1 %v10329_v24  ;;  %v10410_v23 = vld [vmem:[%s15042_s1 + $0x9a4] ss:$16 sps:$4 sm:$0xff]   ;;  %v10413_v24 = vld [vmem:[%s15042_s1 + $0x9ac] ss:$16 sps:$4 sm:$0xff]  }
  0xff   :  { %6735 = vmatpush1.bf16.msra.mxu0 %v10324_v26  ;;  %7583 = vmatpush1.bf16.msra.mxu1 %v10327_v25  ;;  %v10408_v26 = vld [vmem:[%s15042_s1 + $0x9a0] ss:$16 sps:$4 sm:$0xff]   ;;  %v10411_v25 = vld [vmem:[%s15042_s1 + $0x9a8] ss:$16 sps:$4 sm:$0xff]  }
 0x100   :  { %6757 = vmatprep.subr.bf16.mxu0 %v10332_v27  ;;  %7605 = vmatprep.subr.bf16.mxu1 %v10335_v28  ;;  %v10416_v27 = vld [vmem:[%s15042_s1 + $0x9c4] ss:$16 sps:$4 sm:$0xff]   ;;  %v10419_v28 = vld [vmem:[%s15042_s1 + $0x9cc] ss:$16 sps:$4 sm:$0xff]  }
 0x102   :  { %6737 = vmatmul.mubr.bf16.vlgmr.msra.gmra.mrb[0].mxu0 %v8607_v30  ;;  %7585 = vmatmul.mubr.bf16.vlgmr.msra.gmra.mrb[0].mxu1 %v8607_v30  ;;  %v10417_v30 = vld [vmem:[%s15042_s1 + $0x9c8] ss:$16 sps:$4 sm:$0xff]  }
 0x103   :  { %6758 = vmatpush1.bf16.msra.mxu0 %v10330_v32  ;;  %7606 = vmatpush1.bf16.msra.mxu1 %v10333_v34  ;;  %v10425_v32 = vld [vmem:[%s15042_s1 + $0x9ec] ss:$16 sps:$4 sm:$0xff]   ;;  %v10420_v34 = vld [vmem:[%s15042_s1 + $0x9e0] ss:$16 sps:$4 sm:$0xff]  }
 0x104   :  { %6759 = vmatprep.subr.bf16.mxu0 %v10338_v36  ;;  %7607 = vmatprep.subr.bf16.mxu1 %v10341_v33  ;;  %v10423_v36 = vld [vmem:[%s15042_s1 + $0x9e8] ss:$16 sps:$4 sm:$0xff]   ;;  %v10428_v33 = vld [vmem:[%s15042_s1 + $0xa04] ss:$16 sps:$4 sm:$0xff]  }
 0x105   :  { %6746 = vmatprep.mubr.bf16.mxu0 %v8640_v35  ;;  %7594 = vmatprep.mubr.bf16.mxu1 %v8640_v35  ;;  %v10431_v35 = vld [vmem:[%s15042_s1 + $0xa0c] ss:$16 sps:$4 sm:$0xff]  }
 0x107   :  { %6760 = vmatpush1.bf16.msra.mxu0 %v10336_v37  ;;  %7608 = vmatpush1.bf16.msra.mxu1 %v10339_v38  ;;  %v53_v37 = vld [vmem:[%s15043_s0 + $0x120] sm:$0xff] }
 0x108   :  { %6761 = vmatprep.subr.bf16.mxu0 %v10344_v39  ;;  %7609 = vmatprep.subr.bf16.mxu1 %v10347_v40  ;;  %v69_v38 = vld [vmem:[%s15043_s0 + $0x1a0] sm:$0xff]  ;;  %v8609_v39 = vcombine.low %v12389_v41, %v12394_v43  ;;  %v10437_v41 = vld [vmem:[%s15042_s1 + $0xa2c] ss:$16 sps:$4 sm:$0xff]  }
 0x109   :  { %v10426_v40 = vld [vmem:[%s15042_s1 + $0xa00] ss:$16 sps:$4 sm:$0xff]  }
 0x10a   :  { %6747 = vmatmul.mubr.bf16.gmra.mrb[4].mxu0 %v8639_v42  ;;  %7595 = vmatmul.mubr.bf16.gmra.mrb[4].mxu1 %v8639_v42  ;;  %v10429_v42 = vld [vmem:[%s15042_s1 + $0xa08] ss:$16 sps:$4 sm:$0xff]   ;;  %v10432_v43 = vld [vmem:[%s15042_s1 + $0xa20] ss:$16 sps:$4 sm:$0xff]  }
 0x10b   :  { %6762 = vmatpush1.bf16.msra.mxu0 %v10342_v44  ;;  %7610 = vmatpush1.bf16.msra.mxu1 %v10345_v45  ;;  %v10434_v44 = vld [vmem:[%s15042_s1 + $0xa24] ss:$16 sps:$4 sm:$0xff]   ;;  %v10435_v45 = vld [vmem:[%s15042_s1 + $0xa28] ss:$16 sps:$4 sm:$0xff]  }
 0x10c   :  { %6763 = vmatprep.subr.bf16.mxu0 %v10350_v46  ;;  %7611 = vmatprep.subr.bf16.mxu1 %v10353_v47  ;;  %v8642_v46 = vcombine.high %v53_v37, %v69_v38  ;;  %v10440_v47 = vld [vmem:[%s15042_s1 + $0xa44] ss:$16 sps:$4 sm:$0xff]  }
 0x10d   :  { %6789 = vmatprep.mubr.bf16.mxu0 %v8610_v48  ;;  %7637 = vmatprep.mubr.bf16.mxu1 %v8610_v48  ;;  %v10443_v48 = vld [vmem:[%s15042_s1 + $0xa4c] ss:$16 sps:$4 sm:$0xff]  }
 0x10f   :  { %6764 = vmatpush1.bf16.msra.mxu0 %v10348_v49  ;;  %7612 = vmatpush1.bf16.msra.mxu1 %v10351_v50  ;;  %v12601_v49 = vld [vmem:[%s15043_s0 + $0x28] sm:$0xff] }
 0x110   :  { %6765 = vmatprep.subr.bf16.mxu0 %v10356_v51  ;;  %7613 = vmatprep.subr.bf16.mxu1 %v10359_v52  ;;  %v12606_v50 = vld [vmem:[%s15043_s0 + $0xa8] sm:$0xff]  ;;  %v8641_v51 = vcombine.low %v53_v37, %v69_v38  ;;  %v10438_v52 = vld [vmem:[%s15042_s1 + $0xa40] ss:$16 sps:$4 sm:$0xff]  }
 0x111   :  { %v10510_v37 = vld [vmem:[%s15042_s1 + $0xbc0] ss:$16 sps:$4 sm:$0xff]   ;;  %v10513_v38 = vld [vmem:[%s15042_s1 + $0xbc8] ss:$16 sps:$4 sm:$0xff]  }
 0x113   :  { %6766 = vmatpush1.bf16.msra.mxu0 %v10354_v53  ;;  %7614 = vmatpush1.bf16.msra.mxu1 %v10357_v54  ;;  %v10441_v53 = vld [vmem:[%s15042_s1 + $0xa48] ss:$16 sps:$4 sm:$0xff]   ;;  %v10446_v54 = vld [vmem:[%s15042_s1 + $0xa64] ss:$16 sps:$4 sm:$0xff]  }
 0x114   :  { %6767 = vmatprep.subr.bf16.mxu0 %v10362_v55  ;;  %7615 = vmatprep.subr.bf16.mxu1 %v10365_v56  ;;  %v10449_v55 = vld [vmem:[%s15042_s1 + $0xa6c] ss:$16 sps:$4 sm:$0xff]   ;;  %v8612_v56 = vcombine.high %v12601_v49, %v12606_v50 }
 0x117   :  { %6768 = vmatpush1.bf16.msra.mxu0 %v10360_v57  ;;  %7616 = vmatpush1.bf16.msra.mxu1 %v10363_v58  ;;  %v10444_v57 = vld [vmem:[%s15042_s1 + $0xa60] ss:$16 sps:$4 sm:$0xff]   ;;  %v10447_v58 = vld [vmem:[%s15042_s1 + $0xa68] ss:$16 sps:$4 sm:$0xff]  }
 0x118   :  { %6769 = vmatprep.subr.bf16.mxu0 %v10368_v59  ;;  %7617 = vmatprep.subr.bf16.mxu1 %v10371_v60  ;;  %v10452_v59 = vld [vmem:[%s15042_s1 + $0xa84] ss:$16 sps:$4 sm:$0xff]   ;;  %v10455_v60 = vld [vmem:[%s15042_s1 + $0xa8c] ss:$16 sps:$4 sm:$0xff]  }
 0x11b   :  { %6770 = vmatpush1.bf16.msra.mxu0 %v10366_v61  ;;  %7618 = vmatpush1.bf16.msra.mxu1 %v10369_v62  ;;  %v10450_v61 = vld [vmem:[%s15042_s1 + $0xa80] ss:$16 sps:$4 sm:$0xff]   ;;  %v10453_v62 = vld [vmem:[%s15042_s1 + $0xa88] ss:$16 sps:$4 sm:$0xff]  }
 0x11c   :  { %6771 = vmatprep.subr.bf16.mxu0 %v10374_v63  ;;  %7619 = vmatprep.subr.bf16.mxu1 %v10377_v0  ;;  %v10458_v63 = vld [vmem:[%s15042_s1 + $0xaa4] ss:$16 sps:$4 sm:$0xff]   ;;  %v10461_v0 = vld [vmem:[%s15042_s1 + $0xaac] ss:$16 sps:$4 sm:$0xff]  }
 0x11f   :  { %6772 = vmatpush1.bf16.msra.mxu0 %v10372_v1  ;;  %7620 = vmatpush1.bf16.msra.mxu1 %v10375_v2  ;;  %v10456_v1 = vld [vmem:[%s15042_s1 + $0xaa0] ss:$16 sps:$4 sm:$0xff]   ;;  %v10459_v2 = vld [vmem:[%s15042_s1 + $0xaa8] ss:$16 sps:$4 sm:$0xff]  }
 0x120   :  { %6773 = vmatprep.subr.bf16.mxu0 %v10380_v3  ;;  %7621 = vmatprep.subr.bf16.mxu1 %v10383_v4  ;;  %v10464_v3 = vld [vmem:[%s15042_s1 + $0xac4] ss:$16 sps:$4 sm:$0xff]   ;;  %v10467_v4 = vld [vmem:[%s15042_s1 + $0xacc] ss:$16 sps:$4 sm:$0xff]  }
 0x123   :  { %6774 = vmatpush1.bf16.msra.mxu0 %v10378_v5  ;;  %7622 = vmatpush1.bf16.msra.mxu1 %v10381_v6  ;;  %v10462_v5 = vld [vmem:[%s15042_s1 + $0xac0] ss:$16 sps:$4 sm:$0xff]   ;;  %v10465_v6 = vld [vmem:[%s15042_s1 + $0xac8] ss:$16 sps:$4 sm:$0xff]  }
 0x124   :  { %6775 = vmatprep.subr.bf16.mxu0 %v10386_v7  ;;  %7623 = vmatprep.subr.bf16.mxu1 %v10389_v8  ;;  %v10470_v7 = vld [vmem:[%s15042_s1 + $0xae4] ss:$16 sps:$4 sm:$0xff]   ;;  %v10473_v8 = vld [vmem:[%s15042_s1 + $0xaec] ss:$16 sps:$4 sm:$0xff]  }
 0x127   :  { %6776 = vmatpush1.bf16.msra.mxu0 %v10384_v9  ;;  %7624 = vmatpush1.bf16.msra.mxu1 %v10387_v10  ;;  %v10468_v9 = vld [vmem:[%s15042_s1 + $0xae0] ss:$16 sps:$4 sm:$0xff]   ;;  %v10471_v10 = vld [vmem:[%s15042_s1 + $0xae8] ss:$16 sps:$4 sm:$0xff]  }
 0x128   :  { %6777 = vmatprep.subr.bf16.mxu0 %v10392_v11  ;;  %7625 = vmatprep.subr.bf16.mxu1 %v10395_v12  ;;  %v10476_v11 = vld [vmem:[%s15042_s1 + $0xb04] ss:$16 sps:$4 sm:$0xff]   ;;  %v10479_v12 = vld [vmem:[%s15042_s1 + $0xb0c] ss:$16 sps:$4 sm:$0xff]  }
 0x12b   :  { %6778 = vmatpush1.bf16.msra.mxu0 %v10390_v13  ;;  %7626 = vmatpush1.bf16.msra.mxu1 %v10393_v14  ;;  %v10474_v13 = vld [vmem:[%s15042_s1 + $0xb00] ss:$16 sps:$4 sm:$0xff]   ;;  %v10477_v14 = vld [vmem:[%s15042_s1 + $0xb08] ss:$16 sps:$4 sm:$0xff]  }
 0x12c   :  { %6779 = vmatprep.subr.bf16.mxu0 %v10398_v15  ;;  %7627 = vmatprep.subr.bf16.mxu1 %v10401_v16  ;;  %v10482_v15 = vld [vmem:[%s15042_s1 + $0xb24] ss:$16 sps:$4 sm:$0xff]   ;;  %v10485_v16 = vld [vmem:[%s15042_s1 + $0xb2c] ss:$16 sps:$4 sm:$0xff]  }
 0x12f   :  { %6780 = vmatpush1.bf16.msra.mxu0 %v10396_v17  ;;  %7628 = vmatpush1.bf16.msra.mxu1 %v10399_v18  ;;  %v10480_v17 = vld [vmem:[%s15042_s1 + $0xb20] ss:$16 sps:$4 sm:$0xff]   ;;  %v10483_v18 = vld [vmem:[%s15042_s1 + $0xb28] ss:$16 sps:$4 sm:$0xff]  }
 0x130   :  { %6781 = vmatprep.subr.bf16.mxu0 %v10404_v19  ;;  %7629 = vmatprep.subr.bf16.mxu1 %v10407_v20  ;;  %v10488_v19 = vld [vmem:[%s15042_s1 + $0xb44] ss:$16 sps:$4 sm:$0xff]   ;;  %v10491_v20 = vld [vmem:[%s15042_s1 + $0xb4c] ss:$16 sps:$4 sm:$0xff]  }
 0x133   :  { %6782 = vmatpush1.bf16.msra.mxu0 %v10402_v21  ;;  %7630 = vmatpush1.bf16.msra.mxu1 %v10405_v22  ;;  %v10486_v21 = vld [vmem:[%s15042_s1 + $0xb40] ss:$16 sps:$4 sm:$0xff]   ;;  %v10489_v22 = vld [vmem:[%s15042_s1 + $0xb48] ss:$16 sps:$4 sm:$0xff]  }
 0x134   :  { %6783 = vmatprep.subr.bf16.mxu0 %v10410_v23  ;;  %7631 = vmatprep.subr.bf16.mxu1 %v10413_v24  ;;  %v10494_v23 = vld [vmem:[%s15042_s1 + $0xb64] ss:$16 sps:$4 sm:$0xff]   ;;  %v10497_v24 = vld [vmem:[%s15042_s1 + $0xb6c] ss:$16 sps:$4 sm:$0xff]  }
 0x137   :  { %6784 = vmatpush1.bf16.msra.mxu0 %v10408_v26  ;;  %7632 = vmatpush1.bf16.msra.mxu1 %v10411_v25  ;;  %v10492_v26 = vld [vmem:[%s15042_s1 + $0xb60] ss:$16 sps:$4 sm:$0xff]   ;;  %v10495_v25 = vld [vmem:[%s15042_s1 + $0xb68] ss:$16 sps:$4 sm:$0xff]  }
 0x138   :  { %6785 = vmatprep.subr.bf16.mxu0 %v10416_v27  ;;  %7633 = vmatprep.subr.bf16.mxu1 %v10419_v28  ;;  %v10500_v27 = vld [vmem:[%s15042_s1 + $0xb84] ss:$16 sps:$4 sm:$0xff]   ;;  %v10503_v28 = vld [vmem:[%s15042_s1 + $0xb8c] ss:$16 sps:$4 sm:$0xff]  }
 0x13b   :  { %6786 = vmatpush1.bf16.msra.mxu0 %v10414_v29  ;;  %7634 = vmatpush1.bf16.msra.mxu1 %v10417_v30  ;;  %v10498_v29 = vld [vmem:[%s15042_s1 + $0xb80] ss:$16 sps:$4 sm:$0xff]   ;;  %v10501_v30 = vld [vmem:[%s15042_s1 + $0xb88] ss:$16 sps:$4 sm:$0xff]  }
 0x13c   :  { %6787 = vmatprep.subr.bf16.mxu0 %v10422_v31  ;;  %7635 = vmatprep.subr.bf16.mxu1 %v10425_v32  ;;  %v10506_v31 = vld [vmem:[%s15042_s1 + $0xba4] ss:$16 sps:$4 sm:$0xff]   ;;  %v10509_v32 = vld [vmem:[%s15042_s1 + $0xbac] ss:$16 sps:$4 sm:$0xff]  }
 0x13f   :  { %6788 = vmatpush1.bf16.msra.mxu0 %v10420_v34  ;;  %7636 = vmatpush1.bf16.msra.mxu1 %v10423_v36  ;;  %v10504_v34 = vld [vmem:[%s15042_s1 + $0xba0] ss:$16 sps:$4 sm:$0xff]   ;;  %v10507_v36 = vld [vmem:[%s15042_s1 + $0xba8] ss:$16 sps:$4 sm:$0xff]  }
 0x140   :  { %6810 = vmatprep.subr.bf16.mxu0 %v10428_v33  ;;  %7658 = vmatprep.subr.bf16.mxu1 %v10431_v35  ;;  %v10512_v33 = vld [vmem:[%s15042_s1 + $0xbc4] ss:$16 sps:$4 sm:$0xff]   ;;  %v10515_v35 = vld [vmem:[%s15042_s1 + $0xbcc] ss:$16 sps:$4 sm:$0xff]  }
 0x142   :  { %6790 = vmatmul.mubr.bf16.vlgmr.msra.gmra.mrb[0].mxu0 %v8609_v39  ;;  %7638 = vmatmul.mubr.bf16.vlgmr.msra.gmra.mrb[0].mxu1 %v8609_v39  ;;  %v10518_v39 = vld [vmem:[%s15042_s1 + $0xbe4] ss:$16 sps:$4 sm:$0xff]  }
 0x143   :  { %6811 = vmatpush1.bf16.msra.mxu0 %v10426_v40  ;;  %7659 = vmatpush1.bf16.msra.mxu1 %v10429_v42  ;;  %v10521_v40 = vld [vmem:[%s15042_s1 + $0xbec] ss:$16 sps:$4 sm:$0xff]   ;;  %v10516_v42 = vld [vmem:[%s15042_s1 + $0xbe0] ss:$16 sps:$4 sm:$0xff]  }
 0x144   :  { %6812 = vmatprep.subr.bf16.mxu0 %v10434_v44  ;;  %7660 = vmatprep.subr.bf16.mxu1 %v10437_v41  ;;  %v10519_v44 = vld [vmem:[%s15042_s1 + $0xbe8] ss:$16 sps:$4 sm:$0xff]   ;;  %v10524_v41 = vld [vmem:[%s15042_s1 + $0xc04] ss:$16 sps:$4 sm:$0xff]  }
 0x145   :  { %6799 = vmatprep.mubr.bf16.mxu0 %v8642_v46  ;;  %7647 = vmatprep.mubr.bf16.mxu1 %v8642_v46  ;;  %v70_v46 = vld [vmem:[%s15043_s0 + $0x1a8] sm:$0xff] }
 0x147   :  { %6813 = vmatpush1.bf16.msra.mxu0 %v10432_v43  ;;  %7661 = vmatpush1.bf16.msra.mxu1 %v10435_v45  ;;  %v10527_v43 = vld [vmem:[%s15042_s1 + $0xc0c] ss:$16 sps:$4 sm:$0xff]  }
 0x148   :  { %6814 = vmatprep.subr.bf16.mxu0 %v10440_v47  ;;  %7662 = vmatprep.subr.bf16.mxu1 %v10443_v48  ;;  %v54_v45 = vld [vmem:[%s15043_s0 + $0x128] sm:$0xff]  ;;  %v8611_v47 = vcombine.low %v12601_v49, %v12606_v50  ;;  %v10522_v48 = vld [vmem:[%s15042_s1 + $0xc00] ss:$16 sps:$4 sm:$0xff]  }
 0x149   :  { %v10533_v49 = vld [vmem:[%s15042_s1 + $0xc2c] ss:$16 sps:$4 sm:$0xff]   ;;  %v10528_v50 = vld [vmem:[%s15042_s1 + $0xc20] ss:$16 sps:$4 sm:$0xff]  }
 0x14a   :  { %6800 = vmatmul.mubr.bf16.gmra.mrb[4].mxu0 %v8641_v51  ;;  %7648 = vmatmul.mubr.bf16.gmra.mrb[4].mxu1 %v8641_v51  ;;  %v10525_v51 = vld [vmem:[%s15042_s1 + $0xc08] ss:$16 sps:$4 sm:$0xff]  }
 0x14b   :  { %6815 = vmatpush1.bf16.msra.mxu0 %v10438_v52  ;;  %7663 = vmatpush1.bf16.msra.mxu1 %v10441_v53  ;;  %v10530_v52 = vld [vmem:[%s15042_s1 + $0xc24] ss:$16 sps:$4 sm:$0xff]   ;;  %v10531_v53 = vld [vmem:[%s15042_s1 + $0xc28] ss:$16 sps:$4 sm:$0xff]  }
 0x14c   :  { %6816 = vmatprep.subr.bf16.mxu0 %v10446_v54  ;;  %7664 = vmatprep.subr.bf16.mxu1 %v10449_v55  ;;  %v8644_v54 = vcombine.high %v54_v45, %v70_v46  ;;  %v10536_v55 = vld [vmem:[%s15042_s1 + $0xc44] ss:$16 sps:$4 sm:$0xff]  }
 0x14d   :  { %6842 = vmatprep.mubr.bf16.mxu0 %v8612_v56  ;;  %7690 = vmatprep.mubr.bf16.mxu1 %v8612_v56  ;;  %v10539_v56 = vld [vmem:[%s15042_s1 + $0xc4c] ss:$16 sps:$4 sm:$0xff]  }
 0x14f   :  { %6817 = vmatpush1.bf16.msra.mxu0 %v10444_v57  ;;  %7665 = vmatpush1.bf16.msra.mxu1 %v10447_v58  ;;  %v12813_v57 = vld [vmem:[%s15043_s0 + $0x30] sm:$0xff] }
 0x150   :  { %6818 = vmatprep.subr.bf16.mxu0 %v10452_v59  ;;  %7666 = vmatprep.subr.bf16.mxu1 %v10455_v60  ;;  %v12818_v58 = vld [vmem:[%s15043_s0 + $0xb0] sm:$0xff]  ;;  %v8643_v59 = vcombine.low %v54_v45, %v70_v46  ;;  %v10609_v46 = vld [vmem:[%s15042_s1 + $0xdc8] ss:$16 sps:$4 sm:$0xff]  }
 0x151   :  { %v10534_v60 = vld [vmem:[%s15042_s1 + $0xc40] ss:$16 sps:$4 sm:$0xff]  }
 0x152   :  { %v10606_v45 = vld [vmem:[%s15042_s1 + $0xdc0] ss:$16 sps:$4 sm:$0xff]  }
 0x153   :  { %6819 = vmatpush1.bf16.msra.mxu0 %v10450_v61  ;;  %7667 = vmatpush1.bf16.msra.mxu1 %v10453_v62  ;;  %v10537_v61 = vld [vmem:[%s15042_s1 + $0xc48] ss:$16 sps:$4 sm:$0xff]   ;;  %v10542_v62 = vld [vmem:[%s15042_s1 + $0xc64] ss:$16 sps:$4 sm:$0xff]  }
 0x154   :  { %6820 = vmatprep.subr.bf16.mxu0 %v10458_v63  ;;  %7668 = vmatprep.subr.bf16.mxu1 %v10461_v0  ;;  %v10545_v63 = vld [vmem:[%s15042_s1 + $0xc6c] ss:$16 sps:$4 sm:$0xff]   ;;  %v8614_v0 = vcombine.high %v12813_v57, %v12818_v58 }
 0x157   :  { %6821 = vmatpush1.bf16.msra.mxu0 %v10456_v1  ;;  %7669 = vmatpush1.bf16.msra.mxu1 %v10459_v2  ;;  %v10540_v1 = vld [vmem:[%s15042_s1 + $0xc60] ss:$16 sps:$4 sm:$0xff]   ;;  %v10543_v2 = vld [vmem:[%s15042_s1 + $0xc68] ss:$16 sps:$4 sm:$0xff]  }
 0x158   :  { %6822 = vmatprep.subr.bf16.mxu0 %v10464_v3  ;;  %7670 = vmatprep.subr.bf16.mxu1 %v10467_v4  ;;  %v10548_v3 = vld [vmem:[%s15042_s1 + $0xc84] ss:$16 sps:$4 sm:$0xff]   ;;  %v10551_v4 = vld [vmem:[%s15042_s1 + $0xc8c] ss:$16 sps:$4 sm:$0xff]  }
 0x15b   :  { %6823 = vmatpush1.bf16.msra.mxu0 %v10462_v5  ;;  %7671 = vmatpush1.bf16.msra.mxu1 %v10465_v6  ;;  %v10546_v5 = vld [vmem:[%s15042_s1 + $0xc80] ss:$16 sps:$4 sm:$0xff]   ;;  %v10549_v6 = vld [vmem:[%s15042_s1 + $0xc88] ss:$16 sps:$4 sm:$0xff]  }
 0x15c   :  { %6824 = vmatprep.subr.bf16.mxu0 %v10470_v7  ;;  %7672 = vmatprep.subr.bf16.mxu1 %v10473_v8  ;;  %v10554_v7 = vld [vmem:[%s15042_s1 + $0xca4] ss:$16 sps:$4 sm:$0xff]   ;;  %v10557_v8 = vld [vmem:[%s15042_s1 + $0xcac] ss:$16 sps:$4 sm:$0xff]  }
 0x15f   :  { %6825 = vmatpush1.bf16.msra.mxu0 %v10468_v9  ;;  %7673 = vmatpush1.bf16.msra.mxu1 %v10471_v10  ;;  %v10552_v9 = vld [vmem:[%s15042_s1 + $0xca0] ss:$16 sps:$4 sm:$0xff]   ;;  %v10555_v10 = vld [vmem:[%s15042_s1 + $0xca8] ss:$16 sps:$4 sm:$0xff]  }
 0x160   :  { %6826 = vmatprep.subr.bf16.mxu0 %v10476_v11  ;;  %7674 = vmatprep.subr.bf16.mxu1 %v10479_v12  ;;  %v10560_v11 = vld [vmem:[%s15042_s1 + $0xcc4] ss:$16 sps:$4 sm:$0xff]   ;;  %v10563_v12 = vld [vmem:[%s15042_s1 + $0xccc] ss:$16 sps:$4 sm:$0xff]  }
 0x163   :  { %6827 = vmatpush1.bf16.msra.mxu0 %v10474_v13  ;;  %7675 = vmatpush1.bf16.msra.mxu1 %v10477_v14  ;;  %v10558_v13 = vld [vmem:[%s15042_s1 + $0xcc0] ss:$16 sps:$4 sm:$0xff]   ;;  %v10561_v14 = vld [vmem:[%s15042_s1 + $0xcc8] ss:$16 sps:$4 sm:$0xff]  }
 0x164   :  { %6828 = vmatprep.subr.bf16.mxu0 %v10482_v15  ;;  %7676 = vmatprep.subr.bf16.mxu1 %v10485_v16  ;;  %v10566_v15 = vld [vmem:[%s15042_s1 + $0xce4] ss:$16 sps:$4 sm:$0xff]   ;;  %v10569_v16 = vld [vmem:[%s15042_s1 + $0xcec] ss:$16 sps:$4 sm:$0xff]  }
 0x167   :  { %6829 = vmatpush1.bf16.msra.mxu0 %v10480_v17  ;;  %7677 = vmatpush1.bf16.msra.mxu1 %v10483_v18  ;;  %v10564_v17 = vld [vmem:[%s15042_s1 + $0xce0] ss:$16 sps:$4 sm:$0xff]   ;;  %v10567_v18 = vld [vmem:[%s15042_s1 + $0xce8] ss:$16 sps:$4 sm:$0xff]  }
 0x168   :  { %6830 = vmatprep.subr.bf16.mxu0 %v10488_v19  ;;  %7678 = vmatprep.subr.bf16.mxu1 %v10491_v20  ;;  %v10572_v19 = vld [vmem:[%s15042_s1 + $0xd04] ss:$16 sps:$4 sm:$0xff]   ;;  %v10575_v20 = vld [vmem:[%s15042_s1 + $0xd0c] ss:$16 sps:$4 sm:$0xff]  }
 0x16b   :  { %6831 = vmatpush1.bf16.msra.mxu0 %v10486_v21  ;;  %7679 = vmatpush1.bf16.msra.mxu1 %v10489_v22  ;;  %v10570_v21 = vld [vmem:[%s15042_s1 + $0xd00] ss:$16 sps:$4 sm:$0xff]   ;;  %v10573_v22 = vld [vmem:[%s15042_s1 + $0xd08] ss:$16 sps:$4 sm:$0xff]  }
 0x16c   :  { %6832 = vmatprep.subr.bf16.mxu0 %v10494_v23  ;;  %7680 = vmatprep.subr.bf16.mxu1 %v10497_v24  ;;  %v10578_v23 = vld [vmem:[%s15042_s1 + $0xd24] ss:$16 sps:$4 sm:$0xff]   ;;  %v10581_v24 = vld [vmem:[%s15042_s1 + $0xd2c] ss:$16 sps:$4 sm:$0xff]  }
 0x16f   :  { %6833 = vmatpush1.bf16.msra.mxu0 %v10492_v26  ;;  %7681 = vmatpush1.bf16.msra.mxu1 %v10495_v25  ;;  %v10576_v26 = vld [vmem:[%s15042_s1 + $0xd20] ss:$16 sps:$4 sm:$0xff]   ;;  %v10579_v25 = vld [vmem:[%s15042_s1 + $0xd28] ss:$16 sps:$4 sm:$0xff]  }
 0x170   :  { %6834 = vmatprep.subr.bf16.mxu0 %v10500_v27  ;;  %7682 = vmatprep.subr.bf16.mxu1 %v10503_v28  ;;  %v10584_v27 = vld [vmem:[%s15042_s1 + $0xd44] ss:$16 sps:$4 sm:$0xff]   ;;  %v10587_v28 = vld [vmem:[%s15042_s1 + $0xd4c] ss:$16 sps:$4 sm:$0xff]  }
 0x173   :  { %6835 = vmatpush1.bf16.msra.mxu0 %v10498_v29  ;;  %7683 = vmatpush1.bf16.msra.mxu1 %v10501_v30  ;;  %v10582_v29 = vld [vmem:[%s15042_s1 + $0xd40] ss:$16 sps:$4 sm:$0xff]   ;;  %v10585_v30 = vld [vmem:[%s15042_s1 + $0xd48] ss:$16 sps:$4 sm:$0xff]  }
 0x174   :  { %6836 = vmatprep.subr.bf16.mxu0 %v10506_v31  ;;  %7684 = vmatprep.subr.bf16.mxu1 %v10509_v32  ;;  %v10590_v31 = vld [vmem:[%s15042_s1 + $0xd64] ss:$16 sps:$4 sm:$0xff]   ;;  %v10593_v32 = vld [vmem:[%s15042_s1 + $0xd6c] ss:$16 sps:$4 sm:$0xff]  }
 0x177   :  { %6837 = vmatpush1.bf16.msra.mxu0 %v10504_v34  ;;  %7685 = vmatpush1.bf16.msra.mxu1 %v10507_v36  ;;  %v10588_v34 = vld [vmem:[%s15042_s1 + $0xd60] ss:$16 sps:$4 sm:$0xff]   ;;  %v10591_v36 = vld [vmem:[%s15042_s1 + $0xd68] ss:$16 sps:$4 sm:$0xff]  }
 0x178   :  { %6838 = vmatprep.subr.bf16.mxu0 %v10512_v33  ;;  %7686 = vmatprep.subr.bf16.mxu1 %v10515_v35  ;;  %v10596_v33 = vld [vmem:[%s15042_s1 + $0xd84] ss:$16 sps:$4 sm:$0xff]   ;;  %v10599_v35 = vld [vmem:[%s15042_s1 + $0xd8c] ss:$16 sps:$4 sm:$0xff]  }
 0x17b   :  { %6839 = vmatpush1.bf16.msra.mxu0 %v10510_v37  ;;  %7687 = vmatpush1.bf16.msra.mxu1 %v10513_v38  ;;  %v10594_v37 = vld [vmem:[%s15042_s1 + $0xd80] ss:$16 sps:$4 sm:$0xff]   ;;  %v10597_v38 = vld [vmem:[%s15042_s1 + $0xd88] ss:$16 sps:$4 sm:$0xff]  }
 0x17c   :  { %6840 = vmatprep.subr.bf16.mxu0 %v10518_v39  ;;  %7688 = vmatprep.subr.bf16.mxu1 %v10521_v40  ;;  %v10602_v39 = vld [vmem:[%s15042_s1 + $0xda4] ss:$16 sps:$4 sm:$0xff]   ;;  %v10605_v40 = vld [vmem:[%s15042_s1 + $0xdac] ss:$16 sps:$4 sm:$0xff]  }
 0x17f   :  { %6841 = vmatpush1.bf16.msra.mxu0 %v10516_v42  ;;  %7689 = vmatpush1.bf16.msra.mxu1 %v10519_v44  ;;  %v10600_v42 = vld [vmem:[%s15042_s1 + $0xda0] ss:$16 sps:$4 sm:$0xff]   ;;  %v10603_v44 = vld [vmem:[%s15042_s1 + $0xda8] ss:$16 sps:$4 sm:$0xff]  }
 0x180   :  { %6863 = vmatprep.subr.bf16.mxu0 %v10524_v41  ;;  %7711 = vmatprep.subr.bf16.mxu1 %v10527_v43  ;;  %v10608_v41 = vld [vmem:[%s15042_s1 + $0xdc4] ss:$16 sps:$4 sm:$0xff]   ;;  %v10611_v43 = vld [vmem:[%s15042_s1 + $0xdcc] ss:$16 sps:$4 sm:$0xff]  }
 0x182   :  { %6843 = vmatmul.mubr.bf16.vlgmr.msra.gmra.mrb[0].mxu0 %v8611_v47  ;;  %7691 = vmatmul.mubr.bf16.vlgmr.msra.gmra.mrb[0].mxu1 %v8611_v47  ;;  %v10614_v47 = vld [vmem:[%s15042_s1 + $0xde4] ss:$16 sps:$4 sm:$0xff]  }
 0x183   :  { %6864 = vmatpush1.bf16.msra.mxu0 %v10522_v48  ;;  %7712 = vmatpush1.bf16.msra.mxu1 %v10525_v51  ;;  %v10617_v48 = vld [vmem:[%s15042_s1 + $0xdec] ss:$16 sps:$4 sm:$0xff]   ;;  %v10612_v51 = vld [vmem:[%s15042_s1 + $0xde0] ss:$16 sps:$4 sm:$0xff]  }
 0x184   :  { %6865 = vmatprep.subr.bf16.mxu0 %v10530_v52  ;;  %7713 = vmatprep.subr.bf16.mxu1 %v10533_v49  ;;  %v10615_v52 = vld [vmem:[%s15042_s1 + $0xde8] ss:$16 sps:$4 sm:$0xff]   ;;  %v10620_v49 = vld [vmem:[%s15042_s1 + $0xe04] ss:$16 sps:$4 sm:$0xff]  }
 0x185   :  { %6852 = vmatprep.mubr.bf16.mxu0 %v8644_v54  ;;  %7700 = vmatprep.mubr.bf16.mxu1 %v8644_v54  ;;  %v71_v54 = vld [vmem:[%s15043_s0 + $0x1b0] sm:$0xff] }
 0x187   :  { %6866 = vmatpush1.bf16.msra.mxu0 %v10528_v50  ;;  %7714 = vmatpush1.bf16.msra.mxu1 %v10531_v53  ;;  %v10623_v50 = vld [vmem:[%s15042_s1 + $0xe0c] ss:$16 sps:$4 sm:$0xff]   ;;  %v55_v53 = vld [vmem:[%s15043_s0 + $0x130] sm:$0xff] }
 0x188   :  { %6867 = vmatprep.subr.bf16.mxu0 %v10536_v55  ;;  %7715 = vmatprep.subr.bf16.mxu1 %v10539_v56  ;;  %v8613_v55 = vcombine.low %v12813_v57, %v12818_v58  ;;  %v10618_v56 = vld [vmem:[%s15042_s1 + $0xe00] ss:$16 sps:$4 sm:$0xff]   ;;  %v10629_v57 = vld [vmem:[%s15042_s1 + $0xe2c] ss:$16 sps:$4 sm:$0xff]  }
 0x189   :  { %v10624_v58 = vld [vmem:[%s15042_s1 + $0xe20] ss:$16 sps:$4 sm:$0xff]  }
 0x18a   :  { %6853 = vmatmul.mubr.bf16.gmra.mrb[4].mxu0 %v8643_v59  ;;  %7701 = vmatmul.mubr.bf16.gmra.mrb[4].mxu1 %v8643_v59  ;;  %v10621_v59 = vld [vmem:[%s15042_s1 + $0xe08] ss:$16 sps:$4 sm:$0xff]  }
 0x18b   :  { %6868 = vmatpush1.bf16.msra.mxu0 %v10534_v60  ;;  %7716 = vmatpush1.bf16.msra.mxu1 %v10537_v61  ;;  %v10626_v60 = vld [vmem:[%s15042_s1 + $0xe24] ss:$16 sps:$4 sm:$0xff]   ;;  %v10627_v61 = vld [vmem:[%s15042_s1 + $0xe28] ss:$16 sps:$4 sm:$0xff]  }
 0x18c   :  { %6869 = vmatprep.subr.bf16.mxu0 %v10542_v62  ;;  %7717 = vmatprep.subr.bf16.mxu1 %v10545_v63  ;;  %v8646_v62 = vcombine.high %v55_v53, %v71_v54  ;;  %v10632_v63 = vld [vmem:[%s15042_s1 + $0xe44] ss:$16 sps:$4 sm:$0xff]  }
 0x18d   :  { %6895 = vmatprep.mubr.bf16.mxu0 %v8614_v0  ;;  %7743 = vmatprep.mubr.bf16.mxu1 %v8614_v0  ;;  %v10635_v0 = vld [vmem:[%s15042_s1 + $0xe4c] ss:$16 sps:$4 sm:$0xff]  }
 0x18f   :  { %6870 = vmatpush1.bf16.msra.mxu0 %v10540_v1  ;;  %7718 = vmatpush1.bf16.msra.mxu1 %v10543_v2  ;;  %v13025_v1 = vld [vmem:[%s15043_s0 + $0x38] sm:$0xff] }
 0x190   :  { %6871 = vmatprep.subr.bf16.mxu0 %v10548_v3  ;;  %7719 = vmatprep.subr.bf16.mxu1 %v10551_v4  ;;  %v13030_v2 = vld [vmem:[%s15043_s0 + $0xb8] sm:$0xff]  ;;  %v8645_v3 = vcombine.low %v55_v53, %v71_v54  ;;  %v10630_v4 = vld [vmem:[%s15042_s1 + $0xe40] ss:$16 sps:$4 sm:$0xff]  }
 0x191   :  { %v10702_v53 = vld [vmem:[%s15042_s1 + $0xfc0] ss:$16 sps:$4 sm:$0xff]   ;;  %v10705_v54 = vld [vmem:[%s15042_s1 + $0xfc8] ss:$16 sps:$4 sm:$0xff]  }
 0x193   :  { %6872 = vmatpush1.bf16.msra.mxu0 %v10546_v5  ;;  %7720 = vmatpush1.bf16.msra.mxu1 %v10549_v6  ;;  %v10633_v5 = vld [vmem:[%s15042_s1 + $0xe48] ss:$16 sps:$4 sm:$0xff]   ;;  %v10638_v6 = vld [vmem:[%s15042_s1 + $0xe64] ss:$16 sps:$4 sm:$0xff]  }
 0x194   :  { %6873 = vmatprep.subr.bf16.mxu0 %v10554_v7  ;;  %7721 = vmatprep.subr.bf16.mxu1 %v10557_v8  ;;  %v10641_v7 = vld [vmem:[%s15042_s1 + $0xe6c] ss:$16 sps:$4 sm:$0xff]   ;;  %v8616_v8 = vcombine.high %v13025_v1, %v13030_v2 }
 0x197   :  { %6874 = vmatpush1.bf16.msra.mxu0 %v10552_v9  ;;  %7722 = vmatpush1.bf16.msra.mxu1 %v10555_v10  ;;  %v10636_v9 = vld [vmem:[%s15042_s1 + $0xe60] ss:$16 sps:$4 sm:$0xff]   ;;  %v10639_v10 = vld [vmem:[%s15042_s1 + $0xe68] ss:$16 sps:$4 sm:$0xff]  }
 0x198   :  { %6875 = vmatprep.subr.bf16.mxu0 %v10560_v11  ;;  %7723 = vmatprep.subr.bf16.mxu1 %v10563_v12  ;;  %v10644_v11 = vld [vmem:[%s15042_s1 + $0xe84] ss:$16 sps:$4 sm:$0xff]   ;;  %v10647_v12 = vld [vmem:[%s15042_s1 + $0xe8c] ss:$16 sps:$4 sm:$0xff]  }
 0x19b   :  { %6876 = vmatpush1.bf16.msra.mxu0 %v10558_v13  ;;  %7724 = vmatpush1.bf16.msra.mxu1 %v10561_v14  ;;  %v10642_v13 = vld [vmem:[%s15042_s1 + $0xe80] ss:$16 sps:$4 sm:$0xff]   ;;  %v10645_v14 = vld [vmem:[%s15042_s1 + $0xe88] ss:$16 sps:$4 sm:$0xff]  }
 0x19c   :  { %6877 = vmatprep.subr.bf16.mxu0 %v10566_v15  ;;  %7725 = vmatprep.subr.bf16.mxu1 %v10569_v16  ;;  %v10650_v15 = vld [vmem:[%s15042_s1 + $0xea4] ss:$16 sps:$4 sm:$0xff]   ;;  %v10653_v16 = vld [vmem:[%s15042_s1 + $0xeac] ss:$16 sps:$4 sm:$0xff]  }
 0x19f   :  { %6878 = vmatpush1.bf16.msra.mxu0 %v10564_v17  ;;  %7726 = vmatpush1.bf16.msra.mxu1 %v10567_v18  ;;  %v10648_v17 = vld [vmem:[%s15042_s1 + $0xea0] ss:$16 sps:$4 sm:$0xff]   ;;  %v10651_v18 = vld [vmem:[%s15042_s1 + $0xea8] ss:$16 sps:$4 sm:$0xff]  }
 0x1a0   :  { %6879 = vmatprep.subr.bf16.mxu0 %v10572_v19  ;;  %7727 = vmatprep.subr.bf16.mxu1 %v10575_v20  ;;  %v10656_v19 = vld [vmem:[%s15042_s1 + $0xec4] ss:$16 sps:$4 sm:$0xff]   ;;  %v10659_v20 = vld [vmem:[%s15042_s1 + $0xecc] ss:$16 sps:$4 sm:$0xff]  }
 0x1a3   :  { %6880 = vmatpush1.bf16.msra.mxu0 %v10570_v21  ;;  %7728 = vmatpush1.bf16.msra.mxu1 %v10573_v22  ;;  %v10654_v21 = vld [vmem:[%s15042_s1 + $0xec0] ss:$16 sps:$4 sm:$0xff]   ;;  %v10657_v22 = vld [vmem:[%s15042_s1 + $0xec8] ss:$16 sps:$4 sm:$0xff]  }
 0x1a4   :  { %6881 = vmatprep.subr.bf16.mxu0 %v10578_v23  ;;  %7729 = vmatprep.subr.bf16.mxu1 %v10581_v24  ;;  %v10662_v23 = vld [vmem:[%s15042_s1 + $0xee4] ss:$16 sps:$4 sm:$0xff]   ;;  %v10665_v24 = vld [vmem:[%s15042_s1 + $0xeec] ss:$16 sps:$4 sm:$0xff]  }
 0x1a7   :  { %6882 = vmatpush1.bf16.msra.mxu0 %v10576_v26  ;;  %7730 = vmatpush1.bf16.msra.mxu1 %v10579_v25  ;;  %v10660_v26 = vld [vmem:[%s15042_s1 + $0xee0] ss:$16 sps:$4 sm:$0xff]   ;;  %v10663_v25 = vld [vmem:[%s15042_s1 + $0xee8] ss:$16 sps:$4 sm:$0xff]  }
 0x1a8   :  { %6883 = vmatprep.subr.bf16.mxu0 %v10584_v27  ;;  %7731 = vmatprep.subr.bf16.mxu1 %v10587_v28  ;;  %v10668_v27 = vld [vmem:[%s15042_s1 + $0xf04] ss:$16 sps:$4 sm:$0xff]   ;;  %v10671_v28 = vld [vmem:[%s15042_s1 + $0xf0c] ss:$16 sps:$4 sm:$0xff]  }
 0x1ab   :  { %6884 = vmatpush1.bf16.msra.mxu0 %v10582_v29  ;;  %7732 = vmatpush1.bf16.msra.mxu1 %v10585_v30  ;;  %v10666_v29 = vld [vmem:[%s15042_s1 + $0xf00] ss:$16 sps:$4 sm:$0xff]   ;;  %v10669_v30 = vld [vmem:[%s15042_s1 + $0xf08] ss:$16 sps:$4 sm:$0xff]  }
 0x1ac   :  { %6885 = vmatprep.subr.bf16.mxu0 %v10590_v31  ;;  %7733 = vmatprep.subr.bf16.mxu1 %v10593_v32  ;;  %v10674_v31 = vld [vmem:[%s15042_s1 + $0xf24] ss:$16 sps:$4 sm:$0xff]   ;;  %v10677_v32 = vld [vmem:[%s15042_s1 + $0xf2c] ss:$16 sps:$4 sm:$0xff]  }
 0x1af   :  { %6886 = vmatpush1.bf16.msra.mxu0 %v10588_v34  ;;  %7734 = vmatpush1.bf16.msra.mxu1 %v10591_v36  ;;  %v10672_v34 = vld [vmem:[%s15042_s1 + $0xf20] ss:$16 sps:$4 sm:$0xff]   ;;  %v10675_v36 = vld [vmem:[%s15042_s1 + $0xf28] ss:$16 sps:$4 sm:$0xff]  }
 0x1b0   :  { %6887 = vmatprep.subr.bf16.mxu0 %v10596_v33  ;;  %7735 = vmatprep.subr.bf16.mxu1 %v10599_v35  ;;  %v10680_v33 = vld [vmem:[%s15042_s1 + $0xf44] ss:$16 sps:$4 sm:$0xff]   ;;  %v10683_v35 = vld [vmem:[%s15042_s1 + $0xf4c] ss:$16 sps:$4 sm:$0xff]  }
 0x1b3   :  { %6888 = vmatpush1.bf16.msra.mxu0 %v10594_v37  ;;  %7736 = vmatpush1.bf16.msra.mxu1 %v10597_v38  ;;  %v10678_v37 = vld [vmem:[%s15042_s1 + $0xf40] ss:$16 sps:$4 sm:$0xff]   ;;  %v10681_v38 = vld [vmem:[%s15042_s1 + $0xf48] ss:$16 sps:$4 sm:$0xff]  }
 0x1b4   :  { %6889 = vmatprep.subr.bf16.mxu0 %v10602_v39  ;;  %7737 = vmatprep.subr.bf16.mxu1 %v10605_v40  ;;  %v10686_v39 = vld [vmem:[%s15042_s1 + $0xf64] ss:$16 sps:$4 sm:$0xff]   ;;  %v10689_v40 = vld [vmem:[%s15042_s1 + $0xf6c] ss:$16 sps:$4 sm:$0xff]  }
 0x1b7   :  { %6890 = vmatpush1.bf16.msra.mxu0 %v10600_v42  ;;  %7738 = vmatpush1.bf16.msra.mxu1 %v10603_v44  ;;  %v10684_v42 = vld [vmem:[%s15042_s1 + $0xf60] ss:$16 sps:$4 sm:$0xff]   ;;  %v10687_v44 = vld [vmem:[%s15042_s1 + $0xf68] ss:$16 sps:$4 sm:$0xff]  }
 0x1b8   :  { %6891 = vmatprep.subr.bf16.mxu0 %v10608_v41  ;;  %7739 = vmatprep.subr.bf16.mxu1 %v10611_v43  ;;  %v10692_v41 = vld [vmem:[%s15042_s1 + $0xf84] ss:$16 sps:$4 sm:$0xff]   ;;  %v10695_v43 = vld [vmem:[%s15042_s1 + $0xf8c] ss:$16 sps:$4 sm:$0xff]  }
 0x1bb   :  { %6892 = vmatpush1.bf16.msra.mxu0 %v10606_v45  ;;  %7740 = vmatpush1.bf16.msra.mxu1 %v10609_v46  ;;  %v10690_v45 = vld [vmem:[%s15042_s1 + $0xf80] ss:$16 sps:$4 sm:$0xff]   ;;  %v10693_v46 = vld [vmem:[%s15042_s1 + $0xf88] ss:$16 sps:$4 sm:$0xff]  }
 0x1bc   :  { %6893 = vmatprep.subr.bf16.mxu0 %v10614_v47  ;;  %7741 = vmatprep.subr.bf16.mxu1 %v10617_v48  ;;  %v10698_v47 = vld [vmem:[%s15042_s1 + $0xfa4] ss:$16 sps:$4 sm:$0xff]   ;;  %v10701_v48 = vld [vmem:[%s15042_s1 + $0xfac] ss:$16 sps:$4 sm:$0xff]  }
 0x1bf   :  { %6894 = vmatpush1.bf16.msra.mxu0 %v10612_v51  ;;  %7742 = vmatpush1.bf16.msra.mxu1 %v10615_v52  ;;  %v10696_v51 = vld [vmem:[%s15042_s1 + $0xfa0] ss:$16 sps:$4 sm:$0xff]   ;;  %v10699_v52 = vld [vmem:[%s15042_s1 + $0xfa8] ss:$16 sps:$4 sm:$0xff]  }
 0x1c0   :  { %6916 = vmatprep.subr.bf16.mxu0 %v10620_v49  ;;  %7764 = vmatprep.subr.bf16.mxu1 %v10623_v50  ;;  %v10704_v49 = vld [vmem:[%s15042_s1 + $0xfc4] ss:$16 sps:$4 sm:$0xff]   ;;  %v10707_v50 = vld [vmem:[%s15042_s1 + $0xfcc] ss:$16 sps:$4 sm:$0xff]  }
 0x1c2   :  { %6896 = vmatmul.mubr.bf16.vlgmr.msra.gmra.mrb[0].mxu0 %v8613_v55  ;;  %7744 = vmatmul.mubr.bf16.vlgmr.msra.gmra.mrb[0].mxu1 %v8613_v55  ;;  %v10710_v55 = vld [vmem:[%s15042_s1 + $0xfe4] ss:$16 sps:$4 sm:$0xff]  }
 0x1c3   :  { %6917 = vmatpush1.bf16.msra.mxu0 %v10618_v56  ;;  %7765 = vmatpush1.bf16.msra.mxu1 %v10621_v59  ;;  %v10713_v56 = vld [vmem:[%s15042_s1 + $0xfec] ss:$16 sps:$4 sm:$0xff]   ;;  %v10708_v59 = vld [vmem:[%s15042_s1 + $0xfe0] ss:$16 sps:$4 sm:$0xff]  }
 0x1c4   :  { %6918 = vmatprep.subr.bf16.mxu0 %v10626_v60  ;;  %7766 = vmatprep.subr.bf16.mxu1 %v10629_v57  ;;  %v10711_v60 = vld [vmem:[%s15042_s1 + $0xfe8] ss:$16 sps:$4 sm:$0xff]   ;;  %v10716_v57 = vld [vmem:[%s15042_s1 + $0x1004] ss:$16 sps:$4 sm:$0xff]  }
 0x1c5   :  { %6905 = vmatprep.mubr.bf16.mxu0 %v8646_v62  ;;  %7753 = vmatprep.mubr.bf16.mxu1 %v8646_v62  ;;  %v72_v62 = vld [vmem:[%s15043_s0 + $0x1b8] sm:$0xff] }
 0x1c7   :  { %6919 = vmatpush1.bf16.msra.mxu0 %v10624_v58  ;;  %7767 = vmatpush1.bf16.msra.mxu1 %v10627_v61  ;;  %v10719_v58 = vld [vmem:[%s15042_s1 + $0x100c] ss:$16 sps:$4 sm:$0xff]  }
 0x1c8   :  { %6920 = vmatprep.subr.bf16.mxu0 %v10632_v63  ;;  %7768 = vmatprep.subr.bf16.mxu1 %v10635_v0  ;;  %v56_v61 = vld [vmem:[%s15043_s0 + $0x138] sm:$0xff]  ;;  %v8615_v63 = vcombine.low %v13025_v1, %v13030_v2  ;;  %v10714_v0 = vld [vmem:[%s15042_s1 + $0x1000] ss:$16 sps:$4 sm:$0xff]  }
 0x1c9   :  { %v10725_v1 = vld [vmem:[%s15042_s1 + $0x102c] ss:$16 sps:$4 sm:$0xff]   ;;  %v10720_v2 = vld [vmem:[%s15042_s1 + $0x1020] ss:$16 sps:$4 sm:$0xff]  }
 0x1ca   :  { %6906 = vmatmul.mubr.bf16.gmra.mrb[4].mxu0 %v8645_v3  ;;  %7754 = vmatmul.mubr.bf16.gmra.mrb[4].mxu1 %v8645_v3  ;;  %v10717_v3 = vld [vmem:[%s15042_s1 + $0x1008] ss:$16 sps:$4 sm:$0xff]  }
 0x1cb   :  { %6921 = vmatpush1.bf16.msra.mxu0 %v10630_v4  ;;  %7769 = vmatpush1.bf16.msra.mxu1 %v10633_v5  ;;  %v10722_v4 = vld [vmem:[%s15042_s1 + $0x1024] ss:$16 sps:$4 sm:$0xff]   ;;  %v10723_v5 = vld [vmem:[%s15042_s1 + $0x1028] ss:$16 sps:$4 sm:$0xff]  }
 0x1cc   :  { %6922 = vmatprep.subr.bf16.mxu0 %v10638_v6  ;;  %7770 = vmatprep.subr.bf16.mxu1 %v10641_v7  ;;  %v8648_v6 = vcombine.high %v56_v61, %v72_v62  ;;  %v10728_v7 = vld [vmem:[%s15042_s1 + $0x1044] ss:$16 sps:$4 sm:$0xff]  }
 0x1cd   :  { %6948 = vmatprep.mubr.bf16.mxu0 %v8616_v8  ;;  %7796 = vmatprep.mubr.bf16.mxu1 %v8616_v8  ;;  %v10731_v8 = vld [vmem:[%s15042_s1 + $0x104c] ss:$16 sps:$4 sm:$0xff]  }
 0x1cf   :  { %6923 = vmatpush1.bf16.msra.mxu0 %v10636_v9  ;;  %7771 = vmatpush1.bf16.msra.mxu1 %v10639_v10  ;;  %v13237_v9 = vld [vmem:[%s15043_s0 + $0x40] sm:$0xff] }
 0x1d0   :  { %6924 = vmatprep.subr.bf16.mxu0 %v10644_v11  ;;  %7772 = vmatprep.subr.bf16.mxu1 %v10647_v12  ;;  %v13242_v10 = vld [vmem:[%s15043_s0 + $0xc0] sm:$0xff]  ;;  %v8647_v11 = vcombine.low %v56_v61, %v72_v62  ;;  %v10801_v62 = vld [vmem:[%s15042_s1 + $0x11c8] ss:$16 sps:$4 sm:$0xff]  }
 0x1d1   :  { %v10726_v12 = vld [vmem:[%s15042_s1 + $0x1040] ss:$16 sps:$4 sm:$0xff]  }
 0x1d2   :  { %v10798_v61 = vld [vmem:[%s15042_s1 + $0x11c0] ss:$16 sps:$4 sm:$0xff]  }
 0x1d3   :  { %6925 = vmatpush1.bf16.msra.mxu0 %v10642_v13  ;;  %7773 = vmatpush1.bf16.msra.mxu1 %v10645_v14  ;;  %v10729_v13 = vld [vmem:[%s15042_s1 + $0x1048] ss:$16 sps:$4 sm:$0xff]   ;;  %v10734_v14 = vld [vmem:[%s15042_s1 + $0x1064] ss:$16 sps:$4 sm:$0xff]  }
 0x1d4   :  { %6926 = vmatprep.subr.bf16.mxu0 %v10650_v15  ;;  %7774 = vmatprep.subr.bf16.mxu1 %v10653_v16  ;;  %v10737_v15 = vld [vmem:[%s15042_s1 + $0x106c] ss:$16 sps:$4 sm:$0xff]   ;;  %v8618_v16 = vcombine.high %v13237_v9, %v13242_v10 }
 0x1d7   :  { %6927 = vmatpush1.bf16.msra.mxu0 %v10648_v17  ;;  %7775 = vmatpush1.bf16.msra.mxu1 %v10651_v18  ;;  %v10732_v17 = vld [vmem:[%s15042_s1 + $0x1060] ss:$16 sps:$4 sm:$0xff]   ;;  %v10735_v18 = vld [vmem:[%s15042_s1 + $0x1068] ss:$16 sps:$4 sm:$0xff]  }
 0x1d8   :  { %6928 = vmatprep.subr.bf16.mxu0 %v10656_v19  ;;  %7776 = vmatprep.subr.bf16.mxu1 %v10659_v20  ;;  %v10740_v19 = vld [vmem:[%s15042_s1 + $0x1084] ss:$16 sps:$4 sm:$0xff]   ;;  %v10743_v20 = vld [vmem:[%s15042_s1 + $0x108c] ss:$16 sps:$4 sm:$0xff]  }
 0x1db   :  { %6929 = vmatpush1.bf16.msra.mxu0 %v10654_v21  ;;  %7777 = vmatpush1.bf16.msra.mxu1 %v10657_v22  ;;  %v10738_v21 = vld [vmem:[%s15042_s1 + $0x1080] ss:$16 sps:$4 sm:$0xff]   ;;  %v10741_v22 = vld [vmem:[%s15042_s1 + $0x1088] ss:$16 sps:$4 sm:$0xff]  }
 0x1dc   :  { %6930 = vmatprep.subr.bf16.mxu0 %v10662_v23  ;;  %7778 = vmatprep.subr.bf16.mxu1 %v10665_v24  ;;  %v10746_v23 = vld [vmem:[%s15042_s1 + $0x10a4] ss:$16 sps:$4 sm:$0xff]   ;;  %v10749_v24 = vld [vmem:[%s15042_s1 + $0x10ac] ss:$16 sps:$4 sm:$0xff]  }
 0x1df   :  { %6931 = vmatpush1.bf16.msra.mxu0 %v10660_v26  ;;  %7779 = vmatpush1.bf16.msra.mxu1 %v10663_v25  ;;  %v10744_v26 = vld [vmem:[%s15042_s1 + $0x10a0] ss:$16 sps:$4 sm:$0xff]   ;;  %v10747_v25 = vld [vmem:[%s15042_s1 + $0x10a8] ss:$16 sps:$4 sm:$0xff]  }
 0x1e0   :  { %6932 = vmatprep.subr.bf16.mxu0 %v10668_v27  ;;  %7780 = vmatprep.subr.bf16.mxu1 %v10671_v28  ;;  %v10752_v27 = vld [vmem:[%s15042_s1 + $0x10c4] ss:$16 sps:$4 sm:$0xff]   ;;  %v10755_v28 = vld [vmem:[%s15042_s1 + $0x10cc] ss:$16 sps:$4 sm:$0xff]  }
 0x1e3   :  { %6933 = vmatpush1.bf16.msra.mxu0 %v10666_v29  ;;  %7781 = vmatpush1.bf16.msra.mxu1 %v10669_v30  ;;  %v10750_v29 = vld [vmem:[%s15042_s1 + $0x10c0] ss:$16 sps:$4 sm:$0xff]   ;;  %v10753_v30 = vld [vmem:[%s15042_s1 + $0x10c8] ss:$16 sps:$4 sm:$0xff]  }
 0x1e4   :  { %6934 = vmatprep.subr.bf16.mxu0 %v10674_v31  ;;  %7782 = vmatprep.subr.bf16.mxu1 %v10677_v32  ;;  %v10758_v31 = vld [vmem:[%s15042_s1 + $0x10e4] ss:$16 sps:$4 sm:$0xff]   ;;  %v10761_v32 = vld [vmem:[%s15042_s1 + $0x10ec] ss:$16 sps:$4 sm:$0xff]  }
 0x1e7   :  { %6935 = vmatpush1.bf16.msra.mxu0 %v10672_v34  ;;  %7783 = vmatpush1.bf16.msra.mxu1 %v10675_v36  ;;  %v10756_v34 = vld [vmem:[%s15042_s1 + $0x10e0] ss:$16 sps:$4 sm:$0xff]   ;;  %v10759_v36 = vld [vmem:[%s15042_s1 + $0x10e8] ss:$16 sps:$4 sm:$0xff]  }
 0x1e8   :  { %6936 = vmatprep.subr.bf16.mxu0 %v10680_v33  ;;  %7784 = vmatprep.subr.bf16.mxu1 %v10683_v35  ;;  %v10764_v33 = vld [vmem:[%s15042_s1 + $0x1104] ss:$16 sps:$4 sm:$0xff]   ;;  %v10767_v35 = vld [vmem:[%s15042_s1 + $0x110c] ss:$16 sps:$4 sm:$0xff]  }
 0x1eb   :  { %6937 = vmatpush1.bf16.msra.mxu0 %v10678_v37  ;;  %7785 = vmatpush1.bf16.msra.mxu1 %v10681_v38  ;;  %v10762_v37 = vld [vmem:[%s15042_s1 + $0x1100] ss:$16 sps:$4 sm:$0xff]   ;;  %v10765_v38 = vld [vmem:[%s15042_s1 + $0x1108] ss:$16 sps:$4 sm:$0xff]  }
 0x1ec   :  { %6938 = vmatprep.subr.bf16.mxu0 %v10686_v39  ;;  %7786 = vmatprep.subr.bf16.mxu1 %v10689_v40  ;;  %v10770_v39 = vld [vmem:[%s15042_s1 + $0x1124] ss:$16 sps:$4 sm:$0xff]   ;;  %v10773_v40 = vld [vmem:[%s15042_s1 + $0x112c] ss:$16 sps:$4 sm:$0xff]  }
 0x1ef   :  { %6939 = vmatpush1.bf16.msra.mxu0 %v10684_v42  ;;  %7787 = vmatpush1.bf16.msra.mxu1 %v10687_v44  ;;  %v10768_v42 = vld [vmem:[%s15042_s1 + $0x1120] ss:$16 sps:$4 sm:$0xff]   ;;  %v10771_v44 = vld [vmem:[%s15042_s1 + $0x1128] ss:$16 sps:$4 sm:$0xff]  }
 0x1f0   :  { %6940 = vmatprep.subr.bf16.mxu0 %v10692_v41  ;;  %7788 = vmatprep.subr.bf16.mxu1 %v10695_v43  ;;  %v10776_v41 = vld [vmem:[%s15042_s1 + $0x1144] ss:$16 sps:$4 sm:$0xff]   ;;  %v10779_v43 = vld [vmem:[%s15042_s1 + $0x114c] ss:$16 sps:$4 sm:$0xff]  }
 0x1f3   :  { %6941 = vmatpush1.bf16.msra.mxu0 %v10690_v45  ;;  %7789 = vmatpush1.bf16.msra.mxu1 %v10693_v46  ;;  %v10774_v45 = vld [vmem:[%s15042_s1 + $0x1140] ss:$16 sps:$4 sm:$0xff]   ;;  %v10777_v46 = vld [vmem:[%s15042_s1 + $0x1148] ss:$16 sps:$4 sm:$0xff]  }
 0x1f4   :  { %6942 = vmatprep.subr.bf16.mxu0 %v10698_v47  ;;  %7790 = vmatprep.subr.bf16.mxu1 %v10701_v48  ;;  %v10782_v47 = vld [vmem:[%s15042_s1 + $0x1164] ss:$16 sps:$4 sm:$0xff]   ;;  %v10785_v48 = vld [vmem:[%s15042_s1 + $0x116c] ss:$16 sps:$4 sm:$0xff]  }
 0x1f7   :  { %6943 = vmatpush1.bf16.msra.mxu0 %v10696_v51  ;;  %7791 = vmatpush1.bf16.msra.mxu1 %v10699_v52  ;;  %v10780_v51 = vld [vmem:[%s15042_s1 + $0x1160] ss:$16 sps:$4 sm:$0xff]   ;;  %v10783_v52 = vld [vmem:[%s15042_s1 + $0x1168] ss:$16 sps:$4 sm:$0xff]  }
 0x1f8   :  { %6944 = vmatprep.subr.bf16.mxu0 %v10704_v49  ;;  %7792 = vmatprep.subr.bf16.mxu1 %v10707_v50  ;;  %v10788_v49 = vld [vmem:[%s15042_s1 + $0x1184] ss:$16 sps:$4 sm:$0xff]   ;;  %v10791_v50 = vld [vmem:[%s15042_s1 + $0x118c] ss:$16 sps:$4 sm:$0xff]  }
 0x1fb   :  { %6945 = vmatpush1.bf16.msra.mxu0 %v10702_v53  ;;  %7793 = vmatpush1.bf16.msra.mxu1 %v10705_v54  ;;  %v10786_v53 = vld [vmem:[%s15042_s1 + $0x1180] ss:$16 sps:$4 sm:$0xff]   ;;  %v10789_v54 = vld [vmem:[%s15042_s1 + $0x1188] ss:$16 sps:$4 sm:$0xff]  }
 0x1fc   :  { %6946 = vmatprep.subr.bf16.mxu0 %v10710_v55  ;;  %7794 = vmatprep.subr.bf16.mxu1 %v10713_v56  ;;  %v10794_v55 = vld [vmem:[%s15042_s1 + $0x11a4] ss:$16 sps:$4 sm:$0xff]   ;;  %v10797_v56 = vld [vmem:[%s15042_s1 + $0x11ac] ss:$16 sps:$4 sm:$0xff]  }
 0x1ff   :  { %6947 = vmatpush1.bf16.msra.mxu0 %v10708_v59  ;;  %7795 = vmatpush1.bf16.msra.mxu1 %v10711_v60  ;;  %v10792_v59 = vld [vmem:[%s15042_s1 + $0x11a0] ss:$16 sps:$4 sm:$0xff]   ;;  %v10795_v60 = vld [vmem:[%s15042_s1 + $0x11a8] ss:$16 sps:$4 sm:$0xff]  }
 0x200   :  { %6969 = vmatprep.subr.bf16.mxu0 %v10716_v57  ;;  %7817 = vmatprep.subr.bf16.mxu1 %v10719_v58  ;;  %v10800_v57 = vld [vmem:[%s15042_s1 + $0x11c4] ss:$16 sps:$4 sm:$0xff]   ;;  %v10803_v58 = vld [vmem:[%s15042_s1 + $0x11cc] ss:$16 sps:$4 sm:$0xff]  }
 0x202   :  { %6949 = vmatmul.mubr.bf16.vlgmr.msra.gmra.mrb[0].mxu0 %v8615_v63  ;;  %7797 = vmatmul.mubr.bf16.vlgmr.msra.gmra.mrb[0].mxu1 %v8615_v63  ;;  %v10806_v63 = vld [vmem:[%s15042_s1 + $0x11e4] ss:$16 sps:$4 sm:$0xff]  }
 0x203   :  { %6970 = vmatpush1.bf16.msra.mxu0 %v10714_v0  ;;  %7818 = vmatpush1.bf16.msra.mxu1 %v10717_v3  ;;  %v10809_v0 = vld [vmem:[%s15042_s1 + $0x11ec] ss:$16 sps:$4 sm:$0xff]   ;;  %v10804_v3 = vld [vmem:[%s15042_s1 + $0x11e0] ss:$16 sps:$4 sm:$0xff]  }
 0x204   :  { %6971 = vmatprep.subr.bf16.mxu0 %v10722_v4  ;;  %7819 = vmatprep.subr.bf16.mxu1 %v10725_v1  ;;  %v10807_v4 = vld [vmem:[%s15042_s1 + $0x11e8] ss:$16 sps:$4 sm:$0xff]   ;;  %v10812_v1 = vld [vmem:[%s15042_s1 + $0x1204] ss:$16 sps:$4 sm:$0xff]  }
 0x205   :  { %6958 = vmatprep.mubr.bf16.mxu0 %v8648_v6  ;;  %7806 = vmatprep.mubr.bf16.mxu1 %v8648_v6  ;;  %v73_v6 = vld [vmem:[%s15043_s0 + $0x1c0] sm:$0xff] }
 0x207   :  { %6972 = vmatpush1.bf16.msra.mxu0 %v10720_v2  ;;  %7820 = vmatpush1.bf16.msra.mxu1 %v10723_v5  ;;  %v10815_v2 = vld [vmem:[%s15042_s1 + $0x120c] ss:$16 sps:$4 sm:$0xff]   ;;  %v57_v5 = vld [vmem:[%s15043_s0 + $0x140] sm:$0xff] }
 0x208   :  { %6973 = vmatprep.subr.bf16.mxu0 %v10728_v7  ;;  %7821 = vmatprep.subr.bf16.mxu1 %v10731_v8  ;;  %v8617_v7 = vcombine.low %v13237_v9, %v13242_v10  ;;  %v10810_v8 = vld [vmem:[%s15042_s1 + $0x1200] ss:$16 sps:$4 sm:$0xff]   ;;  %v10821_v9 = vld [vmem:[%s15042_s1 + $0x122c] ss:$16 sps:$4 sm:$0xff]  }
 0x209   :  { %v10816_v10 = vld [vmem:[%s15042_s1 + $0x1220] ss:$16 sps:$4 sm:$0xff]  }
 0x20a   :  { %6959 = vmatmul.mubr.bf16.gmra.mrb[4].mxu0 %v8647_v11  ;;  %7807 = vmatmul.mubr.bf16.gmra.mrb[4].mxu1 %v8647_v11  ;;  %v10813_v11 = vld [vmem:[%s15042_s1 + $0x1208] ss:$16 sps:$4 sm:$0xff]  }
 0x20b   :  { %6974 = vmatpush1.bf16.msra.mxu0 %v10726_v12  ;;  %7822 = vmatpush1.bf16.msra.mxu1 %v10729_v13  ;;  %v10818_v12 = vld [vmem:[%s15042_s1 + $0x1224] ss:$16 sps:$4 sm:$0xff]   ;;  %v10819_v13 = vld [vmem:[%s15042_s1 + $0x1228] ss:$16 sps:$4 sm:$0xff]  }
 0x20c   :  { %6975 = vmatprep.subr.bf16.mxu0 %v10734_v14  ;;  %7823 = vmatprep.subr.bf16.mxu1 %v10737_v15  ;;  %v8650_v14 = vcombine.high %v57_v5, %v73_v6  ;;  %v10824_v15 = vld [vmem:[%s15042_s1 + $0x1244] ss:$16 sps:$4 sm:$0xff]  }
 0x20d   :  { %7001 = vmatprep.mubr.bf16.mxu0 %v8618_v16  ;;  %7849 = vmatprep.mubr.bf16.mxu1 %v8618_v16  ;;  %v10827_v16 = vld [vmem:[%s15042_s1 + $0x124c] ss:$16 sps:$4 sm:$0xff]  }
 0x20f   :  { %6976 = vmatpush1.bf16.msra.mxu0 %v10732_v17  ;;  %7824 = vmatpush1.bf16.msra.mxu1 %v10735_v18  ;;  %v13449_v17 = vld [vmem:[%s15043_s0 + $0x48] sm:$0xff] }
 0x210   :  { %6977 = vmatprep.subr.bf16.mxu0 %v10740_v19  ;;  %7825 = vmatprep.subr.bf16.mxu1 %v10743_v20  ;;  %v13454_v18 = vld [vmem:[%s15043_s0 + $0xc8] sm:$0xff]  ;;  %v8649_v19 = vcombine.low %v57_v5, %v73_v6  ;;  %v10822_v20 = vld [vmem:[%s15042_s1 + $0x1240] ss:$16 sps:$4 sm:$0xff]  }
 0x211   :  { %v10894_v5 = vld [vmem:[%s15042_s1 + $0x13c0] ss:$16 sps:$4 sm:$0xff]   ;;  %v10897_v6 = vld [vmem:[%s15042_s1 + $0x13c8] ss:$16 sps:$4 sm:$0xff]  }
 0x213   :  { %6978 = vmatpush1.bf16.msra.mxu0 %v10738_v21  ;;  %7826 = vmatpush1.bf16.msra.mxu1 %v10741_v22  ;;  %v10825_v21 = vld [vmem:[%s15042_s1 + $0x1248] ss:$16 sps:$4 sm:$0xff]   ;;  %v10830_v22 = vld [vmem:[%s15042_s1 + $0x1264] ss:$16 sps:$4 sm:$0xff]  }
 0x214   :  { %6979 = vmatprep.subr.bf16.mxu0 %v10746_v23  ;;  %7827 = vmatprep.subr.bf16.mxu1 %v10749_v24  ;;  %v10833_v23 = vld [vmem:[%s15042_s1 + $0x126c] ss:$16 sps:$4 sm:$0xff]   ;;  %v8620_v24 = vcombine.high %v13449_v17, %v13454_v18 }
 0x217   :  { %6980 = vmatpush1.bf16.msra.mxu0 %v10744_v26  ;;  %7828 = vmatpush1.bf16.msra.mxu1 %v10747_v25  ;;  %v10828_v26 = vld [vmem:[%s15042_s1 + $0x1260] ss:$16 sps:$4 sm:$0xff]   ;;  %v10831_v25 = vld [vmem:[%s15042_s1 + $0x1268] ss:$16 sps:$4 sm:$0xff]  }
 0x218   :  { %6981 = vmatprep.subr.bf16.mxu0 %v10752_v27  ;;  %7829 = vmatprep.subr.bf16.mxu1 %v10755_v28  ;;  %v10836_v27 = vld [vmem:[%s15042_s1 + $0x1284] ss:$16 sps:$4 sm:$0xff]   ;;  %v10839_v28 = vld [vmem:[%s15042_s1 + $0x128c] ss:$16 sps:$4 sm:$0xff]  }
 0x21b   :  { %6982 = vmatpush1.bf16.msra.mxu0 %v10750_v29  ;;  %7830 = vmatpush1.bf16.msra.mxu1 %v10753_v30  ;;  %v10834_v29 = vld [vmem:[%s15042_s1 + $0x1280] ss:$16 sps:$4 sm:$0xff]   ;;  %v10837_v30 = vld [vmem:[%s15042_s1 + $0x1288] ss:$16 sps:$4 sm:$0xff]  }
 0x21c   :  { %6983 = vmatprep.subr.bf16.mxu0 %v10758_v31  ;;  %7831 = vmatprep.subr.bf16.mxu1 %v10761_v32  ;;  %v10842_v31 = vld [vmem:[%s15042_s1 + $0x12a4] ss:$16 sps:$4 sm:$0xff]   ;;  %v10845_v32 = vld [vmem:[%s15042_s1 + $0x12ac] ss:$16 sps:$4 sm:$0xff]  }
 0x21f   :  { %6984 = vmatpush1.bf16.msra.mxu0 %v10756_v34  ;;  %7832 = vmatpush1.bf16.msra.mxu1 %v10759_v36  ;;  %v10840_v34 = vld [vmem:[%s15042_s1 + $0x12a0] ss:$16 sps:$4 sm:$0xff]   ;;  %v10843_v36 = vld [vmem:[%s15042_s1 + $0x12a8] ss:$16 sps:$4 sm:$0xff]  }
 0x220   :  { %6985 = vmatprep.subr.bf16.mxu0 %v10764_v33  ;;  %7833 = vmatprep.subr.bf16.mxu1 %v10767_v35  ;;  %v10848_v33 = vld [vmem:[%s15042_s1 + $0x12c4] ss:$16 sps:$4 sm:$0xff]   ;;  %v10851_v35 = vld [vmem:[%s15042_s1 + $0x12cc] ss:$16 sps:$4 sm:$0xff]  }
 0x223   :  { %6986 = vmatpush1.bf16.msra.mxu0 %v10762_v37  ;;  %7834 = vmatpush1.bf16.msra.mxu1 %v10765_v38  ;;  %v10846_v37 = vld [vmem:[%s15042_s1 + $0x12c0] ss:$16 sps:$4 sm:$0xff]   ;;  %v10849_v38 = vld [vmem:[%s15042_s1 + $0x12c8] ss:$16 sps:$4 sm:$0xff]  }
 0x224   :  { %6987 = vmatprep.subr.bf16.mxu0 %v10770_v39  ;;  %7835 = vmatprep.subr.bf16.mxu1 %v10773_v40  ;;  %v10854_v39 = vld [vmem:[%s15042_s1 + $0x12e4] ss:$16 sps:$4 sm:$0xff]   ;;  %v10857_v40 = vld [vmem:[%s15042_s1 + $0x12ec] ss:$16 sps:$4 sm:$0xff]  }
 0x227   :  { %6988 = vmatpush1.bf16.msra.mxu0 %v10768_v42  ;;  %7836 = vmatpush1.bf16.msra.mxu1 %v10771_v44  ;;  %v10852_v42 = vld [vmem:[%s15042_s1 + $0x12e0] ss:$16 sps:$4 sm:$0xff]   ;;  %v10855_v44 = vld [vmem:[%s15042_s1 + $0x12e8] ss:$16 sps:$4 sm:$0xff]  }
 0x228   :  { %6989 = vmatprep.subr.bf16.mxu0 %v10776_v41  ;;  %7837 = vmatprep.subr.bf16.mxu1 %v10779_v43  ;;  %v10860_v41 = vld [vmem:[%s15042_s1 + $0x1304] ss:$16 sps:$4 sm:$0xff]   ;;  %v10863_v43 = vld [vmem:[%s15042_s1 + $0x130c] ss:$16 sps:$4 sm:$0xff]  }
 0x22b   :  { %6990 = vmatpush1.bf16.msra.mxu0 %v10774_v45  ;;  %7838 = vmatpush1.bf16.msra.mxu1 %v10777_v46  ;;  %v10858_v45 = vld [vmem:[%s15042_s1 + $0x1300] ss:$16 sps:$4 sm:$0xff]   ;;  %v10861_v46 = vld [vmem:[%s15042_s1 + $0x1308] ss:$16 sps:$4 sm:$0xff]  }
 0x22c   :  { %6991 = vmatprep.subr.bf16.mxu0 %v10782_v47  ;;  %7839 = vmatprep.subr.bf16.mxu1 %v10785_v48  ;;  %v10866_v47 = vld [vmem:[%s15042_s1 + $0x1324] ss:$16 sps:$4 sm:$0xff]   ;;  %v10869_v48 = vld [vmem:[%s15042_s1 + $0x132c] ss:$16 sps:$4 sm:$0xff]  }
 0x22f   :  { %6992 = vmatpush1.bf16.msra.mxu0 %v10780_v51  ;;  %7840 = vmatpush1.bf16.msra.mxu1 %v10783_v52  ;;  %v10864_v51 = vld [vmem:[%s15042_s1 + $0x1320] ss:$16 sps:$4 sm:$0xff]   ;;  %v10867_v52 = vld [vmem:[%s15042_s1 + $0x1328] ss:$16 sps:$4 sm:$0xff]  }
 0x230   :  { %6993 = vmatprep.subr.bf16.mxu0 %v10788_v49  ;;  %7841 = vmatprep.subr.bf16.mxu1 %v10791_v50  ;;  %v10872_v49 = vld [vmem:[%s15042_s1 + $0x1344] ss:$16 sps:$4 sm:$0xff]   ;;  %v10875_v50 = vld [vmem:[%s15042_s1 + $0x134c] ss:$16 sps:$4 sm:$0xff]  }
 0x233   :  { %6994 = vmatpush1.bf16.msra.mxu0 %v10786_v53  ;;  %7842 = vmatpush1.bf16.msra.mxu1 %v10789_v54  ;;  %v10870_v53 = vld [vmem:[%s15042_s1 + $0x1340] ss:$16 sps:$4 sm:$0xff]   ;;  %v10873_v54 = vld [vmem:[%s15042_s1 + $0x1348] ss:$16 sps:$4 sm:$0xff]  }
 0x234   :  { %6995 = vmatprep.subr.bf16.mxu0 %v10794_v55  ;;  %7843 = vmatprep.subr.bf16.mxu1 %v10797_v56  ;;  %v10878_v55 = vld [vmem:[%s15042_s1 + $0x1364] ss:$16 sps:$4 sm:$0xff]   ;;  %v10881_v56 = vld [vmem:[%s15042_s1 + $0x136c] ss:$16 sps:$4 sm:$0xff]  }
 0x237   :  { %6996 = vmatpush1.bf16.msra.mxu0 %v10792_v59  ;;  %7844 = vmatpush1.bf16.msra.mxu1 %v10795_v60  ;;  %v10876_v59 = vld [vmem:[%s15042_s1 + $0x1360] ss:$16 sps:$4 sm:$0xff]   ;;  %v10879_v60 = vld [vmem:[%s15042_s1 + $0x1368] ss:$16 sps:$4 sm:$0xff]  }
 0x238   :  { %6997 = vmatprep.subr.bf16.mxu0 %v10800_v57  ;;  %7845 = vmatprep.subr.bf16.mxu1 %v10803_v58  ;;  %v10884_v57 = vld [vmem:[%s15042_s1 + $0x1384] ss:$16 sps:$4 sm:$0xff]   ;;  %v10887_v58 = vld [vmem:[%s15042_s1 + $0x138c] ss:$16 sps:$4 sm:$0xff]  }
 0x23b   :  { %6998 = vmatpush1.bf16.msra.mxu0 %v10798_v61  ;;  %7846 = vmatpush1.bf16.msra.mxu1 %v10801_v62  ;;  %v10882_v61 = vld [vmem:[%s15042_s1 + $0x1380] ss:$16 sps:$4 sm:$0xff]   ;;  %v10885_v62 = vld [vmem:[%s15042_s1 + $0x1388] ss:$16 sps:$4 sm:$0xff]  }
 0x23c   :  { %6999 = vmatprep.subr.bf16.mxu0 %v10806_v63  ;;  %7847 = vmatprep.subr.bf16.mxu1 %v10809_v0  ;;  %v10890_v63 = vld [vmem:[%s15042_s1 + $0x13a4] ss:$16 sps:$4 sm:$0xff]   ;;  %v10893_v0 = vld [vmem:[%s15042_s1 + $0x13ac] ss:$16 sps:$4 sm:$0xff]  }
 0x23f   :  { %7000 = vmatpush1.bf16.msra.mxu0 %v10804_v3  ;;  %7848 = vmatpush1.bf16.msra.mxu1 %v10807_v4  ;;  %v10888_v3 = vld [vmem:[%s15042_s1 + $0x13a0] ss:$16 sps:$4 sm:$0xff]   ;;  %v10891_v4 = vld [vmem:[%s15042_s1 + $0x13a8] ss:$16 sps:$4 sm:$0xff]  }
 0x240   :  { %7022 = vmatprep.subr.bf16.mxu0 %v10812_v1  ;;  %7870 = vmatprep.subr.bf16.mxu1 %v10815_v2  ;;  %v10896_v1 = vld [vmem:[%s15042_s1 + $0x13c4] ss:$16 sps:$4 sm:$0xff]   ;;  %v10899_v2 = vld [vmem:[%s15042_s1 + $0x13cc] ss:$16 sps:$4 sm:$0xff]  }
 0x242   :  { %7002 = vmatmul.mubr.bf16.vlgmr.msra.gmra.mrb[0].mxu0 %v8617_v7  ;;  %7850 = vmatmul.mubr.bf16.vlgmr.msra.gmra.mrb[0].mxu1 %v8617_v7  ;;  %v10902_v7 = vld [vmem:[%s15042_s1 + $0x13e4] ss:$16 sps:$4 sm:$0xff]  }
 0x243   :  { %7023 = vmatpush1.bf16.msra.mxu0 %v10810_v8  ;;  %7871 = vmatpush1.bf16.msra.mxu1 %v10813_v11  ;;  %v10905_v8 = vld [vmem:[%s15042_s1 + $0x13ec] ss:$16 sps:$4 sm:$0xff]   ;;  %v10900_v11 = vld [vmem:[%s15042_s1 + $0x13e0] ss:$16 sps:$4 sm:$0xff]  }
 0x244   :  { %7024 = vmatprep.subr.bf16.mxu0 %v10818_v12  ;;  %7872 = vmatprep.subr.bf16.mxu1 %v10821_v9  ;;  %v10903_v12 = vld [vmem:[%s15042_s1 + $0x13e8] ss:$16 sps:$4 sm:$0xff]   ;;  %v10908_v9 = vld [vmem:[%s15042_s1 + $0x1404] ss:$16 sps:$4 sm:$0xff]  }
 0x245   :  { %7011 = vmatprep.mubr.bf16.mxu0 %v8650_v14  ;;  %7859 = vmatprep.mubr.bf16.mxu1 %v8650_v14  ;;  %v58_v14 = vld [vmem:[%s15043_s0 + $0x148] sm:$0xff] }
 0x247   :  { %7025 = vmatpush1.bf16.msra.mxu0 %v10816_v10  ;;  %7873 = vmatpush1.bf16.msra.mxu1 %v10819_v13  ;;  %v10911_v10 = vld [vmem:[%s15042_s1 + $0x140c] ss:$16 sps:$4 sm:$0xff]   ;;  %v8619_v13 = vcombine.low %v13449_v17, %v13454_v18  ;;  %v10914_v17 = vld [vmem:[%s15042_s1 + $0x1424] ss:$16 sps:$4 sm:$0xff]  }
 0x248   :  { %7026 = vmatprep.subr.bf16.mxu0 %v10824_v15  ;;  %7874 = vmatprep.subr.bf16.mxu1 %v10827_v16  ;;  %v74_v15 = vld [vmem:[%s15043_s0 + $0x1c8] sm:$0xff]  ;;  %v10906_v16 = vld [vmem:[%s15042_s1 + $0x1400] ss:$16 sps:$4 sm:$0xff]  }
 0x249   :  { %v10917_v18 = vld [vmem:[%s15042_s1 + $0x142c] ss:$16 sps:$4 sm:$0xff]  }
 0x24a   :  { %7012 = vmatmul.mubr.bf16.gmra.mrb[4].mxu0 %v8649_v19  ;;  %7860 = vmatmul.mubr.bf16.gmra.mrb[4].mxu1 %v8649_v19  ;;  %v10909_v19 = vld [vmem:[%s15042_s1 + $0x1408] ss:$16 sps:$4 sm:$0xff]  }
 0x24b   :  { %7027 = vmatpush1.bf16.msra.mxu0 %v10822_v20  ;;  %7875 = vmatpush1.bf16.msra.mxu1 %v10825_v21  ;;  %v8652_v20 = vcombine.high %v58_v14, %v74_v15  ;;  %v10912_v21 = vld [vmem:[%s15042_s1 + $0x1420] ss:$16 sps:$4 sm:$0xff]  }
 0x24c   :  { %7028 = vmatprep.subr.bf16.mxu0 %v10830_v22  ;;  %7876 = vmatprep.subr.bf16.mxu1 %v10833_v23  ;;  %v10915_v22 = vld [vmem:[%s15042_s1 + $0x1428] ss:$16 sps:$4 sm:$0xff]   ;;  %v10920_v23 = vld [vmem:[%s15042_s1 + $0x1444] ss:$16 sps:$4 sm:$0xff]  }
 0x24d   :  { %7054 = vmatprep.mubr.bf16.mxu0 %v8620_v24  ;;  %7902 = vmatprep.mubr.bf16.mxu1 %v8620_v24  ;;  %v10923_v24 = vld [vmem:[%s15042_s1 + $0x144c] ss:$16 sps:$4 sm:$0xff]  }
 0x24f   :  { %7029 = vmatpush1.bf16.msra.mxu0 %v10828_v26  ;;  %7877 = vmatpush1.bf16.msra.mxu1 %v10831_v25  ;;  %v8651_v26 = vcombine.low %v58_v14, %v74_v15  ;;  %v13661_v25 = vld [vmem:[%s15043_s0 + $0x50] sm:$0xff]  ;;  %v10993_v14 = vld [vmem:[%s15042_s1 + $0x15c8] ss:$16 sps:$4 sm:$0xff]  }
 0x250   :  { %7030 = vmatprep.subr.bf16.mxu0 %v10836_v27  ;;  %7878 = vmatprep.subr.bf16.mxu1 %v10839_v28  ;;  %v13666_v27 = vld [vmem:[%s15043_s0 + $0xd0] sm:$0xff] }
 0x251   :  { %v10918_v28 = vld [vmem:[%s15042_s1 + $0x1440] ss:$16 sps:$4 sm:$0xff]   ;;  %v10998_v15 = vld [vmem:[%s15042_s1 + $0x15e4] ss:$16 sps:$4 sm:$0xff]  }
 0x253   :  { %7031 = vmatpush1.bf16.msra.mxu0 %v10834_v29  ;;  %7879 = vmatpush1.bf16.msra.mxu1 %v10837_v30  ;;  %v10921_v29 = vld [vmem:[%s15042_s1 + $0x1448] ss:$16 sps:$4 sm:$0xff]   ;;  %v10926_v30 = vld [vmem:[%s15042_s1 + $0x1464] ss:$16 sps:$4 sm:$0xff]  }
 0x254   :  { %7032 = vmatprep.subr.bf16.mxu0 %v10842_v31  ;;  %7880 = vmatprep.subr.bf16.mxu1 %v10845_v32  ;;  %v10929_v31 = vld [vmem:[%s15042_s1 + $0x146c] ss:$16 sps:$4 sm:$0xff]   ;;  %v8622_v32 = vcombine.high %v13661_v25, %v13666_v27 }
 0x257   :  { %7033 = vmatpush1.bf16.msra.mxu0 %v10840_v34  ;;  %7881 = vmatpush1.bf16.msra.mxu1 %v10843_v36  ;;  %v10924_v34 = vld [vmem:[%s15042_s1 + $0x1460] ss:$16 sps:$4 sm:$0xff]   ;;  %v10927_v36 = vld [vmem:[%s15042_s1 + $0x1468] ss:$16 sps:$4 sm:$0xff]  }
 0x258   :  { %7034 = vmatprep.subr.bf16.mxu0 %v10848_v33  ;;  %7882 = vmatprep.subr.bf16.mxu1 %v10851_v35  ;;  %v10932_v33 = vld [vmem:[%s15042_s1 + $0x1484] ss:$16 sps:$4 sm:$0xff]   ;;  %v10935_v35 = vld [vmem:[%s15042_s1 + $0x148c] ss:$16 sps:$4 sm:$0xff]  }
 0x25b   :  { %7035 = vmatpush1.bf16.msra.mxu0 %v10846_v37  ;;  %7883 = vmatpush1.bf16.msra.mxu1 %v10849_v38  ;;  %v10930_v37 = vld [vmem:[%s15042_s1 + $0x1480] ss:$16 sps:$4 sm:$0xff]   ;;  %v10933_v38 = vld [vmem:[%s15042_s1 + $0x1488] ss:$16 sps:$4 sm:$0xff]  }
 0x25c   :  { %7036 = vmatprep.subr.bf16.mxu0 %v10854_v39  ;;  %7884 = vmatprep.subr.bf16.mxu1 %v10857_v40  ;;  %v10938_v39 = vld [vmem:[%s15042_s1 + $0x14a4] ss:$16 sps:$4 sm:$0xff]   ;;  %v10941_v40 = vld [vmem:[%s15042_s1 + $0x14ac] ss:$16 sps:$4 sm:$0xff]  }
 0x25f   :  { %7037 = vmatpush1.bf16.msra.mxu0 %v10852_v42  ;;  %7885 = vmatpush1.bf16.msra.mxu1 %v10855_v44  ;;  %v10936_v42 = vld [vmem:[%s15042_s1 + $0x14a0] ss:$16 sps:$4 sm:$0xff]   ;;  %v10939_v44 = vld [vmem:[%s15042_s1 + $0x14a8] ss:$16 sps:$4 sm:$0xff]  }
 0x260   :  { %7038 = vmatprep.subr.bf16.mxu0 %v10860_v41  ;;  %7886 = vmatprep.subr.bf16.mxu1 %v10863_v43  ;;  %v10944_v41 = vld [vmem:[%s15042_s1 + $0x14c4] ss:$16 sps:$4 sm:$0xff]   ;;  %v10947_v43 = vld [vmem:[%s15042_s1 + $0x14cc] ss:$16 sps:$4 sm:$0xff]  }
 0x263   :  { %7039 = vmatpush1.bf16.msra.mxu0 %v10858_v45  ;;  %7887 = vmatpush1.bf16.msra.mxu1 %v10861_v46  ;;  %v10942_v45 = vld [vmem:[%s15042_s1 + $0x14c0] ss:$16 sps:$4 sm:$0xff]   ;;  %v10945_v46 = vld [vmem:[%s15042_s1 + $0x14c8] ss:$16 sps:$4 sm:$0xff]  }
 0x264   :  { %7040 = vmatprep.subr.bf16.mxu0 %v10866_v47  ;;  %7888 = vmatprep.subr.bf16.mxu1 %v10869_v48  ;;  %v10950_v47 = vld [vmem:[%s15042_s1 + $0x14e4] ss:$16 sps:$4 sm:$0xff]   ;;  %v10953_v48 = vld [vmem:[%s15042_s1 + $0x14ec] ss:$16 sps:$4 sm:$0xff]  }
 0x267   :  { %7041 = vmatpush1.bf16.msra.mxu0 %v10864_v51  ;;  %7889 = vmatpush1.bf16.msra.mxu1 %v10867_v52  ;;  %v10948_v51 = vld [vmem:[%s15042_s1 + $0x14e0] ss:$16 sps:$4 sm:$0xff]   ;;  %v10951_v52 = vld [vmem:[%s15042_s1 + $0x14e8] ss:$16 sps:$4 sm:$0xff]  }
 0x268   :  { %7042 = vmatprep.subr.bf16.mxu0 %v10872_v49  ;;  %7890 = vmatprep.subr.bf16.mxu1 %v10875_v50  ;;  %v10956_v49 = vld [vmem:[%s15042_s1 + $0x1504] ss:$16 sps:$4 sm:$0xff]   ;;  %v10959_v50 = vld [vmem:[%s15042_s1 + $0x150c] ss:$16 sps:$4 sm:$0xff]  }
 0x26b   :  { %7043 = vmatpush1.bf16.msra.mxu0 %v10870_v53  ;;  %7891 = vmatpush1.bf16.msra.mxu1 %v10873_v54  ;;  %v10954_v53 = vld [vmem:[%s15042_s1 + $0x1500] ss:$16 sps:$4 sm:$0xff]   ;;  %v10957_v54 = vld [vmem:[%s15042_s1 + $0x1508] ss:$16 sps:$4 sm:$0xff]  }
 0x26c   :  { %7044 = vmatprep.subr.bf16.mxu0 %v10878_v55  ;;  %7892 = vmatprep.subr.bf16.mxu1 %v10881_v56  ;;  %v10962_v55 = vld [vmem:[%s15042_s1 + $0x1524] ss:$16 sps:$4 sm:$0xff]   ;;  %v10965_v56 = vld [vmem:[%s15042_s1 + $0x152c] ss:$16 sps:$4 sm:$0xff]  }
 0x26f   :  { %7045 = vmatpush1.bf16.msra.mxu0 %v10876_v59  ;;  %7893 = vmatpush1.bf16.msra.mxu1 %v10879_v60  ;;  %v10960_v59 = vld [vmem:[%s15042_s1 + $0x1520] ss:$16 sps:$4 sm:$0xff]   ;;  %v10963_v60 = vld [vmem:[%s15042_s1 + $0x1528] ss:$16 sps:$4 sm:$0xff]  }
 0x270   :  { %7046 = vmatprep.subr.bf16.mxu0 %v10884_v57  ;;  %7894 = vmatprep.subr.bf16.mxu1 %v10887_v58  ;;  %v10968_v57 = vld [vmem:[%s15042_s1 + $0x1544] ss:$16 sps:$4 sm:$0xff]   ;;  %v10971_v58 = vld [vmem:[%s15042_s1 + $0x154c] ss:$16 sps:$4 sm:$0xff]  }
 0x273   :  { %7047 = vmatpush1.bf16.msra.mxu0 %v10882_v61  ;;  %7895 = vmatpush1.bf16.msra.mxu1 %v10885_v62  ;;  %v10966_v61 = vld [vmem:[%s15042_s1 + $0x1540] ss:$16 sps:$4 sm:$0xff]   ;;  %v10969_v62 = vld [vmem:[%s15042_s1 + $0x1548] ss:$16 sps:$4 sm:$0xff]  }
 0x274   :  { %7048 = vmatprep.subr.bf16.mxu0 %v10890_v63  ;;  %7896 = vmatprep.subr.bf16.mxu1 %v10893_v0  ;;  %v10974_v63 = vld [vmem:[%s15042_s1 + $0x1564] ss:$16 sps:$4 sm:$0xff]   ;;  %v10977_v0 = vld [vmem:[%s15042_s1 + $0x156c] ss:$16 sps:$4 sm:$0xff]  }
 0x277   :  { %7049 = vmatpush1.bf16.msra.mxu0 %v10888_v3  ;;  %7897 = vmatpush1.bf16.msra.mxu1 %v10891_v4  ;;  %v10972_v3 = vld [vmem:[%s15042_s1 + $0x1560] ss:$16 sps:$4 sm:$0xff]   ;;  %v10975_v4 = vld [vmem:[%s15042_s1 + $0x1568] ss:$16 sps:$4 sm:$0xff]  }
 0x278   :  { %7050 = vmatprep.subr.bf16.mxu0 %v10896_v1  ;;  %7898 = vmatprep.subr.bf16.mxu1 %v10899_v2  ;;  %v10980_v1 = vld [vmem:[%s15042_s1 + $0x1584] ss:$16 sps:$4 sm:$0xff]   ;;  %v10983_v2 = vld [vmem:[%s15042_s1 + $0x158c] ss:$16 sps:$4 sm:$0xff]  }
 0x27b   :  { %7051 = vmatpush1.bf16.msra.mxu0 %v10894_v5  ;;  %7899 = vmatpush1.bf16.msra.mxu1 %v10897_v6  ;;  %v10978_v5 = vld [vmem:[%s15042_s1 + $0x1580] ss:$16 sps:$4 sm:$0xff]   ;;  %v10981_v6 = vld [vmem:[%s15042_s1 + $0x1588] ss:$16 sps:$4 sm:$0xff]  }
 0x27c   :  { %7052 = vmatprep.subr.bf16.mxu0 %v10902_v7  ;;  %7900 = vmatprep.subr.bf16.mxu1 %v10905_v8  ;;  %v10986_v7 = vld [vmem:[%s15042_s1 + $0x15a4] ss:$16 sps:$4 sm:$0xff]   ;;  %v10989_v8 = vld [vmem:[%s15042_s1 + $0x15ac] ss:$16 sps:$4 sm:$0xff]  }
 0x27f   :  { %7053 = vmatpush1.bf16.msra.mxu0 %v10900_v11  ;;  %7901 = vmatpush1.bf16.msra.mxu1 %v10903_v12  ;;  %v10984_v11 = vld [vmem:[%s15042_s1 + $0x15a0] ss:$16 sps:$4 sm:$0xff]   ;;  %v10987_v12 = vld [vmem:[%s15042_s1 + $0x15a8] ss:$16 sps:$4 sm:$0xff]  }
 0x280   :  { %7075 = vmatprep.subr.bf16.mxu0 %v10908_v9  ;;  %7923 = vmatprep.subr.bf16.mxu1 %v10911_v10  ;;  %v10992_v9 = vld [vmem:[%s15042_s1 + $0x15c4] ss:$16 sps:$4 sm:$0xff]   ;;  %v10995_v10 = vld [vmem:[%s15042_s1 + $0x15cc] ss:$16 sps:$4 sm:$0xff]  }
 0x282   :  { %7055 = vmatmul.mubr.bf16.vlgmr.msra.gmra.mrb[0].mxu0 %v8619_v13  ;;  %7903 = vmatmul.mubr.bf16.vlgmr.msra.gmra.mrb[0].mxu1 %v8619_v13  ;;  %v10990_v13 = vld [vmem:[%s15042_s1 + $0x15c0] ss:$16 sps:$4 sm:$0xff]  }
 0x283   :  { %7076 = vmatpush1.bf16.msra.mxu0 %v10906_v16  ;;  %7924 = vmatpush1.bf16.msra.mxu1 %v10909_v19  ;;  %v11001_v16 = vld [vmem:[%s15042_s1 + $0x15ec] ss:$16 sps:$4 sm:$0xff]   ;;  %v10996_v19 = vld [vmem:[%s15042_s1 + $0x15e0] ss:$16 sps:$4 sm:$0xff]  }
 0x284   :  { %7077 = vmatprep.subr.bf16.mxu0 %v10914_v17  ;;  %7925 = vmatprep.subr.bf16.mxu1 %v10917_v18  ;;  %v10999_v17 = vld [vmem:[%s15042_s1 + $0x15e8] ss:$16 sps:$4 sm:$0xff]   ;;  %v11004_v18 = vld [vmem:[%s15042_s1 + $0x1604] ss:$16 sps:$4 sm:$0xff]  }
 0x285   :  { %7064 = vmatprep.mubr.bf16.mxu0 %v8652_v20  ;;  %7912 = vmatprep.mubr.bf16.mxu1 %v8652_v20  ;;  %v11007_v20 = vld [vmem:[%s15042_s1 + $0x160c] ss:$16 sps:$4 sm:$0xff]  }
 0x287   :  { %7078 = vmatpush1.bf16.msra.mxu0 %v10912_v21  ;;  %7926 = vmatpush1.bf16.msra.mxu1 %v10915_v22  ;;  %v8621_v21 = vcombine.low %v13661_v25, %v13666_v27  ;;  %v59_v22 = vld [vmem:[%s15043_s0 + $0x150] sm:$0xff]  ;;  %v11013_v27 = vld [vmem:[%s15042_s1 + $0x162c] ss:$16 sps:$4 sm:$0xff]  }
 0x288   :  { %7079 = vmatprep.subr.bf16.mxu0 %v10920_v23  ;;  %7927 = vmatprep.subr.bf16.mxu1 %v10923_v24  ;;  %v75_v23 = vld [vmem:[%s15043_s0 + $0x1d0] sm:$0xff] }
 0x289   :  { %v11002_v24 = vld [vmem:[%s15042_s1 + $0x1600] ss:$16 sps:$4 sm:$0xff]   ;;  %v11010_v25 = vld [vmem:[%s15042_s1 + $0x1624] ss:$16 sps:$4 sm:$0xff]  }
 0x28a   :  { %7065 = vmatmul.mubr.bf16.gmra.mrb[4].mxu0 %v8651_v26  ;;  %7913 = vmatmul.mubr.bf16.gmra.mrb[4].mxu1 %v8651_v26  ;;  %v11005_v26 = vld [vmem:[%s15042_s1 + $0x1608] ss:$16 sps:$4 sm:$0xff]  }
 0x28b   :  { %7080 = vmatpush1.bf16.msra.mxu0 %v10918_v28  ;;  %7928 = vmatpush1.bf16.msra.mxu1 %v10921_v29  ;;  %v8654_v28 = vcombine.high %v59_v22, %v75_v23  ;;  %v11008_v29 = vld [vmem:[%s15042_s1 + $0x1620] ss:$16 sps:$4 sm:$0xff]  }
 0x28c   :  { %7081 = vmatprep.subr.bf16.mxu0 %v10926_v30  ;;  %7929 = vmatprep.subr.bf16.mxu1 %v10929_v31  ;;  %v11011_v30 = vld [vmem:[%s15042_s1 + $0x1628] ss:$16 sps:$4 sm:$0xff]   ;;  %v11016_v31 = vld [vmem:[%s15042_s1 + $0x1644] ss:$16 sps:$4 sm:$0xff]  }
 0x28d   :  { %7107 = vmatprep.mubr.bf16.mxu0 %v8622_v32  ;;  %7955 = vmatprep.mubr.bf16.mxu1 %v8622_v32  ;;  %v11019_v32 = vld [vmem:[%s15042_s1 + $0x164c] ss:$16 sps:$4 sm:$0xff]  }
 0x28f   :  { %7082 = vmatpush1.bf16.msra.mxu0 %v10924_v34  ;;  %7930 = vmatpush1.bf16.msra.mxu1 %v10927_v36  ;;  %v8653_v34 = vcombine.low %v59_v22, %v75_v23  ;;  %v13873_v36 = vld [vmem:[%s15043_s0 + $0x58] sm:$0xff]  ;;  %v11094_v23 = vld [vmem:[%s15042_s1 + $0x17e4] ss:$16 sps:$4 sm:$0xff]  }
 0x290   :  { %7083 = vmatprep.subr.bf16.mxu0 %v10932_v33  ;;  %7931 = vmatprep.subr.bf16.mxu1 %v10935_v35  ;;  %v13878_v33 = vld [vmem:[%s15043_s0 + $0xd8] sm:$0xff]  ;;  %v11014_v35 = vld [vmem:[%s15042_s1 + $0x1640] ss:$16 sps:$4 sm:$0xff]  }
 0x291   :  { %v11089_v22 = vld [vmem:[%s15042_s1 + $0x17c8] ss:$16 sps:$4 sm:$0xff]  }
 0x293   :  { %7084 = vmatpush1.bf16.msra.mxu0 %v10930_v37  ;;  %7932 = vmatpush1.bf16.msra.mxu1 %v10933_v38  ;;  %v11017_v37 = vld [vmem:[%s15042_s1 + $0x1648] ss:$16 sps:$4 sm:$0xff]   ;;  %v11022_v38 = vld [vmem:[%s15042_s1 + $0x1664] ss:$16 sps:$4 sm:$0xff]  }
 0x294   :  { %7085 = vmatprep.subr.bf16.mxu0 %v10938_v39  ;;  %7933 = vmatprep.subr.bf16.mxu1 %v10941_v40  ;;  %v11025_v39 = vld [vmem:[%s15042_s1 + $0x166c] ss:$16 sps:$4 sm:$0xff]   ;;  %v8624_v40 = vcombine.high %v13873_v36, %v13878_v33 }
 0x297   :  { %7086 = vmatpush1.bf16.msra.mxu0 %v10936_v42  ;;  %7934 = vmatpush1.bf16.msra.mxu1 %v10939_v44  ;;  %v11020_v42 = vld [vmem:[%s15042_s1 + $0x1660] ss:$16 sps:$4 sm:$0xff]   ;;  %v11023_v44 = vld [vmem:[%s15042_s1 + $0x1668] ss:$16 sps:$4 sm:$0xff]  }
 0x298   :  { %7087 = vmatprep.subr.bf16.mxu0 %v10944_v41  ;;  %7935 = vmatprep.subr.bf16.mxu1 %v10947_v43  ;;  %v11028_v41 = vld [vmem:[%s15042_s1 + $0x1684] ss:$16 sps:$4 sm:$0xff]   ;;  %v11031_v43 = vld [vmem:[%s15042_s1 + $0x168c] ss:$16 sps:$4 sm:$0xff]  }
 0x29b   :  { %7088 = vmatpush1.bf16.msra.mxu0 %v10942_v45  ;;  %7936 = vmatpush1.bf16.msra.mxu1 %v10945_v46  ;;  %v11026_v45 = vld [vmem:[%s15042_s1 + $0x1680] ss:$16 sps:$4 sm:$0xff]   ;;  %v11029_v46 = vld [vmem:[%s15042_s1 + $0x1688] ss:$16 sps:$4 sm:$0xff]  }
 0x29c   :  { %7089 = vmatprep.subr.bf16.mxu0 %v10950_v47  ;;  %7937 = vmatprep.subr.bf16.mxu1 %v10953_v48  ;;  %v11034_v47 = vld [vmem:[%s15042_s1 + $0x16a4] ss:$16 sps:$4 sm:$0xff]   ;;  %v11037_v48 = vld [vmem:[%s15042_s1 + $0x16ac] ss:$16 sps:$4 sm:$0xff]  }
 0x29f   :  { %7090 = vmatpush1.bf16.msra.mxu0 %v10948_v51  ;;  %7938 = vmatpush1.bf16.msra.mxu1 %v10951_v52  ;;  %v11032_v51 = vld [vmem:[%s15042_s1 + $0x16a0] ss:$16 sps:$4 sm:$0xff]   ;;  %v11035_v52 = vld [vmem:[%s15042_s1 + $0x16a8] ss:$16 sps:$4 sm:$0xff]  }
 0x2a0   :  { %7091 = vmatprep.subr.bf16.mxu0 %v10956_v49  ;;  %7939 = vmatprep.subr.bf16.mxu1 %v10959_v50  ;;  %v11040_v49 = vld [vmem:[%s15042_s1 + $0x16c4] ss:$16 sps:$4 sm:$0xff]   ;;  %v11043_v50 = vld [vmem:[%s15042_s1 + $0x16cc] ss:$16 sps:$4 sm:$0xff]  }
 0x2a3   :  { %7092 = vmatpush1.bf16.msra.mxu0 %v10954_v53  ;;  %7940 = vmatpush1.bf16.msra.mxu1 %v10957_v54  ;;  %v11038_v53 = vld [vmem:[%s15042_s1 + $0x16c0] ss:$16 sps:$4 sm:$0xff]   ;;  %v11041_v54 = vld [vmem:[%s15042_s1 + $0x16c8] ss:$16 sps:$4 sm:$0xff]  }
 0x2a4   :  { %7093 = vmatprep.subr.bf16.mxu0 %v10962_v55  ;;  %7941 = vmatprep.subr.bf16.mxu1 %v10965_v56  ;;  %v11046_v55 = vld [vmem:[%s15042_s1 + $0x16e4] ss:$16 sps:$4 sm:$0xff]   ;;  %v11049_v56 = vld [vmem:[%s15042_s1 + $0x16ec] ss:$16 sps:$4 sm:$0xff]  }
 0x2a7   :  { %7094 = vmatpush1.bf16.msra.mxu0 %v10960_v59  ;;  %7942 = vmatpush1.bf16.msra.mxu1 %v10963_v60  ;;  %v11044_v59 = vld [vmem:[%s15042_s1 + $0x16e0] ss:$16 sps:$4 sm:$0xff]   ;;  %v11047_v60 = vld [vmem:[%s15042_s1 + $0x16e8] ss:$16 sps:$4 sm:$0xff]  }
 0x2a8   :  { %7095 = vmatprep.subr.bf16.mxu0 %v10968_v57  ;;  %7943 = vmatprep.subr.bf16.mxu1 %v10971_v58  ;;  %v11052_v57 = vld [vmem:[%s15042_s1 + $0x1704] ss:$16 sps:$4 sm:$0xff]   ;;  %v11055_v58 = vld [vmem:[%s15042_s1 + $0x170c] ss:$16 sps:$4 sm:$0xff]  }
 0x2ab   :  { %7096 = vmatpush1.bf16.msra.mxu0 %v10966_v61  ;;  %7944 = vmatpush1.bf16.msra.mxu1 %v10969_v62  ;;  %v11050_v61 = vld [vmem:[%s15042_s1 + $0x1700] ss:$16 sps:$4 sm:$0xff]   ;;  %v11053_v62 = vld [vmem:[%s15042_s1 + $0x1708] ss:$16 sps:$4 sm:$0xff]  }
 0x2ac   :  { %7097 = vmatprep.subr.bf16.mxu0 %v10974_v63  ;;  %7945 = vmatprep.subr.bf16.mxu1 %v10977_v0  ;;  %v11058_v63 = vld [vmem:[%s15042_s1 + $0x1724] ss:$16 sps:$4 sm:$0xff]   ;;  %v11061_v0 = vld [vmem:[%s15042_s1 + $0x172c] ss:$16 sps:$4 sm:$0xff]  }
 0x2af   :  { %7098 = vmatpush1.bf16.msra.mxu0 %v10972_v3  ;;  %7946 = vmatpush1.bf16.msra.mxu1 %v10975_v4  ;;  %v11056_v3 = vld [vmem:[%s15042_s1 + $0x1720] ss:$16 sps:$4 sm:$0xff]   ;;  %v11059_v4 = vld [vmem:[%s15042_s1 + $0x1728] ss:$16 sps:$4 sm:$0xff]  }
 0x2b0   :  { %7099 = vmatprep.subr.bf16.mxu0 %v10980_v1  ;;  %7947 = vmatprep.subr.bf16.mxu1 %v10983_v2  ;;  %v11064_v1 = vld [vmem:[%s15042_s1 + $0x1744] ss:$16 sps:$4 sm:$0xff]   ;;  %v11067_v2 = vld [vmem:[%s15042_s1 + $0x174c] ss:$16 sps:$4 sm:$0xff]  }
 0x2b3   :  { %7100 = vmatpush1.bf16.msra.mxu0 %v10978_v5  ;;  %7948 = vmatpush1.bf16.msra.mxu1 %v10981_v6  ;;  %v11062_v5 = vld [vmem:[%s15042_s1 + $0x1740] ss:$16 sps:$4 sm:$0xff]   ;;  %v11065_v6 = vld [vmem:[%s15042_s1 + $0x1748] ss:$16 sps:$4 sm:$0xff]  }
 0x2b4   :  { %7101 = vmatprep.subr.bf16.mxu0 %v10986_v7  ;;  %7949 = vmatprep.subr.bf16.mxu1 %v10989_v8  ;;  %v11070_v7 = vld [vmem:[%s15042_s1 + $0x1764] ss:$16 sps:$4 sm:$0xff]   ;;  %v11073_v8 = vld [vmem:[%s15042_s1 + $0x176c] ss:$16 sps:$4 sm:$0xff]  }
 0x2b7   :  { %7102 = vmatpush1.bf16.msra.mxu0 %v10984_v11  ;;  %7950 = vmatpush1.bf16.msra.mxu1 %v10987_v12  ;;  %v11068_v11 = vld [vmem:[%s15042_s1 + $0x1760] ss:$16 sps:$4 sm:$0xff]   ;;  %v11071_v12 = vld [vmem:[%s15042_s1 + $0x1768] ss:$16 sps:$4 sm:$0xff]  }
 0x2b8   :  { %7103 = vmatprep.subr.bf16.mxu0 %v10992_v9  ;;  %7951 = vmatprep.subr.bf16.mxu1 %v10995_v10  ;;  %v11076_v9 = vld [vmem:[%s15042_s1 + $0x1784] ss:$16 sps:$4 sm:$0xff]   ;;  %v11079_v10 = vld [vmem:[%s15042_s1 + $0x178c] ss:$16 sps:$4 sm:$0xff]  }
 0x2bb   :  { %7104 = vmatpush1.bf16.msra.mxu0 %v10990_v13  ;;  %7952 = vmatpush1.bf16.msra.mxu1 %v10993_v14  ;;  %v11074_v13 = vld [vmem:[%s15042_s1 + $0x1780] ss:$16 sps:$4 sm:$0xff]   ;;  %v11077_v14 = vld [vmem:[%s15042_s1 + $0x1788] ss:$16 sps:$4 sm:$0xff]  }
 0x2bc   :  { %7105 = vmatprep.subr.bf16.mxu0 %v10998_v15  ;;  %7953 = vmatprep.subr.bf16.mxu1 %v11001_v16  ;;  %v11082_v15 = vld [vmem:[%s15042_s1 + $0x17a4] ss:$16 sps:$4 sm:$0xff]   ;;  %v11085_v16 = vld [vmem:[%s15042_s1 + $0x17ac] ss:$16 sps:$4 sm:$0xff]  }
 0x2bf   :  { %7106 = vmatpush1.bf16.msra.mxu0 %v10996_v19  ;;  %7954 = vmatpush1.bf16.msra.mxu1 %v10999_v17  ;;  %v11080_v19 = vld [vmem:[%s15042_s1 + $0x17a0] ss:$16 sps:$4 sm:$0xff]   ;;  %v11083_v17 = vld [vmem:[%s15042_s1 + $0x17a8] ss:$16 sps:$4 sm:$0xff]  }
 0x2c0   :  { %7128 = vmatprep.subr.bf16.mxu0 %v11004_v18  ;;  %7976 = vmatprep.subr.bf16.mxu1 %v11007_v20  ;;  %v11088_v18 = vld [vmem:[%s15042_s1 + $0x17c4] ss:$16 sps:$4 sm:$0xff]   ;;  %v11091_v20 = vld [vmem:[%s15042_s1 + $0x17cc] ss:$16 sps:$4 sm:$0xff]  }
 0x2c2   :  { %7108 = vmatmul.mubr.bf16.vlgmr.msra.gmra.mrb[0].mxu0 %v8621_v21  ;;  %7956 = vmatmul.mubr.bf16.vlgmr.msra.gmra.mrb[0].mxu1 %v8621_v21  ;;  %v11086_v21 = vld [vmem:[%s15042_s1 + $0x17c0] ss:$16 sps:$4 sm:$0xff]  }
 0x2c3   :  { %7129 = vmatpush1.bf16.msra.mxu0 %v11002_v24  ;;  %7977 = vmatpush1.bf16.msra.mxu1 %v11005_v26  ;;  %v11097_v24 = vld [vmem:[%s15042_s1 + $0x17ec] ss:$16 sps:$4 sm:$0xff]   ;;  %v11092_v26 = vld [vmem:[%s15042_s1 + $0x17e0] ss:$16 sps:$4 sm:$0xff]  }
 0x2c4   :  { %7130 = vmatprep.subr.bf16.mxu0 %v11010_v25  ;;  %7978 = vmatprep.subr.bf16.mxu1 %v11013_v27  ;;  %v11095_v25 = vld [vmem:[%s15042_s1 + $0x17e8] ss:$16 sps:$4 sm:$0xff]   ;;  %v11100_v27 = vld [vmem:[%s15042_s1 + $0x1804] ss:$16 sps:$4 sm:$0xff]  }
 0x2c5   :  { %7117 = vmatprep.mubr.bf16.mxu0 %v8654_v28  ;;  %7965 = vmatprep.mubr.bf16.mxu1 %v8654_v28  ;;  %v11103_v28 = vld [vmem:[%s15042_s1 + $0x180c] ss:$16 sps:$4 sm:$0xff]  }
 0x2c7   :  { %7131 = vmatpush1.bf16.msra.mxu0 %v11008_v29  ;;  %7979 = vmatpush1.bf16.msra.mxu1 %v11011_v30  ;;  %v8623_v29 = vcombine.low %v13873_v36, %v13878_v33  ;;  %v60_v30 = vld [vmem:[%s15043_s0 + $0x158] sm:$0xff]  ;;  %v11106_v36 = vld [vmem:[%s15042_s1 + $0x1824] ss:$16 sps:$4 sm:$0xff]  }
 0x2c8   :  { %7132 = vmatprep.subr.bf16.mxu0 %v11016_v31  ;;  %7980 = vmatprep.subr.bf16.mxu1 %v11019_v32  ;;  %v76_v31 = vld [vmem:[%s15043_s0 + $0x1d8] sm:$0xff]  ;;  %v11098_v32 = vld [vmem:[%s15042_s1 + $0x1800] ss:$16 sps:$4 sm:$0xff]  }
 0x2c9   :  { %v11109_v33 = vld [vmem:[%s15042_s1 + $0x182c] ss:$16 sps:$4 sm:$0xff]  }
 0x2ca   :  { %7118 = vmatmul.mubr.bf16.gmra.mrb[4].mxu0 %v8653_v34  ;;  %7966 = vmatmul.mubr.bf16.gmra.mrb[4].mxu1 %v8653_v34  ;;  %v11101_v34 = vld [vmem:[%s15042_s1 + $0x1808] ss:$16 sps:$4 sm:$0xff]  }
 0x2cb   :  { %7133 = vmatpush1.bf16.msra.mxu0 %v11014_v35  ;;  %7981 = vmatpush1.bf16.msra.mxu1 %v11017_v37  ;;  %v8656_v35 = vcombine.high %v60_v30, %v76_v31  ;;  %v11104_v37 = vld [vmem:[%s15042_s1 + $0x1820] ss:$16 sps:$4 sm:$0xff]  }
 0x2cc   :  { %7134 = vmatprep.subr.bf16.mxu0 %v11022_v38  ;;  %7982 = vmatprep.subr.bf16.mxu1 %v11025_v39  ;;  %v11107_v38 = vld [vmem:[%s15042_s1 + $0x1828] ss:$16 sps:$4 sm:$0xff]   ;;  %v11112_v39 = vld [vmem:[%s15042_s1 + $0x1844] ss:$16 sps:$4 sm:$0xff]  }
 0x2cd   :  { %7160 = vmatprep.mubr.bf16.mxu0 %v8624_v40  ;;  %8008 = vmatprep.mubr.bf16.mxu1 %v8624_v40  ;;  %v11115_v40 = vld [vmem:[%s15042_s1 + $0x184c] ss:$16 sps:$4 sm:$0xff]  }
 0x2cf   :  { %7135 = vmatpush1.bf16.msra.mxu0 %v11020_v42  ;;  %7983 = vmatpush1.bf16.msra.mxu1 %v11023_v44  ;;  %v8655_v42 = vcombine.low %v60_v30, %v76_v31  ;;  %v14085_v44 = vld [vmem:[%s15043_s0 + $0x60] sm:$0xff]  ;;  %v11185_v30 = vld [vmem:[%s15042_s1 + $0x19c8] ss:$16 sps:$4 sm:$0xff]  }
 0x2d0   :  { %7136 = vmatprep.subr.bf16.mxu0 %v11028_v41  ;;  %7984 = vmatprep.subr.bf16.mxu1 %v11031_v43  ;;  %v14090_v41 = vld [vmem:[%s15043_s0 + $0xe0] sm:$0xff] }
 0x2d1   :  { %v11110_v43 = vld [vmem:[%s15042_s1 + $0x1840] ss:$16 sps:$4 sm:$0xff]   ;;  %v11190_v31 = vld [vmem:[%s15042_s1 + $0x19e4] ss:$16 sps:$4 sm:$0xff]  }
 0x2d3   :  { %7137 = vmatpush1.bf16.msra.mxu0 %v11026_v45  ;;  %7985 = vmatpush1.bf16.msra.mxu1 %v11029_v46  ;;  %v11113_v45 = vld [vmem:[%s15042_s1 + $0x1848] ss:$16 sps:$4 sm:$0xff]   ;;  %v11118_v46 = vld [vmem:[%s15042_s1 + $0x1864] ss:$16 sps:$4 sm:$0xff]  }
 0x2d4   :  { %7138 = vmatprep.subr.bf16.mxu0 %v11034_v47  ;;  %7986 = vmatprep.subr.bf16.mxu1 %v11037_v48  ;;  %v11121_v47 = vld [vmem:[%s15042_s1 + $0x186c] ss:$16 sps:$4 sm:$0xff]   ;;  %v8626_v48 = vcombine.high %v14085_v44, %v14090_v41 }
 0x2d7   :  { %7139 = vmatpush1.bf16.msra.mxu0 %v11032_v51  ;;  %7987 = vmatpush1.bf16.msra.mxu1 %v11035_v52  ;;  %v11116_v51 = vld [vmem:[%s15042_s1 + $0x1860] ss:$16 sps:$4 sm:$0xff]   ;;  %v11119_v52 = vld [vmem:[%s15042_s1 + $0x1868] ss:$16 sps:$4 sm:$0xff]  }
 0x2d8   :  { %7140 = vmatprep.subr.bf16.mxu0 %v11040_v49  ;;  %7988 = vmatprep.subr.bf16.mxu1 %v11043_v50  ;;  %v11124_v49 = vld [vmem:[%s15042_s1 + $0x1884] ss:$16 sps:$4 sm:$0xff]   ;;  %v11127_v50 = vld [vmem:[%s15042_s1 + $0x188c] ss:$16 sps:$4 sm:$0xff]  }
 0x2db   :  { %7141 = vmatpush1.bf16.msra.mxu0 %v11038_v53  ;;  %7989 = vmatpush1.bf16.msra.mxu1 %v11041_v54  ;;  %v11122_v53 = vld [vmem:[%s15042_s1 + $0x1880] ss:$16 sps:$4 sm:$0xff]   ;;  %v11125_v54 = vld [vmem:[%s15042_s1 + $0x1888] ss:$16 sps:$4 sm:$0xff]  }
 0x2dc   :  { %7142 = vmatprep.subr.bf16.mxu0 %v11046_v55  ;;  %7990 = vmatprep.subr.bf16.mxu1 %v11049_v56  ;;  %v11130_v55 = vld [vmem:[%s15042_s1 + $0x18a4] ss:$16 sps:$4 sm:$0xff]   ;;  %v11133_v56 = vld [vmem:[%s15042_s1 + $0x18ac] ss:$16 sps:$4 sm:$0xff]  }
 0x2df   :  { %7143 = vmatpush1.bf16.msra.mxu0 %v11044_v59  ;;  %7991 = vmatpush1.bf16.msra.mxu1 %v11047_v60  ;;  %v11128_v59 = vld [vmem:[%s15042_s1 + $0x18a0] ss:$16 sps:$4 sm:$0xff]   ;;  %v11131_v60 = vld [vmem:[%s15042_s1 + $0x18a8] ss:$16 sps:$4 sm:$0xff]  }
 0x2e0   :  { %7144 = vmatprep.subr.bf16.mxu0 %v11052_v57  ;;  %7992 = vmatprep.subr.bf16.mxu1 %v11055_v58  ;;  %v11136_v57 = vld [vmem:[%s15042_s1 + $0x18c4] ss:$16 sps:$4 sm:$0xff]   ;;  %v11139_v58 = vld [vmem:[%s15042_s1 + $0x18cc] ss:$16 sps:$4 sm:$0xff]  }
 0x2e3   :  { %7145 = vmatpush1.bf16.msra.mxu0 %v11050_v61  ;;  %7993 = vmatpush1.bf16.msra.mxu1 %v11053_v62  ;;  %v11134_v61 = vld [vmem:[%s15042_s1 + $0x18c0] ss:$16 sps:$4 sm:$0xff]   ;;  %v11137_v62 = vld [vmem:[%s15042_s1 + $0x18c8] ss:$16 sps:$4 sm:$0xff]  }
 0x2e4   :  { %7146 = vmatprep.subr.bf16.mxu0 %v11058_v63  ;;  %7994 = vmatprep.subr.bf16.mxu1 %v11061_v0  ;;  %v11142_v63 = vld [vmem:[%s15042_s1 + $0x18e4] ss:$16 sps:$4 sm:$0xff]   ;;  %v11145_v0 = vld [vmem:[%s15042_s1 + $0x18ec] ss:$16 sps:$4 sm:$0xff]  }
 0x2e7   :  { %7147 = vmatpush1.bf16.msra.mxu0 %v11056_v3  ;;  %7995 = vmatpush1.bf16.msra.mxu1 %v11059_v4  ;;  %v11140_v3 = vld [vmem:[%s15042_s1 + $0x18e0] ss:$16 sps:$4 sm:$0xff]   ;;  %v11143_v4 = vld [vmem:[%s15042_s1 + $0x18e8] ss:$16 sps:$4 sm:$0xff]  }
 0x2e8   :  { %7148 = vmatprep.subr.bf16.mxu0 %v11064_v1  ;;  %7996 = vmatprep.subr.bf16.mxu1 %v11067_v2  ;;  %v11148_v1 = vld [vmem:[%s15042_s1 + $0x1904] ss:$16 sps:$4 sm:$0xff]   ;;  %v11151_v2 = vld [vmem:[%s15042_s1 + $0x190c] ss:$16 sps:$4 sm:$0xff]  }
 0x2eb   :  { %7149 = vmatpush1.bf16.msra.mxu0 %v11062_v5  ;;  %7997 = vmatpush1.bf16.msra.mxu1 %v11065_v6  ;;  %v11146_v5 = vld [vmem:[%s15042_s1 + $0x1900] ss:$16 sps:$4 sm:$0xff]   ;;  %v11149_v6 = vld [vmem:[%s15042_s1 + $0x1908] ss:$16 sps:$4 sm:$0xff]  }
 0x2ec   :  { %7150 = vmatprep.subr.bf16.mxu0 %v11070_v7  ;;  %7998 = vmatprep.subr.bf16.mxu1 %v11073_v8  ;;  %v11154_v7 = vld [vmem:[%s15042_s1 + $0x1924] ss:$16 sps:$4 sm:$0xff]   ;;  %v11157_v8 = vld [vmem:[%s15042_s1 + $0x192c] ss:$16 sps:$4 sm:$0xff]  }
 0x2ef   :  { %7151 = vmatpush1.bf16.msra.mxu0 %v11068_v11  ;;  %7999 = vmatpush1.bf16.msra.mxu1 %v11071_v12  ;;  %v11152_v11 = vld [vmem:[%s15042_s1 + $0x1920] ss:$16 sps:$4 sm:$0xff]   ;;  %v11155_v12 = vld [vmem:[%s15042_s1 + $0x1928] ss:$16 sps:$4 sm:$0xff]  }
 0x2f0   :  { %7152 = vmatprep.subr.bf16.mxu0 %v11076_v9  ;;  %8000 = vmatprep.subr.bf16.mxu1 %v11079_v10  ;;  %v11160_v9 = vld [vmem:[%s15042_s1 + $0x1944] ss:$16 sps:$4 sm:$0xff]   ;;  %v11163_v10 = vld [vmem:[%s15042_s1 + $0x194c] ss:$16 sps:$4 sm:$0xff]  }
 0x2f3   :  { %7153 = vmatpush1.bf16.msra.mxu0 %v11074_v13  ;;  %8001 = vmatpush1.bf16.msra.mxu1 %v11077_v14  ;;  %v11158_v13 = vld [vmem:[%s15042_s1 + $0x1940] ss:$16 sps:$4 sm:$0xff]   ;;  %v11161_v14 = vld [vmem:[%s15042_s1 + $0x1948] ss:$16 sps:$4 sm:$0xff]  }
 0x2f4   :  { %7154 = vmatprep.subr.bf16.mxu0 %v11082_v15  ;;  %8002 = vmatprep.subr.bf16.mxu1 %v11085_v16  ;;  %v11166_v15 = vld [vmem:[%s15042_s1 + $0x1964] ss:$16 sps:$4 sm:$0xff]   ;;  %v11169_v16 = vld [vmem:[%s15042_s1 + $0x196c] ss:$16 sps:$4 sm:$0xff]  }
 0x2f7   :  { %7155 = vmatpush1.bf16.msra.mxu0 %v11080_v19  ;;  %8003 = vmatpush1.bf16.msra.mxu1 %v11083_v17  ;;  %v11164_v19 = vld [vmem:[%s15042_s1 + $0x1960] ss:$16 sps:$4 sm:$0xff]   ;;  %v11167_v17 = vld [vmem:[%s15042_s1 + $0x1968] ss:$16 sps:$4 sm:$0xff]  }
 0x2f8   :  { %7156 = vmatprep.subr.bf16.mxu0 %v11088_v18  ;;  %8004 = vmatprep.subr.bf16.mxu1 %v11091_v20  ;;  %v11172_v18 = vld [vmem:[%s15042_s1 + $0x1984] ss:$16 sps:$4 sm:$0xff]   ;;  %v11175_v20 = vld [vmem:[%s15042_s1 + $0x198c] ss:$16 sps:$4 sm:$0xff]  }
 0x2fb   :  { %7157 = vmatpush1.bf16.msra.mxu0 %v11086_v21  ;;  %8005 = vmatpush1.bf16.msra.mxu1 %v11089_v22  ;;  %v11170_v21 = vld [vmem:[%s15042_s1 + $0x1980] ss:$16 sps:$4 sm:$0xff]   ;;  %v11173_v22 = vld [vmem:[%s15042_s1 + $0x1988] ss:$16 sps:$4 sm:$0xff]  }
 0x2fc   :  { %7158 = vmatprep.subr.bf16.mxu0 %v11094_v23  ;;  %8006 = vmatprep.subr.bf16.mxu1 %v11097_v24  ;;  %v11178_v23 = vld [vmem:[%s15042_s1 + $0x19a4] ss:$16 sps:$4 sm:$0xff]   ;;  %v11181_v24 = vld [vmem:[%s15042_s1 + $0x19ac] ss:$16 sps:$4 sm:$0xff]  }
 0x2ff   :  { %7159 = vmatpush1.bf16.msra.mxu0 %v11092_v26  ;;  %8007 = vmatpush1.bf16.msra.mxu1 %v11095_v25  ;;  %v11176_v26 = vld [vmem:[%s15042_s1 + $0x19a0] ss:$16 sps:$4 sm:$0xff]   ;;  %v11179_v25 = vld [vmem:[%s15042_s1 + $0x19a8] ss:$16 sps:$4 sm:$0xff]  }
 0x300   :  { %7181 = vmatprep.subr.bf16.mxu0 %v11100_v27  ;;  %8029 = vmatprep.subr.bf16.mxu1 %v11103_v28  ;;  %v11184_v27 = vld [vmem:[%s15042_s1 + $0x19c4] ss:$16 sps:$4 sm:$0xff]   ;;  %v11187_v28 = vld [vmem:[%s15042_s1 + $0x19cc] ss:$16 sps:$4 sm:$0xff]  }
 0x302   :  { %7161 = vmatmul.mubr.bf16.vlgmr.msra.gmra.mrb[0].mxu0 %v8623_v29  ;;  %8009 = vmatmul.mubr.bf16.vlgmr.msra.gmra.mrb[0].mxu1 %v8623_v29  ;;  %v11182_v29 = vld [vmem:[%s15042_s1 + $0x19c0] ss:$16 sps:$4 sm:$0xff]  }
 0x303   :  { %7182 = vmatpush1.bf16.msra.mxu0 %v11098_v32  ;;  %8030 = vmatpush1.bf16.msra.mxu1 %v11101_v34  ;;  %v11193_v32 = vld [vmem:[%s15042_s1 + $0x19ec] ss:$16 sps:$4 sm:$0xff]   ;;  %v11188_v34 = vld [vmem:[%s15042_s1 + $0x19e0] ss:$16 sps:$4 sm:$0xff]  }
 0x304   :  { %7183 = vmatprep.subr.bf16.mxu0 %v11106_v36  ;;  %8031 = vmatprep.subr.bf16.mxu1 %v11109_v33  ;;  %v11191_v36 = vld [vmem:[%s15042_s1 + $0x19e8] ss:$16 sps:$4 sm:$0xff]   ;;  %v11196_v33 = vld [vmem:[%s15042_s1 + $0x1a04] ss:$16 sps:$4 sm:$0xff]  }
 0x305   :  { %7170 = vmatprep.mubr.bf16.mxu0 %v8656_v35  ;;  %8018 = vmatprep.mubr.bf16.mxu1 %v8656_v35  ;;  %v11199_v35 = vld [vmem:[%s15042_s1 + $0x1a0c] ss:$16 sps:$4 sm:$0xff]  }
 0x307   :  { %7184 = vmatpush1.bf16.msra.mxu0 %v11104_v37  ;;  %8032 = vmatpush1.bf16.msra.mxu1 %v11107_v38  ;;  %v8625_v37 = vcombine.low %v14085_v44, %v14090_v41  ;;  %v61_v38 = vld [vmem:[%s15043_s0 + $0x160] sm:$0xff]  ;;  %v11205_v41 = vld [vmem:[%s15042_s1 + $0x1a2c] ss:$16 sps:$4 sm:$0xff]  }
 0x308   :  { %7185 = vmatprep.subr.bf16.mxu0 %v11112_v39  ;;  %8033 = vmatprep.subr.bf16.mxu1 %v11115_v40  ;;  %v77_v39 = vld [vmem:[%s15043_s0 + $0x1e0] sm:$0xff] }
 0x309   :  { %v11194_v40 = vld [vmem:[%s15042_s1 + $0x1a00] ss:$16 sps:$4 sm:$0xff]   ;;  %v11202_v44 = vld [vmem:[%s15042_s1 + $0x1a24] ss:$16 sps:$4 sm:$0xff]  }
 0x30a   :  { %7171 = vmatmul.mubr.bf16.gmra.mrb[4].mxu0 %v8655_v42  ;;  %8019 = vmatmul.mubr.bf16.gmra.mrb[4].mxu1 %v8655_v42  ;;  %v11197_v42 = vld [vmem:[%s15042_s1 + $0x1a08] ss:$16 sps:$4 sm:$0xff]  }
 0x30b   :  { %7186 = vmatpush1.bf16.msra.mxu0 %v11110_v43  ;;  %8034 = vmatpush1.bf16.msra.mxu1 %v11113_v45  ;;  %v8658_v43 = vcombine.high %v61_v38, %v77_v39  ;;  %v11200_v45 = vld [vmem:[%s15042_s1 + $0x1a20] ss:$16 sps:$4 sm:$0xff]  }
 0x30c   :  { %7187 = vmatprep.subr.bf16.mxu0 %v11118_v46  ;;  %8035 = vmatprep.subr.bf16.mxu1 %v11121_v47  ;;  %v11203_v46 = vld [vmem:[%s15042_s1 + $0x1a28] ss:$16 sps:$4 sm:$0xff]   ;;  %v11208_v47 = vld [vmem:[%s15042_s1 + $0x1a44] ss:$16 sps:$4 sm:$0xff]  }
 0x30d   :  { %7213 = vmatprep.mubr.bf16.mxu0 %v8626_v48  ;;  %8061 = vmatprep.mubr.bf16.mxu1 %v8626_v48  ;;  %v11211_v48 = vld [vmem:[%s15042_s1 + $0x1a4c] ss:$16 sps:$4 sm:$0xff]  }
 0x30f   :  { %7188 = vmatpush1.bf16.msra.mxu0 %v11116_v51  ;;  %8036 = vmatpush1.bf16.msra.mxu1 %v11119_v52  ;;  %v8657_v51 = vcombine.low %v61_v38, %v77_v39  ;;  %v14297_v52 = vld [vmem:[%s15043_s0 + $0x68] sm:$0xff]  ;;  %v11286_v39 = vld [vmem:[%s15042_s1 + $0x1be4] ss:$16 sps:$4 sm:$0xff]  }
 0x310   :  { %7189 = vmatprep.subr.bf16.mxu0 %v11124_v49  ;;  %8037 = vmatprep.subr.bf16.mxu1 %v11127_v50  ;;  %v14302_v49 = vld [vmem:[%s15043_s0 + $0xe8] sm:$0xff]  ;;  %v11206_v50 = vld [vmem:[%s15042_s1 + $0x1a40] ss:$16 sps:$4 sm:$0xff]  }
 0x311   :  { %v11281_v38 = vld [vmem:[%s15042_s1 + $0x1bc8] ss:$16 sps:$4 sm:$0xff]  }
 0x313   :  { %7190 = vmatpush1.bf16.msra.mxu0 %v11122_v53  ;;  %8038 = vmatpush1.bf16.msra.mxu1 %v11125_v54  ;;  %v11209_v53 = vld [vmem:[%s15042_s1 + $0x1a48] ss:$16 sps:$4 sm:$0xff]   ;;  %v11214_v54 = vld [vmem:[%s15042_s1 + $0x1a64] ss:$16 sps:$4 sm:$0xff]  }
 0x314   :  { %7191 = vmatprep.subr.bf16.mxu0 %v11130_v55  ;;  %8039 = vmatprep.subr.bf16.mxu1 %v11133_v56  ;;  %v11217_v55 = vld [vmem:[%s15042_s1 + $0x1a6c] ss:$16 sps:$4 sm:$0xff]   ;;  %v8628_v56 = vcombine.high %v14297_v52, %v14302_v49 }
 0x317   :  { %7192 = vmatpush1.bf16.msra.mxu0 %v11128_v59  ;;  %8040 = vmatpush1.bf16.msra.mxu1 %v11131_v60  ;;  %v11212_v59 = vld [vmem:[%s15042_s1 + $0x1a60] ss:$16 sps:$4 sm:$0xff]   ;;  %v11215_v60 = vld [vmem:[%s15042_s1 + $0x1a68] ss:$16 sps:$4 sm:$0xff]  }
 0x318   :  { %7193 = vmatprep.subr.bf16.mxu0 %v11136_v57  ;;  %8041 = vmatprep.subr.bf16.mxu1 %v11139_v58  ;;  %v11220_v57 = vld [vmem:[%s15042_s1 + $0x1a84] ss:$16 sps:$4 sm:$0xff]   ;;  %v11223_v58 = vld [vmem:[%s15042_s1 + $0x1a8c] ss:$16 sps:$4 sm:$0xff]  }
 0x31b   :  { %7194 = vmatpush1.bf16.msra.mxu0 %v11134_v61  ;;  %8042 = vmatpush1.bf16.msra.mxu1 %v11137_v62  ;;  %v11218_v61 = vld [vmem:[%s15042_s1 + $0x1a80] ss:$16 sps:$4 sm:$0xff]   ;;  %v11221_v62 = vld [vmem:[%s15042_s1 + $0x1a88] ss:$16 sps:$4 sm:$0xff]  }
 0x31c   :  { %7195 = vmatprep.subr.bf16.mxu0 %v11142_v63  ;;  %8043 = vmatprep.subr.bf16.mxu1 %v11145_v0  ;;  %v11226_v63 = vld [vmem:[%s15042_s1 + $0x1aa4] ss:$16 sps:$4 sm:$0xff]   ;;  %v11229_v0 = vld [vmem:[%s15042_s1 + $0x1aac] ss:$16 sps:$4 sm:$0xff]  }
 0x31f   :  { %7196 = vmatpush1.bf16.msra.mxu0 %v11140_v3  ;;  %8044 = vmatpush1.bf16.msra.mxu1 %v11143_v4  ;;  %v11224_v3 = vld [vmem:[%s15042_s1 + $0x1aa0] ss:$16 sps:$4 sm:$0xff]   ;;  %v11227_v4 = vld [vmem:[%s15042_s1 + $0x1aa8] ss:$16 sps:$4 sm:$0xff]  }
 0x320   :  { %7197 = vmatprep.subr.bf16.mxu0 %v11148_v1  ;;  %8045 = vmatprep.subr.bf16.mxu1 %v11151_v2  ;;  %v11232_v1 = vld [vmem:[%s15042_s1 + $0x1ac4] ss:$16 sps:$4 sm:$0xff]   ;;  %v11235_v2 = vld [vmem:[%s15042_s1 + $0x1acc] ss:$16 sps:$4 sm:$0xff]  }
 0x323   :  { %7198 = vmatpush1.bf16.msra.mxu0 %v11146_v5  ;;  %8046 = vmatpush1.bf16.msra.mxu1 %v11149_v6  ;;  %v11230_v5 = vld [vmem:[%s15042_s1 + $0x1ac0] ss:$16 sps:$4 sm:$0xff]   ;;  %v11233_v6 = vld [vmem:[%s15042_s1 + $0x1ac8] ss:$16 sps:$4 sm:$0xff]  }
 0x324   :  { %7199 = vmatprep.subr.bf16.mxu0 %v11154_v7  ;;  %8047 = vmatprep.subr.bf16.mxu1 %v11157_v8  ;;  %v11238_v7 = vld [vmem:[%s15042_s1 + $0x1ae4] ss:$16 sps:$4 sm:$0xff]   ;;  %v11241_v8 = vld [vmem:[%s15042_s1 + $0x1aec] ss:$16 sps:$4 sm:$0xff]  }
 0x327   :  { %7200 = vmatpush1.bf16.msra.mxu0 %v11152_v11  ;;  %8048 = vmatpush1.bf16.msra.mxu1 %v11155_v12  ;;  %v11236_v11 = vld [vmem:[%s15042_s1 + $0x1ae0] ss:$16 sps:$4 sm:$0xff]   ;;  %v11239_v12 = vld [vmem:[%s15042_s1 + $0x1ae8] ss:$16 sps:$4 sm:$0xff]  }
 0x328   :  { %7201 = vmatprep.subr.bf16.mxu0 %v11160_v9  ;;  %8049 = vmatprep.subr.bf16.mxu1 %v11163_v10  ;;  %v11244_v9 = vld [vmem:[%s15042_s1 + $0x1b04] ss:$16 sps:$4 sm:$0xff]   ;;  %v11247_v10 = vld [vmem:[%s15042_s1 + $0x1b0c] ss:$16 sps:$4 sm:$0xff]  }
 0x32b   :  { %7202 = vmatpush1.bf16.msra.mxu0 %v11158_v13  ;;  %8050 = vmatpush1.bf16.msra.mxu1 %v11161_v14  ;;  %v11242_v13 = vld [vmem:[%s15042_s1 + $0x1b00] ss:$16 sps:$4 sm:$0xff]   ;;  %v11245_v14 = vld [vmem:[%s15042_s1 + $0x1b08] ss:$16 sps:$4 sm:$0xff]  }
 0x32c   :  { %7203 = vmatprep.subr.bf16.mxu0 %v11166_v15  ;;  %8051 = vmatprep.subr.bf16.mxu1 %v11169_v16  ;;  %v11250_v15 = vld [vmem:[%s15042_s1 + $0x1b24] ss:$16 sps:$4 sm:$0xff]   ;;  %v11253_v16 = vld [vmem:[%s15042_s1 + $0x1b2c] ss:$16 sps:$4 sm:$0xff]  }
 0x32f   :  { %7204 = vmatpush1.bf16.msra.mxu0 %v11164_v19  ;;  %8052 = vmatpush1.bf16.msra.mxu1 %v11167_v17  ;;  %v11248_v19 = vld [vmem:[%s15042_s1 + $0x1b20] ss:$16 sps:$4 sm:$0xff]   ;;  %v11251_v17 = vld [vmem:[%s15042_s1 + $0x1b28] ss:$16 sps:$4 sm:$0xff]  }
 0x330   :  { %7205 = vmatprep.subr.bf16.mxu0 %v11172_v18  ;;  %8053 = vmatprep.subr.bf16.mxu1 %v11175_v20  ;;  %v11256_v18 = vld [vmem:[%s15042_s1 + $0x1b44] ss:$16 sps:$4 sm:$0xff]   ;;  %v11259_v20 = vld [vmem:[%s15042_s1 + $0x1b4c] ss:$16 sps:$4 sm:$0xff]  }
 0x333   :  { %7206 = vmatpush1.bf16.msra.mxu0 %v11170_v21  ;;  %8054 = vmatpush1.bf16.msra.mxu1 %v11173_v22  ;;  %v11254_v21 = vld [vmem:[%s15042_s1 + $0x1b40] ss:$16 sps:$4 sm:$0xff]   ;;  %v11257_v22 = vld [vmem:[%s15042_s1 + $0x1b48] ss:$16 sps:$4 sm:$0xff]  }
 0x334   :  { %7207 = vmatprep.subr.bf16.mxu0 %v11178_v23  ;;  %8055 = vmatprep.subr.bf16.mxu1 %v11181_v24  ;;  %v11262_v23 = vld [vmem:[%s15042_s1 + $0x1b64] ss:$16 sps:$4 sm:$0xff]   ;;  %v11265_v24 = vld [vmem:[%s15042_s1 + $0x1b6c] ss:$16 sps:$4 sm:$0xff]  }
 0x337   :  { %7208 = vmatpush1.bf16.msra.mxu0 %v11176_v26  ;;  %8056 = vmatpush1.bf16.msra.mxu1 %v11179_v25  ;;  %v11260_v26 = vld [vmem:[%s15042_s1 + $0x1b60] ss:$16 sps:$4 sm:$0xff]   ;;  %v11263_v25 = vld [vmem:[%s15042_s1 + $0x1b68] ss:$16 sps:$4 sm:$0xff]  }
 0x338   :  { %7209 = vmatprep.subr.bf16.mxu0 %v11184_v27  ;;  %8057 = vmatprep.subr.bf16.mxu1 %v11187_v28  ;;  %v11268_v27 = vld [vmem:[%s15042_s1 + $0x1b84] ss:$16 sps:$4 sm:$0xff]   ;;  %v11271_v28 = vld [vmem:[%s15042_s1 + $0x1b8c] ss:$16 sps:$4 sm:$0xff]  }
 0x33b   :  { %7210 = vmatpush1.bf16.msra.mxu0 %v11182_v29  ;;  %8058 = vmatpush1.bf16.msra.mxu1 %v11185_v30  ;;  %v11266_v29 = vld [vmem:[%s15042_s1 + $0x1b80] ss:$16 sps:$4 sm:$0xff]   ;;  %v11269_v30 = vld [vmem:[%s15042_s1 + $0x1b88] ss:$16 sps:$4 sm:$0xff]  }
 0x33c   :  { %7211 = vmatprep.subr.bf16.mxu0 %v11190_v31  ;;  %8059 = vmatprep.subr.bf16.mxu1 %v11193_v32  ;;  %v11274_v31 = vld [vmem:[%s15042_s1 + $0x1ba4] ss:$16 sps:$4 sm:$0xff]   ;;  %v11277_v32 = vld [vmem:[%s15042_s1 + $0x1bac] ss:$16 sps:$4 sm:$0xff]  }
 0x33f   :  { %7212 = vmatpush1.bf16.msra.mxu0 %v11188_v34  ;;  %8060 = vmatpush1.bf16.msra.mxu1 %v11191_v36  ;;  %v11272_v34 = vld [vmem:[%s15042_s1 + $0x1ba0] ss:$16 sps:$4 sm:$0xff]   ;;  %v11275_v36 = vld [vmem:[%s15042_s1 + $0x1ba8] ss:$16 sps:$4 sm:$0xff]  }
 0x340   :  { %7234 = vmatprep.subr.bf16.mxu0 %v11196_v33  ;;  %8082 = vmatprep.subr.bf16.mxu1 %v11199_v35  ;;  %v11280_v33 = vld [vmem:[%s15042_s1 + $0x1bc4] ss:$16 sps:$4 sm:$0xff]   ;;  %v11283_v35 = vld [vmem:[%s15042_s1 + $0x1bcc] ss:$16 sps:$4 sm:$0xff]  }
 0x342   :  { %7214 = vmatmul.mubr.bf16.vlgmr.msra.gmra.mrb[0].mxu0 %v8625_v37  ;;  %8062 = vmatmul.mubr.bf16.vlgmr.msra.gmra.mrb[0].mxu1 %v8625_v37  ;;  %v11278_v37 = vld [vmem:[%s15042_s1 + $0x1bc0] ss:$16 sps:$4 sm:$0xff]  }
 0x343   :  { %7235 = vmatpush1.bf16.msra.mxu0 %v11194_v40  ;;  %8083 = vmatpush1.bf16.msra.mxu1 %v11197_v42  ;;  %v11289_v40 = vld [vmem:[%s15042_s1 + $0x1bec] ss:$16 sps:$4 sm:$0xff]   ;;  %v11284_v42 = vld [vmem:[%s15042_s1 + $0x1be0] ss:$16 sps:$4 sm:$0xff]  }
 0x344   :  { %7236 = vmatprep.subr.bf16.mxu0 %v11202_v44  ;;  %8084 = vmatprep.subr.bf16.mxu1 %v11205_v41  ;;  %v11287_v44 = vld [vmem:[%s15042_s1 + $0x1be8] ss:$16 sps:$4 sm:$0xff]   ;;  %v11292_v41 = vld [vmem:[%s15042_s1 + $0x1c04] ss:$16 sps:$4 sm:$0xff]  }
 0x345   :  { %7223 = vmatprep.mubr.bf16.mxu0 %v8658_v43  ;;  %8071 = vmatprep.mubr.bf16.mxu1 %v8658_v43  ;;  %v11295_v43 = vld [vmem:[%s15042_s1 + $0x1c0c] ss:$16 sps:$4 sm:$0xff]  }
 0x347   :  { %7237 = vmatpush1.bf16.msra.mxu0 %v11200_v45  ;;  %8085 = vmatpush1.bf16.msra.mxu1 %v11203_v46  ;;  %v8627_v45 = vcombine.low %v14297_v52, %v14302_v49  ;;  %v62_v46 = vld [vmem:[%s15043_s0 + $0x168] sm:$0xff]  ;;  %v11298_v52 = vld [vmem:[%s15042_s1 + $0x1c24] ss:$16 sps:$4 sm:$0xff]  }
 0x348   :  { %7238 = vmatprep.subr.bf16.mxu0 %v11208_v47  ;;  %8086 = vmatprep.subr.bf16.mxu1 %v11211_v48  ;;  %v78_v47 = vld [vmem:[%s15043_s0 + $0x1e8] sm:$0xff]  ;;  %v11290_v48 = vld [vmem:[%s15042_s1 + $0x1c00] ss:$16 sps:$4 sm:$0xff]  }
 0x349   :  { %v11301_v49 = vld [vmem:[%s15042_s1 + $0x1c2c] ss:$16 sps:$4 sm:$0xff]  }
 0x34a   :  { %7224 = vmatmul.mubr.bf16.gmra.mrb[4].mxu0 %v8657_v51  ;;  %8072 = vmatmul.mubr.bf16.gmra.mrb[4].mxu1 %v8657_v51  ;;  %v11293_v51 = vld [vmem:[%s15042_s1 + $0x1c08] ss:$16 sps:$4 sm:$0xff]  }
 0x34b   :  { %7239 = vmatpush1.bf16.msra.mxu0 %v11206_v50  ;;  %8087 = vmatpush1.bf16.msra.mxu1 %v11209_v53  ;;  %v8660_v50 = vcombine.high %v62_v46, %v78_v47  ;;  %v11296_v53 = vld [vmem:[%s15042_s1 + $0x1c20] ss:$16 sps:$4 sm:$0xff]  }
 0x34c   :  { %7240 = vmatprep.subr.bf16.mxu0 %v11214_v54  ;;  %8088 = vmatprep.subr.bf16.mxu1 %v11217_v55  ;;  %v11299_v54 = vld [vmem:[%s15042_s1 + $0x1c28] ss:$16 sps:$4 sm:$0xff]   ;;  %v11304_v55 = vld [vmem:[%s15042_s1 + $0x1c44] ss:$16 sps:$4 sm:$0xff]  }
 0x34d   :  { %7266 = vmatprep.mubr.bf16.mxu0 %v8628_v56  ;;  %8114 = vmatprep.mubr.bf16.mxu1 %v8628_v56  ;;  %v11307_v56 = vld [vmem:[%s15042_s1 + $0x1c4c] ss:$16 sps:$4 sm:$0xff]  }
 0x34f   :  { %7241 = vmatpush1.bf16.msra.mxu0 %v11212_v59  ;;  %8089 = vmatpush1.bf16.msra.mxu1 %v11215_v60  ;;  %v8659_v59 = vcombine.low %v62_v46, %v78_v47  ;;  %v14509_v60 = vld [vmem:[%s15043_s0 + $0x70] sm:$0xff]  ;;  %v11377_v46 = vld [vmem:[%s15042_s1 + $0x1dc8] ss:$16 sps:$4 sm:$0xff]  }
 0x350   :  { %7242 = vmatprep.subr.bf16.mxu0 %v11220_v57  ;;  %8090 = vmatprep.subr.bf16.mxu1 %v11223_v58  ;;  %v14514_v57 = vld [vmem:[%s15043_s0 + $0xf0] sm:$0xff] }
 0x351   :  { %v11302_v58 = vld [vmem:[%s15042_s1 + $0x1c40] ss:$16 sps:$4 sm:$0xff]   ;;  %v11382_v47 = vld [vmem:[%s15042_s1 + $0x1de4] ss:$16 sps:$4 sm:$0xff]  }
 0x353   :  { %7243 = vmatpush1.bf16.msra.mxu0 %v11218_v61  ;;  %8091 = vmatpush1.bf16.msra.mxu1 %v11221_v62  ;;  %v11305_v61 = vld [vmem:[%s15042_s1 + $0x1c48] ss:$16 sps:$4 sm:$0xff]   ;;  %v11310_v62 = vld [vmem:[%s15042_s1 + $0x1c64] ss:$16 sps:$4 sm:$0xff]  }
 0x354   :  { %7244 = vmatprep.subr.bf16.mxu0 %v11226_v63  ;;  %8092 = vmatprep.subr.bf16.mxu1 %v11229_v0  ;;  %v11313_v63 = vld [vmem:[%s15042_s1 + $0x1c6c] ss:$16 sps:$4 sm:$0xff]   ;;  %v8630_v0 = vcombine.high %v14509_v60, %v14514_v57 }
 0x357   :  { %7245 = vmatpush1.bf16.msra.mxu0 %v11224_v3  ;;  %8093 = vmatpush1.bf16.msra.mxu1 %v11227_v4  ;;  %v11308_v3 = vld [vmem:[%s15042_s1 + $0x1c60] ss:$16 sps:$4 sm:$0xff]   ;;  %v11311_v4 = vld [vmem:[%s15042_s1 + $0x1c68] ss:$16 sps:$4 sm:$0xff]  }
 0x358   :  { %7246 = vmatprep.subr.bf16.mxu0 %v11232_v1  ;;  %8094 = vmatprep.subr.bf16.mxu1 %v11235_v2  ;;  %v11316_v1 = vld [vmem:[%s15042_s1 + $0x1c84] ss:$16 sps:$4 sm:$0xff]   ;;  %v11319_v2 = vld [vmem:[%s15042_s1 + $0x1c8c] ss:$16 sps:$4 sm:$0xff]  }
 0x35b   :  { %7247 = vmatpush1.bf16.msra.mxu0 %v11230_v5  ;;  %8095 = vmatpush1.bf16.msra.mxu1 %v11233_v6  ;;  %v11314_v5 = vld [vmem:[%s15042_s1 + $0x1c80] ss:$16 sps:$4 sm:$0xff]   ;;  %v11317_v6 = vld [vmem:[%s15042_s1 + $0x1c88] ss:$16 sps:$4 sm:$0xff]  }
 0x35c   :  { %7248 = vmatprep.subr.bf16.mxu0 %v11238_v7  ;;  %8096 = vmatprep.subr.bf16.mxu1 %v11241_v8  ;;  %v11322_v7 = vld [vmem:[%s15042_s1 + $0x1ca4] ss:$16 sps:$4 sm:$0xff]   ;;  %v11325_v8 = vld [vmem:[%s15042_s1 + $0x1cac] ss:$16 sps:$4 sm:$0xff]  }
 0x35f   :  { %7249 = vmatpush1.bf16.msra.mxu0 %v11236_v11  ;;  %8097 = vmatpush1.bf16.msra.mxu1 %v11239_v12  ;;  %v11320_v11 = vld [vmem:[%s15042_s1 + $0x1ca0] ss:$16 sps:$4 sm:$0xff]   ;;  %v11323_v12 = vld [vmem:[%s15042_s1 + $0x1ca8] ss:$16 sps:$4 sm:$0xff]  }
 0x360   :  { %7250 = vmatprep.subr.bf16.mxu0 %v11244_v9  ;;  %8098 = vmatprep.subr.bf16.mxu1 %v11247_v10  ;;  %v11328_v9 = vld [vmem:[%s15042_s1 + $0x1cc4] ss:$16 sps:$4 sm:$0xff]   ;;  %v11331_v10 = vld [vmem:[%s15042_s1 + $0x1ccc] ss:$16 sps:$4 sm:$0xff]  }
 0x363   :  { %7251 = vmatpush1.bf16.msra.mxu0 %v11242_v13  ;;  %8099 = vmatpush1.bf16.msra.mxu1 %v11245_v14  ;;  %v11326_v13 = vld [vmem:[%s15042_s1 + $0x1cc0] ss:$16 sps:$4 sm:$0xff]   ;;  %v11329_v14 = vld [vmem:[%s15042_s1 + $0x1cc8] ss:$16 sps:$4 sm:$0xff]  }
 0x364   :  { %7252 = vmatprep.subr.bf16.mxu0 %v11250_v15  ;;  %8100 = vmatprep.subr.bf16.mxu1 %v11253_v16  ;;  %v11334_v15 = vld [vmem:[%s15042_s1 + $0x1ce4] ss:$16 sps:$4 sm:$0xff]   ;;  %v11337_v16 = vld [vmem:[%s15042_s1 + $0x1cec] ss:$16 sps:$4 sm:$0xff]  }
 0x367   :  { %7253 = vmatpush1.bf16.msra.mxu0 %v11248_v19  ;;  %8101 = vmatpush1.bf16.msra.mxu1 %v11251_v17  ;;  %v11332_v19 = vld [vmem:[%s15042_s1 + $0x1ce0] ss:$16 sps:$4 sm:$0xff]   ;;  %v11335_v17 = vld [vmem:[%s15042_s1 + $0x1ce8] ss:$16 sps:$4 sm:$0xff]  }
 0x368   :  { %7254 = vmatprep.subr.bf16.mxu0 %v11256_v18  ;;  %8102 = vmatprep.subr.bf16.mxu1 %v11259_v20  ;;  %v11340_v18 = vld [vmem:[%s15042_s1 + $0x1d04] ss:$16 sps:$4 sm:$0xff]   ;;  %v11343_v20 = vld [vmem:[%s15042_s1 + $0x1d0c] ss:$16 sps:$4 sm:$0xff]  }
 0x36b   :  { %7255 = vmatpush1.bf16.msra.mxu0 %v11254_v21  ;;  %8103 = vmatpush1.bf16.msra.mxu1 %v11257_v22  ;;  %v11338_v21 = vld [vmem:[%s15042_s1 + $0x1d00] ss:$16 sps:$4 sm:$0xff]   ;;  %v11341_v22 = vld [vmem:[%s15042_s1 + $0x1d08] ss:$16 sps:$4 sm:$0xff]  }
 0x36c   :  { %7256 = vmatprep.subr.bf16.mxu0 %v11262_v23  ;;  %8104 = vmatprep.subr.bf16.mxu1 %v11265_v24  ;;  %v11346_v23 = vld [vmem:[%s15042_s1 + $0x1d24] ss:$16 sps:$4 sm:$0xff]   ;;  %v11349_v24 = vld [vmem:[%s15042_s1 + $0x1d2c] ss:$16 sps:$4 sm:$0xff]  }
 0x36f   :  { %7257 = vmatpush1.bf16.msra.mxu0 %v11260_v26  ;;  %8105 = vmatpush1.bf16.msra.mxu1 %v11263_v25  ;;  %v11344_v26 = vld [vmem:[%s15042_s1 + $0x1d20] ss:$16 sps:$4 sm:$0xff]   ;;  %v11347_v25 = vld [vmem:[%s15042_s1 + $0x1d28] ss:$16 sps:$4 sm:$0xff]  }
 0x370   :  { %7258 = vmatprep.subr.bf16.mxu0 %v11268_v27  ;;  %8106 = vmatprep.subr.bf16.mxu1 %v11271_v28  ;;  %v11352_v27 = vld [vmem:[%s15042_s1 + $0x1d44] ss:$16 sps:$4 sm:$0xff]   ;;  %v11355_v28 = vld [vmem:[%s15042_s1 + $0x1d4c] ss:$16 sps:$4 sm:$0xff]  }
 0x373   :  { %7259 = vmatpush1.bf16.msra.mxu0 %v11266_v29  ;;  %8107 = vmatpush1.bf16.msra.mxu1 %v11269_v30  ;;  %v11350_v29 = vld [vmem:[%s15042_s1 + $0x1d40] ss:$16 sps:$4 sm:$0xff]   ;;  %v11353_v30 = vld [vmem:[%s15042_s1 + $0x1d48] ss:$16 sps:$4 sm:$0xff]  }
 0x374   :  { %7260 = vmatprep.subr.bf16.mxu0 %v11274_v31  ;;  %8108 = vmatprep.subr.bf16.mxu1 %v11277_v32  ;;  %v11358_v31 = vld [vmem:[%s15042_s1 + $0x1d64] ss:$16 sps:$4 sm:$0xff]   ;;  %v11361_v32 = vld [vmem:[%s15042_s1 + $0x1d6c] ss:$16 sps:$4 sm:$0xff]  }
 0x377   :  { %7261 = vmatpush1.bf16.msra.mxu0 %v11272_v34  ;;  %8109 = vmatpush1.bf16.msra.mxu1 %v11275_v36  ;;  %v11356_v34 = vld [vmem:[%s15042_s1 + $0x1d60] ss:$16 sps:$4 sm:$0xff]   ;;  %v11359_v36 = vld [vmem:[%s15042_s1 + $0x1d68] ss:$16 sps:$4 sm:$0xff]  }
 0x378   :  { %7262 = vmatprep.subr.bf16.mxu0 %v11280_v33  ;;  %8110 = vmatprep.subr.bf16.mxu1 %v11283_v35  ;;  %v11364_v33 = vld [vmem:[%s15042_s1 + $0x1d84] ss:$16 sps:$4 sm:$0xff]   ;;  %v11367_v35 = vld [vmem:[%s15042_s1 + $0x1d8c] ss:$16 sps:$4 sm:$0xff]  }
 0x37b   :  { %7263 = vmatpush1.bf16.msra.mxu0 %v11278_v37  ;;  %8111 = vmatpush1.bf16.msra.mxu1 %v11281_v38  ;;  %v11362_v37 = vld [vmem:[%s15042_s1 + $0x1d80] ss:$16 sps:$4 sm:$0xff]   ;;  %v11365_v38 = vld [vmem:[%s15042_s1 + $0x1d88] ss:$16 sps:$4 sm:$0xff]  }
 0x37c   :  { %7264 = vmatprep.subr.bf16.mxu0 %v11286_v39  ;;  %8112 = vmatprep.subr.bf16.mxu1 %v11289_v40  ;;  %v11370_v39 = vld [vmem:[%s15042_s1 + $0x1da4] ss:$16 sps:$4 sm:$0xff]   ;;  %v11373_v40 = vld [vmem:[%s15042_s1 + $0x1dac] ss:$16 sps:$4 sm:$0xff]  }
 0x37f   :  { %7265 = vmatpush1.bf16.msra.mxu0 %v11284_v42  ;;  %8113 = vmatpush1.bf16.msra.mxu1 %v11287_v44  ;;  %v11368_v42 = vld [vmem:[%s15042_s1 + $0x1da0] ss:$16 sps:$4 sm:$0xff]   ;;  %v11371_v44 = vld [vmem:[%s15042_s1 + $0x1da8] ss:$16 sps:$4 sm:$0xff]  }
 0x380   :  { %7287 = vmatprep.subr.bf16.mxu0 %v11292_v41  ;;  %8135 = vmatprep.subr.bf16.mxu1 %v11295_v43  ;;  %v11376_v41 = vld [vmem:[%s15042_s1 + $0x1dc4] ss:$16 sps:$4 sm:$0xff]   ;;  %v11379_v43 = vld [vmem:[%s15042_s1 + $0x1dcc] ss:$16 sps:$4 sm:$0xff]  }
 0x382   :  { %7267 = vmatmul.mubr.bf16.vlgmr.msra.gmra.mrb[0].mxu0 %v8627_v45  ;;  %8115 = vmatmul.mubr.bf16.vlgmr.msra.gmra.mrb[0].mxu1 %v8627_v45  ;;  %v11374_v45 = vld [vmem:[%s15042_s1 + $0x1dc0] ss:$16 sps:$4 sm:$0xff]  }
 0x383   :  { %7288 = vmatpush1.bf16.msra.mxu0 %v11290_v48  ;;  %8136 = vmatpush1.bf16.msra.mxu1 %v11293_v51  ;;  %v11385_v48 = vld [vmem:[%s15042_s1 + $0x1dec] ss:$16 sps:$4 sm:$0xff]   ;;  %v11380_v51 = vld [vmem:[%s15042_s1 + $0x1de0] ss:$16 sps:$4 sm:$0xff]  }
 0x384   :  { %7289 = vmatprep.subr.bf16.mxu0 %v11298_v52  ;;  %8137 = vmatprep.subr.bf16.mxu1 %v11301_v49  ;;  %v11383_v52 = vld [vmem:[%s15042_s1 + $0x1de8] ss:$16 sps:$4 sm:$0xff]   ;;  %v11388_v49 = vld [vmem:[%s15042_s1 + $0x1e04] ss:$16 sps:$4 sm:$0xff]  }
 0x385   :  { %7276 = vmatprep.mubr.bf16.mxu0 %v8660_v50  ;;  %8124 = vmatprep.mubr.bf16.mxu1 %v8660_v50  ;;  %v11391_v50 = vld [vmem:[%s15042_s1 + $0x1e0c] ss:$16 sps:$4 sm:$0xff]  }
 0x387   :  { %7290 = vmatpush1.bf16.msra.mxu0 %v11296_v53  ;;  %8138 = vmatpush1.bf16.msra.mxu1 %v11299_v54  ;;  %v8629_v53 = vcombine.low %v14509_v60, %v14514_v57  ;;  %v63_v54 = vld [vmem:[%s15043_s0 + $0x170] sm:$0xff]  ;;  %v11397_v57 = vld [vmem:[%s15042_s1 + $0x1e2c] ss:$16 sps:$4 sm:$0xff]  }
 0x388   :  { %7291 = vmatprep.subr.bf16.mxu0 %v11304_v55  ;;  %8139 = vmatprep.subr.bf16.mxu1 %v11307_v56  ;;  %v79_v55 = vld [vmem:[%s15043_s0 + $0x1f0] sm:$0xff] }
 0x389   :  { %v11386_v56 = vld [vmem:[%s15042_s1 + $0x1e00] ss:$16 sps:$4 sm:$0xff]   ;;  %v11394_v60 = vld [vmem:[%s15042_s1 + $0x1e24] ss:$16 sps:$4 sm:$0xff]  }
 0x38a   :  { %7277 = vmatmul.mubr.bf16.gmra.mrb[4].mxu0 %v8659_v59  ;;  %8125 = vmatmul.mubr.bf16.gmra.mrb[4].mxu1 %v8659_v59  ;;  %v11389_v59 = vld [vmem:[%s15042_s1 + $0x1e08] ss:$16 sps:$4 sm:$0xff]  }
 0x38b   :  { %7292 = vmatpush1.bf16.msra.mxu0 %v11302_v58  ;;  %8140 = vmatpush1.bf16.msra.mxu1 %v11305_v61  ;;  %v8662_v58 = vcombine.high %v63_v54, %v79_v55  ;;  %v11392_v61 = vld [vmem:[%s15042_s1 + $0x1e20] ss:$16 sps:$4 sm:$0xff]  }
 0x38c   :  { %7293 = vmatprep.subr.bf16.mxu0 %v11310_v62  ;;  %8141 = vmatprep.subr.bf16.mxu1 %v11313_v63  ;;  %v11395_v62 = vld [vmem:[%s15042_s1 + $0x1e28] ss:$16 sps:$4 sm:$0xff]   ;;  %v11400_v63 = vld [vmem:[%s15042_s1 + $0x1e44] ss:$16 sps:$4 sm:$0xff]  }
 0x38d   :  { %7319 = vmatprep.mubr.bf16.mxu0 %v8630_v0  ;;  %8167 = vmatprep.mubr.bf16.mxu1 %v8630_v0  ;;  %v11403_v0 = vld [vmem:[%s15042_s1 + $0x1e4c] ss:$16 sps:$4 sm:$0xff]  }
 0x38f   :  { %7294 = vmatpush1.bf16.msra.mxu0 %v11308_v3  ;;  %8142 = vmatpush1.bf16.msra.mxu1 %v11311_v4  ;;  %v8661_v3 = vcombine.low %v63_v54, %v79_v55  ;;  %v14721_v4 = vld [vmem:[%s15043_s0 + $0x78] sm:$0xff]  ;;  %v11478_v55 = vld [vmem:[%s15042_s1 + $0x1fe4] ss:$16 sps:$4 sm:$0xff]  }
 0x390   :  { %7295 = vmatprep.subr.bf16.mxu0 %v11316_v1  ;;  %8143 = vmatprep.subr.bf16.mxu1 %v11319_v2  ;;  %v14726_v1 = vld [vmem:[%s15043_s0 + $0xf8] sm:$0xff]  ;;  %v11398_v2 = vld [vmem:[%s15042_s1 + $0x1e40] ss:$16 sps:$4 sm:$0xff]  }
 0x391   :  { %v11473_v54 = vld [vmem:[%s15042_s1 + $0x1fc8] ss:$16 sps:$4 sm:$0xff]  }
 0x393   :  { %7296 = vmatpush1.bf16.msra.mxu0 %v11314_v5  ;;  %8144 = vmatpush1.bf16.msra.mxu1 %v11317_v6  ;;  %v11401_v5 = vld [vmem:[%s15042_s1 + $0x1e48] ss:$16 sps:$4 sm:$0xff]   ;;  %v11406_v6 = vld [vmem:[%s15042_s1 + $0x1e64] ss:$16 sps:$4 sm:$0xff]  }
 0x394   :  { %7297 = vmatprep.subr.bf16.mxu0 %v11322_v7  ;;  %8145 = vmatprep.subr.bf16.mxu1 %v11325_v8  ;;  %v11409_v7 = vld [vmem:[%s15042_s1 + $0x1e6c] ss:$16 sps:$4 sm:$0xff]   ;;  %v8632_v8 = vcombine.high %v14721_v4, %v14726_v1 }
 0x397   :  { %7298 = vmatpush1.bf16.msra.mxu0 %v11320_v11  ;;  %8146 = vmatpush1.bf16.msra.mxu1 %v11323_v12  ;;  %v11404_v11 = vld [vmem:[%s15042_s1 + $0x1e60] ss:$16 sps:$4 sm:$0xff]   ;;  %v11407_v12 = vld [vmem:[%s15042_s1 + $0x1e68] ss:$16 sps:$4 sm:$0xff]  }
 0x398   :  { %7299 = vmatprep.subr.bf16.mxu0 %v11328_v9  ;;  %8147 = vmatprep.subr.bf16.mxu1 %v11331_v10  ;;  %v11412_v9 = vld [vmem:[%s15042_s1 + $0x1e84] ss:$16 sps:$4 sm:$0xff]   ;;  %v11415_v10 = vld [vmem:[%s15042_s1 + $0x1e8c] ss:$16 sps:$4 sm:$0xff]  }
 0x39b   :  { %7300 = vmatpush1.bf16.msra.mxu0 %v11326_v13  ;;  %8148 = vmatpush1.bf16.msra.mxu1 %v11329_v14  ;;  %v11410_v13 = vld [vmem:[%s15042_s1 + $0x1e80] ss:$16 sps:$4 sm:$0xff]   ;;  %v11413_v14 = vld [vmem:[%s15042_s1 + $0x1e88] ss:$16 sps:$4 sm:$0xff]  }
 0x39c   :  { %7301 = vmatprep.subr.bf16.mxu0 %v11334_v15  ;;  %8149 = vmatprep.subr.bf16.mxu1 %v11337_v16  ;;  %v11418_v15 = vld [vmem:[%s15042_s1 + $0x1ea4] ss:$16 sps:$4 sm:$0xff]   ;;  %v11421_v16 = vld [vmem:[%s15042_s1 + $0x1eac] ss:$16 sps:$4 sm:$0xff]  }
 0x39f   :  { %7302 = vmatpush1.bf16.msra.mxu0 %v11332_v19  ;;  %8150 = vmatpush1.bf16.msra.mxu1 %v11335_v17  ;;  %v11416_v19 = vld [vmem:[%s15042_s1 + $0x1ea0] ss:$16 sps:$4 sm:$0xff]   ;;  %v11419_v17 = vld [vmem:[%s15042_s1 + $0x1ea8] ss:$16 sps:$4 sm:$0xff]  }
 0x3a0   :  { %7303 = vmatprep.subr.bf16.mxu0 %v11340_v18  ;;  %8151 = vmatprep.subr.bf16.mxu1 %v11343_v20  ;;  %v11424_v18 = vld [vmem:[%s15042_s1 + $0x1ec4] ss:$16 sps:$4 sm:$0xff]   ;;  %v11427_v20 = vld [vmem:[%s15042_s1 + $0x1ecc] ss:$16 sps:$4 sm:$0xff]  }
 0x3a3   :  { %7304 = vmatpush1.bf16.msra.mxu0 %v11338_v21  ;;  %8152 = vmatpush1.bf16.msra.mxu1 %v11341_v22  ;;  %v11422_v21 = vld [vmem:[%s15042_s1 + $0x1ec0] ss:$16 sps:$4 sm:$0xff]   ;;  %v11425_v22 = vld [vmem:[%s15042_s1 + $0x1ec8] ss:$16 sps:$4 sm:$0xff]  }
 0x3a4   :  { %7305 = vmatprep.subr.bf16.mxu0 %v11346_v23  ;;  %8153 = vmatprep.subr.bf16.mxu1 %v11349_v24  ;;  %v11430_v23 = vld [vmem:[%s15042_s1 + $0x1ee4] ss:$16 sps:$4 sm:$0xff]   ;;  %v11433_v24 = vld [vmem:[%s15042_s1 + $0x1eec] ss:$16 sps:$4 sm:$0xff]  }
 0x3a7   :  { %7306 = vmatpush1.bf16.msra.mxu0 %v11344_v26  ;;  %8154 = vmatpush1.bf16.msra.mxu1 %v11347_v25  ;;  %v11428_v26 = vld [vmem:[%s15042_s1 + $0x1ee0] ss:$16 sps:$4 sm:$0xff]   ;;  %v11431_v25 = vld [vmem:[%s15042_s1 + $0x1ee8] ss:$16 sps:$4 sm:$0xff]  }
 0x3a8   :  { %7307 = vmatprep.subr.bf16.mxu0 %v11352_v27  ;;  %8155 = vmatprep.subr.bf16.mxu1 %v11355_v28  ;;  %v11436_v27 = vld [vmem:[%s15042_s1 + $0x1f04] ss:$16 sps:$4 sm:$0xff]   ;;  %v11439_v28 = vld [vmem:[%s15042_s1 + $0x1f0c] ss:$16 sps:$4 sm:$0xff]  }
 0x3ab   :  { %7308 = vmatpush1.bf16.msra.mxu0 %v11350_v29  ;;  %8156 = vmatpush1.bf16.msra.mxu1 %v11353_v30  ;;  %v11434_v29 = vld [vmem:[%s15042_s1 + $0x1f00] ss:$16 sps:$4 sm:$0xff]   ;;  %v11437_v30 = vld [vmem:[%s15042_s1 + $0x1f08] ss:$16 sps:$4 sm:$0xff]  }
 0x3ac   :  { %7309 = vmatprep.subr.bf16.mxu0 %v11358_v31  ;;  %8157 = vmatprep.subr.bf16.mxu1 %v11361_v32  ;;  %v11442_v31 = vld [vmem:[%s15042_s1 + $0x1f24] ss:$16 sps:$4 sm:$0xff]   ;;  %v11445_v32 = vld [vmem:[%s15042_s1 + $0x1f2c] ss:$16 sps:$4 sm:$0xff]  }
 0x3af   :  { %7310 = vmatpush1.bf16.msra.mxu0 %v11356_v34  ;;  %8158 = vmatpush1.bf16.msra.mxu1 %v11359_v36  ;;  %v11440_v34 = vld [vmem:[%s15042_s1 + $0x1f20] ss:$16 sps:$4 sm:$0xff]   ;;  %v11443_v36 = vld [vmem:[%s15042_s1 + $0x1f28] ss:$16 sps:$4 sm:$0xff]  }
 0x3b0   :  { %7311 = vmatprep.subr.bf16.mxu0 %v11364_v33  ;;  %8159 = vmatprep.subr.bf16.mxu1 %v11367_v35  ;;  %v11448_v33 = vld [vmem:[%s15042_s1 + $0x1f44] ss:$16 sps:$4 sm:$0xff]   ;;  %v11451_v35 = vld [vmem:[%s15042_s1 + $0x1f4c] ss:$16 sps:$4 sm:$0xff]  }
 0x3b3   :  { %7312 = vmatpush1.bf16.msra.mxu0 %v11362_v37  ;;  %8160 = vmatpush1.bf16.msra.mxu1 %v11365_v38  ;;  %v11446_v37 = vld [vmem:[%s15042_s1 + $0x1f40] ss:$16 sps:$4 sm:$0xff]   ;;  %v11449_v38 = vld [vmem:[%s15042_s1 + $0x1f48] ss:$16 sps:$4 sm:$0xff]  }
 0x3b4   :  { %7313 = vmatprep.subr.bf16.mxu0 %v11370_v39  ;;  %8161 = vmatprep.subr.bf16.mxu1 %v11373_v40  ;;  %v11454_v39 = vld [vmem:[%s15042_s1 + $0x1f64] ss:$16 sps:$4 sm:$0xff]   ;;  %v11457_v40 = vld [vmem:[%s15042_s1 + $0x1f6c] ss:$16 sps:$4 sm:$0xff]  }
 0x3b7   :  { %7314 = vmatpush1.bf16.msra.mxu0 %v11368_v42  ;;  %8162 = vmatpush1.bf16.msra.mxu1 %v11371_v44  ;;  %v11452_v42 = vld [vmem:[%s15042_s1 + $0x1f60] ss:$16 sps:$4 sm:$0xff]   ;;  %v11455_v44 = vld [vmem:[%s15042_s1 + $0x1f68] ss:$16 sps:$4 sm:$0xff]  }
 0x3b8   :  { %7315 = vmatprep.subr.bf16.mxu0 %v11376_v41  ;;  %8163 = vmatprep.subr.bf16.mxu1 %v11379_v43  ;;  %v11460_v41 = vld [vmem:[%s15042_s1 + $0x1f84] ss:$16 sps:$4 sm:$0xff]   ;;  %v11463_v43 = vld [vmem:[%s15042_s1 + $0x1f8c] ss:$16 sps:$4 sm:$0xff]  }
 0x3bb   :  { %7316 = vmatpush1.bf16.msra.mxu0 %v11374_v45  ;;  %8164 = vmatpush1.bf16.msra.mxu1 %v11377_v46  ;;  %v11458_v45 = vld [vmem:[%s15042_s1 + $0x1f80] ss:$16 sps:$4 sm:$0xff]   ;;  %v11461_v46 = vld [vmem:[%s15042_s1 + $0x1f88] ss:$16 sps:$4 sm:$0xff]  }
 0x3bc   :  { %7317 = vmatprep.subr.bf16.mxu0 %v11382_v47  ;;  %8165 = vmatprep.subr.bf16.mxu1 %v11385_v48  ;;  %v11466_v47 = vld [vmem:[%s15042_s1 + $0x1fa4] ss:$16 sps:$4 sm:$0xff]   ;;  %v11469_v48 = vld [vmem:[%s15042_s1 + $0x1fac] ss:$16 sps:$4 sm:$0xff]  }
 0x3bf   :  { %7318 = vmatpush1.bf16.msra.mxu0 %v11380_v51  ;;  %8166 = vmatpush1.bf16.msra.mxu1 %v11383_v52  ;;  %v11464_v51 = vld [vmem:[%s15042_s1 + $0x1fa0] ss:$16 sps:$4 sm:$0xff]   ;;  %v11467_v52 = vld [vmem:[%s15042_s1 + $0x1fa8] ss:$16 sps:$4 sm:$0xff]  }
 0x3c0   :  { %7340 = vmatprep.subr.bf16.mxu0 %v11388_v49  ;;  %8188 = vmatprep.subr.bf16.mxu1 %v11391_v50  ;;  %v11472_v49 = vld [vmem:[%s15042_s1 + $0x1fc4] ss:$16 sps:$4 sm:$0xff]   ;;  %v11475_v50 = vld [vmem:[%s15042_s1 + $0x1fcc] ss:$16 sps:$4 sm:$0xff]  }
 0x3c2   :  { %7320 = vmatmul.mubr.bf16.vlgmr.msra.gmra.mrb[0].mxu0 %v8629_v53  ;;  %8168 = vmatmul.mubr.bf16.vlgmr.msra.gmra.mrb[0].mxu1 %v8629_v53  ;;  %v11470_v53 = vld [vmem:[%s15042_s1 + $0x1fc0] ss:$16 sps:$4 sm:$0xff]  }
 0x3c3   :  { %7341 = vmatpush1.bf16.msra.mxu0 %v11386_v56  ;;  %8189 = vmatpush1.bf16.msra.mxu1 %v11389_v59  ;;  %v11481_v56 = vld [vmem:[%s15042_s1 + $0x1fec] ss:$16 sps:$4 sm:$0xff]   ;;  %v11476_v59 = vld [vmem:[%s15042_s1 + $0x1fe0] ss:$16 sps:$4 sm:$0xff]  }
 0x3c4   :  { %7342 = vmatprep.subr.bf16.mxu0 %v11394_v60  ;;  %8190 = vmatprep.subr.bf16.mxu1 %v11397_v57  ;;  %v11479_v60 = vld [vmem:[%s15042_s1 + $0x1fe8] ss:$16 sps:$4 sm:$0xff]  }
 0x3c5   :  { %7329 = vmatprep.mubr.bf16.mxu0 %v8662_v58  ;;  %8177 = vmatprep.mubr.bf16.mxu1 %v8662_v58  ;;  %v64_v57 = vld [vmem:[%s15043_s0 + $0x178] sm:$0xff] }
 0x3c6   :  { %v80_v58 = vld [vmem:[%s15043_s0 + $0x1f8] sm:$0xff] }
 0x3c7   :  { %7343 = vmatpush1.bf16.msra.mxu0 %v11392_v61  ;;  %8191 = vmatpush1.bf16.msra.mxu1 %v11395_v62  ;;  %v8631_v61 = vcombine.low %v14721_v4, %v14726_v1  ;;  %v8664_v62 = vcombine.high %v64_v57, %v80_v58 }
 0x3c8   :  { %7344 = vmatprep.subr.bf16.mxu0 %v11400_v63  ;;  %8192 = vmatprep.subr.bf16.mxu1 %v11403_v0  ;;  %v8663_v63 = vcombine.low %v64_v57, %v80_v58 }
 0x3ca   :  { %7330 = vmatmul.mubr.bf16.gmra.mrb[4].mxu0 %v8661_v3  ;;  %8178 = vmatmul.mubr.bf16.gmra.mrb[4].mxu1 %v8661_v3 }
 0x3cb   :  { %7345 = vmatpush1.bf16.msra.mxu0 %v11398_v2  ;;  %8193 = vmatpush1.bf16.msra.mxu1 %v11401_v5 }
 0x3cc   :  { %7346 = vmatprep.subr.bf16.mxu0 %v11406_v6  ;;  %8194 = vmatprep.subr.bf16.mxu1 %v11409_v7 }
 0x3cd   :  { %7372 = vmatprep.mubr.bf16.mxu0 %v8632_v8  ;;  %8220 = vmatprep.mubr.bf16.mxu1 %v8632_v8 }
 0x3cf   :  { %7347 = vmatpush1.bf16.msra.mxu0 %v11404_v11  ;;  %8195 = vmatpush1.bf16.msra.mxu1 %v11407_v12 }
 0x3d0   :  { %7348 = vmatprep.subr.bf16.mxu0 %v11412_v9  ;;  %8196 = vmatprep.subr.bf16.mxu1 %v11415_v10 }
 0x3d3   :  { %7349 = vmatpush1.bf16.msra.mxu0 %v11410_v13  ;;  %8197 = vmatpush1.bf16.msra.mxu1 %v11413_v14 }
 0x3d4   :  { %7350 = vmatprep.subr.bf16.mxu0 %v11418_v15  ;;  %8198 = vmatprep.subr.bf16.mxu1 %v11421_v16 }
 0x3d7   :  { %7351 = vmatpush1.bf16.msra.mxu0 %v11416_v19  ;;  %8199 = vmatpush1.bf16.msra.mxu1 %v11419_v17 }
 0x3d8   :  { %7352 = vmatprep.subr.bf16.mxu0 %v11424_v18  ;;  %8200 = vmatprep.subr.bf16.mxu1 %v11427_v20 }
 0x3db   :  { %7353 = vmatpush1.bf16.msra.mxu0 %v11422_v21  ;;  %8201 = vmatpush1.bf16.msra.mxu1 %v11425_v22 }
 0x3dc   :  { %7354 = vmatprep.subr.bf16.mxu0 %v11430_v23  ;;  %8202 = vmatprep.subr.bf16.mxu1 %v11433_v24 }
 0x3df   :  { %7355 = vmatpush1.bf16.msra.mxu0 %v11428_v26  ;;  %8203 = vmatpush1.bf16.msra.mxu1 %v11431_v25 }
 0x3e0   :  { %7356 = vmatprep.subr.bf16.mxu0 %v11436_v27  ;;  %8204 = vmatprep.subr.bf16.mxu1 %v11439_v28 }
 0x3e3   :  { %7357 = vmatpush1.bf16.msra.mxu0 %v11434_v29  ;;  %8205 = vmatpush1.bf16.msra.mxu1 %v11437_v30 }
 0x3e4   :  { %7358 = vmatprep.subr.bf16.mxu0 %v11442_v31  ;;  %8206 = vmatprep.subr.bf16.mxu1 %v11445_v32 }
 0x3e7   :  { %7359 = vmatpush1.bf16.msra.mxu0 %v11440_v34  ;;  %8207 = vmatpush1.bf16.msra.mxu1 %v11443_v36 }
 0x3e8   :  { %7360 = vmatprep.subr.bf16.mxu0 %v11448_v33  ;;  %8208 = vmatprep.subr.bf16.mxu1 %v11451_v35 }
 0x3eb   :  { %7361 = vmatpush1.bf16.msra.mxu0 %v11446_v37  ;;  %8209 = vmatpush1.bf16.msra.mxu1 %v11449_v38 }
 0x3ec   :  { %7362 = vmatprep.subr.bf16.mxu0 %v11454_v39  ;;  %8210 = vmatprep.subr.bf16.mxu1 %v11457_v40 }
 0x3ef   :  { %7363 = vmatpush1.bf16.msra.mxu0 %v11452_v42  ;;  %8211 = vmatpush1.bf16.msra.mxu1 %v11455_v44 }
 0x3f0   :  { %7364 = vmatprep.subr.bf16.mxu0 %v11460_v41  ;;  %8212 = vmatprep.subr.bf16.mxu1 %v11463_v43 }
 0x3f3   :  { %7365 = vmatpush1.bf16.msra.mxu0 %v11458_v45  ;;  %8213 = vmatpush1.bf16.msra.mxu1 %v11461_v46 }
 0x3f4   :  { %7366 = vmatprep.subr.bf16.mxu0 %v11466_v47  ;;  %8214 = vmatprep.subr.bf16.mxu1 %v11469_v48 }
 0x3f7   :  { %7367 = vmatpush1.bf16.msra.mxu0 %v11464_v51  ;;  %8215 = vmatpush1.bf16.msra.mxu1 %v11467_v52 }
 0x3f8   :  { %7368 = vmatprep.subr.bf16.mxu0 %v11472_v49  ;;  %8216 = vmatprep.subr.bf16.mxu1 %v11475_v50 }
 0x3fb   :  { %7369 = vmatpush1.bf16.msra.mxu0 %v11470_v53  ;;  %8217 = vmatpush1.bf16.msra.mxu1 %v11473_v54 }
 0x3fc   :  { %7370 = vmatprep.subr.bf16.mxu0 %v11478_v55  ;;  %8218 = vmatprep.subr.bf16.mxu1 %v11481_v56 }
 0x3ff   :  { %7371 = vmatpush1.bf16.msra.mxu0 %v11476_v59  ;;  %8219 = vmatpush1.bf16.msra.mxu1 %v11479_v60 }
 0x402   :  { %7373 = vmatmul.mubr.bf16.vlgmr.msra.gmra.mrb[0].mxu0 %v8631_v61  ;;  %8221 = vmatmul.mubr.bf16.vlgmr.msra.gmra.mrb[0].mxu1 %v8631_v61 }
 0x403   :  { %7382 = vmatprep.mubr.bf16.mxu0 %v8664_v62  ;;  %8230 = vmatprep.mubr.bf16.mxu1 %v8664_v62 }
 0x40a   :  { %7383 = vmatmul.mubr.bf16.gmra.mrb[4].mxu0 %v8663_v63  ;;  %8231 = vmatmul.mubr.bf16.gmra.mrb[4].mxu1 %v8663_v63 }
 0x4d5   :  { %v14900_v0 = vpop.f32.mrb[0].mxu0  ;;  %v14902_v3 = vpop.f32.mrb[0].mxu1 }
 0x4d6   :  { %v14904_v2 = vpop.f32.mrb[1].mxu0  ;;  %v14906_v5 = vpop.f32.mrb[1].mxu1  ;;  %v8281_v4 = vmul.f32 %v14900_v0, %v14900_v0  ;;  %v8283_v1 = vmul.f32 %v14902_v3, %v14902_v3 }
 0x4d7   :  { %v8282_v6 = vmul.f32 %v14904_v2, %v14904_v2  ;;  %v8284_v7 = vmul.f32 %v14906_v5, %v14906_v5  ;;  %v14916_v8 = vpop.f32.mrb[2].mxu0  ;;  %v14918_v11 = vpop.f32.mrb[2].mxu1 }
 0x4d8   :  { %v8241_v12 = vadd.f32 %v14916_v8, %v14900_v0  ;;  %v8285_v9 = vmul.f32 %v14916_v8, %v14916_v8  ;;  %v8259_v10 = vadd.f32 %v14918_v11, %v14902_v3  ;;  %v8287_v13 = vmul.f32 %v14918_v11, %v14918_v11  ;;  %v14928_v14 = vpop.f32.mrb[3].mxu0  ;;  %v14930_v15 = vpop.f32.mrb[3].mxu1 }
 0x4d9   :  { %v8250_v16 = vadd.f32 %v14928_v14, %v14904_v2  ;;  %v8286_v19 = vmul.f32 %v14928_v14, %v14928_v14  ;;  %v8268_v17 = vadd.f32 %v14930_v15, %v14906_v5  ;;  %v8288_v18 = vmul.f32 %v14930_v15, %v14930_v15 }
 0x4da   :  { %v8297_v20 = vadd.f32 %v8285_v9, %v8281_v4  ;;  %v8315_v21 = vadd.f32 %v8287_v13, %v8283_v1 }
 0x4db   :  { %v8306_v22 = vadd.f32 %v8286_v19, %v8282_v6  ;;  %v8324_v23 = vadd.f32 %v8288_v18, %v8284_v7 }
 0x4dd   :  { %v14940_v24 = vpop.f32.mrb[4].mxu0  ;;  %v14942_v26 = vpop.f32.mrb[4].mxu1 }
 0x4de   :  { %v8242_v25 = vadd.f32 %v8241_v12, %v14940_v24  ;;  %v8289_v27 = vmul.f32 %v14940_v24, %v14940_v24  ;;  %v8260_v28 = vadd.f32 %v8259_v10, %v14942_v26  ;;  %v8291_v29 = vmul.f32 %v14942_v26, %v14942_v26  ;;  %v14950_v30 = vpop.f32.mrb[5].mxu0  ;;  %v14952_v31 = vpop.f32.mrb[5].mxu1 }
 0x4df   :  { %v8251_v32 = vadd.f32 %v8250_v16, %v14950_v30  ;;  %v8290_v34 = vmul.f32 %v14950_v30, %v14950_v30  ;;  %v8269_v36 = vadd.f32 %v8268_v17, %v14952_v31  ;;  %v8292_v33 = vmul.f32 %v14952_v31, %v14952_v31  ;;  %v14960_v35 = vpop.f32.mrb[6].mxu0  ;;  %v14962_v37 = vpop.f32.mrb[6].mxu1 }
 0x4e0   :  { %v8298_v38 = vadd.f32 %v8297_v20, %v8289_v27  ;;  %v8316_v39 = vadd.f32 %v8315_v21, %v8291_v29  ;;  %v8243_v40 = vadd.f32 %v8242_v25, %v14960_v35  ;;  %v8293_v42 = vmul.f32 %v14960_v35, %v14960_v35  ;;  %v14967_v44 = vpop.f32.mrb[7].mxu0  ;;  %v14969_v41 = vpop.f32.mrb[7].mxu1 }
 0x4e1   :  { %v8307_v43 = vadd.f32 %v8306_v22, %v8290_v34  ;;  %v8325_v45 = vadd.f32 %v8324_v23, %v8292_v33  ;;  %v8261_v46 = vadd.f32 %v8260_v28, %v14962_v37  ;;  %v8295_v47 = vmul.f32 %v14962_v37, %v14962_v37 }
 0x4e2   :  { %v8244_v48 = vrot.slane %v8243_v40, 4  ;;  %v8299_v51 = vadd.f32 %v8298_v38, %v8293_v42  ;;  %v8252_v52 = vadd.f32 %v8251_v32, %v14967_v44  ;;  %v8294_v49 = vmul.f32 %v14967_v44, %v14967_v44 }
 0x4e3   :  { %v8262_v50 = vrot.slane %v8261_v46, 4  ;;  %v8317_v53 = vadd.f32 %v8316_v39, %v8295_v47  ;;  %v8270_v54 = vadd.f32 %v8269_v36, %v14969_v41  ;;  %v8296_v55 = vmul.f32 %v14969_v41, %v14969_v41 }
 0x4e4   :  { %v8245_v56 = vadd.f32 %v8244_v48, %v8243_v40  ;;  %v8300_v59 = vrot.slane %v8299_v51, 4  ;;  %v8253_v60 = vrot.slane %v8252_v52, 4  ;;  %v8308_v57 = vadd.f32 %v8307_v43, %v8294_v49 }
 0x4e5   :  { %v8263_v58 = vadd.f32 %v8262_v50, %v8261_v46  ;;  %v8318_v61 = vrot.slane %v8317_v53, 4  ;;  %v8271_v62 = vrot.slane %v8270_v54, 4  ;;  %v8326_v63 = vadd.f32 %v8325_v45, %v8296_v55 }
 0x4e6   :  { %v8246_v4 = vrot.slane %v8245_v56, 2  ;;  %v8301_v1 = vadd.f32 %v8300_v59, %v8299_v51  ;;  %v8254_v6 = vadd.f32 %v8253_v60, %v8252_v52  ;;  %v8309_v7 = vrot.slane %v8308_v57, 4 }
 0x4e7   :  { %v8264_v12 = vrot.slane %v8263_v58, 2  ;;  %v8319_v9 = vadd.f32 %v8318_v61, %v8317_v53  ;;  %v8272_v10 = vadd.f32 %v8271_v62, %v8270_v54  ;;  %v8327_v13 = vrot.slane %v8326_v63, 4 }
 0x4e8   :  { %v8247_v16 = vadd.f32 %v8246_v4, %v8245_v56  ;;  %v8302_v19 = vrot.slane %v8301_v1, 2  ;;  %v8255_v17 = vrot.slane %v8254_v6, 2  ;;  %v8310_v18 = vadd.f32 %v8309_v7, %v8308_v57 }
 0x4e9   :  { %v8265_v20 = vadd.f32 %v8264_v12, %v8263_v58  ;;  %v8320_v21 = vrot.slane %v8319_v9, 2  ;;  %v8273_v22 = vrot.slane %v8272_v10, 2  ;;  %v8328_v23 = vadd.f32 %v8327_v13, %v8326_v63 }
 0x4ea   :  { %v8248_v25 = vrot.slane %v8247_v16, 1  ;;  %v8303_v27 = vadd.f32 %v8302_v19, %v8301_v1  ;;  %v8256_v28 = vadd.f32 %v8255_v17, %v8254_v6  ;;  %v8311_v29 = vrot.slane %v8310_v18, 2 }
 0x4eb   :  { %v8266_v32 = vrot.slane %v8265_v20, 1  ;;  %v8321_v34 = vadd.f32 %v8320_v21, %v8319_v9  ;;  %v8274_v36 = vadd.f32 %v8273_v22, %v8272_v10  ;;  %v8329_v33 = vrot.slane %v8328_v23, 2 }
 0x4ec   :  { %v8249_v38 = vadd.f32 %v8248_v25, %v8247_v16  ;;  %v8304_v39 = vrot.slane %v8303_v27, 1  ;;  %v8257_v40 = vrot.slane %v8256_v28, 1  ;;  %v8312_v42 = vadd.f32 %v8311_v29, %v8310_v18 }
 0x4ed   :  { %v8267_v43 = vadd.f32 %v8266_v32, %v8265_v20  ;;  %v8322_v45 = vrot.slane %v8321_v34, 1  ;;  %v8275_v46 = vrot.slane %v8274_v36, 1  ;;  %v8330_v47 = vadd.f32 %v8329_v33, %v8328_v23 }
 0x4ee   :  { %v8277_v48 = vmul.f32 0.03125, %v8249_v38  ;;  %v8305_v51 = vadd.f32 %v8304_v39, %v8303_v27  ;;  %v8258_v52 = vadd.f32 %v8257_v40, %v8256_v28  ;;  %v8313_v49 = vrot.slane %v8312_v42, 1 }
 0x4ef   :  { %v8279_v50 = vmul.f32 0.03125, %v8267_v43  ;;  %v8323_v53 = vadd.f32 %v8322_v45, %v8321_v34  ;;  %v8276_v54 = vadd.f32 %v8275_v46, %v8274_v36  ;;  %v8331_v55 = vrot.slane %v8330_v47, 1 }
 0x4f0   :  { %v8333_v56 = vmul.f32 0.03125, %v8305_v51  ;;  %v8337_v59 = vmul.f32 %v8277_v48, %v8277_v48  ;;  %v8278_v60 = vmul.f32 0.03125, %v8258_v52  ;;  %v8314_v57 = vadd.f32 %v8313_v49, %v8312_v42  ;;  %v8345_v42 = vld [vmem:[%s15044_s2] sm:$0xf] }
 0x4f1   :  { %v8335_v58 = vmul.f32 0.03125, %v8323_v53  ;;  %v8339_v61 = vmul.f32 %v8279_v50, %v8279_v50  ;;  %v8280_v62 = vmul.f32 0.03125, %v8276_v54  ;;  %v8332_v63 = vadd.f32 %v8331_v55, %v8330_v47 }
 0x4f2   :  { %v8341_v4 = vsub.f32 %v8333_v56, %v8337_v59  ;;  %v8334_v1 = vmul.f32 0.03125, %v8314_v57  ;;  %v8338_v6 = vmul.f32 %v8278_v60, %v8278_v60  ;;  %v11490_v20 = vmov 1966171168  }
 0x4f3   :  { %v8343_v7 = vsub.f32 %v8335_v58, %v8339_v61  ;;  %v8336_v12 = vmul.f32 0.03125, %v8332_v63  ;;  %v8340_v9 = vmul.f32 %v8280_v62, %v8280_v62  ;;  %v8361_v21 = vunpack.c.l.s4 %v11490_v20 }
 0x4f4   :  { %v8346_v10 = vadd.f32 1e-05, %v8341_v4  ;;  %v8342_v13 = vsub.f32 %v8334_v1, %v8338_v6  ;;  %v8363_v22 = vlaneseq }
 0x4f5   :  { %v8348_v16 = vadd.f32 1e-05, %v8343_v7  ;;  %v8344_v19 = vsub.f32 %v8336_v12, %v8340_v9  ;;  %v8362_v23 = vunpack.c.0.s8 %v8361_v21 }
 0x4f6   :  { %11482 = vrsqrt.f32 %v8346_v10  ;;  %v8347_v17 = vadd.f32 1e-05, %v8342_v13  ;;  %v8364_v25 = vshrl.u32 %v8363_v22, 7 }
 0x4f7   :  { %11484 = vrsqrt.f32 %v8348_v16  ;;  %v8349_v18 = vadd.f32 1e-05, %v8344_v19 }
 0x4f8   :  { %11486 = vrsqrt.f32 %v8347_v17  ;;  %v8365_v29 = vsub.s32 %v8362_v23, %v8364_v25  ;;  %v8388_v43 = vsub.s32 0, %v8364_v25  ;;  %v8392_v46 = vsub.s32 1, %v8364_v25 }
 0x4f9   :  { %11488 = vrsqrt.f32 %v8349_v18  ;;  %v8396_v47 = vsub.s32 2, %v8364_v25  ;;  %v8400_v51 = vsub.s32 3, %v8364_v25 }
 0x500   :  { %v11483_v27 = vpop.eup %11482 }
 0x501   :  { %v11485_v28 = vpop.eup %11484 }
 0x502   :  { %v11487_v32 = vpop.eup %11486 }
 0x503   :  { %v11489_v34 = vpop.eup %11488  ;;  %v8358_v36 = vcombine.low %v11483_v27, %v11487_v32 }
 0x504   :  { %v8359_v33 = vcombine.low %v11485_v28, %v11489_v34 }
 0x505   :  { %v8366_v38 = vrot.slane %v8358_v36, %v8365_v29 }
 0x506   :  { %v8373_v39 = vrot.slane %v8359_v33, %v8365_v29 }
 0x508   :  { %v8374_v40 = vcombine.low %v8366_v38, %v8373_v39 }
 0x50a   :  { %v8381_v45 = vrot.slane %v8374_v40, %v8365_v29 }
 0x50c   :  { %v8383_v52 = vmul.f32 %v8381_v45, %v8345_v42 }
 0x50e   :  { %v8389_v49 = vrot.slane %v8383_v52, %v8388_v43  ;;  %v8393_v53 = vrot.slane %v8383_v52, %v8392_v46  ;;  %v8397_v54 = vrot.slane %v8383_v52, %v8396_v47  ;;  %v8401_v55 = vrot.slane %v8383_v52, %v8400_v51 }
 0x510   :  { %v8406_v56 = vmul.f32 %v8389_v49, %v8277_v48  ;;  %v8407_v59 = vmul.f32 %v8393_v53, %v8278_v60  ;;  %v8408_v57 = vmul.f32 %v8397_v54, %v8279_v50  ;;  %v8409_v58 = vmul.f32 %v8401_v55, %v8280_v62 }
 0x511   :  { %v8440_v61 = vmul.f32 %v8389_v49, %v14900_v0  ;;  %v8441_v63 = vmul.f32 %v8393_v53, %v14904_v2  ;;  %v8442_v4 = vmul.f32 %v8397_v54, %v14902_v3  ;;  %v8443_v1 = vmul.f32 %v8401_v55, %v14906_v5 }
 0x512   :  { %v8414_v6 = vcombine.low %v8406_v56, %v8407_v59  ;;  %v8415_v7 = vcombine.low %v8408_v57, %v8409_v58  ;;  %v8444_v12 = vmul.f32 %v8389_v49, %v14916_v8  ;;  %v8445_v9 = vmul.f32 %v8393_v53, %v14928_v14 }
 0x513   :  { %v8446_v10 = vmul.f32 %v8397_v54, %v14918_v11  ;;  %v8447_v48 = vmul.f32 %v8401_v55, %v14930_v15  ;;  %v8448_v50 = vmul.f32 %v8389_v49, %v14940_v24  ;;  %v8449_v0 = vmul.f32 %v8393_v53, %v14950_v30  ;;  %v8384_v15 = vld [vmem:[%s15045_s3] sm:$0xf] }
 0x514   :  { %v8422_v60 = vrot.slane %v8414_v6, %v8365_v29  ;;  %v8429_v2 = vrot.slane %v8415_v7, %v8365_v29  ;;  %v8450_v3 = vmul.f32 %v8397_v54, %v14942_v26  ;;  %v8451_v5 = vmul.f32 %v8401_v55, %v14952_v31 }
 0x515   :  { %v8452_v62 = vmul.f32 %v8389_v49, %v14960_v35  ;;  %v8453_v8 = vmul.f32 %v8393_v53, %v14967_v44  ;;  %v8454_v14 = vmul.f32 %v8397_v54, %v14962_v37  ;;  %v8455_v11 = vmul.f32 %v8401_v55, %v14969_v41 }
 0x516   :  { %v8430_v13 = vcombine.low %v8422_v60, %v8429_v2 }
 0x518   :  { %v8437_v24 = vrot.slane %v8430_v13, %v8365_v29 }
 0x51a   :  { %v8439_v30 = vsub.f32 %v8384_v15, %v8437_v24 }
 0x51c   :  { %v8460_v16 = vrot.slane %v8439_v30, %v8388_v43  ;;  %v8464_v19 = vrot.slane %v8439_v30, %v8392_v46  ;;  %v8468_v26 = vrot.slane %v8439_v30, %v8396_v47  ;;  %v8472_v17 = vrot.slane %v8439_v30, %v8400_v51 }
 0x51e   :  { %v8477_v31 = vadd.f32 %v8460_v16, %v8440_v61  ;;  %v8478_v18 = vadd.f32 %v8464_v19, %v8441_v63  ;;  %v8479_v35 = vadd.f32 %v8468_v26, %v8442_v4  ;;  %v8480_v20 = vadd.f32 %v8472_v17, %v8443_v1 }
 0x51f   :  { %v8481_v44 = vadd.f32 %v8460_v16, %v8444_v12  ;;  %v8482_v21 = vadd.f32 %v8464_v19, %v8445_v9  ;;  %v8483_v37 = vadd.f32 %v8468_v26, %v8446_v10  ;;  %v8484_v22 = vadd.f32 %v8472_v17, %v8447_v48 }
 0x520   :  { %v8485_v41 = vadd.f32 %v8460_v16, %v8448_v50  ;;  %v8486_v23 = vadd.f32 %v8464_v19, %v8449_v0  ;;  %v8487_v25 = vadd.f32 %v8468_v26, %v8450_v3  ;;  %v8488_v27 = vadd.f32 %v8472_v17, %v8451_v5 }
 0x521   :  { %v8489_v28 = vadd.f32 %v8460_v16, %v8452_v62  ;;  %v8490_v32 = vadd.f32 %v8464_v19, %v8453_v8  ;;  %v8491_v29 = vadd.f32 %v8468_v26, %v8454_v14  ;;  %v8492_v34 = vadd.f32 %v8472_v17, %v8455_v11 }
 0x522   :  { %vm8493_vm0 = vcmp.gt.f32.partialorder %v8477_v31, 0.0  ;;  %vm8494_vm1 = vcmp.gt.f32.partialorder %v8478_v18, 0.0  ;;  %vm8495_vm2 = vcmp.gt.f32.partialorder %v8479_v35, 0.0  ;;  %vm8496_vm3 = vcmp.gt.f32.partialorder %v8480_v20, 0.0 }
 0x523   :  { %vm8497_vm4 = vcmp.gt.f32.partialorder %v8481_v44, 0.0  ;;  %vm8498_vm5 = vcmp.gt.f32.partialorder %v8482_v21, 0.0  ;;  %vm8499_vm6 = vcmp.gt.f32.partialorder %v8483_v37, 0.0  ;;  %vm8500_vm7 = vcmp.gt.f32.partialorder %v8484_v22, 0.0 }
 0x524   :  { %vm8501_vm8 = vcmp.gt.f32.partialorder %v8485_v41, 0.0  ;;  %vm8502_vm9 = vcmp.gt.f32.partialorder %v8486_v23, 0.0  ;;  %vm8503_vm10 = vcmp.gt.f32.partialorder %v8487_v25, 0.0  ;;  %vm8504_vm11 = vcmp.gt.f32.partialorder %v8488_v27, 0.0 }
 0x525   :  { %vm8505_vm12 = vcmp.gt.f32.partialorder %v8489_v28, 0.0  ;;  %vm8506_vm13 = vcmp.gt.f32.partialorder %v8490_v32, 0.0  ;;  %vm8507_vm14 = vcmp.gt.f32.partialorder %v8491_v29, 0.0  ;;  %vm8508_vm15 = vcmp.gt.f32.partialorder %v8492_v34, 0.0 }
 0x526   :  { %v8509_v36 = vmul.f32 0.2, %v8477_v31  ;;  %v8510_v33 = vmul.f32 0.2, %v8478_v18  ;;  %v8511_v38 = vmul.f32 0.2, %v8479_v35 }
 0x527   :  { %v8512_v39 = vmul.f32 0.2, %v8480_v20  ;;  %v8513_v40 = vmul.f32 0.2, %v8481_v44  ;;  %v8514_v42 = vmul.f32 0.2, %v8482_v21 }
 0x528   :  { %v8515_v43 = vmul.f32 0.2, %v8483_v37  ;;  %v8516_v45 = vmul.f32 0.2, %v8484_v22  ;;  %v8517_v46 = vmul.f32 0.2, %v8485_v41  ;;  %v8525_v47 = vsel %vm8493_vm0, %v8477_v31, %v8509_v36 }
 0x529   :  { %v8518_v51 = vmul.f32 0.2, %v8486_v23  ;;  %v8519_v52 = vmul.f32 0.2, %v8487_v25  ;;  %v8520_v49 = vmul.f32 0.2, %v8488_v27  ;;  %v8526_v53 = vsel %vm8494_vm1, %v8478_v18, %v8510_v33 }
 0x52a   :  { %v8521_v54 = vmul.f32 0.2, %v8489_v28  ;;  %v8522_v55 = vmul.f32 0.2, %v8490_v32  ;;  %v8523_v56 = vmul.f32 0.2, %v8491_v29  ;;  %v8527_v59 = vsel %vm8495_vm2, %v8479_v35, %v8511_v38 }
 0x52b   :  { %v8524_v57 = vmul.f32 0.2, %v8492_v34  ;;  %v8528_v58 = vsel %vm8496_vm3, %v8480_v20, %v8512_v39  ;;  %v8529_v61 = vsel %vm8497_vm4, %v8481_v44, %v8513_v40  ;;  %v8530_v63 = vsel %vm8498_vm5, %v8482_v21, %v8514_v42 }
 0x52c   :  { %v8531_v4 = vsel %vm8499_vm6, %v8483_v37, %v8515_v43  ;;  %v8532_v1 = vsel %vm8500_vm7, %v8484_v22, %v8516_v45  ;;  %v8533_v6 = vsel %vm8501_vm8, %v8485_v41, %v8517_v46  ;;  %v8534_v7 = vsel %vm8502_vm9, %v8486_v23, %v8518_v51 }
 0x52d   :  { %v8535_v12 = vsel %vm8503_vm10, %v8487_v25, %v8519_v52  ;;  %v8536_v9 = vsel %vm8504_vm11, %v8488_v27, %v8520_v49  ;;  %v8537_v10 = vsel %vm8505_vm12, %v8489_v28, %v8521_v54  ;;  %v8538_v48 = vsel %vm8506_vm13, %v8490_v32, %v8522_v55 }
 0x52e   :  { %v8539_v50 = vsel %vm8507_vm14, %v8491_v29, %v8523_v56  ;;  %v8540_v0 = vsel %vm8508_vm15, %v8492_v34, %v8524_v57  ;;  %v9697_v60 = vpack.c.bf16 %v8526_v53, %v8525_v47  ;;  %v9698_v2 = vpack.c.bf16 %v8528_v58, %v8527_v59 }
 0x52f   :  { %v9699_v3 = vpack.c.bf16 %v8530_v63, %v8529_v61  ;;  %v9700_v5 = vpack.c.bf16 %v8532_v1, %v8531_v4  ;;  %v9701_v62 = vpack.c.bf16 %v8534_v7, %v8533_v6  ;;  %v9702_v8 = vpack.c.bf16 %v8536_v9, %v8535_v12 }
 0x530   :  { %v9703_v14 = vpack.c.bf16 %v8538_v48, %v8537_v10  ;;  %v9704_v11 = vpack.c.bf16 %v8540_v0, %v8539_v50  ;;  %8589 = vst [vmem:[%s15046_s4] sm:$0xff] %v9697_v60  ;;  %8590 = vst [vmem:[%s15046_s4 + $0x8] sm:$0xff] %v9698_v2 }
 0x531   :  { %8591 = vst [vmem:[%s15046_s4 + $0x10] sm:$0xff] %v9699_v3  ;;  %8592 = vst [vmem:[%s15046_s4 + $0x18] sm:$0xff] %v9700_v5 }
 0x532   :  { %8593 = vst [vmem:[%s15046_s4 + $0x20] sm:$0xff] %v9701_v62  ;;  %8594 = vst [vmem:[%s15046_s4 + $0x28] sm:$0xff] %v9702_v8 }
 0x533   :  { %8595 = vst [vmem:[%s15046_s4 + $0x30] sm:$0xff] %v9703_v14  ;;  %8596 = vst [vmem:[%s15046_s4 + $0x38] sm:$0xff] %v9704_v11 }

</bundles_post_ra>
